<compile_context>
chip_gen: v7x
topology: tpu7x:2x2x1
jax: 0.10.0
libtpu: 0.0.40
codegen_flags: <defaults>
</compile_context>

<pallas_src>
import functools

import jax
import jax.numpy as jnp
from jax.experimental import pallas as pl
from jax.experimental.pallas import tpu as pltpu

NEG_SLOPE = 0.01          # nn.LeakyReLU default negative_slope
BOTTLENECK_PAD = 128      # pad the 10-wide bottleneck to a full lane group
LANE = 128
DEFAULT_TILE_B = 512      # multiple of 256 (v6e/v7x MXU rows) and 128 (v5e)


def _round_up(x, m):
    return ((x + m - 1) // m) * m


def _leaky_relu(h):
    # max(h, a*h) == LeakyReLU(h) for 0 < a < 1; one VALU op cheaper than where.
    return jnp.maximum(h, NEG_SLOPE * h)


def _device_kind():
    try:
        return jax.devices()[0].device_kind.lower()
    except Exception:
        return ""


def _detect_bf16_epilogue(kind=None):
    kind = _device_kind() if kind is None else kind
    # bf16-native VPUs: v6e / v7x.  v5e and older emulate bf16 elementwise.
    return any(s in kind for s in ("v6", "v7", "7x"))


# --------------------------------------------------------------------------
# Kernel
# --------------------------------------------------------------------------
def autoencoder_kernel(x_ref,
                       w1, b1, w2, b2, w3, b3, w4, b4,
                       w5, b5, w6, b6, w7, b7, w8, b8,
                       o_ref, *, bf16_epilogue=False):
    act_dtype = jnp.bfloat16 if bf16_epilogue else jnp.float32

    def lin(h, w_r, b_r, activate):
        # bf16 x bf16 MXU matmul with f32 accumulation.
        y = jnp.dot(h.astype(jnp.bfloat16), w_r[...],
                    preferred_element_type=jnp.float32)
        if activate:
            y = y.astype(act_dtype) + b_r[...].astype(act_dtype)
            return _leaky_relu(y)
        return y + b_r[...]          # last layer: f32 bias add, no activation

    h = x_ref[...]
    h = lin(h, w1, b1, True)
    h = lin(h, w2, b2, True)
    h = lin(h, w3, b3, True)
    h = lin(h, w4, b4, True)   # bottleneck out-lanes padded to 128 (zeros exact)
    h = lin(h, w5, b5, True)   # padded zero rows of w5 contribute nothing
    h = lin(h, w6, b6, True)
    h = lin(h, w7, b7, True)
    h = lin(h, w8, b8, False)
    o_ref[...] = h.astype(o_ref.dtype)


# --------------------------------------------------------------------------
# Parameters
# --------------------------------------------------------------------------
def init_params(key, in_dim):
    """PyTorch nn.Linear default init (uniform +-1/sqrt(fan_in)).
    Weights stored pre-transposed as [in, out] f32; biases as [1, out] f32."""
    dims = [in_dim, 1024, 256, 64, 10, 64, 256, 1024, in_dim]
    params = []
    for i in range(len(dims) - 1):
        fan_in, fan_out = dims[i], dims[i + 1]
        key, kw, kb = jax.random.split(key, 3)
        bound = 1.0 / jnp.sqrt(jnp.float32(fan_in))
        w = jax.random.uniform(kw, (fan_in, fan_out), jnp.float32, -bound, bound)
        b = jax.random.uniform(kb, (1, fan_out), jnp.float32, -bound, bound)
        params.append((w, b))
    return params


def prepare_kernel_params(params):
    """bf16 weights + f32 biases; zero-pad the bottleneck to 128 lanes and the
    in/out feature dim D to a multiple of 128 (lane-dense I/O)."""
    in_dim = params[0][0].shape[0]
    d_pad = _round_up(in_dim, LANE)
    kparams = []
    for i, (w, b) in enumerate(params):
        w = w.astype(jnp.bfloat16)
        b = b.astype(jnp.float32)
        if i == 0 and d_pad != in_dim:          # linear1: pad input rows
            w = jnp.pad(w, ((0, d_pad - w.shape[0]), (0, 0)))
        if i == 3:                              # linear4 (64->10): pad out lanes
            w = jnp.pad(w, ((0, 0), (0, BOTTLENECK_PAD - w.shape[1])))
            b = jnp.pad(b, ((0, 0), (0, BOTTLENECK_PAD - b.shape[1])))
        if i == 4:                              # linear5 (10->64): pad in rows
            w = jnp.pad(w, ((0, BOTTLENECK_PAD - w.shape[0]), (0, 0)))
        if i == 7 and d_pad != in_dim:          # linear8: pad out lanes + bias
            w = jnp.pad(w, ((0, 0), (0, d_pad - w.shape[1])))
            b = jnp.pad(b, ((0, 0), (0, d_pad - b.shape[1])))
        kparams.append((w, b))
    return kparams


# --------------------------------------------------------------------------
# Wrapper
# --------------------------------------------------------------------------
def _const_spec(shape):
    """Constant-index operand (weights/biases): resident in VMEM, single buffer."""
    index_map = lambda i: (0, 0)
    try:
        return pl.BlockSpec(shape, index_map,
                            pipeline_mode=pl.Buffered(buffer_count=1))
    except TypeError:  # older jax without pipeline_mode: fall back (still correct)
        return pl.BlockSpec(shape, index_map)


def _choose_tile_b(B, d_pad, weight_bytes, requested=DEFAULT_TILE_B):
    # VMEM-aware cap (~40 MiB working budget: safe on v7x's 64 MiB physical).
    per_row = 2 * 2 * d_pad * 4 + 4 * 1024 * 4   # dbl-buffered in/out tile + act temporaries
    avail = (40 << 20) - weight_bytes
    cap = max(256, int(avail // per_row) // 256 * 256)
    requested = max(256, min(requested, cap))

    if B <= requested:
        if B > 256 and B % 16 == 0:
            return B // 2                        # even grid: both v7x TCs busy
        return _round_up(max(B, 8), 8)           # one tile, no batch padding loss

    # B > requested: prefer a multiple of 256 that divides B (no batch pad),
    # and among those prefer one giving an even grid length.
    best = None
    for t in range(requested, 255, -256):
        if B % t == 0:
            if (B // t) % 2 == 0:
                return t
            if best is None:
                best = t
    return best if best is not None else requested


@functools.partial(jax.jit, static_argnames=("tile_b", "bf16_epilogue"))
def autoencoder_forward(x, kparams, tile_b=None, bf16_epilogue=None):
    """x: [B, D] float32. kparams: list of (W[in,out] bf16, b[1,out] f32),
    already padded by prepare_kernel_params."""
    B, D = x.shape
    d_pad = kparams[0][0].shape[0]
    assert d_pad == _round_up(D, LANE), "kparams padding does not match x"

    flat = [t for wb in kparams for t in wb]
    weight_bytes = sum(int(t.size) * t.dtype.itemsize for t in flat)

    kind = _device_kind()
    if bf16_epilogue is None:
        bf16_epilogue = _detect_bf16_epilogue(kind)
    is_v7 = any(s in kind for s in ("v7", "7x"))
    if is_v7:
        vmem_limit = 48 << 20                     # 64 MiB physical on v7x
    elif any(s in kind for s in ("v5", "v6")):
        vmem_limit = 96 << 20                     # 128 MiB physical parts
    else:
        vmem_limit = 64 << 20

    if tile_b is None:
        tile_b = _choose_tile_b(B, d_pad, weight_bytes)
    tile_b = min(tile_b, _round_up(B, 8))

    b_pad = _round_up(B, tile_b)
    if b_pad != B or d_pad != D:
        x = jnp.pad(x, ((0, b_pad - B), (0, d_pad - D)))

    io_spec = pl.BlockSpec((tile_b, d_pad), lambda i: (i, 0))
    weight_specs = [_const_spec(t.shape) for t in flat]

    flops = 2 * b_pad * sum(int(w.shape[0]) * int(w.shape[1]) for w, _ in kparams)
    bytes_accessed = weight_bytes + b_pad * d_pad * 4 * 2

    out = pl.pallas_call(
        functools.partial(autoencoder_kernel, bf16_epilogue=bf16_epilogue),
        out_shape=jax.ShapeDtypeStruct((b_pad, d_pad), jnp.float32),
        grid=(b_pad // tile_b,),
        in_specs=[io_spec] + weight_specs,
        out_specs=io_spec,
        compiler_params=pltpu.CompilerParams(
            dimension_semantics=("parallel",),
            vmem_limit_bytes=vmem_limit,
        ),
        cost_estimate=pl.CostEstimate(
            flops=flops, transcendentals=0, bytes_accessed=bytes_accessed),
    )(x, *flat)

    if b_pad != B or d_pad != D:
        out = out[:B, :D]
    return out


def reference_forward(x, params, bf16_epilogue=False):
    """Pure-JAX reference with matching numerics (bf16 weights, f32 accum,
    epilogue dtype matching the kernel's device-dependent choice)."""
    act_dtype = jnp.bfloat16 if bf16_epilogue else jnp.float32
    h = x
    n = len(params)
    for i, (w, b) in enumerate(params):
        y = jnp.dot(h.astype(jnp.bfloat16), w.astype(jnp.bfloat16),
                    preferred_element_type=jnp.float32)
        if i < n - 1:
            y = y.astype(act_dtype) + b.astype(act_dtype)
            h = _leaky_relu(y)
        else:
            h = y + b
    return h


if __name__ == "__main__":
    # D stands in for len(training_states[0]); B exercises the batch grid.
    # TODO(synk): training scaffolding (DataLoader/optimizer) from VAE.py is
    # out of scope; only the AutoEncoder forward pass is implemented.
    B, D = 512, 32
    key = jax.random.PRNGKey(0)
    key, kx = jax.random.split(key)
    x = jax.random.normal(kx, (B, D), jnp.float32)

    params = init_params(key, D)
    kparams = prepare_kernel_params(params)

    bf16_ep = _detect_bf16_epilogue()
    out = autoencoder_forward(x, kparams, bf16_epilogue=bf16_ep)
    out = jax.block_until_ready(out)

    ref = reference_forward(x, params, bf16_epilogue=bf16_ep)
    assert out.shape == (B, D)
    tol = 2e-2 if bf16_ep else 2e-3
    assert jnp.allclose(out, ref, atol=tol, rtol=tol), (
        float(jnp.max(jnp.abs(out - ref))))

    print("KERNEL_OK")
</pallas_src>

<mosaic_0001>
module attributes {stable_mosaic.version = 11 : i64} {
  func.func @autoencoder_kernel(%arg0: i32, %arg1: memref<256x128xf32, #tpu.memory_space<vmem>>, %arg2: memref<128x1024xbf16, #tpu.memory_space<vmem>>, %arg3: memref<1x1024xf32, #tpu.memory_space<vmem>>, %arg4: memref<1024x256xbf16, #tpu.memory_space<vmem>>, %arg5: memref<1x256xf32, #tpu.memory_space<vmem>>, %arg6: memref<256x64xbf16, #tpu.memory_space<vmem>>, %arg7: memref<1x64xf32, #tpu.memory_space<vmem>>, %arg8: memref<64x128xbf16, #tpu.memory_space<vmem>>, %arg9: memref<1x128xf32, #tpu.memory_space<vmem>>, %arg10: memref<128x64xbf16, #tpu.memory_space<vmem>>, %arg11: memref<1x64xf32, #tpu.memory_space<vmem>>, %arg12: memref<64x256xbf16, #tpu.memory_space<vmem>>, %arg13: memref<1x256xf32, #tpu.memory_space<vmem>>, %arg14: memref<256x1024xbf16, #tpu.memory_space<vmem>>, %arg15: memref<1x1024xf32, #tpu.memory_space<vmem>>, %arg16: memref<1024x128xbf16, #tpu.memory_space<vmem>>, %arg17: memref<1x128xf32, #tpu.memory_space<vmem>>, %arg18: memref<256x128xf32, #tpu.memory_space<vmem>>) attributes {dimension_semantics = [#tpu.dimension_semantics<parallel>], iteration_bounds = array<i64: 2>, scalar_prefetch = 0 : i64, scratch_operands = 0 : i64, tpu.core_type = #tpu.core_type<tc>, window_params = [{transform_indices = @transform_0, window_bounds = array<i64: 256, 128>}, {pipeline_mode = #tpu.pipeline_mode<synchronous>, transform_indices = @transform_1, window_bounds = array<i64: 128, 1024>}, {pipeline_mode = #tpu.pipeline_mode<synchronous>, transform_indices = @transform_2, window_bounds = array<i64: 1, 1024>}, {pipeline_mode = #tpu.pipeline_mode<synchronous>, transform_indices = @transform_3, window_bounds = array<i64: 1024, 256>}, {pipeline_mode = #tpu.pipeline_mode<synchronous>, transform_indices = @transform_4, window_bounds = array<i64: 1, 256>}, {pipeline_mode = #tpu.pipeline_mode<synchronous>, transform_indices = @transform_5, window_bounds = array<i64: 256, 64>}, {pipeline_mode = #tpu.pipeline_mode<synchronous>, transform_indices = @transform_6, window_bounds = array<i64: 1, 64>}, {pipeline_mode = #tpu.pipeline_mode<synchronous>, transform_indices = @transform_7, window_bounds = array<i64: 64, 128>}, {pipeline_mode = #tpu.pipeline_mode<synchronous>, transform_indices = @transform_8, window_bounds = array<i64: 1, 128>}, {pipeline_mode = #tpu.pipeline_mode<synchronous>, transform_indices = @transform_9, window_bounds = array<i64: 128, 64>}, {pipeline_mode = #tpu.pipeline_mode<synchronous>, transform_indices = @transform_10, window_bounds = array<i64: 1, 64>}, {pipeline_mode = #tpu.pipeline_mode<synchronous>, transform_indices = @transform_11, window_bounds = array<i64: 64, 256>}, {pipeline_mode = #tpu.pipeline_mode<synchronous>, transform_indices = @transform_12, window_bounds = array<i64: 1, 256>}, {pipeline_mode = #tpu.pipeline_mode<synchronous>, transform_indices = @transform_13, window_bounds = array<i64: 256, 1024>}, {pipeline_mode = #tpu.pipeline_mode<synchronous>, transform_indices = @transform_14, window_bounds = array<i64: 1, 1024>}, {pipeline_mode = #tpu.pipeline_mode<synchronous>, transform_indices = @transform_15, window_bounds = array<i64: 1024, 128>}, {pipeline_mode = #tpu.pipeline_mode<synchronous>, transform_indices = @transform_16, window_bounds = array<i64: 1, 128>}, {transform_indices = @transform_17, window_bounds = array<i64: 256, 128>}]} {
    %c0 = arith.constant 0 : index
    %c0_0 = arith.constant 0 : index
    %0 = vector.load %arg1[%c0, %c0_0] : memref<256x128xf32, #tpu.memory_space<vmem>>, vector<256x128xf32>
    %1 = arith.truncf %0 : vector<256x128xf32> to vector<256x128xbf16>
    %c0_1 = arith.constant 0 : index
    %c0_2 = arith.constant 0 : index
    %2 = vector.load %arg2[%c0_1, %c0_2] : memref<128x1024xbf16, #tpu.memory_space<vmem>>, vector<128x1024xbf16>
    %cst = arith.constant dense<0.000000e+00> : vector<256x1024xf32>
    %3 = tpu.matmul %1, %2, %cst {dimension_numbers = #tpu.dot_dimension_numbers<[1], [0], [0], [1], [0, 0, 1, 1], [], []>} : vector<256x128xbf16>, vector<128x1024xbf16>, vector<256x1024xf32> -> vector<256x1024xf32>
    %c0_3 = arith.constant 0 : index
    %c0_4 = arith.constant 0 : index
    %4 = vector.load %arg3[%c0_3, %c0_4] : memref<1x1024xf32, #tpu.memory_space<vmem>>, vector<1x1024xf32>
    %5 = vector.broadcast %4 : vector<1x1024xf32> to vector<256x1024xf32>
    %6 = arith.addf %3, %5 : vector<256x1024xf32>
    %cst_5 = arith.constant 0.00999999977 : f32
    %7 = vector.broadcast %cst_5 : f32 to vector<256x1024xf32>
    %8 = arith.mulf %7, %6 : vector<256x1024xf32>
    %9 = arith.maximumf %6, %8 : vector<256x1024xf32>
    %10 = arith.truncf %9 : vector<256x1024xf32> to vector<256x1024xbf16>
    %c0_6 = arith.constant 0 : index
    %c0_7 = arith.constant 0 : index
    %11 = vector.load %arg4[%c0_6, %c0_7] : memref<1024x256xbf16, #tpu.memory_space<vmem>>, vector<1024x256xbf16>
    %cst_8 = arith.constant dense<0.000000e+00> : vector<256x256xf32>
    %12 = tpu.matmul %10, %11, %cst_8 {dimension_numbers = #tpu.dot_dimension_numbers<[1], [0], [0], [1], [0, 0, 1, 1], [], []>} : vector<256x1024xbf16>, vector<1024x256xbf16>, vector<256x256xf32> -> vector<256x256xf32>
    %c0_9 = arith.constant 0 : index
    %c0_10 = arith.constant 0 : index
    %13 = vector.load %arg5[%c0_9, %c0_10] : memref<1x256xf32, #tpu.memory_space<vmem>>, vector<1x256xf32>
    %14 = vector.broadcast %13 : vector<1x256xf32> to vector<256x256xf32>
    %15 = arith.addf %12, %14 : vector<256x256xf32>
    %cst_11 = arith.constant 0.00999999977 : f32
    %16 = vector.broadcast %cst_11 : f32 to vector<256x256xf32>
    %17 = arith.mulf %16, %15 : vector<256x256xf32>
    %18 = arith.maximumf %15, %17 : vector<256x256xf32>
    %19 = arith.truncf %18 : vector<256x256xf32> to vector<256x256xbf16>
    %c0_12 = arith.constant 0 : index
    %c0_13 = arith.constant 0 : index
    %20 = vector.load %arg6[%c0_12, %c0_13] : memref<256x64xbf16, #tpu.memory_space<vmem>>, vector<256x64xbf16>
    %cst_14 = arith.constant dense<0.000000e+00> : vector<256x64xf32>
    %21 = tpu.matmul %19, %20, %cst_14 {dimension_numbers = #tpu.dot_dimension_numbers<[1], [0], [0], [1], [0, 0, 1, 1], [], []>} : vector<256x256xbf16>, vector<256x64xbf16>, vector<256x64xf32> -> vector<256x64xf32>
    %c0_15 = arith.constant 0 : index
    %c0_16 = arith.constant 0 : index
    %22 = vector.load %arg7[%c0_15, %c0_16] : memref<1x64xf32, #tpu.memory_space<vmem>>, vector<1x64xf32>
    %23 = vector.broadcast %22 : vector<1x64xf32> to vector<256x64xf32>
    %24 = arith.addf %21, %23 : vector<256x64xf32>
    %cst_17 = arith.constant 0.00999999977 : f32
    %25 = vector.broadcast %cst_17 : f32 to vector<256x64xf32>
    %26 = arith.mulf %25, %24 : vector<256x64xf32>
    %27 = arith.maximumf %24, %26 : vector<256x64xf32>
    %28 = arith.truncf %27 : vector<256x64xf32> to vector<256x64xbf16>
    %c0_18 = arith.constant 0 : index
    %c0_19 = arith.constant 0 : index
    %29 = vector.load %arg8[%c0_18, %c0_19] : memref<64x128xbf16, #tpu.memory_space<vmem>>, vector<64x128xbf16>
    %cst_20 = arith.constant dense<0.000000e+00> : vector<256x128xf32>
    %30 = tpu.matmul %28, %29, %cst_20 {dimension_numbers = #tpu.dot_dimension_numbers<[1], [0], [0], [1], [0, 0, 1, 1], [], []>} : vector<256x64xbf16>, vector<64x128xbf16>, vector<256x128xf32> -> vector<256x128xf32>
    %c0_21 = arith.constant 0 : index
    %c0_22 = arith.constant 0 : index
    %31 = vector.load %arg9[%c0_21, %c0_22] : memref<1x128xf32, #tpu.memory_space<vmem>>, vector<1x128xf32>
    %32 = vector.broadcast %31 : vector<1x128xf32> to vector<256x128xf32>
    %33 = arith.addf %30, %32 : vector<256x128xf32>
    %cst_23 = arith.constant 0.00999999977 : f32
    %34 = vector.broadcast %cst_23 : f32 to vector<256x128xf32>
    %35 = arith.mulf %34, %33 : vector<256x128xf32>
    %36 = arith.maximumf %33, %35 : vector<256x128xf32>
    %37 = arith.truncf %36 : vector<256x128xf32> to vector<256x128xbf16>
    %c0_24 = arith.constant 0 : index
    %c0_25 = arith.constant 0 : index
    %38 = vector.load %arg10[%c0_24, %c0_25] : memref<128x64xbf16, #tpu.memory_space<vmem>>, vector<128x64xbf16>
    %cst_26 = arith.constant dense<0.000000e+00> : vector<256x64xf32>
    %39 = tpu.matmul %37, %38, %cst_26 {dimension_numbers = #tpu.dot_dimension_numbers<[1], [0], [0], [1], [0, 0, 1, 1], [], []>} : vector<256x128xbf16>, vector<128x64xbf16>, vector<256x64xf32> -> vector<256x64xf32>
    %c0_27 = arith.constant 0 : index
    %c0_28 = arith.constant 0 : index
    %40 = vector.load %arg11[%c0_27, %c0_28] : memref<1x64xf32, #tpu.memory_space<vmem>>, vector<1x64xf32>
    %41 = vector.broadcast %40 : vector<1x64xf32> to vector<256x64xf32>
    %42 = arith.addf %39, %41 : vector<256x64xf32>
    %cst_29 = arith.constant 0.00999999977 : f32
    %43 = vector.broadcast %cst_29 : f32 to vector<256x64xf32>
    %44 = arith.mulf %43, %42 : vector<256x64xf32>
    %45 = arith.maximumf %42, %44 : vector<256x64xf32>
    %46 = arith.truncf %45 : vector<256x64xf32> to vector<256x64xbf16>
    %c0_30 = arith.constant 0 : index
    %c0_31 = arith.constant 0 : index
    %47 = vector.load %arg12[%c0_30, %c0_31] : memref<64x256xbf16, #tpu.memory_space<vmem>>, vector<64x256xbf16>
    %cst_32 = arith.constant dense<0.000000e+00> : vector<256x256xf32>
    %48 = tpu.matmul %46, %47, %cst_32 {dimension_numbers = #tpu.dot_dimension_numbers<[1], [0], [0], [1], [0, 0, 1, 1], [], []>} : vector<256x64xbf16>, vector<64x256xbf16>, vector<256x256xf32> -> vector<256x256xf32>
    %c0_33 = arith.constant 0 : index
    %c0_34 = arith.constant 0 : index
    %49 = vector.load %arg13[%c0_33, %c0_34] : memref<1x256xf32, #tpu.memory_space<vmem>>, vector<1x256xf32>
    %50 = vector.broadcast %49 : vector<1x256xf32> to vector<256x256xf32>
    %51 = arith.addf %48, %50 : vector<256x256xf32>
    %cst_35 = arith.constant 0.00999999977 : f32
    %52 = vector.broadcast %cst_35 : f32 to vector<256x256xf32>
    %53 = arith.mulf %52, %51 : vector<256x256xf32>
    %54 = arith.maximumf %51, %53 : vector<256x256xf32>
    %55 = arith.truncf %54 : vector<256x256xf32> to vector<256x256xbf16>
    %c0_36 = arith.constant 0 : index
    %c0_37 = arith.constant 0 : index
    %56 = vector.load %arg14[%c0_36, %c0_37] : memref<256x1024xbf16, #tpu.memory_space<vmem>>, vector<256x1024xbf16>
    %cst_38 = arith.constant dense<0.000000e+00> : vector<256x1024xf32>
    %57 = tpu.matmul %55, %56, %cst_38 {dimension_numbers = #tpu.dot_dimension_numbers<[1], [0], [0], [1], [0, 0, 1, 1], [], []>} : vector<256x256xbf16>, vector<256x1024xbf16>, vector<256x1024xf32> -> vector<256x1024xf32>
    %c0_39 = arith.constant 0 : index
    %c0_40 = arith.constant 0 : index
    %58 = vector.load %arg15[%c0_39, %c0_40] : memref<1x1024xf32, #tpu.memory_space<vmem>>, vector<1x1024xf32>
    %59 = vector.broadcast %58 : vector<1x1024xf32> to vector<256x1024xf32>
    %60 = arith.addf %57, %59 : vector<256x1024xf32>
    %cst_41 = arith.constant 0.00999999977 : f32
    %61 = vector.broadcast %cst_41 : f32 to vector<256x1024xf32>
    %62 = arith.mulf %61, %60 : vector<256x1024xf32>
    %63 = arith.maximumf %60, %62 : vector<256x1024xf32>
    %64 = arith.truncf %63 : vector<256x1024xf32> to vector<256x1024xbf16>
    %c0_42 = arith.constant 0 : index
    %c0_43 = arith.constant 0 : index
    %65 = vector.load %arg16[%c0_42, %c0_43] : memref<1024x128xbf16, #tpu.memory_space<vmem>>, vector<1024x128xbf16>
    %cst_44 = arith.constant dense<0.000000e+00> : vector<256x128xf32>
    %66 = tpu.matmul %64, %65, %cst_44 {dimension_numbers = #tpu.dot_dimension_numbers<[1], [0], [0], [1], [0, 0, 1, 1], [], []>} : vector<256x1024xbf16>, vector<1024x128xbf16>, vector<256x128xf32> -> vector<256x128xf32>
    %c0_45 = arith.constant 0 : index
    %c0_46 = arith.constant 0 : index
    %67 = vector.load %arg17[%c0_45, %c0_46] : memref<1x128xf32, #tpu.memory_space<vmem>>, vector<1x128xf32>
    %68 = vector.broadcast %67 : vector<1x128xf32> to vector<256x128xf32>
    %69 = arith.addf %66, %68 : vector<256x128xf32>
    %c0_47 = arith.constant 0 : index
    %c0_48 = arith.constant 0 : index
    %70 = vector.load %arg18[%c0_47, %c0_48] : memref<256x128xf32, #tpu.memory_space<vmem>>, vector<256x128xf32>
    tpu.vector_store %arg18[%c0_47, %c0_48], %69 {strides = array<i32>} : memref<256x128xf32, #tpu.memory_space<vmem>>, vector<256x128xf32>,
    return
  }
  func.func @transform_0(%arg0: i32) -> (i32, i32) {
    %c0_i32 = arith.constant 0 : i32
    %c0_i32_0 = arith.constant 0 : i32
    return %arg0, %c0_i32 : i32, i32
  }
  func.func @transform_1(%arg0: i32) -> (i32, i32) {
    %c0_i32 = arith.constant 0 : i32
    %c0_i32_0 = arith.constant 0 : i32
    %c0_i32_1 = arith.constant 0 : i32
    return %c0_i32, %c0_i32_0 : i32, i32
  }
  func.func @transform_2(%arg0: i32) -> (i32, i32) {
    %c0_i32 = arith.constant 0 : i32
    %c0_i32_0 = arith.constant 0 : i32
    %c0_i32_1 = arith.constant 0 : i32
    return %c0_i32, %c0_i32_0 : i32, i32
  }
  func.func @transform_3(%arg0: i32) -> (i32, i32) {
    %c0_i32 = arith.constant 0 : i32
    %c0_i32_0 = arith.constant 0 : i32
    %c0_i32_1 = arith.constant 0 : i32
    return %c0_i32, %c0_i32_0 : i32, i32
  }
  func.func @transform_4(%arg0: i32) -> (i32, i32) {
    %c0_i32 = arith.constant 0 : i32
    %c0_i32_0 = arith.constant 0 : i32
    %c0_i32_1 = arith.constant 0 : i32
    return %c0_i32, %c0_i32_0 : i32, i32
  }
  func.func @transform_5(%arg0: i32) -> (i32, i32) {
    %c0_i32 = arith.constant 0 : i32
    %c0_i32_0 = arith.constant 0 : i32
    %c0_i32_1 = arith.constant 0 : i32
    return %c0_i32, %c0_i32_0 : i32, i32
  }
  func.func @transform_6(%arg0: i32) -> (i32, i32) {
    %c0_i32 = arith.constant 0 : i32
    %c0_i32_0 = arith.constant 0 : i32
    %c0_i32_1 = arith.constant 0 : i32
    return %c0_i32, %c0_i32_0 : i32, i32
  }
  func.func @transform_7(%arg0: i32) -> (i32, i32) {
    %c0_i32 = arith.constant 0 : i32
    %c0_i32_0 = arith.constant 0 : i32
    %c0_i32_1 = arith.constant 0 : i32
    return %c0_i32, %c0_i32_0 : i32, i32
  }
  func.func @transform_8(%arg0: i32) -> (i32, i32) {
    %c0_i32 = arith.constant 0 : i32
    %c0_i32_0 = arith.constant 0 : i32
    %c0_i32_1 = arith.constant 0 : i32
    return %c0_i32, %c0_i32_0 : i32, i32
  }
  func.func @transform_9(%arg0: i32) -> (i32, i32) {
    %c0_i32 = arith.constant 0 : i32
    %c0_i32_0 = arith.constant 0 : i32
    %c0_i32_1 = arith.constant 0 : i32
    return %c0_i32, %c0_i32_0 : i32, i32
  }
  func.func @transform_10(%arg0: i32) -> (i32, i32) {
    %c0_i32 = arith.constant 0 : i32
    %c0_i32_0 = arith.constant 0 : i32
    %c0_i32_1 = arith.constant 0 : i32
    return %c0_i32, %c0_i32_0 : i32, i32
  }
  func.func @transform_11(%arg0: i32) -> (i32, i32) {
    %c0_i32 = arith.constant 0 : i32
    %c0_i32_0 = arith.constant 0 : i32
    %c0_i32_1 = arith.constant 0 : i32
    return %c0_i32, %c0_i32_0 : i32, i32
  }
  func.func @transform_12(%arg0: i32) -> (i32, i32) {
    %c0_i32 = arith.constant 0 : i32
    %c0_i32_0 = arith.constant 0 : i32
    %c0_i32_1 = arith.constant 0 : i32
    return %c0_i32, %c0_i32_0 : i32, i32
  }
  func.func @transform_13(%arg0: i32) -> (i32, i32) {
    %c0_i32 = arith.constant 0 : i32
    %c0_i32_0 = arith.constant 0 : i32
    %c0_i32_1 = arith.constant 0 : i32
    return %c0_i32, %c0_i32_0 : i32, i32
  }
  func.func @transform_14(%arg0: i32) -> (i32, i32) {
    %c0_i32 = arith.constant 0 : i32
    %c0_i32_0 = arith.constant 0 : i32
    %c0_i32_1 = arith.constant 0 : i32
    return %c0_i32, %c0_i32_0 : i32, i32
  }
  func.func @transform_15(%arg0: i32) -> (i32, i32) {
    %c0_i32 = arith.constant 0 : i32
    %c0_i32_0 = arith.constant 0 : i32
    %c0_i32_1 = arith.constant 0 : i32
    return %c0_i32, %c0_i32_0 : i32, i32
  }
  func.func @transform_16(%arg0: i32) -> (i32, i32) {
    %c0_i32 = arith.constant 0 : i32
    %c0_i32_0 = arith.constant 0 : i32
    %c0_i32_1 = arith.constant 0 : i32
    return %c0_i32, %c0_i32_0 : i32, i32
  }
  func.func @transform_17(%arg0: i32) -> (i32, i32) {
    %c0_i32 = arith.constant 0 : i32
    %c0_i32_0 = arith.constant 0 : i32
    return %arg0, %c0_i32 : i32, i32
  }
}

</mosaic_0001>

<bundles_post_ra>
// kernel: autoencoder_forward.1
= control target key start
LH: loop header
LB: loop body
LE: loop exit
PB: predicated region body
PF: predicated region fallthrough
CT: control target
= control target key end

     0   :  { %s14917_s0 = inlined_call_operand.hbm [shape: f32[512,128], index: 0, kind: input, shape index: {}]   ;;  %s14918_s1 = inlined_call_operand.hbm [shape: bf16[128,1024], index: 1, kind: input, shape index: {}]   ;;  %s14919_s2 = inlined_call_operand.hbm [shape: f32[1,1024], index: 2, kind: input, shape index: {}]   ;;  %s14920_s3 = inlined_call_operand.hbm [shape: bf16[1024,256], index: 3, kind: input, shape index: {}]   ;;  %s14921_s4 = inlined_call_operand.hbm [shape: f32[1,256], index: 4, kind: input, shape index: {}]   ;;  %s14922_s5 = inlined_call_operand.hbm [shape: bf16[256,64], index: 5, kind: input, shape index: {}]   ;;  %s14923_s6 = inlined_call_operand.hbm [shape: f32[1,64], index: 6, kind: input, shape index: {}]   ;;  %s14924_s7 = inlined_call_operand.hbm [shape: bf16[64,128], index: 7, kind: input, shape index: {}]   ;;  %s14925_s8 = inlined_call_operand.hbm [shape: f32[1,128], index: 8, kind: input, shape index: {}]   ;;  %s14926_s9 = inlined_call_operand.hbm [shape: bf16[128,64], index: 9, kind: input, shape index: {}]   ;;  %s14927_s10 = inlined_call_operand.hbm [shape: f32[1,64], index: 10, kind: input, shape index: {}]   ;;  %s14928_s11 = inlined_call_operand.hbm [shape: bf16[64,256], index: 11, kind: input, shape index: {}]   ;;  %s14929_s12 = inlined_call_operand.hbm [shape: f32[1,256], index: 12, kind: input, shape index: {}]   ;;  %s14930_s13 = inlined_call_operand.hbm [shape: bf16[256,1024], index: 13, kind: input, shape index: {}]   ;;  %s14931_s14 = inlined_call_operand.hbm [shape: f32[1,1024], index: 14, kind: input, shape index: {}]   ;;  %s14932_s15 = inlined_call_operand.hbm [shape: bf16[1024,128], index: 15, kind: input, shape index: {}]   ;;  %s14933_s16 = inlined_call_operand.hbm [shape: f32[1,128], index: 16, kind: input, shape index: {}]   ;;  %s14934_s17 = inlined_call_operand.hbm [shape: f32[512,128], index: 17, kind: output, shape index: {}]  }
   0x1   :  { %14970 = sst [smem:[#allocation61_spill]] %s14917_s0 }
   0x2   :  { %14971 = sst [smem:[#allocation62_spill]] %s14918_s1 }
   0x3   :  { %14972 = sst [smem:[#allocation63_spill]] %s14919_s2 }
   0x4   :  { %14973 = sst [smem:[#allocation64_spill]] %s14920_s3 }
   0x5   :  { %14974 = sst [smem:[#allocation65_spill]] %s14922_s5 }
   0x6   :  { %14975 = sst [smem:[#allocation66_spill]] %s14933_s16 }
   0x7   :  { %14976 = sst [smem:[#allocation67_spill]] %s14934_s17 }
   0x8   :  { %22 = vsyncpa [#allocation3], 0 }
   0x9   :  { %24 = vsyncpa [#allocation3 + $0x1], 0 }
   0xa   :  { %25 = vsyncpa [#allocation6], 0 }
   0xb   :  { %26 = vsyncpa [#allocation9], 0 }
   0xc   :  { %27 = vsyncpa [#allocation12], 0 }
   0xd   :  { %28 = vsyncpa [#allocation15], 0 }
   0xe   :  { %29 = vsyncpa [#allocation18], 0 }
   0xf   :  { %30 = vsyncpa [#allocation21], 0 }
  0x10   :  { %31 = vsyncpa [#allocation24], 0 }
  0x11   :  { %32 = vsyncpa [#allocation27], 0 }
  0x12   :  { %33 = vsyncpa [#allocation4], 0 }
  0x13   :  { %35 = vsyncpa [#allocation4 + $0x1], 0  ;;  %s12195_s24 = smov 0   ;;  %s12197_s25 = smov 0  }
  0x14   :  { %s12199_s26 = smov 0   ;;  %s12201_s27 = smov 0  }
  0x15 LB: > { %14977 = sst [smem:[#allocation40_spill]] %s12064_s24  ;;  %s12078_s28 = smov [#allocation5]   ;;  %s12076_s27 = sphi %s12201_s27, %s15074_s27   ;;  %s12072_s26 = sphi %s12199_s26, %s15073_s26   ;;  %s12068_s25 = sphi %s12197_s25, %s15072_s25   ;;  %s12064_s24 = sphi %s12195_s24, %s15071_s24  }
  0x16   : > { %14978 = sst [smem:[#allocation41_spill]] %s12068_s25  ;;  %s446_s29 = sshll.u32 %s12078_s28, 4  ;;  %s12221_s29 = int_to_ptr.vmem [resolvable:$true] %s446_s29 }
  0x17   : > { %14979 = sst [smem:[#allocation42_spill]] %s12072_s26  ;;  %s12216_s0 = sadd.s32 4294967295, %s12076_s27  }
  0x18   : > { %14980 = sst [smem:[#allocation43_spill]] %s12076_s27  ;;  %p9519_p0 = scmp.ge.s32.totalorder %s12076_s27, 1 }
  0x19   : > { %14981 = sst [smem:[#allocation44_spill]] %s12216_s0  ;;  %p14948_p1 = scmp.eq.s32.totalorder %s12216_s0, 0 }
  0x1a   : > { %p434_p2 = scmp.lt.s32.totalorder %s12076_s27, 3  ;;  %s12079_s18 = smov [#allocation8]  }
  0x1b   : > { %s470_s19 = sshll.u32 %s12079_s18, 4  ;;  %s12080_s20 = smov [#allocation11]   ;;  %s12236_s19 = int_to_ptr.vmem [resolvable:$true] %s470_s19 }
  0x1c   : > { %p12223_p3 = pnand %p9519_p0, %p434_p2  ;;  %s12238_s21 = sshll.u32 %s12080_s20, 4  ;;  %s495_s21 = int_to_ptr.vmem [resolvable:$true] %s12238_s21 }
  0x1d   : > { %s14985_s28 = sld [smem:[#allocation62_spill]] }
  0x1e   : > { %s14982_s30 = scalar_select %p12223_p3, 1, 0 }
  0x1f   : > { %p11054_p5 = pneg %p12223_p3 }
  0x20   : > { %14983 = sst [smem:[#allocation45_spill]] %s14982_s30 }
  0x21   : > { %p12232_p6 = pnand %p11054_p5, %p14948_p1 }
  0x23   : > { %s11500_s17 = scalar_lea.hbm %s14985_s28, 8192  ;;  %p12248_p8 = pneg %p12232_p6 }
  0x24   : > { %p11501_p7 = scmp.ne.s32.totalorder %s14985_s28, %s11500_s17  ;;  %p11507_p11 = scmp.lt.u32.totalorder %s11500_s17, %s14985_s28 }
  0x26   : > { %p11503_p9 = pnand %p12248_p8, %p11501_p7 }
  0x28   : > { %p11504_p10 = pneg %p11503_p9 }
  0x2a   : > { %p11509_p12 = pnand %p11507_p11, %p11504_p10 }
  0x2c   : > { %11512 = shalt.err (!%p11509_p12)
}
  0x2d   : > { %s11513_s24 = scalar_lea.vmem %s12221_s29, 8192  ;;  %p11521_p5 = scmp.lt.s32.totalorder %s12221_s29, %s12221_s29 }
  0x2e   : > { %p11514_p13 = scmp.ne.s32.totalorder %s12221_s29, %s11513_s24  ;;  %p11522_p4 = scmp.lt.s32.totalorder %s11513_s24, %s11513_s24 }
  0x30   : > { %p11516_p0 = pnand %p11514_p13, %p12248_p8  ;;  %p11523_p7 = por %p11522_p4, %p11521_p5 }
  0x32   : > { %p11517_p2 = pneg %p11516_p0 }
  0x34   : > { %p11524_p9 = pnand %p11523_p7, %p11517_p2 }
  0x36   : > { %11527 = shalt.err (!%p11524_p9)
}
  0x37   : > { %s14947_s30 = smov 512   ;;  %s14950_s17 = smov 32  }
  0x38   : > { %11057 = dma.hbm_to_vmem [thread:$0]  (!%p12232_p6), %s14985_s28, 8192, %s12221_s29, [#allocation6], %s14947_s30, %s14947_s30, %s14950_s17  }
  0x39   : > { %s14987_s3 = sld [smem:[#allocation64_spill]] }
  0x3f   : > { %s11528_s24 = scalar_lea.hbm %s14987_s3, 16384 }
  0x40   : > { %p11529_p4 = scmp.ne.s32.totalorder %s14987_s3, %s11528_s24  ;;  %p11535_p12 = scmp.lt.u32.totalorder %s11528_s24, %s14987_s3 }
  0x42   : > { %p11531_p10 = pnand %p11529_p4, %p12248_p8 }
  0x44   : > { %p11532_p11 = pneg %p11531_p10 }
  0x46   : > { %p11537_p13 = pnand %p11535_p12, %p11532_p11 }
  0x48   : > { %11540 = shalt.err (!%p11537_p13)
}
  0x49   : > { %s11541_s29 = scalar_lea.vmem %s12236_s19, 16384  ;;  %p11549_p7 = scmp.lt.s32.totalorder %s12236_s19, %s12236_s19 }
  0x4a   : > { %p11542_p0 = scmp.ne.s32.totalorder %s12236_s19, %s11541_s29  ;;  %p11550_p9 = scmp.lt.s32.totalorder %s11541_s29, %s11541_s29 }
  0x4c   : > { %p11544_p2 = pnand %p11542_p0, %p12248_p8  ;;  %p11551_p4 = por %p11550_p9, %p11549_p7 }
  0x4e   : > { %p11545_p5 = pneg %p11544_p2 }
  0x50   : > { %p11552_p10 = pnand %p11551_p4, %p11545_p5 }
  0x52   : > { %11555 = shalt.err (!%p11552_p10)
}
  0x53   : > { %s14951_s25 = smov 128   ;;  %s14953_s16 = smov 8  }
  0x54   : > { %11063 = dma.hbm_to_vmem [thread:$0]  (!%p12232_p6), %s14987_s3, 16384, %s12236_s19, [#allocation9], %s14951_s25, %s14951_s25, %s14953_s16  }
  0x55   : > { %s14988_s5 = sld [smem:[#allocation65_spill]] }
  0x5b   : > { %s11556_s23 = scalar_lea.hbm %s14988_s5, 2048 }
  0x5c   : > { %p11557_p11 = scmp.ne.s32.totalorder %s14988_s5, %s11556_s23  ;;  %p11563_p0 = scmp.lt.u32.totalorder %s11556_s23, %s14988_s5 }
  0x5e   : > { %p11559_p12 = pnand %p11557_p11, %p12248_p8 }
  0x60   : > { %p11560_p13 = pneg %p11559_p12 }
  0x62   : > { %p11565_p2 = pnand %p11563_p0, %p11560_p13 }
  0x64   : > { %11568 = shalt.err (!%p11565_p2)
}
  0x65   : > { %s11569_s26 = scalar_lea.vmem %s495_s21, 2048  ;;  %p11577_p4 = scmp.lt.s32.totalorder %s495_s21, %s495_s21 }
  0x66   : > { %p11570_p5 = scmp.ne.s32.totalorder %s495_s21, %s11569_s26  ;;  %p11578_p10 = scmp.lt.s32.totalorder %s11569_s26, %s11569_s26 }
  0x68   : > { %p11572_p7 = pnand %p11570_p5, %p12248_p8  ;;  %p11579_p1 = por %p11578_p10, %p11577_p4 }
  0x6a   : > { %p11573_p9 = pneg %p11572_p7 }
  0x6c   : > { %p11580_p3 = pnand %p11579_p1, %p11573_p9 }
  0x6e   : > { %11583 = shalt.err (!%p11580_p3)
}
  0x6f   : > { %s14956_s19 = smov 64   ;;  %s14957_s27 = smov 4  }
  0x70   : > { %11069 = dma.hbm_to_vmem [thread:$0]  (!%p12232_p6), %s14988_s5, 2048, %s495_s21, [#allocation12], %s14956_s19, %s14956_s19, %s14957_s27  }
  0x71   : > { %s12087_s22 = smov [#allocation14]   ;;  %s12088_s20 = smov [#allocation17]  }
  0x72   : > { %s518_s23 = sshll.u32 %s12087_s22, 4  ;;  %s542_s24 = sshll.u32 %s12088_s20, 4  ;;  %s519_s23 = int_to_ptr.vmem [resolvable:$true] %s518_s23  ;;  %s543_s24 = int_to_ptr.vmem [resolvable:$true] %s542_s24 }
  0x73   : > { %s11584_s17 = scalar_lea.hbm %s14924_s7, 512 }
  0x74   : > { %p11585_p1 = scmp.ne.s32.totalorder %s14924_s7, %s11584_s17  ;;  %p11591_p12 = scmp.lt.u32.totalorder %s11584_s17, %s14924_s7 }
  0x76   : > { %p11587_p3 = pnand %p11585_p1, %p12248_p8 }
  0x78   : > { %p11588_p11 = pneg %p11587_p3 }
  0x7a   : > { %p11593_p13 = pnand %p11591_p12, %p11588_p11 }
  0x7c   : > { %11596 = shalt.err (!%p11593_p13)
}
  0x7d   : > { %s11597_s21 = scalar_lea.vmem %s519_s23, 512  ;;  %p11605_p7 = scmp.lt.s32.totalorder %s519_s23, %s519_s23 }
  0x7e   : > { %p11598_p0 = scmp.ne.s32.totalorder %s519_s23, %s11597_s21  ;;  %p11606_p9 = scmp.lt.s32.totalorder %s11597_s21, %s11597_s21 }
  0x80   : > { %p11600_p2 = pnand %p11598_p0, %p12248_p8  ;;  %p11607_p4 = por %p11606_p9, %p11605_p7 }
  0x82   : > { %p11601_p5 = pneg %p11600_p2 }
  0x84   : > { %p11608_p10 = pnand %p11607_p4, %p11601_p5 }
  0x86   : > { %11611 = shalt.err (!%p11608_p10)
}
  0x87   : > { %11075 = dma.hbm_to_vmem [thread:$0]  (!%p12232_p6), %s14924_s7, 512, %s519_s23, [#allocation15], %s14956_s19, %s14956_s19, %s14957_s27  }
  0x88   : > { %s11612_s16 = scalar_lea.hbm %s14926_s9, 1024 }
  0x89   : > { %p11613_p1 = scmp.ne.s32.totalorder %s14926_s9, %s11612_s16  ;;  %p11619_p12 = scmp.lt.u32.totalorder %s11612_s16, %s14926_s9 }
  0x8b   : > { %p11615_p3 = pnand %p11613_p1, %p12248_p8 }
  0x8d   : > { %p11616_p11 = pneg %p11615_p3 }
  0x8f   : > { %p11621_p13 = pnand %p11619_p12, %p11616_p11 }
  0x91   : > { %11624 = shalt.err (!%p11621_p13)
}
  0x92   : > { %s11625_s29 = scalar_lea.vmem %s543_s24, 1024  ;;  %p11633_p7 = scmp.lt.s32.totalorder %s543_s24, %s543_s24 }
  0x93   : > { %p11626_p0 = scmp.ne.s32.totalorder %s543_s24, %s11625_s29  ;;  %p11634_p9 = scmp.lt.s32.totalorder %s11625_s29, %s11625_s29 }
  0x95   : > { %p11628_p2 = pnand %p11626_p0, %p12248_p8  ;;  %p11635_p4 = por %p11634_p9, %p11633_p7 }
  0x97   : > { %p11629_p5 = pneg %p11628_p2 }
  0x99   : > { %p11636_p10 = pnand %p11635_p4, %p11629_p5 }
  0x9b   : > { %11639 = shalt.err (!%p11636_p10)
}
  0x9c   : > { %11081 = dma.hbm_to_vmem [thread:$0]  (!%p12232_p6), %s14926_s9, 1024, %s543_s24, [#allocation18], %s14956_s19, %s14956_s19, %s14957_s27  }
  0x9d   : > { %s12089_s21 = smov [#allocation20]   ;;  %s12090_s28 = smov [#allocation23]  }
  0x9e   : > { %s566_s3 = sshll.u32 %s12089_s21, 4  ;;  %s590_s17 = sshll.u32 %s12090_s28, 4  ;;  %s567_s3 = int_to_ptr.vmem [resolvable:$true] %s566_s3  ;;  %s591_s17 = int_to_ptr.vmem [resolvable:$true] %s590_s17 }
  0x9f   : > { %s11640_s30 = scalar_lea.hbm %s14928_s11, 1024 }
  0xa0   : > { %p11641_p1 = scmp.ne.s32.totalorder %s14928_s11, %s11640_s30  ;;  %p11647_p12 = scmp.lt.u32.totalorder %s11640_s30, %s14928_s11 }
  0xa2   : > { %p11643_p3 = pnand %p11641_p1, %p12248_p8 }
  0xa4   : > { %p11644_p11 = pneg %p11643_p3 }
  0xa6   : > { %p11649_p13 = pnand %p11647_p12, %p11644_p11 }
  0xa8   : > { %11652 = shalt.err (!%p11649_p13)
}
  0xa9   : > { %s11653_s24 = scalar_lea.vmem %s567_s3, 1024  ;;  %p11661_p7 = scmp.lt.s32.totalorder %s567_s3, %s567_s3 }
  0xaa   : > { %p11654_p0 = scmp.ne.s32.totalorder %s567_s3, %s11653_s24  ;;  %p11662_p9 = scmp.lt.s32.totalorder %s11653_s24, %s11653_s24 }
  0xac   : > { %p11656_p2 = pnand %p11654_p0, %p12248_p8  ;;  %p11663_p4 = por %p11662_p9, %p11661_p7 }
  0xae   : > { %p11657_p5 = pneg %p11656_p2 }
  0xb0   : > { %p11664_p10 = pnand %p11663_p4, %p11657_p5 }
  0xb2   : > { %11667 = shalt.err (!%p11664_p10)
}
  0xb3   : > { %s14989_s23 = smov 8   ;;  %s14990_s26 = smov 128  }
  0xb4   : > { %11087 = dma.hbm_to_vmem [thread:$0]  (!%p12232_p6), %s14928_s11, 1024, %s567_s3, [#allocation21], %s14990_s26, %s14990_s26, %s14989_s23  }
  0xb5   : > { %s11668_s30 = scalar_lea.hbm %s14930_s13, 16384 }
  0xb6   : > { %p11669_p1 = scmp.ne.s32.totalorder %s14930_s13, %s11668_s30  ;;  %p11675_p12 = scmp.lt.u32.totalorder %s11668_s30, %s14930_s13 }
  0xb8   : > { %p11671_p3 = pnand %p11669_p1, %p12248_p8 }
  0xba   : > { %p11672_p11 = pneg %p11671_p3 }
  0xbc   : > { %p11677_p13 = pnand %p11675_p12, %p11672_p11 }
  0xbe   : > { %11680 = shalt.err (!%p11677_p13)
}
  0xbf   : > { %s11681_s24 = scalar_lea.vmem %s591_s17, 16384  ;;  %p11689_p7 = scmp.lt.s32.totalorder %s591_s17, %s591_s17 }
  0xc0   : > { %p11682_p0 = scmp.ne.s32.totalorder %s591_s17, %s11681_s24  ;;  %p11690_p9 = scmp.lt.s32.totalorder %s11681_s24, %s11681_s24 }
  0xc2   : > { %p11684_p2 = pnand %p11682_p0, %p12248_p8  ;;  %p11691_p4 = por %p11690_p9, %p11689_p7 }
  0xc4   : > { %p11685_p5 = pneg %p11684_p2 }
  0xc6   : > { %p11692_p10 = pnand %p11691_p4, %p11685_p5 }
  0xc8   : > { %11695 = shalt.err (!%p11692_p10)
}
  0xc9   : > { %s14991_s3 = smov 32   ;;  %s14992_s21 = smov 512  }
  0xca   : > { %11093 = dma.hbm_to_vmem [thread:$0]  (!%p12232_p6), %s14930_s13, 16384, %s591_s17, [#allocation24], %s14992_s21, %s14992_s21, %s14991_s3  }
  0xcb   : > { %s12091_s16 = smov [#allocation26]   ;;  %s12092_s0 = smov [#allocation7]  }
  0xcc   : > { %s614_s30 = sshll.u32 %s12091_s16, 4  ;;  %s460_s22 = sshll.u32 %s12092_s0, 4  ;;  %s615_s30 = int_to_ptr.vmem [resolvable:$true] %s614_s30  ;;  %s461_s22 = int_to_ptr.vmem [resolvable:$true] %s460_s22 }
  0xcd   : > { %s11696_s24 = scalar_lea.hbm %s14932_s15, 8192 }
  0xce   : > { %p11697_p1 = scmp.ne.s32.totalorder %s14932_s15, %s11696_s24  ;;  %p11703_p12 = scmp.lt.u32.totalorder %s11696_s24, %s14932_s15 }
  0xd0   : > { %p11699_p3 = pnand %p11697_p1, %p12248_p8 }
  0xd2   : > { %p11700_p11 = pneg %p11699_p3 }
  0xd4   : > { %p11705_p13 = pnand %p11703_p12, %p11700_p11 }
  0xd6   : > { %11708 = shalt.err (!%p11705_p13)
}
  0xd7   : > { %s11709_s17 = scalar_lea.vmem %s615_s30, 8192  ;;  %p11717_p7 = scmp.lt.s32.totalorder %s615_s30, %s615_s30 }
  0xd8   : > { %p11710_p0 = scmp.ne.s32.totalorder %s615_s30, %s11709_s17  ;;  %p11718_p9 = scmp.lt.s32.totalorder %s11709_s17, %s11709_s17 }
  0xda   : > { %p11712_p2 = pnand %p11710_p0, %p12248_p8  ;;  %p11719_p4 = por %p11718_p9, %p11717_p7 }
  0xdc   : > { %p11713_p5 = pneg %p11712_p2 }
  0xde   : > { %p11720_p10 = pnand %p11719_p4, %p11713_p5 }
  0xe0   : > { %11723 = shalt.err (!%p11720_p10)
}
  0xe1   : > { %s14993_s19 = smov 4   ;;  %s14994_s27 = smov 64  }
  0xe2   : > { %11099 = dma.hbm_to_vmem [thread:$0]  (!%p12232_p6), %s14932_s15, 8192, %s615_s30, [#allocation27], %s14994_s27, %s14994_s27, %s14993_s19  }
  0xe3   : > { %s14995_s2 = sld [smem:[#allocation63_spill]] }
  0xe9   : > { %s11724_s16 = scalar_lea.hbm %s14995_s2, 128 }
  0xea   : > { %p11725_p1 = scmp.ne.s32.totalorder %s14995_s2, %s11724_s16  ;;  %p11731_p12 = scmp.lt.u32.totalorder %s11724_s16, %s14995_s2 }
  0xec   : > { %p11727_p3 = pnand %p11725_p1, %p12248_p8 }
  0xee   : > { %p11728_p11 = pneg %p11727_p3 }
  0xf0   : > { %p11733_p13 = pnand %p11731_p12, %p11728_p11 }
  0xf2   : > { %11736 = shalt.err (!%p11733_p13)
}
  0xf3   : > { %s11737_s28 = scalar_lea.vmem %s461_s22, 128  ;;  %p11745_p7 = scmp.lt.s32.totalorder %s461_s22, %s461_s22 }
  0xf4   : > { %p11738_p0 = scmp.ne.s32.totalorder %s461_s22, %s11737_s28  ;;  %p11746_p9 = scmp.lt.s32.totalorder %s11737_s28, %s11737_s28 }
  0xf6   : > { %p11740_p2 = pnand %p11738_p0, %p12248_p8  ;;  %p11747_p4 = por %p11746_p9, %p11745_p7 }
  0xf8   : > { %p11741_p5 = pneg %p11740_p2 }
  0xfa   : > { %p11748_p10 = pnand %p11747_p4, %p11741_p5 }
  0xfc   : > { %11751 = shalt.err (!%p11748_p10)
}
  0xfd   : > { %11060 = dma.hbm_to_vmem [thread:$0]  (!%p12232_p6), %s14995_s2, 128, %s461_s22, [#allocation6]  }
  0xfe   : > { %s12093_s19 = smov [#allocation10]   ;;  %s12094_s5 = smov [#allocation13]  }
  0xff   : > { %s484_s27 = sshll.u32 %s12093_s19, 4  ;;  %s508_s3 = sshll.u32 %s12094_s5, 4  ;;  %s485_s27 = int_to_ptr.vmem [resolvable:$true] %s484_s27  ;;  %s509_s3 = int_to_ptr.vmem [resolvable:$true] %s508_s3 }
 0x100   : > { %s11752_s16 = scalar_lea.hbm %s14921_s4, 32 }
 0x101   : > { %p11753_p1 = scmp.ne.s32.totalorder %s14921_s4, %s11752_s16  ;;  %p11759_p12 = scmp.lt.u32.totalorder %s11752_s16, %s14921_s4 }
 0x103   : > { %p11755_p3 = pnand %p11753_p1, %p12248_p8 }
 0x105   : > { %p11756_p11 = pneg %p11755_p3 }
 0x107   : > { %p11761_p13 = pnand %p11759_p12, %p11756_p11 }
 0x109   : > { %11764 = shalt.err (!%p11761_p13)
}
 0x10a   : > { %s11765_s22 = scalar_lea.vmem %s485_s27, 32  ;;  %p11773_p7 = scmp.lt.s32.totalorder %s485_s27, %s485_s27 }
 0x10b   : > { %p11766_p0 = scmp.ne.s32.totalorder %s485_s27, %s11765_s22  ;;  %p11774_p9 = scmp.lt.s32.totalorder %s11765_s22, %s11765_s22 }
 0x10d   : > { %p11768_p2 = pnand %p11766_p0, %p12248_p8  ;;  %p11775_p4 = por %p11774_p9, %p11773_p7 }
 0x10f   : > { %p11769_p5 = pneg %p11768_p2 }
 0x111   : > { %p11776_p10 = pnand %p11775_p4, %p11769_p5 }
 0x113   : > { %11779 = shalt.err (!%p11776_p10)
}
 0x114   : > { %11066 = dma.hbm_to_vmem [thread:$0]  (!%p12232_p6), %s14921_s4, 32, %s485_s27, [#allocation9]  }
 0x115   : > { %s11780_s5 = scalar_lea.hbm %s14923_s6, 16 }
 0x116   : > { %p11781_p1 = scmp.ne.s32.totalorder %s14923_s6, %s11780_s5  ;;  %p11787_p12 = scmp.lt.u32.totalorder %s11780_s5, %s14923_s6 }
 0x118   : > { %p11783_p3 = pnand %p11781_p1, %p12248_p8 }
 0x11a   : > { %p11784_p11 = pneg %p11783_p3 }
 0x11c   : > { %p11789_p13 = pnand %p11787_p12, %p11784_p11 }
 0x11e   : > { %11792 = shalt.err (!%p11789_p13)
}
 0x11f   : > { %s11793_s20 = scalar_lea.vmem %s509_s3, 16  ;;  %s11800_s27 = scalar_lea.vmem %s509_s3, 32 }
 0x120   : > { %p11794_p0 = scmp.ne.s32.totalorder %s509_s3, %s11793_s20  ;;  %p11801_p7 = scmp.lt.s32.totalorder %s509_s3, %s509_s3 }
 0x121   : > { %p11802_p9 = scmp.lt.s32.totalorder %s11800_s27, %s11793_s20 }
 0x122   : > { %p11796_p2 = pnand %p11794_p0, %p12248_p8 }
 0x123   : > { %p11803_p4 = por %p11802_p9, %p11801_p7 }
 0x124   : > { %p11797_p5 = pneg %p11796_p2 }
 0x126   : > { %p11804_p10 = pnand %p11803_p4, %p11797_p5 }
 0x128   : > { %11807 = shalt.err (!%p11804_p10)
}
 0x129   : > { %11072 = dma.hbm_to_vmem [thread:$0]  (!%p12232_p6), %s14923_s6, 16, %s509_s3, [#allocation12]  }
 0x12a   : > { %s12095_s22 = smov [#allocation16]   ;;  %s12096_s30 = smov [#allocation19]  }
 0x12b   : > { %s532_s28 = sshll.u32 %s12095_s22, 4  ;;  %s556_s17 = sshll.u32 %s12096_s30, 4  ;;  %s533_s28 = int_to_ptr.vmem [resolvable:$true] %s532_s28  ;;  %s557_s17 = int_to_ptr.vmem [resolvable:$true] %s556_s17 }
 0x12c   : > { %s11808_s21 = scalar_lea.hbm %s14925_s8, 16 }
 0x12d   : > { %p11809_p1 = scmp.ne.s32.totalorder %s14925_s8, %s11808_s21  ;;  %p11815_p12 = scmp.lt.u32.totalorder %s11808_s21, %s14925_s8 }
 0x12f   : > { %p11811_p3 = pnand %p11809_p1, %p12248_p8 }
 0x131   : > { %p11812_p11 = pneg %p11811_p3 }
 0x133   : > { %p11817_p13 = pnand %p11815_p12, %p11812_p11 }
 0x135   : > { %11820 = shalt.err (!%p11817_p13)
}
 0x136   : > { %s11821_s3 = scalar_lea.vmem %s533_s28, 16  ;;  %s11828_s27 = scalar_lea.vmem %s533_s28, 32 }
 0x137   : > { %p11822_p0 = scmp.ne.s32.totalorder %s533_s28, %s11821_s3  ;;  %p11829_p7 = scmp.lt.s32.totalorder %s533_s28, %s533_s28 }
 0x138   : > { %p11830_p9 = scmp.lt.s32.totalorder %s11828_s27, %s11821_s3 }
 0x139   : > { %p11824_p2 = pnand %p11822_p0, %p12248_p8 }
 0x13a   : > { %p11831_p4 = por %p11830_p9, %p11829_p7 }
 0x13b   : > { %p11825_p5 = pneg %p11824_p2 }
 0x13d   : > { %p11832_p10 = pnand %p11831_p4, %p11825_p5 }
 0x13f   : > { %11835 = shalt.err (!%p11832_p10)
}
 0x140   : > { %11078 = dma.hbm_to_vmem [thread:$0]  (!%p12232_p6), %s14925_s8, 16, %s533_s28, [#allocation15]  }
 0x141   : > { %s11836_s19 = scalar_lea.hbm %s14927_s10, 16 }
 0x142   : > { %p11837_p1 = scmp.ne.s32.totalorder %s14927_s10, %s11836_s19  ;;  %p11843_p12 = scmp.lt.u32.totalorder %s11836_s19, %s14927_s10 }
 0x144   : > { %p11839_p3 = pnand %p11837_p1, %p12248_p8 }
 0x146   : > { %p11840_p11 = pneg %p11839_p3 }
 0x148   : > { %p11845_p13 = pnand %p11843_p12, %p11840_p11 }
 0x14a   : > { %11848 = shalt.err (!%p11845_p13)
}
 0x14b   : > { %s11849_s0 = scalar_lea.vmem %s557_s17, 16  ;;  %s11856_s28 = scalar_lea.vmem %s557_s17, 32 }
 0x14c   : > { %p11850_p0 = scmp.ne.s32.totalorder %s557_s17, %s11849_s0  ;;  %p11857_p7 = scmp.lt.s32.totalorder %s557_s17, %s557_s17 }
 0x14d   : > { %p11858_p9 = scmp.lt.s32.totalorder %s11856_s28, %s11849_s0 }
 0x14e   : > { %p11852_p2 = pnand %p11850_p0, %p12248_p8 }
 0x14f   : > { %p11859_p4 = por %p11858_p9, %p11857_p7 }
 0x150   : > { %p11853_p5 = pneg %p11852_p2 }
 0x152   : > { %p11860_p10 = pnand %p11859_p4, %p11853_p5 }
 0x154   : > { %11863 = shalt.err (!%p11860_p10)
}
 0x155   : > { %11084 = dma.hbm_to_vmem [thread:$0]  (!%p12232_p6), %s14927_s10, 16, %s557_s17, [#allocation18]  }
 0x156   : > { %s12097_s27 = smov [#allocation22]   ;;  %s12098_s24 = smov [#allocation25]  }
 0x157   : > { %s580_s29 = sshll.u32 %s12097_s27, 4  ;;  %s604_s22 = sshll.u32 %s12098_s24, 4  ;;  %s581_s29 = int_to_ptr.vmem [resolvable:$true] %s580_s29  ;;  %s605_s22 = int_to_ptr.vmem [resolvable:$true] %s604_s22 }
 0x158   : > { %s11864_s5 = scalar_lea.hbm %s14929_s12, 32 }
 0x159   : > { %p11865_p1 = scmp.ne.s32.totalorder %s14929_s12, %s11864_s5  ;;  %p11871_p12 = scmp.lt.u32.totalorder %s11864_s5, %s14929_s12 }
 0x15b   : > { %p11867_p3 = pnand %p11865_p1, %p12248_p8 }
 0x15d   : > { %p11868_p11 = pneg %p11867_p3 }
 0x15f   : > { %p11873_p13 = pnand %p11871_p12, %p11868_p11 }
 0x161   : > { %11876 = shalt.err (!%p11873_p13)
}
 0x162   : > { %s11877_s17 = scalar_lea.vmem %s581_s29, 32  ;;  %p11885_p7 = scmp.lt.s32.totalorder %s581_s29, %s581_s29 }
 0x163   : > { %p11878_p0 = scmp.ne.s32.totalorder %s581_s29, %s11877_s17  ;;  %p11886_p9 = scmp.lt.s32.totalorder %s11877_s17, %s11877_s17 }
 0x165   : > { %p11880_p2 = pnand %p11878_p0, %p12248_p8  ;;  %p11887_p4 = por %p11886_p9, %p11885_p7 }
 0x167   : > { %p11881_p5 = pneg %p11880_p2 }
 0x169   : > { %p11888_p10 = pnand %p11887_p4, %p11881_p5 }
 0x16b   : > { %11891 = shalt.err (!%p11888_p10)
}
 0x16c   : > { %11090 = dma.hbm_to_vmem [thread:$0]  (!%p12232_p6), %s14929_s12, 32, %s581_s29, [#allocation21]  }
 0x16d   : > { %s11892_s24 = scalar_lea.hbm %s14931_s14, 128 }
 0x16e   : > { %p11893_p1 = scmp.ne.s32.totalorder %s14931_s14, %s11892_s24  ;;  %p11899_p12 = scmp.lt.u32.totalorder %s11892_s24, %s14931_s14 }
 0x170   : > { %p11895_p3 = pnand %p11893_p1, %p12248_p8 }
 0x172   : > { %p11896_p11 = pneg %p11895_p3 }
 0x174   : > { %p11901_p13 = pnand %p11899_p12, %p11896_p11 }
 0x176   : > { %11904 = shalt.err (!%p11901_p13)
}
 0x177   : > { %s11905_s25 = scalar_lea.vmem %s605_s22, 128  ;;  %p11913_p7 = scmp.lt.s32.totalorder %s605_s22, %s605_s22 }
 0x178   : > { %p11906_p0 = scmp.ne.s32.totalorder %s605_s22, %s11905_s25  ;;  %p11914_p9 = scmp.lt.s32.totalorder %s11905_s25, %s11905_s25 }
 0x17a   : > { %p11908_p2 = pnand %p11906_p0, %p12248_p8  ;;  %p11915_p4 = por %p11914_p9, %p11913_p7 }
 0x17c   : > { %p11909_p5 = pneg %p11908_p2 }
 0x17e   : > { %p11916_p10 = pnand %p11915_p4, %p11909_p5 }
 0x180   : > { %11919 = shalt.err (!%p11916_p10)
}
 0x181   : > { %11096 = dma.hbm_to_vmem [thread:$0]  (!%p12232_p6), %s14931_s14, 128, %s605_s22, [#allocation24]  }
 0x182   : > { %s12099_s0 = smov [#allocation28]   ;;  %s14996_s3 = sld [smem:[#allocation66_spill]] }
 0x183   : > { %s628_s17 = sshll.u32 %s12099_s0, 4  ;;  %s629_s17 = int_to_ptr.vmem [resolvable:$true] %s628_s17 }
 0x188   : > { %s11920_s27 = scalar_lea.hbm %s14996_s3, 16 }
 0x189   : > { %p11921_p1 = scmp.ne.s32.totalorder %s14996_s3, %s11920_s27  ;;  %p11927_p12 = scmp.lt.u32.totalorder %s11920_s27, %s14996_s3 }
 0x18b   : > { %p11923_p3 = pnand %p11921_p1, %p12248_p8 }
 0x18d   : > { %p11924_p11 = pneg %p11923_p3 }
 0x18f   : > { %p11929_p13 = pnand %p11927_p12, %p11924_p11 }
 0x191   : > { %11932 = shalt.err (!%p11929_p13)
}
 0x192   : > { %s11933_s22 = scalar_lea.vmem %s629_s17, 16  ;;  %s11940_s21 = scalar_lea.vmem %s629_s17, 32 }
 0x193   : > { %p11934_p0 = scmp.ne.s32.totalorder %s629_s17, %s11933_s22  ;;  %p11941_p7 = scmp.lt.s32.totalorder %s629_s17, %s629_s17 }
 0x194   : > { %p11942_p9 = scmp.lt.s32.totalorder %s11940_s21, %s11933_s22 }
 0x195   : > { %p11936_p2 = pnand %p11934_p0, %p12248_p8 }
 0x196   : > { %p11943_p4 = por %p11942_p9, %p11941_p7 }
 0x197   : > { %p11937_p5 = pneg %p11936_p2 }
 0x199   : > { %p11944_p10 = pnand %p11943_p4, %p11937_p5 }
 0x19b   : > { %11947 = shalt.err (!%p11944_p10)
}
 0x19c   : > { %s14997_s16 = sld [smem:[#allocation43_spill]]  ;;  %s14998_s0 = sld [smem:[#allocation42_spill]] }
 0x19d   : > { %s14999_s28 = sld [smem:[#allocation41_spill]]  ;;  %s15000_s18 = sld [smem:[#allocation40_spill]] }
 0x19e   : > { %s15001_s20 = sld [smem:[#allocation44_spill]] }
 0x19f   : > { %11102 = dma.hbm_to_vmem [thread:$0]  (!%p12232_p6), %s14996_s3, 16, %s629_s17, [#allocation27]  }
 0x1a2   : > { %s9518_s27 = sadd.s32 4294967294, %s14997_s16   ;;  %s12571_s1 = sadd.s32 1, %s14997_s16  }
 0x1a3   : > { %s45_s24 = ssub.s32 %s14997_s16, %s12571_s1  ;;  %s48_s30 = sadd.s32 1, %s14998_s0 }
 0x1a4   : > { %p46_p8 = scmp.eq.s32.totalorder %s45_s24, 0  ;;  %p55_p1 = scmp.ne.s32.totalorder %s14998_s0, %s14999_s28 }
 0x1a5   : > { %p56_p3 = scmp.eq.s32.totalorder %s14997_s16, 0  ;;  %p61_p11 = scmp.ne.s32.totalorder %s14999_s28, %s15000_s18 }
 0x1a6   : > { %s12582_s19 = scalar_select %p46_p8, %s14998_s0, %s48_s30  }
 0x1a7   : > { %p12584_p12 = por %p56_p3, %p55_p1  ;;  %p15003_p13 = scmp.eq.s32.totalorder %s15001_s20, 0 }
 0x1a8   : > { %p421_p0 = scmp.eq.s32.totalorder %s15001_s20, 1  ;;  %p427_p2 = scmp.eq.s32.totalorder %s9518_s27, 1 }
 0x1a9   : > { %p12590_p6 = por %p15003_p13, %p61_p11  ;;  %p11127_p5 = scmp.lt.s32.totalorder %s14997_s16, 2 }
 0x1aa   : > { %s639_s22 = sand.u32 1, %s14998_s0   ;;  %p12597_p7 = por %p421_p0, %p55_p1 }
 0x1ab   : > { %p12601_p9 = por %p427_p2, %p61_p11  ;;  %s9537_s29 = sshll.u32 %s639_s22, 8 }
 0x1ac   : > { %s15005_s21 = scalar_select %p12597_p7, 1, 0 }
 0x1ad   : > { %s15006_s25 = scalar_select %p12601_p9, 1, 0 }
 0x1ae   : > { %s10020_s28 = sshll.u32 %s14997_s16, 12  ;;  %s15007_s30 = sld [smem:[#allocation61_spill]] }
 0x1af   : > { %s643_s0 = scalar_lea.vmem [#allocation2], %s9537_s29  ;;  %p12615_p4 = pnand %p11127_p5, %p12584_p12 }
 0x1b0   : > { %s650_s20 = sshll.u32 %s643_s0, 4  ;;  %s12619_s16 = scalar_lea.sflag [#allocation3], %s639_s22  ;;  %s12611_s20 = int_to_ptr.vmem [resolvable:$true] %s650_s20 }
 0x1b1   : > { %p11950_p8 = pneg %p12615_p4 }
 0x1b4   : > { %s12609_s2 = scalar_lea.hbm %s15007_s30, %s10020_s28  ;;  %s11953_s5 = scalar_lea.hbm %s15007_s30, 8192 }
 0x1b5   : > { %s11948_s18 = scalar_lea.hbm %s12609_s2, 4096  ;;  %p11954_p11 = scmp.lt.u32.totalorder %s12609_s2, %s15007_s30 }
 0x1b6   : > { %p11949_p10 = scmp.ne.s32.totalorder %s12609_s2, %s11948_s18  ;;  %p11955_p12 = scmp.lt.u32.totalorder %s11953_s5, %s11948_s18 }
 0x1b7   : > { %p11957_p0 = scmp.lt.u32.totalorder %s11948_s18, %s12609_s2 }
 0x1b8   : > { %p11951_p1 = pnand %p11950_p8, %p11949_p10  ;;  %p11956_p13 = por %p11955_p12, %p11954_p11 }
 0x1ba   : > { %p11952_p3 = pneg %p11951_p1  ;;  %p11958_p2 = por %p11957_p0, %p11956_p13 }
 0x1bc   : > { %p11959_p5 = pnand %p11958_p2, %p11952_p3 }
 0x1be   : > { %11962 = shalt.err (!%p11959_p5)
}
 0x1bf   : > { %s11963_s22 = scalar_lea.vmem %s12611_s20, 4096  ;;  %s12100_s29 = smov [#allocation2]  }
 0x1c0   : > { %p11964_p10 = scmp.ne.s32.totalorder %s12611_s20, %s11963_s22  ;;  %s11968_s28 = sshll.u32 %s12100_s29, 4  ;;  %s11969_s28 = int_to_ptr.vmem [resolvable:$false] %s11968_s28 }
 0x1c1   : > { %s11970_s24 = scalar_lea.vmem %s11969_s28, 8192  ;;  %p11971_p7 = scmp.lt.s32.totalorder %s12611_s20, %s11969_s28 }
 0x1c2   : > { %p11966_p1 = pnand %p11964_p10, %p11950_p8  ;;  %p11972_p11 = scmp.lt.s32.totalorder %s11970_s24, %s11963_s22 }
 0x1c4   : > { %p11967_p9 = pneg %p11966_p1  ;;  %p11973_p12 = por %p11972_p11, %p11971_p7 }
 0x1c6   : > { %p11974_p13 = pnand %p11973_p12, %p11967_p9 }
 0x1c8   : > { %11977 = shalt.err (!%p11974_p13)
}
 0x1c9   : > { %11106 = dma.hbm_to_vmem [thread:$0]  (!%p12615_p4), %s12609_s2, 4096, %s12611_s20, %s12619_s16, %s14990_s26, %s14990_s26, %s14989_s23  }
 0x1ca   : > { %s15009_s18 = sld [smem:[#allocation45_spill]] }
 0x1d0   : > { %p15010_p8 = scmp.ne.s32.totalorder %s15009_s18, 0 }
 0x1d2   : > { %662 = sbr.rel (%p15010_p8) target bundleno = 3026 (0xbd2), region = 88 }
 0x1d9   : > { %s15011_s5 = sld [smem:[#allocation41_spill]] }
 0x1df   : > { %s12653_s0 = sand.u32 1, %s15011_s5  }
 0x1e0   : > { %s9541_s22 = sshll.u32 %s12653_s0, 8  ;;  %s665_s29 = scalar_lea.sflag [#allocation3], %s12653_s0 }
 0x1e1   : > { %s12659_s27 = scalar_lea.vmem [#allocation2], %s9541_s22 }
 0x1e2   : > { %12023 = dma.done.wait (%p12590_p6), %s665_s29, 4096  }
 0x1e3   : > { %12025 = vsyncadd (%p12590_p6), %s665_s29, 4294963200  ;;  %s15012_s2 = sld [smem:[#allocation44_spill]] }
 0x1e9   : > { %p15013_p7 = scmp.eq.s32.totalorder %s15012_s2, 0 }
 0x1eb   : > { %12027 = dma.done.wait (%p15013_p7), [#allocation6], 8320   ;;  %p15014_p9 = pmov %p15013_p7 }
 0x1ec   : > { %p15015_p4 = pmov %p15013_p7 }
 0x1ed   : > { %12029 = vsyncadd (%p15014_p9), [#allocation6], 4294958976 }
 0x1ee   : > { %12031 = dma.done.wait (%p15015_p4), [#allocation9], 16416   ;;  %p15016_p3 = pmov %p15015_p4 }
 0x1f0   : > { %12033 = vsyncadd (%p15016_p3), [#allocation9], 4294950880  ;;  %p15017_p0 = pmov %p15016_p3 }
 0x1f2   : > { %12035 = dma.done.wait (%p15017_p0), [#allocation12], 2064   ;;  %p15018_p2 = pmov %p15017_p0 }
 0x1f3   : > { %p15019_p6 = pmov %p15017_p0 }
 0x1f4   : > { %12037 = vsyncadd (%p15018_p2), [#allocation12], 4294965232 }
 0x1f5   : > { %12039 = dma.done.wait (%p15019_p6), [#allocation15], 528   ;;  %p15020_p5 = pmov %p15017_p0 }
 0x1f6   : > { %p15021_p10 = pmov %p15017_p0 }
 0x1f7   : > { %12041 = vsyncadd (%p15020_p5), [#allocation15], 4294966768 }
 0x1f8   : > { %12043 = dma.done.wait (%p15021_p10), [#allocation18], 1040   ;;  %p15022_p1 = pmov %p15017_p0 }
 0x1f9   : > { %p15023_p11 = pmov %p15017_p0 }
 0x1fa   : > { %12045 = vsyncadd (%p15022_p1), [#allocation18], 4294966256 }
 0x1fb   : > { %12047 = dma.done.wait (%p15023_p11), [#allocation21], 1056   ;;  %p15024_p12 = pmov %p15017_p0 }
 0x1fc   : > { %p15025_p13 = pmov %p15017_p0 }
 0x1fd   : > { %12049 = vsyncadd (%p15024_p12), [#allocation21], 4294966240 }
 0x1fe   : > { %12051 = dma.done.wait (%p15025_p13), [#allocation24], 16512   ;;  %p15026_p8 = pmov %p15017_p0 }
 0x1ff   : > { %p15027_p7 = pmov %p15017_p0 }
 0x200   : > { %12053 = vsyncadd (%p15026_p8), [#allocation24], 4294950784 }
 0x201   : > { %12055 = dma.done.wait (%p15027_p7), [#allocation27], 8208   ;;  %p15028_p9 = pmov %p15017_p0 }
 0x202   : > { %v14965_v0 = vmov 0   ;;  %v834_v1 = vld [vmem:[#allocation5] sm:$0xff]  ;;  %v836_v32 = vld [vmem:[#allocation5 + $0x10] sm:$0xff]  ;;  %v835_v35 = vld [vmem:[#allocation5 + $0x8] sm:$0xff]  ;;  %vm4799_vm0 = vcmask 523264   ;;  %s14802_s23 = scalar_lea.vmem [#allocation29], %s9541_s22 }
 0x203   : > { %12057 = vsyncadd (%p15028_p9), [#allocation27], 4294959088  ;;  %1292 = vmatprep.mubr.bf16.mxu0 %v14965_v0  ;;  %1372 = vmatprep.mubr.bf16.mxu1 %v14965_v0  ;;  %v838_v2 = vld [vmem:[#allocation5 + $0x20] sm:$0xff]  ;;  %v840_v33 = vld [vmem:[#allocation5 + $0x30] sm:$0xff]  ;;  %s10021_s26 = sshll.u32 %s15012_s2, 12  ;;  %s9293_s17 = sshll.u32 %s14802_s23, 4  ;;  %s14871_s17 = int_to_ptr.vmem [resolvable:$true] %s9293_s17 }
 0x204   : > { %v842_v3 = vld [vmem:[#allocation5 + $0x40] sm:$0xff]  ;;  %v9560_v4 = vcombine.high %v834_v1, %v838_v2  ;;  %v9559_v5 = vcombine.low %v834_v1, %v838_v2  ;;  %v839_v36 = vld [vmem:[#allocation5 + $0x28] sm:$0xff]  ;;  %v9564_v39 = vcombine.high %v836_v32, %v840_v33  ;;  %v844_v40 = vld [vmem:[#allocation5 + $0x50] sm:$0xff]  ;;  %v9563_v47 = vcombine.low %v836_v32, %v840_v33  ;;  %s15065_s28 = sld [smem:[#allocation67_spill]]  ;;  %s9280_s18 = scalar_lea.sflag [#allocation4], %s12653_s0 }
 0x205   : > { %v846_v6 = vld [vmem:[#allocation5 + $0x60] sm:$0xff]  ;;  %v787_v38 = vld [vmem:[%s12659_s27 + $0x8] sm:$0xff]  ;;  %v848_v41 = vld [vmem:[#allocation5 + $0x70] sm:$0xff]  ;;  %v9562_v44 = vcombine.high %v835_v35, %v839_v36  ;;  %v9561_v54 = vcombine.low %v835_v35, %v839_v36  ;;  %s11978_s5 = scalar_lea.vmem %s14871_s17, 4096  ;;  %p15066_p3 = scmp.ne.s32.totalorder %s15005_s21, 0 }
 0x206   : > { %v9568_v7 = vcombine.high %v842_v3, %v846_v6  ;;  %v850_v8 = vld [vmem:[#allocation5 + $0x80] sm:$0xff]  ;;  %1260 = vmatprep.subr.bf16.mxu0 %v9560_v4  ;;  %10714 = vmatprep.subr.bf16.mxu1 %v9560_v4  ;;  %v9567_v10 = vcombine.low %v842_v3, %v846_v6  ;;  %v803_v43 = vld [vmem:[%s12659_s27 + $0x88] sm:$0xff]  ;;  %v9572_v49 = vcombine.high %v844_v40, %v848_v41  ;;  %v788_v51 = vld [vmem:[%s12659_s27 + $0x10] sm:$0xff]  ;;  %p11979_p4 = scmp.ne.s32.totalorder %s14871_s17, %s11978_s5  ;;  %s12102_s22 = smov [#allocation29]  }
 0x207   : > { %v854_v9 = vld [vmem:[#allocation5 + $0xa0] sm:$0xff]  ;;  %1261 = vmatpush1.bf16.msra.mxu0 %v9559_v5  ;;  %10722 = vmatpush1.bf16.msra.mxu1 %v9559_v5  ;;  %v843_v46 = vld [vmem:[#allocation5 + $0x48] sm:$0xff]  ;;  %v852_v52 = vld [vmem:[#allocation5 + $0x90] sm:$0xff]  ;;  %v9571_v58 = vcombine.low %v844_v40, %v848_v41  ;;  %s11982_s29 = sshll.u32 %s12102_s22, 4  ;;  %s11983_s29 = int_to_ptr.vmem [resolvable:$false] %s11982_s29 }
 0x208   : > { %1262 = vmatprep.subr.bf16.mxu0 %v9568_v7  ;;  %v9576_v11 = vcombine.high %v850_v8, %v854_v9  ;;  %v858_v12 = vld [vmem:[#allocation5 + $0xc0] sm:$0xff]  ;;  %10715 = vmatprep.subr.bf16.mxu1 %v9568_v7  ;;  %v9575_v14 = vcombine.low %v850_v8, %v854_v9  ;;  %v847_v48 = vld [vmem:[#allocation5 + $0x68] sm:$0xff]  ;;  %v856_v53 = vld [vmem:[#allocation5 + $0xb0] sm:$0xff]  ;;  %p11980_p0 = pnand %p11979_p4, %p15066_p3  ;;  %p11985_p6 = scmp.lt.s32.totalorder %s14871_s17, %s11983_s29 }
 0x209   : > { %v862_v13 = vld [vmem:[#allocation5 + $0xe0] sm:$0xff]  ;;  %v789_v55 = vld [vmem:[%s12659_s27 + $0x18] sm:$0xff]  ;;  %v9570_v56 = vcombine.high %v843_v46, %v847_v48  ;;  %v851_v57 = vld [vmem:[#allocation5 + $0x88] sm:$0xff]  ;;  %v9580_v63 = vcombine.high %v852_v52, %v856_v53  ;;  %v9569_v2 = vcombine.low %v843_v46, %v847_v48  ;;  %v9579_v7 = vcombine.low %v852_v52, %v856_v53 }
 0x20a   : > { %v9584_v15 = vcombine.high %v858_v12, %v862_v13  ;;  %v866_v16 = vld [vmem:[#allocation5 + $0x100] sm:$0xff]  ;;  %v9583_v18 = vcombine.low %v858_v12, %v862_v13  ;;  %v860_v59 = vld [vmem:[#allocation5 + $0xd0] sm:$0xff]  ;;  %v855_v62 = vld [vmem:[#allocation5 + $0xa8] sm:$0xff]  ;;  %v12715_v5 = vpack.c.bf16 %v789_v55, %v788_v51  ;;  %s14869_s24 = scalar_lea.hbm %s15065_s28, %s10021_s26  ;;  %p11981_p2 = pneg %p11980_p0 }
 0x20b   : > { %1263 = vmatpush1.bf16.msra.mxu0 %v9567_v10  ;;  %10723 = vmatpush1.bf16.msra.mxu1 %v9567_v10  ;;  %v870_v17 = vld [vmem:[#allocation5 + $0x120] sm:$0xff]  ;;  %v864_v60 = vld [vmem:[#allocation5 + $0xf0] sm:$0xff]  ;;  %v805_v1 = vld [vmem:[%s12659_s27 + $0x98] sm:$0xff]  ;;  %v9578_v6 = vcombine.high %v851_v57, %v855_v62 }
 0x20c   : > { %1264 = vmatprep.subr.bf16.mxu0 %v9576_v11  ;;  %10716 = vmatprep.subr.bf16.mxu1 %v9576_v11  ;;  %v9592_v19 = vcombine.high %v866_v16, %v870_v17  ;;  %v874_v20 = vld [vmem:[#allocation5 + $0x140] sm:$0xff]  ;;  %v9591_v22 = vcombine.low %v866_v16, %v870_v17  ;;  %v804_v61 = vld [vmem:[%s12659_s27 + $0x90] sm:$0xff]  ;;  %v859_v3 = vld [vmem:[#allocation5 + $0xc8] sm:$0xff]  ;;  %v9588_v10 = vcombine.high %v860_v59, %v864_v60 }
 0x20d   : > { %v878_v21 = vld [vmem:[#allocation5 + $0x160] sm:$0xff]  ;;  %v863_v4 = vld [vmem:[#allocation5 + $0xe8] sm:$0xff]  ;;  %v868_v8 = vld [vmem:[#allocation5 + $0x110] sm:$0xff]  ;;  %v12717_v11 = vpack.c.bf16 %v805_v1, %v804_v61 }
 0x20e   : > { %v9600_v23 = vcombine.high %v874_v20, %v878_v21  ;;  %v882_v24 = vld [vmem:[#allocation5 + $0x180] sm:$0xff]  ;;  %v9599_v26 = vcombine.low %v874_v20, %v878_v21  ;;  %v872_v9 = vld [vmem:[#allocation5 + $0x130] sm:$0xff]  ;;  %v791_v13 = vld [vmem:[%s12659_s27 + $0x28] sm:$0xff] }
 0x20f   : > { %1265 = vmatpush1.bf16.msra.mxu0 %v9575_v14  ;;  %10724 = vmatpush1.bf16.msra.mxu1 %v9575_v14  ;;  %v886_v25 = vld [vmem:[#allocation5 + $0x1a0] sm:$0xff]  ;;  %v9577_v14 = vcombine.low %v851_v57, %v855_v62  ;;  %v867_v16 = vld [vmem:[#allocation5 + $0x108] sm:$0xff]  ;;  %v880_v20 = vld [vmem:[#allocation5 + $0x170] sm:$0xff] }
 0x210   : > { %1266 = vmatprep.subr.bf16.mxu0 %v9584_v15  ;;  %10717 = vmatprep.subr.bf16.mxu1 %v9584_v15  ;;  %v9608_v27 = vcombine.high %v882_v24, %v886_v25  ;;  %v890_v28 = vld [vmem:[#allocation5 + $0x1c0] sm:$0xff]  ;;  %v9607_v30 = vcombine.low %v882_v24, %v886_v25  ;;  %v9586_v15 = vcombine.high %v859_v3, %v863_v4  ;;  %v871_v17 = vld [vmem:[#allocation5 + $0x128] sm:$0xff]  ;;  %v793_v35 = vld [vmem:[%s12659_s27 + $0x38] sm:$0xff] }
 0x211   : > { %v894_v29 = vld [vmem:[#allocation5 + $0x1e0] sm:$0xff]  ;;  %v9585_v24 = vcombine.low %v859_v3, %v863_v4  ;;  %v875_v25 = vld [vmem:[#allocation5 + $0x148] sm:$0xff]  ;;  %v9593_v36 = vcombine.low %v867_v16, %v871_v17  ;;  %v808_v41 = vld [vmem:[%s12659_s27 + $0xb0] sm:$0xff] }
 0x212   : > { %v9616_v31 = vcombine.high %v890_v28, %v894_v29  ;;  %v786_v34 = vld [vmem:[%s12659_s27] sm:$0xff]  ;;  %v9615_v37 = vcombine.low %v890_v28, %v894_v29  ;;  %v9594_v28 = vcombine.high %v867_v16, %v871_v17  ;;  %v9595_v29 = vcombine.low %v868_v8, %v872_v9  ;;  %v891_v48 = vld [vmem:[#allocation5 + $0x1c8] sm:$0xff]  ;;  %v796_v4 = vld [vmem:[%s12659_s27 + $0x50] sm:$0xff] }
 0x213   : > { %1267 = vmatpush1.bf16.msra.mxu0 %v9583_v18  ;;  %10725 = vmatpush1.bf16.msra.mxu1 %v9583_v18  ;;  %v802_v42 = vld [vmem:[%s12659_s27 + $0x80] sm:$0xff]  ;;  %v12703_v45 = vpack.c.bf16 %v787_v38, %v786_v34  ;;  %v9587_v18 = vcombine.low %v860_v59, %v864_v60  ;;  %v792_v34 = vld [vmem:[%s12659_s27 + $0x30] sm:$0xff]  ;;  %v883_v38 = vld [vmem:[#allocation5 + $0x188] sm:$0xff] }
 0x214   : > { %1268 = vmatprep.subr.bf16.mxu0 %v9592_v19  ;;  %10718 = vmatprep.subr.bf16.mxu1 %v9592_v19  ;;  %v12705_v50 = vpack.c.bf16 %v803_v43, %v802_v42  ;;  %v790_v12 = vld [vmem:[%s12659_s27 + $0x20] sm:$0xff]  ;;  %v876_v19 = vld [vmem:[#allocation5 + $0x150] sm:$0xff]  ;;  %v809_v42 = vld [vmem:[%s12659_s27 + $0xb8] sm:$0xff]  ;;  %v12739_v51 = vpack.c.bf16 %v793_v35, %v792_v34 }
 0x215   : > { %v806_v21 = vld [vmem:[%s12659_s27 + $0xa0] sm:$0xff]  ;;  %v9604_v32 = vcombine.high %v876_v19, %v880_v20  ;;  %v9603_v40 = vcombine.low %v876_v19, %v880_v20  ;;  %v892_v43 = vld [vmem:[#allocation5 + $0x1d0] sm:$0xff]  ;;  %v801_v19 = vld [vmem:[%s12659_s27 + $0x78] sm:$0xff] }
 0x216   : > { %v11204_v59 = vld [vmem:[#allocation8 + $0x4] ss:$8 sps:$4 sm:$0xff]   ;;  %v810_v62 = vld [vmem:[%s12659_s27 + $0xc0] sm:$0xff]  ;;  %v11214_v34 = vld [vmem:[#allocation8 + $0x40] ss:$8 sps:$4 sm:$0xff]  }
 0x217   : > { %1269 = vmatpush1.bf16.msra.mxu0 %v9591_v22  ;;  %10726 = vmatpush1.bf16.msra.mxu1 %v9591_v22  ;;  %v807_v22 = vld [vmem:[%s12659_s27 + $0xa8] sm:$0xff]  ;;  %v816_v20 = vld [vmem:[%s12659_s27 + $0xf0] sm:$0xff]  ;;  %v11219_v35 = vld [vmem:[#allocation8 + $0x54] ss:$8 sps:$4 sm:$0xff]  }
 0x218   : > { %1270 = vmatprep.subr.bf16.mxu0 %v9600_v23  ;;  %10719 = vmatprep.subr.bf16.mxu1 %v9600_v23  ;;  %v9596_v23 = vcombine.high %v868_v8, %v872_v9  ;;  %v12729_v33 = vpack.c.bf16 %v807_v22, %v806_v21  ;;  %v813_v8 = vld [vmem:[%s12659_s27 + $0xd8] sm:$0xff] }
 0x219   : > { %v817_v21 = vld [vmem:[%s12659_s27 + $0xf8] sm:$0xff] }
 0x21b   : > { %1271 = vmatpush1.bf16.msra.mxu0 %v9599_v26  ;;  %10727 = vmatpush1.bf16.msra.mxu1 %v9599_v26  ;;  %v879_v26 = vld [vmem:[#allocation5 + $0x168] sm:$0xff] }
 0x21c   : > { %1272 = vmatprep.subr.bf16.mxu0 %v9608_v27  ;;  %10720 = vmatprep.subr.bf16.mxu1 %v9608_v27  ;;  %v12727_v27 = vpack.c.bf16 %v791_v13, %v790_v12  ;;  %v798_v12 = vld [vmem:[%s12659_s27 + $0x60] sm:$0xff]  ;;  %v799_v13 = vld [vmem:[%s12659_s27 + $0x68] sm:$0xff] }
 0x21d   : > { %v12775_v16 = vpack.c.bf16 %v799_v13, %v798_v12  ;;  %v853_v13 = vld [vmem:[#allocation5 + $0x98] sm:$0xff] }
 0x21f   : > { %1273 = vmatpush1.bf16.msra.mxu0 %v9607_v30  ;;  %10728 = vmatpush1.bf16.msra.mxu1 %v9607_v30  ;;  %v884_v30 = vld [vmem:[#allocation5 + $0x190] sm:$0xff] }
 0x220   : > { %1274 = vmatprep.subr.bf16.mxu0 %v9616_v31  ;;  %10721 = vmatprep.subr.bf16.mxu1 %v9616_v31  ;;  %v888_v31 = vld [vmem:[#allocation5 + $0x1b0] sm:$0xff] }
 0x221   : > { %v9612_v46 = vcombine.high %v884_v30, %v888_v31  ;;  %v9611_v53 = vcombine.low %v884_v30, %v888_v31  ;;  %v11213_v30 = vld [vmem:[#allocation8 + $0x34] ss:$8 sps:$4 sm:$0xff]   ;;  %v11211_v31 = vld [vmem:[#allocation8 + $0x30] ss:$8 sps:$4 sm:$0xff]  }
 0x223   : > { %1275 = vmatpush1.bf16.msra.mxu0 %v9615_v37  ;;  %10729 = vmatpush1.bf16.msra.mxu1 %v9615_v37  ;;  %v9602_v37 = vcombine.high %v875_v25, %v879_v26 }
 0x224   : > { %1646 = vmatprep.subr.bf16.mxu0 %v9564_v39  ;;  %1453 = vmatprep.subr.bf16.mxu1 %v9562_v44  ;;  %v887_v39 = vld [vmem:[#allocation5 + $0x1a8] sm:$0xff]  ;;  %v896_v44 = vld [vmem:[#allocation5 + $0x1f0] sm:$0xff] }
 0x225   : > { %v9610_v52 = vcombine.high %v883_v38, %v887_v39  ;;  %v9620_v55 = vcombine.high %v892_v43, %v896_v44  ;;  %v9609_v57 = vcombine.low %v883_v38, %v887_v39  ;;  %v9619_v61 = vcombine.low %v892_v43, %v896_v44  ;;  %v11220_v38 = vld [vmem:[#allocation8 + $0x60] ss:$8 sps:$4 sm:$0xff]   ;;  %v11225_v39 = vld [vmem:[#allocation8 + $0x74] ss:$8 sps:$4 sm:$0xff]   ;;  %v11229_v44 = vld [vmem:[#allocation8 + $0x90] ss:$8 sps:$4 sm:$0xff]  }
 0x226   : > { %1293 = vmatmul.mubr.bf16.vlgmr.msra.gmra.mrb[0].mxu0 %v12703_v45  ;;  %1373 = vmatmul.mubr.bf16.vlgmr.msra.gmra.mrb[0].mxu1 %v12705_v50  ;;  %v11231_v43 = vld [vmem:[#allocation8 + $0x94] ss:$8 sps:$4 sm:$0xff]  }
 0x227   : > { %1302 = vmatprep.mubr.bf16.mxu0 %v14965_v0  ;;  %1647 = vmatpush1.bf16.msra.mxu0 %v9563_v47  ;;  %v9601_v47 = vcombine.low %v875_v25, %v879_v26  ;;  %v11207_v25 = vld [vmem:[#allocation8 + $0x14] ss:$8 sps:$4 sm:$0xff]   ;;  %v11205_v26 = vld [vmem:[#allocation8 + $0x10] ss:$8 sps:$4 sm:$0xff]  }
 0x228   : > { %1648 = vmatprep.subr.bf16.mxu0 %v9572_v49  ;;  %1454 = vmatpush1.bf16.msra.mxu1 %v9561_v54  ;;  %v895_v49 = vld [vmem:[#allocation5 + $0x1e8] sm:$0xff]  ;;  %v12741_v54 = vpack.c.bf16 %v809_v42, %v808_v41 }
 0x229   : > { %1382 = vmatprep.mubr.bf16.mxu1 %v14965_v0  ;;  %1455 = vmatprep.subr.bf16.mxu1 %v9570_v56  ;;  %v794_v56 = vld [vmem:[%s12659_s27 + $0x40] sm:$0xff]  ;;  %v9618_v60 = vcombine.high %v891_v48, %v895_v49  ;;  %v9617_v1 = vcombine.low %v891_v48, %v895_v49  ;;  %v11228_v41 = vld [vmem:[#allocation8 + $0x84] ss:$8 sps:$4 sm:$0xff]   ;;  %v11226_v42 = vld [vmem:[#allocation8 + $0x80] ss:$8 sps:$4 sm:$0xff]  }
 0x22a   : > { %v11237_v48 = vld [vmem:[#allocation8 + $0xb4] ss:$8 sps:$4 sm:$0xff]   ;;  %v11235_v49 = vld [vmem:[#allocation8 + $0xb0] ss:$8 sps:$4 sm:$0xff]  }
 0x22b   : > { %1649 = vmatpush1.bf16.msra.mxu0 %v9571_v58  ;;  %v795_v58 = vld [vmem:[%s12659_s27 + $0x48] sm:$0xff] }
 0x22c   : > { %1650 = vmatprep.subr.bf16.mxu0 %v9580_v63  ;;  %1456 = vmatpush1.bf16.msra.mxu1 %v9569_v2  ;;  %v811_v63 = vld [vmem:[%s12659_s27 + $0xc8] sm:$0xff]  ;;  %v12751_v2 = vpack.c.bf16 %v795_v58, %v794_v56  ;;  %v11241_v56 = vld [vmem:[#allocation8 + $0xd0] ss:$8 sps:$4 sm:$0xff]  }
 0x22d   : > { %1457 = vmatprep.subr.bf16.mxu1 %v9578_v6  ;;  %v12753_v3 = vpack.c.bf16 %v811_v63, %v810_v62  ;;  %v797_v6 = vld [vmem:[%s12659_s27 + $0x58] sm:$0xff]  ;;  %v11244_v58 = vld [vmem:[#allocation8 + $0xe0] ss:$8 sps:$4 sm:$0xff]  }
 0x22e   : > { %1303 = vmatmul.mubr.bf16.gmra.mrb[4].mxu0 %v12715_v5  ;;  %1383 = vmatmul.mubr.bf16.gmra.mrb[4].mxu1 %v12717_v11  ;;  %v12763_v9 = vpack.c.bf16 %v797_v6, %v796_v4  ;;  %v837_v62 = vld [vmem:[#allocation5 + $0x18] sm:$0xff] }
 0x22f   : > { %1312 = vmatprep.mubr.bf16.mxu0 %v14965_v0  ;;  %1651 = vmatpush1.bf16.msra.mxu0 %v9579_v7  ;;  %v812_v7 = vld [vmem:[%s12659_s27 + $0xd0] sm:$0xff]  ;;  %v841_v63 = vld [vmem:[#allocation5 + $0x38] sm:$0xff] }
 0x230   : > { %1652 = vmatprep.subr.bf16.mxu0 %v9588_v10  ;;  %1392 = vmatprep.mubr.bf16.mxu1 %v14965_v0  ;;  %v12765_v10 = vpack.c.bf16 %v813_v8, %v812_v7  ;;  %v9566_v4 = vcombine.high %v837_v62, %v841_v63  ;;  %v845_v6 = vld [vmem:[#allocation5 + $0x58] sm:$0xff] }
 0x231   : > { %1458 = vmatpush1.bf16.msra.mxu1 %v9577_v14  ;;  %v814_v14 = vld [vmem:[%s12659_s27 + $0xe0] sm:$0xff]  ;;  %v849_v7 = vld [vmem:[#allocation5 + $0x78] sm:$0xff] }
 0x232   : > { %1459 = vmatprep.subr.bf16.mxu1 %v9586_v15  ;;  %v815_v15 = vld [vmem:[%s12659_s27 + $0xe8] sm:$0xff]  ;;  %v9573_v8 = vcombine.low %v845_v6, %v849_v7  ;;  %v9574_v12 = vcombine.high %v845_v6, %v849_v7 }
 0x233   : > { %1653 = vmatpush1.bf16.msra.mxu0 %v9587_v18  ;;  %v12777_v17 = vpack.c.bf16 %v815_v15, %v814_v14  ;;  %v800_v18 = vld [vmem:[%s12659_s27 + $0x70] sm:$0xff]  ;;  %v857_v14 = vld [vmem:[#allocation5 + $0xb8] sm:$0xff]  ;;  %s11984_s27 = scalar_lea.vmem %s11983_s29, 8192 }
 0x234   : > { %1654 = vmatprep.subr.bf16.mxu0 %v9596_v23  ;;  %v12787_v22 = vpack.c.bf16 %v801_v19, %v800_v18  ;;  %v12789_v23 = vpack.c.bf16 %v817_v21, %v816_v20  ;;  %v9581_v15 = vcombine.low %v853_v13, %v857_v14  ;;  %v9582_v18 = vcombine.high %v853_v13, %v857_v14  ;;  %v861_v19 = vld [vmem:[#allocation5 + $0xd8] sm:$0xff]  ;;  %p11986_p5 = scmp.lt.s32.totalorder %s11984_s27, %s11978_s5 }
 0x235   : > { %1460 = vmatpush1.bf16.msra.mxu1 %v9585_v24  ;;  %v11202_v24 = vld [vmem:[#allocation8] ss:$8 sps:$4 sm:$0xff]   ;;  %v865_v20 = vld [vmem:[#allocation5 + $0xf8] sm:$0xff] }
 0x236   : > { %1313 = vmatmul.mubr.bf16.gmra.mrb[8].mxu0 %v12727_v27  ;;  %1461 = vmatprep.subr.bf16.mxu1 %v9594_v28  ;;  %v11210_v28 = vld [vmem:[#allocation8 + $0x24] ss:$8 sps:$4 sm:$0xff]   ;;  %v9589_v21 = vcombine.low %v861_v19, %v865_v20  ;;  %v885_v13 = vld [vmem:[#allocation5 + $0x198] sm:$0xff]  ;;  %p11987_p10 = por %p11986_p5, %p11985_p6 }
 0x237   : > { %1322 = vmatprep.mubr.bf16.mxu0 %v14965_v0  ;;  %1655 = vmatpush1.bf16.msra.mxu0 %v9595_v29  ;;  %v11208_v29 = vld [vmem:[#allocation8 + $0x20] ss:$8 sps:$4 sm:$0xff]   ;;  %v889_v14 = vld [vmem:[#allocation5 + $0x1b8] sm:$0xff] }
 0x238   : > { %1656 = vmatprep.subr.bf16.mxu0 %v9604_v32  ;;  %1393 = vmatmul.mubr.bf16.gmra.mrb[8].mxu1 %v12729_v33  ;;  %v11216_v32 = vld [vmem:[#allocation8 + $0x44] ss:$8 sps:$4 sm:$0xff]   ;;  %p11988_p1 = pnand %p11987_p10, %p11981_p2 }
 0x239   : > { %1402 = vmatprep.mubr.bf16.mxu1 %v14965_v0  ;;  %1462 = vmatpush1.bf16.msra.mxu1 %v9593_v36  ;;  %v11217_v36 = vld [vmem:[#allocation8 + $0x50] ss:$8 sps:$4 sm:$0xff]  }
 0x23a   : > { %1463 = vmatprep.subr.bf16.mxu1 %v9602_v37  ;;  %v11222_v37 = vld [vmem:[#allocation8 + $0x64] ss:$8 sps:$4 sm:$0xff]  }
 0x23b   : > { %1657 = vmatpush1.bf16.msra.mxu0 %v9603_v40  ;;  %v11223_v40 = vld [vmem:[#allocation8 + $0x70] ss:$8 sps:$4 sm:$0xff]  }
 0x23c   : > { %1658 = vmatprep.subr.bf16.mxu0 %v9612_v46  ;;  %v11234_v46 = vld [vmem:[#allocation8 + $0xa4] ss:$8 sps:$4 sm:$0xff]  }
 0x23d   : > { %1464 = vmatpush1.bf16.msra.mxu1 %v9601_v47  ;;  %v11232_v47 = vld [vmem:[#allocation8 + $0xa0] ss:$8 sps:$4 sm:$0xff]  }
 0x23e   : > { %1323 = vmatmul.mubr.bf16.gmra.mrb[12].mxu0 %v12739_v51  ;;  %1465 = vmatprep.subr.bf16.mxu1 %v9610_v52  ;;  %v11240_v52 = vld [vmem:[#allocation8 + $0xc4] ss:$8 sps:$4 sm:$0xff]  }
 0x23f   : > { %1332 = vmatprep.mubr.bf16.mxu0 %v14965_v0  ;;  %1659 = vmatpush1.bf16.msra.mxu0 %v9611_v53  ;;  %v11238_v53 = vld [vmem:[#allocation8 + $0xc0] ss:$8 sps:$4 sm:$0xff]  }
 0x240   : > { %1403 = vmatmul.mubr.bf16.gmra.mrb[12].mxu1 %v12741_v54  ;;  %1660 = vmatprep.subr.bf16.mxu0 %v9620_v55  ;;  %v11243_v55 = vld [vmem:[#allocation8 + $0xd4] ss:$8 sps:$4 sm:$0xff]  }
 0x241   : > { %1412 = vmatprep.mubr.bf16.mxu1 %v14965_v0  ;;  %1466 = vmatpush1.bf16.msra.mxu1 %v9609_v57  ;;  %v11246_v57 = vld [vmem:[#allocation8 + $0xe4] ss:$8 sps:$4 sm:$0xff]  }
 0x242   : > { %1467 = vmatprep.subr.bf16.mxu1 %v9618_v60  ;;  %v11247_v60 = vld [vmem:[#allocation8 + $0xf0] ss:$8 sps:$4 sm:$0xff]  }
 0x243   : > { %1661 = vmatpush1.bf16.msra.mxu0 %v9619_v61  ;;  %v11252_v61 = vld [vmem:[#allocation8 + $0x104] ss:$8 sps:$4 sm:$0xff]  }
 0x244   : > { %3452 = vmatprep.subr.bf16.mxu0 %v11204_v59  ;;  %v11249_v59 = vld [vmem:[#allocation8 + $0xf4] ss:$8 sps:$4 sm:$0xff]  }
 0x245   : > { %1468 = vmatpush1.bf16.msra.mxu1 %v9617_v1  ;;  %v9565_v1 = vcombine.low %v837_v62, %v841_v63 }
 0x246   : > { %1333 = vmatmul.mubr.bf16.gmra.mrb[16].mxu0 %v12751_v2  ;;  %1839 = vmatprep.subr.bf16.mxu1 %v9566_v4 }
 0x247   : > { %1342 = vmatprep.mubr.bf16.mxu0 %v14965_v0 }
 0x248   : > { %1413 = vmatmul.mubr.bf16.gmra.mrb[16].mxu1 %v12753_v3 }
 0x249   : > { %1422 = vmatprep.mubr.bf16.mxu1 %v14965_v0 }
 0x24e   : > { %1343 = vmatmul.mubr.bf16.gmra.mrb[20].mxu0 %v12763_v9 }
 0x24f   : > { %1352 = vmatprep.mubr.bf16.mxu0 %v14965_v0 }
 0x250   : > { %1423 = vmatmul.mubr.bf16.gmra.mrb[20].mxu1 %v12765_v10 }
 0x251   : > { %1432 = vmatprep.mubr.bf16.mxu1 %v14965_v0 }
 0x256   : > { %1353 = vmatmul.mubr.bf16.gmra.mrb[24].mxu0 %v12775_v16 }
 0x257   : > { %1362 = vmatprep.mubr.bf16.mxu0 %v14965_v0 }
 0x258   : > { %1433 = vmatmul.mubr.bf16.gmra.mrb[24].mxu1 %v12777_v17 }
 0x259   : > { %1442 = vmatprep.mubr.bf16.mxu1 %v14965_v0 }
 0x25e   : > { %1363 = vmatmul.mubr.bf16.gmra.mrb[28].mxu0 %v12787_v22 }
 0x25f   : > { %1678 = vmatprep.mubr.bf16.mxu0 %v14965_v0 }
 0x260   : > { %1443 = vmatmul.mubr.bf16.gmra.mrb[28].mxu1 %v12789_v23 }
 0x261   : > { %1485 = vmatprep.mubr.bf16.mxu1 %v14965_v0 }
 0x266   : > { %1679 = vmatmul.mubr.bf16.vlgmr.msra.gmra.mrb[32].mxu0 %v12703_v45 }
 0x267   : > { %3453 = vmatpush1.bf16.msra.mxu0 %v11202_v24  ;;  %1688 = vmatprep.mubr.bf16.mxu0 %v14965_v0  ;;  %v9590_v24 = vcombine.high %v861_v19, %v865_v20  ;;  %v9613_v20 = vcombine.low %v885_v13, %v889_v14 }
 0x268   : > { %3454 = vmatprep.subr.bf16.mxu0 %v11207_v25  ;;  %1486 = vmatmul.mubr.bf16.vlgmr.msra.gmra.mrb[32].mxu1 %v12703_v45  ;;  %v869_v25 = vld [vmem:[#allocation5 + $0x118] sm:$0xff] }
 0x269   : > { %1495 = vmatprep.mubr.bf16.mxu1 %v14965_v0  ;;  %1840 = vmatpush1.bf16.msra.mxu1 %v9565_v1 }
 0x26a   : > { %1841 = vmatprep.subr.bf16.mxu1 %v9574_v12 }
 0x26b   : > { %3455 = vmatpush1.bf16.msra.mxu0 %v11205_v26  ;;  %v873_v26 = vld [vmem:[#allocation5 + $0x138] sm:$0xff] }
 0x26c   : > { %3456 = vmatprep.subr.bf16.mxu0 %v11210_v28  ;;  %v9597_v28 = vcombine.low %v869_v25, %v873_v26 }
 0x26d   : > { %1842 = vmatpush1.bf16.msra.mxu1 %v9573_v8 }
 0x26e   : > { %1689 = vmatmul.mubr.bf16.gmra.mrb[36].mxu0 %v12715_v5  ;;  %1843 = vmatprep.subr.bf16.mxu1 %v9582_v18 }
 0x26f   : > { %1698 = vmatprep.mubr.bf16.mxu0 %v14965_v0  ;;  %3457 = vmatpush1.bf16.msra.mxu0 %v11208_v29  ;;  %v9598_v29 = vcombine.high %v869_v25, %v873_v26 }
 0x270   : > { %3458 = vmatprep.subr.bf16.mxu0 %v11213_v30  ;;  %1496 = vmatmul.mubr.bf16.gmra.mrb[36].mxu1 %v12715_v5  ;;  %v900_v30 = vlaneseq }
 0x271   : > { %1505 = vmatprep.mubr.bf16.mxu1 %v14965_v0  ;;  %1844 = vmatpush1.bf16.msra.mxu1 %v9581_v15 }
 0x272   : > { %1845 = vmatprep.subr.bf16.mxu1 %v9590_v24 }
 0x273   : > { %3459 = vmatpush1.bf16.msra.mxu0 %v11211_v31  ;;  %v12858_v31 = vshrl.u32 %v900_v30, 7 }
 0x274   : > { %3460 = vmatprep.subr.bf16.mxu0 %v11216_v32  ;;  %v877_v32 = vld [vmem:[#allocation5 + $0x158] sm:$0xff] }
 0x275   : > { %1846 = vmatpush1.bf16.msra.mxu1 %v9589_v21 }
 0x276   : > { %1699 = vmatmul.mubr.bf16.gmra.mrb[40].mxu0 %v12727_v27  ;;  %1847 = vmatprep.subr.bf16.mxu1 %v9598_v29 }
 0x277   : > { %1708 = vmatprep.mubr.bf16.mxu0 %v14965_v0  ;;  %3461 = vmatpush1.bf16.msra.mxu0 %v11214_v34  ;;  %v881_v34 = vld [vmem:[#allocation5 + $0x178] sm:$0xff] }
 0x278   : > { %3462 = vmatprep.subr.bf16.mxu0 %v11219_v35  ;;  %1506 = vmatmul.mubr.bf16.gmra.mrb[40].mxu1 %v12727_v27  ;;  %v9605_v35 = vcombine.low %v877_v32, %v881_v34 }
 0x279   : > { %1515 = vmatprep.mubr.bf16.mxu1 %v14965_v0  ;;  %1848 = vmatpush1.bf16.msra.mxu1 %v9597_v28  ;;  %v9614_v28 = vcombine.high %v885_v13, %v889_v14 }
 0x27b   : > { %3463 = vmatpush1.bf16.msra.mxu0 %v11217_v36  ;;  %v9606_v36 = vcombine.high %v877_v32, %v881_v34 }
 0x27c   : > { %3464 = vmatprep.subr.bf16.mxu0 %v11222_v37  ;;  %v12861_v37 = vsub.s32 0, %v12858_v31 }
 0x27d   : > { %1849 = vmatprep.subr.bf16.mxu1 %v9606_v36 }
 0x27e   : > { %1709 = vmatmul.mubr.bf16.gmra.mrb[44].mxu0 %v12739_v51  ;;  %15029 = vst [vmem:[#allocation46_spill] sm:$0xff] %v12861_v37  ;;  %1850 = vmatpush1.bf16.msra.mxu1 %v9605_v35 }
 0x27f   : > { %1718 = vmatprep.mubr.bf16.mxu0 %v14965_v0  ;;  %3465 = vmatpush1.bf16.msra.mxu0 %v11220_v38  ;;  %v12863_v38 = vld [vmem:[#allocation7] sm:$0xff] }
 0x280   : > { %1516 = vmatmul.mubr.bf16.gmra.mrb[44].mxu1 %v12739_v51  ;;  %3466 = vmatprep.subr.bf16.mxu0 %v11225_v39  ;;  %v12866_v39 = vsub.s32 1, %v12858_v31 }
 0x281   : > { %1525 = vmatprep.mubr.bf16.mxu1 %v14965_v0  ;;  %1851 = vmatprep.subr.bf16.mxu1 %v9614_v28 }
 0x282   : > { %15030 = vst [vmem:[#allocation47_spill] sm:$0xff] %v12866_v39  ;;  %1852 = vmatpush1.bf16.msra.mxu1 %v9613_v20 }
 0x283   : > { %3467 = vmatpush1.bf16.msra.mxu0 %v11223_v40  ;;  %v12870_v40 = vrot.slane %v12863_v38, %v12861_v37 }
 0x284   : > { %3468 = vmatprep.subr.bf16.mxu0 %v11228_v41  ;;  %v12874_v41 = vrot.slane %v12863_v38, %v12866_v39 }
 0x286   : > { %1719 = vmatmul.mubr.bf16.gmra.mrb[48].mxu0 %v12751_v2 }
 0x287   : > { %1728 = vmatprep.mubr.bf16.mxu0 %v14965_v0  ;;  %3469 = vmatpush1.bf16.msra.mxu0 %v11226_v42 }
 0x288   : > { %1526 = vmatmul.mubr.bf16.gmra.mrb[48].mxu1 %v12751_v2  ;;  %3470 = vmatprep.subr.bf16.mxu0 %v11231_v43 }
 0x289   : > { %1535 = vmatprep.mubr.bf16.mxu1 %v14965_v0 }
 0x28b   : > { %3471 = vmatpush1.bf16.msra.mxu0 %v11229_v44 }
 0x28c   : > { %3472 = vmatprep.subr.bf16.mxu0 %v11234_v46 }
 0x28e   : > { %1729 = vmatmul.mubr.bf16.gmra.mrb[52].mxu0 %v12763_v9 }
 0x28f   : > { %1738 = vmatprep.mubr.bf16.mxu0 %v14965_v0  ;;  %3473 = vmatpush1.bf16.msra.mxu0 %v11232_v47 }
 0x290   : > { %1536 = vmatmul.mubr.bf16.gmra.mrb[52].mxu1 %v12763_v9  ;;  %3474 = vmatprep.subr.bf16.mxu0 %v11237_v48 }
 0x291   : > { %1545 = vmatprep.mubr.bf16.mxu1 %v14965_v0 }
 0x293   : > { %3475 = vmatpush1.bf16.msra.mxu0 %v11235_v49 }
 0x294   : > { %3476 = vmatprep.subr.bf16.mxu0 %v11240_v52 }
 0x296   : > { %1739 = vmatmul.mubr.bf16.gmra.mrb[56].mxu0 %v12775_v16 }
 0x297   : > { %1748 = vmatprep.mubr.bf16.mxu0 %v14965_v0  ;;  %3477 = vmatpush1.bf16.msra.mxu0 %v11238_v53 }
 0x298   : > { %1546 = vmatmul.mubr.bf16.gmra.mrb[56].mxu1 %v12775_v16  ;;  %3478 = vmatprep.subr.bf16.mxu0 %v11243_v55 }
 0x299   : > { %1555 = vmatprep.mubr.bf16.mxu1 %v14965_v0 }
 0x29b   : > { %3479 = vmatpush1.bf16.msra.mxu0 %v11241_v56 }
 0x29c   : > { %3480 = vmatprep.subr.bf16.mxu0 %v11246_v57 }
 0x29e   : > { %1749 = vmatmul.mubr.bf16.gmra.mrb[60].mxu0 %v12787_v22 }
 0x29f   : > { %1758 = vmatprep.mubr.bf16.mxu0 %v14965_v0  ;;  %3481 = vmatpush1.bf16.msra.mxu0 %v11244_v58 }
 0x2a0   : > { %1556 = vmatmul.mubr.bf16.gmra.mrb[60].mxu1 %v12787_v22  ;;  %3482 = vmatprep.subr.bf16.mxu0 %v11249_v59 }
 0x2a1   : > { %1565 = vmatprep.mubr.bf16.mxu1 %v14965_v0 }
 0x2a3   : > { %3483 = vmatpush1.bf16.msra.mxu0 %v11247_v60 }
 0x2a4   : > { %3645 = vmatprep.subr.bf16.mxu0 %v11252_v61 }
 0x2a6   : > { %1759 = vmatmul.mubr.bf16.gmra.mrb[64].mxu0 %v12705_v50 }
 0x2a7   : > { %1768 = vmatprep.mubr.bf16.mxu0 %v14965_v0 }
 0x2a8   : > { %1566 = vmatmul.mubr.bf16.gmra.mrb[64].mxu1 %v12705_v50 }
 0x2a9   : > { %1575 = vmatprep.mubr.bf16.mxu1 %v14965_v0 }
 0x2ae   : > { %1769 = vmatmul.mubr.bf16.gmra.mrb[68].mxu0 %v12717_v11 }
 0x2af   : > { %1778 = vmatprep.mubr.bf16.mxu0 %v14965_v0 }
 0x2b0   : > { %1576 = vmatmul.mubr.bf16.gmra.mrb[68].mxu1 %v12717_v11 }
 0x2b1   : > { %1585 = vmatprep.mubr.bf16.mxu1 %v14965_v0 }
 0x2b6   : > { %1779 = vmatmul.mubr.bf16.gmra.mrb[72].mxu0 %v12729_v33 }
 0x2b7   : > { %1788 = vmatprep.mubr.bf16.mxu0 %v14965_v0 }
 0x2b8   : > { %1586 = vmatmul.mubr.bf16.gmra.mrb[72].mxu1 %v12729_v33 }
 0x2b9   : > { %1595 = vmatprep.mubr.bf16.mxu1 %v14965_v0 }
 0x2be   : > { %1789 = vmatmul.mubr.bf16.gmra.mrb[76].mxu0 %v12741_v54 }
 0x2bf   : > { %1798 = vmatprep.mubr.bf16.mxu0 %v14965_v0 }
 0x2c0   : > { %1596 = vmatmul.mubr.bf16.gmra.mrb[76].mxu1 %v12741_v54 }
 0x2c1   : > { %1605 = vmatprep.mubr.bf16.mxu1 %v14965_v0 }
 0x2c6   : > { %1799 = vmatmul.mubr.bf16.gmra.mrb[80].mxu0 %v12753_v3 }
 0x2c7   : > { %1808 = vmatprep.mubr.bf16.mxu0 %v14965_v0 }
 0x2c8   : > { %1606 = vmatmul.mubr.bf16.gmra.mrb[80].mxu1 %v12753_v3 }
 0x2c9   : > { %1615 = vmatprep.mubr.bf16.mxu1 %v14965_v0 }
 0x2ce   : > { %1809 = vmatmul.mubr.bf16.gmra.mrb[84].mxu0 %v12765_v10 }
 0x2cf   : > { %1818 = vmatprep.mubr.bf16.mxu0 %v14965_v0 }
 0x2d0   : > { %1616 = vmatmul.mubr.bf16.gmra.mrb[84].mxu1 %v12765_v10 }
 0x2d1   : > { %1625 = vmatprep.mubr.bf16.mxu1 %v14965_v0 }
 0x2d6   : > { %1819 = vmatmul.mubr.bf16.gmra.mrb[88].mxu0 %v12777_v17 }
 0x2d7   : > { %1828 = vmatprep.mubr.bf16.mxu0 %v14965_v0 }
 0x2d8   : > { %1626 = vmatmul.mubr.bf16.gmra.mrb[88].mxu1 %v12777_v17 }
 0x2d9   : > { %1635 = vmatprep.mubr.bf16.mxu1 %v14965_v0 }
 0x2de   : > { %1829 = vmatmul.mubr.bf16.gmra.mrb[92].mxu0 %v12789_v23 }
 0x2e0   : > { %1636 = vmatmul.mubr.bf16.gmra.mrb[92].mxu1 %v12789_v23 }
 0x2e1   : > { %1871 = vmatprep.mubr.bf16.mxu1 %v14965_v0 }
 0x2f9   : > { %v1294_v42 = vpop.f32.mrb[0].mxu0  ;;  %v1374_v48 = vpop.f32.mrb[0].mxu1 }
 0x2fa   : > { %v1295_v43 = vadd.f32 %v1294_v42, %v12870_v40  ;;  %v1296_v44 = vpop.f32.mrb[1].mxu0  ;;  %v1375_v55 = vadd.f32 %v1374_v48, %v12870_v40  ;;  %v1376_v56 = vpop.f32.mrb[1].mxu1 }
 0x2fb   : > { %v1297_v46 = vadd.f32 %v1296_v44, %v12874_v41  ;;  %v1298_v47 = vpop.f32.mrb[2].mxu0  ;;  %v1377_v59 = vadd.f32 %v1376_v56, %v12874_v41  ;;  %v1378_v60 = vpop.f32.mrb[2].mxu1 }
 0x2fc   : > { %v2032_v49 = vmul.f32 0.01, %v1295_v43  ;;  %v1299_v52 = vadd.f32 %v1298_v47, %v12870_v40  ;;  %v1300_v53 = vpop.f32.mrb[3].mxu0  ;;  %v2160_v63 = vmul.f32 0.01, %v1375_v55  ;;  %v1379_v1 = vadd.f32 %v1378_v60, %v12870_v40  ;;  %v1380_v4 = vpop.f32.mrb[3].mxu1 }
 0x2fd   : > { %v2033_v57 = vmul.f32 0.01, %v1297_v46  ;;  %v1301_v58 = vadd.f32 %v1300_v53, %v12874_v41  ;;  %v2161_v8 = vmul.f32 0.01, %v1377_v59  ;;  %v1381_v12 = vadd.f32 %v1380_v4, %v12874_v41 }
 0x2fe   : > { %v2288_v61 = vmax.f32 %v1295_v43, %v2032_v49  ;;  %v2040_v62 = vmul.f32 0.01, %v1299_v52  ;;  %v2416_v18 = vmax.f32 %v1375_v55, %v2160_v63  ;;  %v2168_v19 = vmul.f32 0.01, %v1379_v1  ;;  %v11250_v43 = vld [vmem:[#allocation8 + $0x100] ss:$8 sps:$4 sm:$0xff]  }
 0x2ff   : > { %v2289_v6 = vmax.f32 %v1297_v46, %v2033_v57  ;;  %v2041_v7 = vmul.f32 0.01, %v1301_v58  ;;  %v2417_v25 = vmax.f32 %v1377_v59, %v2161_v8  ;;  %v2169_v26 = vmul.f32 0.01, %v1381_v12 }
 0x300   : > { %v2296_v15 = vmax.f32 %v1299_v52, %v2040_v62  ;;  %v2424_v34 = vmax.f32 %v1379_v1, %v2168_v19  ;;  %v11255_v52 = vld [vmem:[#allocation8 + $0x114] ss:$8 sps:$4 sm:$0xff]  }
 0x301   : > { %v2297_v21 = vmax.f32 %v1301_v58, %v2041_v7  ;;  %v1304_v24 = vpop.f32.mrb[4].mxu0  ;;  %v2425_v44 = vmax.f32 %v1381_v12, %v2169_v26  ;;  %v1384_v46 = vpop.f32.mrb[4].mxu1  ;;  %v11253_v7 = vld [vmem:[#allocation8 + $0x110] ss:$8 sps:$4 sm:$0xff]  }
 0x302   : > { %v2544_v29 = vpack.c.bf16 %v2296_v15, %v2288_v61  ;;  %v1305_v30 = vadd.f32 %v1304_v24, %v12870_v40  ;;  %v1306_v32 = vpop.f32.mrb[5].mxu0  ;;  %v1385_v53 = vadd.f32 %v1384_v46, %v12870_v40  ;;  %v1386_v55 = vpop.f32.mrb[5].mxu1  ;;  %v12888_v56 = vpack.c.bf16 %v2424_v34, %v2416_v18  ;;  %v11258_v15 = vld [vmem:[#allocation8 + $0x124] ss:$8 sps:$4 sm:$0xff]  }
 0x303   : > { %v1307_v35 = vadd.f32 %v1306_v32, %v12874_v41  ;;  %v1308_v36 = vpop.f32.mrb[6].mxu0  ;;  %v2545_v42 = vpack.c.bf16 %v2297_v21, %v2289_v6  ;;  %v1387_v59 = vadd.f32 %v1386_v55, %v12874_v41  ;;  %v1388_v60 = vpop.f32.mrb[6].mxu1  ;;  %v12892_v61 = vpack.c.bf16 %v2425_v44, %v2417_v25 }
 0x304   : > { %v2048_v47 = vmul.f32 0.01, %v1305_v30  ;;  %v1309_v48 = vadd.f32 %v1308_v36, %v12870_v40  ;;  %v1310_v49 = vpop.f32.mrb[7].mxu0  ;;  %v2176_v63 = vmul.f32 0.01, %v1385_v53  ;;  %v1389_v1 = vadd.f32 %v1388_v60, %v12870_v40  ;;  %v1390_v4 = vpop.f32.mrb[7].mxu1 }
 0x305   : > { %v2049_v57 = vmul.f32 0.01, %v1307_v35  ;;  %v1311_v58 = vadd.f32 %v1310_v49, %v12874_v41  ;;  %3484 = vmatprep.mubr.bf16.mxu0 %v2545_v42  ;;  %v2177_v8 = vmul.f32 0.01, %v1387_v59  ;;  %v1391_v12 = vadd.f32 %v1390_v4, %v12874_v41  ;;  %v11261_v49 = vld [vmem:[#allocation8 + $0x134] ss:$8 sps:$4 sm:$0xff]  }
 0x306   : > { %v2056_v62 = vmul.f32 0.01, %v1309_v48  ;;  %3485 = vmatmul.mubr.bf16.vlgmr.msra.gmra.mrb[96].mxu0 %v2544_v29  ;;  %v2304_v13 = vmax.f32 %v1305_v30, %v2048_v47  ;;  %v2432_v18 = vmax.f32 %v1385_v53, %v2176_v63  ;;  %v2184_v19 = vmul.f32 0.01, %v1389_v1  ;;  %v11256_v30 = vld [vmem:[#allocation8 + $0x120] ss:$8 sps:$4 sm:$0xff]  }
 0x307   : > { %v2057_v6 = vmul.f32 0.01, %v1311_v58  ;;  %3646 = vmatpush1.bf16.msra.mxu0 %v11250_v43  ;;  %v2305_v20 = vmax.f32 %v1307_v35, %v2049_v57  ;;  %v2433_v25 = vmax.f32 %v1387_v59, %v2177_v8  ;;  %v2185_v26 = vmul.f32 0.01, %v1391_v12  ;;  %v11259_v59 = vld [vmem:[#allocation8 + $0x130] ss:$8 sps:$4 sm:$0xff]  }
 0x308   : > { %v2312_v14 = vmax.f32 %v1309_v48, %v2056_v62  ;;  %3647 = vmatprep.subr.bf16.mxu0 %v11255_v52  ;;  %v2440_v34 = vmax.f32 %v1389_v1, %v2184_v19  ;;  %v897_v19 = vld [vmem:[#allocation5 + $0x1f8] sm:$0xff] }
 0x309   : > { %v2313_v21 = vmax.f32 %v1311_v58, %v2057_v6  ;;  %v1314_v24 = vpop.f32.mrb[8].mxu0  ;;  %v2441_v44 = vmax.f32 %v1391_v12, %v2185_v26 }
 0x30a   : > { %v1315_v28 = vadd.f32 %v1314_v24, %v12870_v40  ;;  %v1316_v29 = vpop.f32.mrb[9].mxu0  ;;  %v2552_v32 = vpack.c.bf16 %v2312_v14, %v2304_v13  ;;  %v12900_v55 = vpack.c.bf16 %v2440_v34, %v2432_v18  ;;  %v893_v18 = vld [vmem:[#allocation5 + $0x1d8] sm:$0xff] }
 0x30b   : > { %v1317_v36 = vadd.f32 %v1316_v29, %v12874_v41  ;;  %v1318_v42 = vpop.f32.mrb[10].mxu0  ;;  %v2553_v43 = vpack.c.bf16 %v2313_v21, %v2305_v20  ;;  %3648 = vmatpush1.bf16.msra.mxu0 %v11253_v7  ;;  %v1394_v46 = vpop.f32.mrb[8].mxu1  ;;  %v12904_v63 = vpack.c.bf16 %v2441_v44, %v2433_v25  ;;  %v11264_v21 = vld [vmem:[#allocation8 + $0x144] ss:$8 sps:$4 sm:$0xff]   ;;  %v9621_v26 = vcombine.low %v893_v18, %v897_v19 }
 0x30c   : > { %v2064_v47 = vmul.f32 0.01, %v1315_v28  ;;  %v1319_v35 = vadd.f32 %v1318_v42, %v12870_v40  ;;  %v1320_v48 = vpop.f32.mrb[11].mxu0  ;;  %3649 = vmatprep.subr.bf16.mxu0 %v11258_v15  ;;  %v1395_v52 = vadd.f32 %v1394_v46, %v12870_v40  ;;  %v1396_v53 = vpop.f32.mrb[9].mxu1  ;;  %v9622_v42 = vcombine.high %v893_v18, %v897_v19 }
 0x30d   : > { %v2065_v57 = vmul.f32 0.01, %v1317_v36  ;;  %v1321_v58 = vadd.f32 %v1320_v48, %v12874_v41  ;;  %3494 = vmatprep.mubr.bf16.mxu0 %v2553_v43  ;;  %v1397_v60 = vadd.f32 %v1396_v53, %v12874_v41  ;;  %v1398_v62 = vpop.f32.mrb[10].mxu1 }
 0x30e   : > { %v2320_v1 = vmax.f32 %v1315_v28, %v2064_v47  ;;  %v2072_v4 = vmul.f32 0.01, %v1319_v35  ;;  %3495 = vmatmul.mubr.bf16.gmra.mrb[100].mxu0 %v2552_v32  ;;  %v2192_v6 = vmul.f32 0.01, %v1395_v52  ;;  %v1399_v7 = vadd.f32 %v1398_v62, %v12870_v40  ;;  %v1400_v8 = vpop.f32.mrb[11].mxu1  ;;  %1853 = vmatprep.subr.bf16.mxu1 %v9622_v42 }
 0x30f   : > { %v2321_v12 = vmax.f32 %v1317_v36, %v2065_v57  ;;  %v2073_v13 = vmul.f32 0.01, %v1321_v58  ;;  %3650 = vmatpush1.bf16.msra.mxu0 %v11256_v30  ;;  %v2193_v14 = vmul.f32 0.01, %v1397_v60  ;;  %v1401_v15 = vadd.f32 %v1400_v8, %v12874_v41  ;;  %1854 = vmatpush1.bf16.msra.mxu1 %v9621_v26 }
 0x310   : > { %v2328_v20 = vmax.f32 %v1319_v35, %v2072_v4  ;;  %3651 = vmatprep.subr.bf16.mxu0 %v11261_v49  ;;  %v2448_v24 = vmax.f32 %v1395_v52, %v2192_v6  ;;  %v2200_v25 = vmul.f32 0.01, %v1399_v7  ;;  %v11262_v35 = vld [vmem:[#allocation8 + $0x140] ss:$8 sps:$4 sm:$0xff]  }
 0x311   : > { %v2329_v28 = vmax.f32 %v1321_v58, %v2073_v13  ;;  %v1324_v29 = vpop.f32.mrb[12].mxu0  ;;  %v2449_v32 = vmax.f32 %v1397_v60, %v2193_v14  ;;  %v2201_v34 = vmul.f32 0.01, %v1401_v15  ;;  %v11267_v60 = vld [vmem:[#allocation8 + $0x154] ss:$8 sps:$4 sm:$0xff]  }
 0x312   : > { %v1325_v36 = vadd.f32 %v1324_v29, %v12870_v40  ;;  %v1326_v43 = vpop.f32.mrb[13].mxu0  ;;  %v2560_v30 = vpack.c.bf16 %v2328_v20, %v2320_v1  ;;  %v2456_v44 = vmax.f32 %v1399_v7, %v2200_v25  ;;  %v11265_v20 = vld [vmem:[#allocation8 + $0x150] ss:$8 sps:$4 sm:$0xff]   ;;  %1872 = vmatmul.mubr.bf16.vlgmr.msra.gmra.mrb[96].mxu1 %v12703_v45 }
 0x313   : > { %v1327_v46 = vadd.f32 %v1326_v43, %v12874_v41  ;;  %v1328_v47 = vpop.f32.mrb[14].mxu0  ;;  %v2561_v48 = vpack.c.bf16 %v2329_v28, %v2321_v12  ;;  %3652 = vmatpush1.bf16.msra.mxu0 %v11259_v59  ;;  %v2457_v49 = vmax.f32 %v1401_v15, %v2201_v34  ;;  %v1404_v52 = vpop.f32.mrb[12].mxu1  ;;  %v11270_v28 = vld [vmem:[#allocation8 + $0x164] ss:$8 sps:$4 sm:$0xff]   ;;  %1881 = vmatprep.mubr.bf16.mxu1 %v14965_v0 }
 0x314   : > { %v2080_v53 = vmul.f32 0.01, %v1325_v36  ;;  %v1329_v57 = vadd.f32 %v1328_v47, %v12870_v40  ;;  %v1330_v58 = vpop.f32.mrb[15].mxu0  ;;  %3653 = vmatprep.subr.bf16.mxu0 %v11264_v21  ;;  %v1405_v62 = vadd.f32 %v1404_v52, %v12870_v40  ;;  %v1406_v4 = vpop.f32.mrb[13].mxu1  ;;  %v12912_v1 = vpack.c.bf16 %v2456_v44, %v2448_v24 }
 0x315   : > { %v2081_v6 = vmul.f32 0.01, %v1327_v46  ;;  %v1331_v7 = vadd.f32 %v1330_v58, %v12874_v41  ;;  %3504 = vmatprep.mubr.bf16.mxu0 %v2561_v48  ;;  %v1407_v59 = vadd.f32 %v1406_v4, %v12874_v41  ;;  %v1408_v8 = vpop.f32.mrb[14].mxu1  ;;  %v12916_v12 = vpack.c.bf16 %v2457_v49, %v2449_v32  ;;  %v11273_v4 = vld [vmem:[#allocation8 + $0x174] ss:$8 sps:$4 sm:$0xff]  }
 0x316   : > { %v2088_v13 = vmul.f32 0.01, %v1329_v57  ;;  %3505 = vmatmul.mubr.bf16.gmra.mrb[104].mxu0 %v2560_v30  ;;  %v2208_v14 = vmul.f32 0.01, %v1405_v62  ;;  %v1409_v15 = vadd.f32 %v1408_v8, %v12870_v40  ;;  %v1410_v18 = vpop.f32.mrb[15].mxu1  ;;  %v2336_v25 = vmax.f32 %v1325_v36, %v2080_v53 }
 0x317   : > { %v2089_v19 = vmul.f32 0.01, %v1331_v7  ;;  %3654 = vmatpush1.bf16.msra.mxu0 %v11262_v35  ;;  %v2209_v21 = vmul.f32 0.01, %v1407_v59  ;;  %v1411_v24 = vadd.f32 %v1410_v18, %v12874_v41  ;;  %v2337_v34 = vmax.f32 %v1327_v46, %v2081_v6  ;;  %v11268_v53 = vld [vmem:[#allocation8 + $0x160] ss:$8 sps:$4 sm:$0xff]  }
 0x318   : > { %v2344_v26 = vmax.f32 %v1329_v57, %v2088_v13  ;;  %3655 = vmatprep.subr.bf16.mxu0 %v11267_v60  ;;  %v2464_v29 = vmax.f32 %v1405_v62, %v2208_v14  ;;  %v2216_v32 = vmul.f32 0.01, %v1409_v15 }
 0x319   : > { %v2345_v42 = vmax.f32 %v1331_v7, %v2089_v19  ;;  %v1334_v43 = vpop.f32.mrb[16].mxu0  ;;  %v2465_v30 = vmax.f32 %v1407_v59, %v2209_v21  ;;  %v2217_v44 = vmul.f32 0.01, %v1411_v24 }
 0x31a   : > { %v1335_v47 = vadd.f32 %v1334_v43, %v12870_v40  ;;  %v1336_v48 = vpop.f32.mrb[17].mxu0  ;;  %v2568_v35 = vpack.c.bf16 %v2344_v26, %v2336_v25  ;;  %v2472_v49 = vmax.f32 %v1409_v15, %v2216_v32  ;;  %v11271_v26 = vld [vmem:[#allocation8 + $0x170] ss:$8 sps:$4 sm:$0xff]   ;;  %1882 = vmatmul.mubr.bf16.gmra.mrb[100].mxu1 %v12715_v5 }
 0x31b   : > { %v1337_v45 = vadd.f32 %v1336_v48, %v12874_v41  ;;  %v1338_v36 = vpop.f32.mrb[18].mxu0  ;;  %v2569_v52 = vpack.c.bf16 %v2345_v42, %v2337_v34  ;;  %3656 = vmatpush1.bf16.msra.mxu0 %v11265_v20  ;;  %v2473_v57 = vmax.f32 %v1411_v24, %v2217_v44  ;;  %v1414_v58 = vpop.f32.mrb[16].mxu1  ;;  %v11276_v42 = vld [vmem:[#allocation8 + $0x184] ss:$8 sps:$4 sm:$0xff]   ;;  %1891 = vmatprep.mubr.bf16.mxu1 %v14965_v0 }
 0x31c   : > { %v2096_v60 = vmul.f32 0.01, %v1335_v47  ;;  %v1339_v46 = vadd.f32 %v1338_v36, %v12870_v40  ;;  %v1340_v62 = vpop.f32.mrb[19].mxu0  ;;  %3657 = vmatprep.subr.bf16.mxu0 %v11270_v28  ;;  %v1415_v6 = vadd.f32 %v1414_v58, %v12870_v40  ;;  %v1416_v7 = vpop.f32.mrb[17].mxu1  ;;  %v12926_v59 = vpack.c.bf16 %v2472_v49, %v2464_v29 }
 0x31d   : > { %v2097_v8 = vmul.f32 0.01, %v1337_v45  ;;  %v1341_v13 = vadd.f32 %v1340_v62, %v12874_v41  ;;  %3514 = vmatprep.mubr.bf16.mxu0 %v2569_v52  ;;  %v1417_v14 = vadd.f32 %v1416_v7, %v12874_v41  ;;  %v1418_v15 = vpop.f32.mrb[18].mxu1  ;;  %v12930_v18 = vpack.c.bf16 %v2473_v57, %v2465_v30 }
 0x31e   : > { %v2104_v19 = vmul.f32 0.01, %v1339_v46  ;;  %3515 = vmatmul.mubr.bf16.gmra.mrb[108].mxu0 %v2568_v35  ;;  %v2224_v20 = vmul.f32 0.01, %v1415_v6  ;;  %v1419_v21 = vadd.f32 %v1418_v15, %v12870_v40  ;;  %v1420_v24 = vpop.f32.mrb[19].mxu1  ;;  %v2352_v32 = vmax.f32 %v1335_v47, %v2096_v60 }
 0x31f   : > { %v2105_v25 = vmul.f32 0.01, %v1341_v13  ;;  %3658 = vmatpush1.bf16.msra.mxu0 %v11268_v53  ;;  %v2225_v28 = vmul.f32 0.01, %v1417_v14  ;;  %v1421_v29 = vadd.f32 %v1420_v24, %v12874_v41  ;;  %v2353_v44 = vmax.f32 %v1337_v45, %v2097_v8  ;;  %v11279_v8 = vld [vmem:[#allocation8 + $0x194] ss:$8 sps:$4 sm:$0xff]  }
 0x320   : > { %v2360_v34 = vmax.f32 %v1339_v46, %v2104_v19  ;;  %3659 = vmatprep.subr.bf16.mxu0 %v11273_v4  ;;  %v2480_v43 = vmax.f32 %v1415_v6, %v2224_v20  ;;  %v2232_v30 = vmul.f32 0.01, %v1419_v21  ;;  %v11274_v46 = vld [vmem:[#allocation8 + $0x180] ss:$8 sps:$4 sm:$0xff]  }
 0x321   : > { %v2361_v48 = vmax.f32 %v1341_v13, %v2105_v25  ;;  %v1344_v35 = vpop.f32.mrb[20].mxu0  ;;  %v2481_v49 = vmax.f32 %v1417_v14, %v2225_v28  ;;  %v2233_v36 = vmul.f32 0.01, %v1421_v29 }
 0x322   : > { %v1345_v52 = vadd.f32 %v1344_v35, %v12870_v40  ;;  %v1346_v53 = vpop.f32.mrb[21].mxu0  ;;  %v2576_v57 = vpack.c.bf16 %v2360_v34, %v2352_v32  ;;  %v2488_v58 = vmax.f32 %v1419_v21, %v2232_v30  ;;  %1892 = vmatmul.mubr.bf16.gmra.mrb[104].mxu1 %v12727_v27  ;;  %v11282_v35 = vld [vmem:[#allocation8 + $0x1a4] ss:$8 sps:$4 sm:$0xff]  }
 0x323   : > { %v1347_v5 = vadd.f32 %v1346_v53, %v12874_v41  ;;  %v1348_v47 = vpop.f32.mrb[22].mxu0  ;;  %v2577_v60 = vpack.c.bf16 %v2361_v48, %v2353_v44  ;;  %3660 = vmatpush1.bf16.msra.mxu0 %v11271_v26  ;;  %v2489_v62 = vmax.f32 %v1421_v29, %v2233_v36  ;;  %v1424_v4 = vpop.f32.mrb[20].mxu1  ;;  %1901 = vmatprep.mubr.bf16.mxu1 %v14965_v0 }
 0x324   : > { %v2112_v6 = vmul.f32 0.01, %v1345_v52  ;;  %v1349_v45 = vadd.f32 %v1348_v47, %v12870_v40  ;;  %v1350_v7 = vpop.f32.mrb[23].mxu0  ;;  %3661 = vmatprep.subr.bf16.mxu0 %v11276_v42  ;;  %v1425_v13 = vadd.f32 %v1424_v4, %v12870_v40  ;;  %v1426_v14 = vpop.f32.mrb[21].mxu1  ;;  %v12940_v15 = vpack.c.bf16 %v2488_v58, %v2480_v43  ;;  %v11277_v42 = vld [vmem:[#allocation8 + $0x190] ss:$8 sps:$4 sm:$0xff]  }
 0x325   : > { %v2113_v19 = vmul.f32 0.01, %v1347_v5  ;;  %v1351_v20 = vadd.f32 %v1350_v7, %v12874_v41  ;;  %3524 = vmatprep.mubr.bf16.mxu0 %v2577_v60  ;;  %v1427_v21 = vadd.f32 %v1426_v14, %v12874_v41  ;;  %v1428_v24 = vpop.f32.mrb[22].mxu1  ;;  %v12944_v25 = vpack.c.bf16 %v2489_v62, %v2481_v49 }
 0x326   : > { %v2120_v26 = vmul.f32 0.01, %v1349_v45  ;;  %3525 = vmatmul.mubr.bf16.gmra.mrb[112].mxu0 %v2576_v57  ;;  %v2240_v28 = vmul.f32 0.01, %v1425_v13  ;;  %v1429_v29 = vadd.f32 %v1428_v24, %v12870_v40  ;;  %v1430_v32 = vpop.f32.mrb[23].mxu1  ;;  %v2368_v44 = vmax.f32 %v1345_v52, %v2112_v6 }
 0x327   : > { %v2121_v34 = vmul.f32 0.01, %v1351_v20  ;;  %3662 = vmatpush1.bf16.msra.mxu0 %v11274_v46  ;;  %v2241_v43 = vmul.f32 0.01, %v1427_v21  ;;  %v1431_v30 = vadd.f32 %v1430_v32, %v12874_v41  ;;  %v2369_v53 = vmax.f32 %v1347_v5, %v2113_v19  ;;  %v11285_v24 = vld [vmem:[#allocation8 + $0x1b4] ss:$8 sps:$4 sm:$0xff]  }
 0x328   : > { %v2376_v48 = vmax.f32 %v1349_v45, %v2120_v26  ;;  %3663 = vmatprep.subr.bf16.mxu0 %v11279_v8  ;;  %v2496_v49 = vmax.f32 %v1425_v13, %v2240_v28  ;;  %v2248_v36 = vmul.f32 0.01, %v1429_v29  ;;  %v14960_v7 = vsub.s32 4, %v12858_v31  ;;  %v11280_v13 = vld [vmem:[#allocation8 + $0x1a0] ss:$8 sps:$4 sm:$0xff]  }
 0x329   : > { %v2377_v57 = vmax.f32 %v1351_v20, %v2121_v34  ;;  %v1354_v58 = vpop.f32.mrb[24].mxu0  ;;  %v2497_v47 = vmax.f32 %v1427_v21, %v2241_v43  ;;  %v2249_v60 = vmul.f32 0.01, %v1431_v30  ;;  %v14959_v8 = vsub.s32 5, %v12858_v31 }
 0x32a   : > { %v1355_v46 = vadd.f32 %v1354_v58, %v12870_v40  ;;  %v1356_v62 = vpop.f32.mrb[25].mxu0  ;;  %v2584_v4 = vpack.c.bf16 %v2376_v48, %v2368_v44  ;;  %v2504_v27 = vmax.f32 %v1429_v29, %v2248_v36  ;;  %v12965_v48 = vrot.slane %v12863_v38, %v14960_v7  ;;  %v11283_v58 = vld [vmem:[#allocation8 + $0x1b0] ss:$8 sps:$4 sm:$0xff]   ;;  %1902 = vmatmul.mubr.bf16.gmra.mrb[108].mxu1 %v12739_v51 }
 0x32b   : > { %v1357_v52 = vadd.f32 %v1356_v62, %v12874_v41  ;;  %v1358_v6 = vpop.f32.mrb[26].mxu0  ;;  %v2585_v45 = vpack.c.bf16 %v2377_v57, %v2369_v53  ;;  %3664 = vmatpush1.bf16.msra.mxu0 %v11277_v42  ;;  %v2505_v5 = vmax.f32 %v1431_v30, %v2249_v60  ;;  %v1434_v14 = vpop.f32.mrb[24].mxu1  ;;  %v12971_v57 = vrot.slane %v12863_v38, %v14959_v8 }
 0x32c   : > { %v2128_v19 = vmul.f32 0.01, %v1355_v46  ;;  %v1359_v20 = vadd.f32 %v1358_v6, %v12870_v40  ;;  %v1360_v21 = vpop.f32.mrb[27].mxu0  ;;  %3665 = vmatprep.subr.bf16.mxu0 %v11282_v35  ;;  %v1435_v26 = vadd.f32 %v1434_v14, %v12870_v40  ;;  %v1436_v28 = vpop.f32.mrb[25].mxu1  ;;  %v12956_v29 = vpack.c.bf16 %v2504_v27, %v2496_v49  ;;  %v11288_v6 = vld [vmem:[#allocation8 + $0x1c4] ss:$8 sps:$4 sm:$0xff]   ;;  %1911 = vmatprep.mubr.bf16.mxu1 %v14965_v0 }
 0x32d   : > { %v2129_v32 = vmul.f32 0.01, %v1357_v52  ;;  %v1361_v34 = vadd.f32 %v1360_v21, %v12874_v41  ;;  %3534 = vmatprep.mubr.bf16.mxu0 %v2585_v45  ;;  %v1437_v42 = vadd.f32 %v1436_v28, %v12874_v41  ;;  %v1438_v43 = vpop.f32.mrb[26].mxu1  ;;  %v12960_v30 = vpack.c.bf16 %v2505_v5, %v2497_v47 }
 0x32e   : > { %v2136_v44 = vmul.f32 0.01, %v1359_v20  ;;  %3535 = vmatmul.mubr.bf16.gmra.mrb[116].mxu0 %v2584_v4  ;;  %v2256_v35 = vmul.f32 0.01, %v1435_v26  ;;  %v1439_v49 = vadd.f32 %v1438_v43, %v12870_v40  ;;  %v1440_v36 = vpop.f32.mrb[27].mxu1  ;;  %v2384_v62 = vmax.f32 %v1355_v46, %v2128_v19 }
 0x32f   : > { %v2137_v53 = vmul.f32 0.01, %v1361_v34  ;;  %3666 = vmatpush1.bf16.msra.mxu0 %v11280_v13  ;;  %v2257_v47 = vmul.f32 0.01, %v1437_v42  ;;  %v1441_v60 = vadd.f32 %v1440_v36, %v12874_v41  ;;  %v2385_v5 = vmax.f32 %v1357_v52, %v2129_v32 }
 0x330   : > { %v2392_v4 = vmax.f32 %v1359_v20, %v2136_v44  ;;  %3667 = vmatprep.subr.bf16.mxu0 %v11285_v24  ;;  %v2512_v27 = vmax.f32 %v1435_v26, %v2256_v35  ;;  %v2264_v45 = vmul.f32 0.01, %v1439_v49  ;;  %v14961_v51 = vsub.s32 2, %v12858_v31  ;;  %v11286_v24 = vld [vmem:[#allocation8 + $0x1c0] ss:$8 sps:$4 sm:$0xff]  }
 0x331   : > { %v2393_v14 = vmax.f32 %v1361_v34, %v2137_v53  ;;  %v1364_v21 = vpop.f32.mrb[28].mxu0  ;;  %v2513_v28 = vmax.f32 %v1437_v42, %v2257_v47  ;;  %v2265_v43 = vmul.f32 0.01, %v1441_v60  ;;  %v14962_v52 = vsub.s32 3, %v12858_v31  ;;  %v11291_v53 = vld [vmem:[#allocation8 + $0x1d4] ss:$8 sps:$4 sm:$0xff]  }
 0x332   : > { %v1365_v13 = vadd.f32 %v1364_v21, %v12870_v40  ;;  %v1366_v8 = vpop.f32.mrb[29].mxu0  ;;  %v2592_v7 = vpack.c.bf16 %v2392_v4, %v2384_v62  ;;  %v2520_v36 = vmax.f32 %v1439_v49, %v2264_v45  ;;  %1912 = vmatmul.mubr.bf16.gmra.mrb[112].mxu1 %v12751_v2 }
 0x333   : > { %v1367_v46 = vadd.f32 %v1366_v8, %v12874_v41  ;;  %v1368_v19 = vpop.f32.mrb[30].mxu0  ;;  %v2593_v20 = vpack.c.bf16 %v2393_v14, %v2385_v5  ;;  %3668 = vmatpush1.bf16.msra.mxu0 %v11283_v58  ;;  %v2521_v26 = vmax.f32 %v1441_v60, %v2265_v43  ;;  %v1444_v44 = vpop.f32.mrb[28].mxu1  ;;  %1921 = vmatprep.mubr.bf16.mxu1 %v14965_v0 }
 0x334   : > { %v2144_v32 = vmul.f32 0.01, %v1365_v13  ;;  %v1369_v34 = vadd.f32 %v1368_v19, %v12870_v40  ;;  %v1370_v42 = vpop.f32.mrb[31].mxu0  ;;  %3669 = vmatprep.subr.bf16.mxu0 %v11288_v6  ;;  %v1445_v35 = vadd.f32 %v1444_v44, %v12870_v40  ;;  %v1446_v49 = vpop.f32.mrb[29].mxu1  ;;  %v12982_v47 = vpack.c.bf16 %v2520_v36, %v2512_v27  ;;  %v11289_v36 = vld [vmem:[#allocation8 + $0x1d0] ss:$8 sps:$4 sm:$0xff]  }
 0x335   : > { %v2145_v8 = vmul.f32 0.01, %v1367_v46  ;;  %v1371_v62 = vadd.f32 %v1370_v42, %v12874_v41  ;;  %3544 = vmatprep.mubr.bf16.mxu0 %v2593_v20  ;;  %v1447_v58 = vadd.f32 %v1446_v49, %v12874_v41  ;;  %v1448_v60 = vpop.f32.mrb[30].mxu1  ;;  %v12986_v4 = vpack.c.bf16 %v2521_v26, %v2513_v28  ;;  %v11294_v44 = vld [vmem:[#allocation8 + $0x1e4] ss:$8 sps:$4 sm:$0xff]  }
 0x336   : > { %v2152_v45 = vmul.f32 0.01, %v1369_v34  ;;  %3545 = vmatmul.mubr.bf16.gmra.mrb[120].mxu0 %v2592_v7  ;;  %v2272_v5 = vmul.f32 0.01, %v1445_v35  ;;  %v1449_v6 = vadd.f32 %v1448_v60, %v12870_v40  ;;  %v1450_v14 = vpop.f32.mrb[31].mxu1  ;;  %v12992_v27 = vrot.slane %v12863_v38, %v14961_v51 }
 0x337   : > { %v2153_v21 = vmul.f32 0.01, %v1371_v62  ;;  %3670 = vmatpush1.bf16.msra.mxu0 %v11286_v24  ;;  %v2273_v43 = vmul.f32 0.01, %v1447_v58  ;;  %v1451_v19 = vadd.f32 %v1450_v14, %v12874_v41  ;;  %v12998_v28 = vrot.slane %v12863_v38, %v14962_v52 }
 0x338   : > { %v2400_v40 = vmax.f32 %v1365_v13, %v2144_v32  ;;  %v2408_v7 = vmax.f32 %v1369_v34, %v2152_v45  ;;  %v2528_v20 = vmax.f32 %v1445_v35, %v2272_v5  ;;  %3671 = vmatprep.subr.bf16.mxu0 %v11291_v53  ;;  %v2280_v26 = vmul.f32 0.01, %v1449_v6  ;;  %v11292_v35 = vld [vmem:[#allocation8 + $0x1e0] ss:$8 sps:$4 sm:$0xff]   ;;  %v11297_v45 = vld [vmem:[#allocation8 + $0x1f4] ss:$8 sps:$4 sm:$0xff]  }
 0x339   : > { %v2401_v24 = vmax.f32 %v1367_v46, %v2145_v8  ;;  %v2409_v42 = vmax.f32 %v1371_v62, %v2153_v21  ;;  %v1680_v49 = vpop.f32.mrb[32].mxu0  ;;  %v2529_v60 = vmax.f32 %v1447_v58, %v2273_v43  ;;  %v2281_v41 = vmul.f32 0.01, %v1451_v19 }
 0x33a   : > { %v2600_v14 = vpack.c.bf16 %v2408_v7, %v2400_v40  ;;  %v1681_v51 = vadd.f32 %v1680_v49, %v12965_v48  ;;  %v1682_v38 = vpop.f32.mrb[33].mxu0  ;;  %v2536_v52 = vmax.f32 %v1449_v6, %v2280_v26  ;;  %v11295_v49 = vld [vmem:[#allocation8 + $0x1f0] ss:$8 sps:$4 sm:$0xff]   ;;  %1922 = vmatmul.mubr.bf16.gmra.mrb[116].mxu1 %v12763_v9 }
 0x33b   : > { %v2601_v39 = vpack.c.bf16 %v2409_v42, %v2401_v24  ;;  %v1683_v2 = vadd.f32 %v1682_v38, %v12971_v57  ;;  %v1684_v13 = vpop.f32.mrb[34].mxu0  ;;  %3672 = vmatpush1.bf16.msra.mxu0 %v11289_v36  ;;  %v2537_v32 = vmax.f32 %v1451_v19, %v2281_v41  ;;  %v1487_v34 = vpop.f32.mrb[32].mxu1  ;;  %1931 = vmatprep.mubr.bf16.mxu1 %v14965_v0 }
 0x33c   : > { %v2036_v53 = vmul.f32 0.01, %v1681_v51  ;;  %v1685_v46 = vadd.f32 %v1684_v13, %v12965_v48  ;;  %v1686_v8 = vpop.f32.mrb[35].mxu0  ;;  %v1488_v62 = vadd.f32 %v1487_v34, %v12992_v27  ;;  %v1489_v58 = vpop.f32.mrb[33].mxu1  ;;  %3673 = vmatprep.subr.bf16.mxu0 %v11294_v44  ;;  %v13006_v5 = vpack.c.bf16 %v2536_v52, %v2528_v20 }
 0x33d   : > { %3554 = vmatprep.mubr.bf16.mxu0 %v2601_v39  ;;  %v2037_v6 = vmul.f32 0.01, %v1683_v2  ;;  %v1687_v21 = vadd.f32 %v1686_v8, %v12971_v57  ;;  %v1490_v43 = vadd.f32 %v1489_v58, %v12998_v28  ;;  %v1491_v36 = vpop.f32.mrb[34].mxu1  ;;  %v13010_v19 = vpack.c.bf16 %v2537_v32, %v2529_v60 }
 0x33e   : > { %3555 = vmatmul.mubr.bf16.gmra.mrb[124].mxu0 %v2600_v14  ;;  %v2292_v40 = vmax.f32 %v1681_v51, %v2036_v53  ;;  %v2044_v7 = vmul.f32 0.01, %v1685_v46  ;;  %v2034_v26 = vmul.f32 0.01, %v1488_v62  ;;  %v1492_v24 = vadd.f32 %v1491_v36, %v12992_v27  ;;  %v1493_v42 = vpop.f32.mrb[35].mxu1 }
 0x33f   : > { %3564 = vmatprep.mubr.bf16.mxu0 %v12892_v61  ;;  %v2293_v52 = vmax.f32 %v1683_v2, %v2037_v6  ;;  %v2045_v20 = vmul.f32 0.01, %v1687_v21  ;;  %v2035_v39 = vmul.f32 0.01, %v1490_v43  ;;  %3674 = vmatpush1.bf16.msra.mxu0 %v11292_v35  ;;  %v1494_v44 = vadd.f32 %v1493_v42, %v12998_v28  ;;  %v11300_v14 = vld [vmem:[#allocation8 + $0x204] ss:$8 sps:$4 sm:$0xff]  }
 0x340   : > { %v2300_v41 = vmax.f32 %v1685_v46, %v2044_v7  ;;  %v2290_v38 = vmax.f32 %v1488_v62, %v2034_v26  ;;  %v2042_v60 = vmul.f32 0.01, %v1492_v24  ;;  %3675 = vmatprep.subr.bf16.mxu0 %v11297_v45 }
 0x341   : > { %v2301_v51 = vmax.f32 %v1687_v21, %v2045_v20  ;;  %v1690_v13 = vpop.f32.mrb[36].mxu0  ;;  %v2291_v32 = vmax.f32 %v1490_v43, %v2035_v39  ;;  %v2043_v34 = vmul.f32 0.01, %v1494_v44 }
 0x342   : > { %v13017_v61 = vpack.c.bf16 %v2300_v41, %v2292_v40  ;;  %v1691_v2 = vadd.f32 %v1690_v13, %v12965_v48  ;;  %v1692_v35 = vpop.f32.mrb[37].mxu0  ;;  %v2298_v53 = vmax.f32 %v1492_v24, %v2042_v60  ;;  %1932 = vmatmul.mubr.bf16.gmra.mrb[120].mxu1 %v12775_v16 }
 0x343   : > { %v1693_v46 = vadd.f32 %v1692_v35, %v12971_v57  ;;  %v1694_v8 = vpop.f32.mrb[38].mxu0  ;;  %v2299_v62 = vmax.f32 %v1494_v44, %v2043_v34  ;;  %v1497_v58 = vpop.f32.mrb[36].mxu1  ;;  %3676 = vmatpush1.bf16.msra.mxu0 %v11295_v49  ;;  %v13021_v45 = vpack.c.bf16 %v2301_v51, %v2293_v52  ;;  %1941 = vmatprep.mubr.bf16.mxu1 %v14965_v0 }
 0x344   : > { %v2052_v9 = vmul.f32 0.01, %v1691_v2  ;;  %v1695_v6 = vadd.f32 %v1694_v8, %v12965_v48  ;;  %v1696_v21 = vpop.f32.mrb[39].mxu0  ;;  %v13024_v43 = vpack.c.bf16 %v2298_v53, %v2290_v38  ;;  %v1498_v36 = vadd.f32 %v1497_v58, %v12992_v27  ;;  %v1499_v40 = vpop.f32.mrb[37].mxu1  ;;  %3838 = vmatprep.subr.bf16.mxu0 %v11300_v14 }
 0x345   : > { %v2053_v7 = vmul.f32 0.01, %v1693_v46  ;;  %v1697_v26 = vadd.f32 %v1696_v21, %v12971_v57  ;;  %v1500_v24 = vadd.f32 %v1499_v40, %v12998_v28  ;;  %v1501_v42 = vpop.f32.mrb[38].mxu1  ;;  %v13029_v20 = vpack.c.bf16 %v2299_v62, %v2291_v32 }
 0x346   : > { %3565 = vmatmul.mubr.bf16.gmra.mrb[128].mxu0 %v12888_v56  ;;  %v2308_v52 = vmax.f32 %v1691_v2, %v2052_v9  ;;  %v2060_v39 = vmul.f32 0.01, %v1695_v6  ;;  %v2050_v44 = vmul.f32 0.01, %v1498_v36  ;;  %v1502_v49 = vadd.f32 %v1501_v42, %v12992_v27  ;;  %v1503_v41 = vpop.f32.mrb[39].mxu1 }
 0x347   : > { %3574 = vmatprep.mubr.bf16.mxu0 %v12904_v63  ;;  %v2309_v38 = vmax.f32 %v1693_v46, %v2053_v7  ;;  %v2061_v60 = vmul.f32 0.01, %v1697_v26  ;;  %v2051_v14 = vmul.f32 0.01, %v1500_v24  ;;  %v1504_v51 = vadd.f32 %v1503_v41, %v12998_v28 }
 0x348   : > { %v2316_v13 = vmax.f32 %v1695_v6, %v2060_v39  ;;  %v2306_v34 = vmax.f32 %v1498_v36, %v2050_v44  ;;  %v2058_v35 = vmul.f32 0.01, %v1502_v49 }
 0x349   : > { %v2317_v32 = vmax.f32 %v1697_v26, %v2061_v60  ;;  %v1700_v56 = vpop.f32.mrb[40].mxu0  ;;  %v2307_v2 = vmax.f32 %v1500_v24, %v2051_v14  ;;  %v2059_v53 = vmul.f32 0.01, %v1504_v51 }
 0x34a   : > { %v1701_v8 = vadd.f32 %v1700_v56, %v12965_v48  ;;  %v1702_v62 = vpop.f32.mrb[41].mxu0  ;;  %v2314_v63 = vmax.f32 %v1502_v49, %v2058_v35  ;;  %v13038_v46 = vpack.c.bf16 %v2316_v13, %v2308_v52  ;;  %1942 = vmatmul.mubr.bf16.gmra.mrb[124].mxu1 %v12787_v22 }
 0x34b   : > { %v1703_v58 = vadd.f32 %v1702_v62, %v12971_v57  ;;  %v1704_v9 = vpop.f32.mrb[42].mxu0  ;;  %v2315_v6 = vmax.f32 %v1504_v51, %v2059_v53  ;;  %v1507_v21 = vpop.f32.mrb[40].mxu1  ;;  %v13041_v36 = vpack.c.bf16 %v2317_v32, %v2309_v38  ;;  %1951 = vmatprep.mubr.bf16.mxu1 %v14965_v0 }
 0x34c   : > { %v2068_v16 = vmul.f32 0.01, %v1701_v8  ;;  %v1705_v40 = vadd.f32 %v1704_v9, %v12965_v48  ;;  %v1706_v7 = vpop.f32.mrb[43].mxu0  ;;  %v1508_v26 = vadd.f32 %v1507_v21, %v12992_v27  ;;  %v1509_v24 = vpop.f32.mrb[41].mxu1  ;;  %v13045_v42 = vpack.c.bf16 %v2314_v63, %v2306_v34 }
 0x34d   : > { %v2069_v39 = vmul.f32 0.01, %v1703_v58  ;;  %v1707_v52 = vadd.f32 %v1706_v7, %v12971_v57  ;;  %v1510_v44 = vadd.f32 %v1509_v24, %v12998_v28  ;;  %v1511_v49 = vpop.f32.mrb[42].mxu1  ;;  %v13049_v41 = vpack.c.bf16 %v2315_v6, %v2307_v2 }
 0x34e   : > { %3575 = vmatmul.mubr.bf16.gmra.mrb[132].mxu0 %v12900_v55  ;;  %v2324_v38 = vmax.f32 %v1701_v8, %v2068_v16  ;;  %v2076_v60 = vmul.f32 0.01, %v1705_v40  ;;  %v2066_v14 = vmul.f32 0.01, %v1508_v26  ;;  %v1512_v51 = vadd.f32 %v1511_v49, %v12992_v27  ;;  %v1513_v13 = vpop.f32.mrb[43].mxu1 }
 0x34f   : > { %3584 = vmatprep.mubr.bf16.mxu0 %v12916_v12  ;;  %v2325_v34 = vmax.f32 %v1703_v58, %v2069_v39  ;;  %v2077_v35 = vmul.f32 0.01, %v1707_v52  ;;  %v2067_v32 = vmul.f32 0.01, %v1510_v44  ;;  %v1514_v56 = vadd.f32 %v1513_v13, %v12998_v28 }
 0x350   : > { %v2332_v53 = vmax.f32 %v1705_v40, %v2076_v60  ;;  %v2322_v62 = vmax.f32 %v1508_v26, %v2066_v14  ;;  %v2074_v63 = vmul.f32 0.01, %v1512_v51 }
 0x351   : > { %v2333_v2 = vmax.f32 %v1707_v52, %v2077_v35  ;;  %v1710_v55 = vpop.f32.mrb[44].mxu0  ;;  %v2323_v8 = vmax.f32 %v1510_v44, %v2067_v32  ;;  %v2075_v9 = vmul.f32 0.01, %v1514_v56 }
 0x352   : > { %v1711_v6 = vadd.f32 %v1710_v55, %v12965_v48  ;;  %v1712_v21 = vpop.f32.mrb[45].mxu0  ;;  %v2330_v12 = vmax.f32 %v1512_v51, %v2074_v63  ;;  %v13058_v58 = vpack.c.bf16 %v2332_v53, %v2324_v38  ;;  %1952 = vmatmul.mubr.bf16.gmra.mrb[128].mxu1 %v12705_v50 }
 0x353   : > { %v1713_v16 = vadd.f32 %v1712_v21, %v12971_v57  ;;  %v1714_v7 = vpop.f32.mrb[46].mxu0  ;;  %v2331_v40 = vmax.f32 %v1514_v56, %v2075_v9  ;;  %v1517_v26 = vpop.f32.mrb[44].mxu1  ;;  %v13061_v24 = vpack.c.bf16 %v2333_v2, %v2325_v34  ;;  %1961 = vmatprep.mubr.bf16.mxu1 %v14965_v0 }
 0x354   : > { %v2084_v22 = vmul.f32 0.01, %v1711_v6  ;;  %v1715_v39 = vadd.f32 %v1714_v7, %v12965_v48  ;;  %v1716_v52 = vpop.f32.mrb[47].mxu0  ;;  %v1518_v44 = vadd.f32 %v1517_v26, %v12992_v27  ;;  %v1519_v49 = vpop.f32.mrb[45].mxu1  ;;  %v13065_v60 = vpack.c.bf16 %v2330_v12, %v2322_v62 }
 0x355   : > { %v2085_v14 = vmul.f32 0.01, %v1713_v16  ;;  %v1717_v38 = vadd.f32 %v1716_v52, %v12971_v57  ;;  %v1520_v51 = vadd.f32 %v1519_v49, %v12998_v28  ;;  %v1521_v13 = vpop.f32.mrb[46].mxu1  ;;  %v13069_v35 = vpack.c.bf16 %v2331_v40, %v2323_v8 }
 0x356   : > { %3585 = vmatmul.mubr.bf16.gmra.mrb[136].mxu0 %v12912_v1  ;;  %v2340_v34 = vmax.f32 %v1711_v6, %v2084_v22  ;;  %v2092_v32 = vmul.f32 0.01, %v1715_v39  ;;  %v2082_v56 = vmul.f32 0.01, %v1518_v44  ;;  %v1522_v53 = vadd.f32 %v1521_v13, %v12992_v27  ;;  %v1523_v63 = vpop.f32.mrb[47].mxu1 }
 0x357   : > { %3594 = vmatprep.mubr.bf16.mxu0 %v12930_v18  ;;  %v2341_v62 = vmax.f32 %v1713_v16, %v2085_v14  ;;  %v2093_v2 = vmul.f32 0.01, %v1717_v38  ;;  %v2083_v55 = vmul.f32 0.01, %v1520_v51  ;;  %v1524_v9 = vadd.f32 %v1523_v63, %v12998_v28 }
 0x358   : > { %v2348_v21 = vmax.f32 %v1715_v39, %v2092_v32  ;;  %v2338_v12 = vmax.f32 %v1518_v44, %v2082_v56  ;;  %v2090_v7 = vmul.f32 0.01, %v1522_v53 }
 0x359   : > { %v2349_v8 = vmax.f32 %v1717_v38, %v2093_v2  ;;  %v1720_v1 = vpop.f32.mrb[48].mxu0  ;;  %v2339_v6 = vmax.f32 %v1520_v51, %v2083_v55  ;;  %v2091_v40 = vmul.f32 0.01, %v1524_v9 }
 0x35a   : > { %v1721_v26 = vadd.f32 %v1720_v1, %v12965_v48  ;;  %v1722_v22 = vpop.f32.mrb[49].mxu0  ;;  %v2346_v18 = vmax.f32 %v1522_v53, %v2090_v7  ;;  %v13078_v16 = vpack.c.bf16 %v2348_v21, %v2340_v34  ;;  %1962 = vmatmul.mubr.bf16.gmra.mrb[132].mxu1 %v12717_v11 }
 0x35b   : > { %v1723_v52 = vadd.f32 %v1722_v22, %v12971_v57  ;;  %v1724_v49 = vpop.f32.mrb[50].mxu0  ;;  %v2347_v39 = vmax.f32 %v1524_v9, %v2091_v40  ;;  %v1527_v44 = vpop.f32.mrb[48].mxu1  ;;  %v13081_v14 = vpack.c.bf16 %v2349_v8, %v2341_v62  ;;  %1971 = vmatprep.mubr.bf16.mxu1 %v14965_v0 }
 0x35c   : > { %v2100_v50 = vmul.f32 0.01, %v1721_v26  ;;  %v1725_v38 = vadd.f32 %v1724_v49, %v12965_v48  ;;  %v1726_v51 = vpop.f32.mrb[51].mxu0  ;;  %v1528_v13 = vadd.f32 %v1527_v44, %v12992_v27  ;;  %v1529_v32 = vpop.f32.mrb[49].mxu1  ;;  %v13085_v56 = vpack.c.bf16 %v2346_v18, %v2338_v12 }
 0x35d   : > { %v2101_v63 = vmul.f32 0.01, %v1723_v52  ;;  %v1727_v34 = vadd.f32 %v1726_v51, %v12971_v57  ;;  %v1530_v53 = vadd.f32 %v1529_v32, %v12998_v28  ;;  %v1531_v2 = vpop.f32.mrb[50].mxu1  ;;  %v13089_v55 = vpack.c.bf16 %v2347_v39, %v2339_v6 }
 0x35e   : > { %3595 = vmatmul.mubr.bf16.gmra.mrb[140].mxu0 %v12926_v59  ;;  %v2356_v62 = vmax.f32 %v1721_v26, %v2100_v50  ;;  %v2108_v9 = vmul.f32 0.01, %v1725_v38  ;;  %v2098_v21 = vmul.f32 0.01, %v1528_v13  ;;  %v1532_v7 = vadd.f32 %v1531_v2, %v12992_v27  ;;  %v1533_v8 = vpop.f32.mrb[51].mxu1 }
 0x35f   : > { %3604 = vmatprep.mubr.bf16.mxu0 %v12944_v25  ;;  %v2357_v12 = vmax.f32 %v1723_v52, %v2101_v63  ;;  %v2109_v1 = vmul.f32 0.01, %v1727_v34  ;;  %v2099_v40 = vmul.f32 0.01, %v1530_v53  ;;  %v1534_v22 = vadd.f32 %v1533_v8, %v12998_v28 }
 0x360   : > { %v2364_v18 = vmax.f32 %v1725_v38, %v2108_v9  ;;  %v2354_v49 = vmax.f32 %v1528_v13, %v2098_v21  ;;  %v2106_v44 = vmul.f32 0.01, %v1532_v7 }
 0x361   : > { %v2365_v6 = vmax.f32 %v1727_v34, %v2109_v1  ;;  %v1730_v59 = vpop.f32.mrb[52].mxu0  ;;  %v2355_v26 = vmax.f32 %v1530_v53, %v2099_v40  ;;  %v2107_v39 = vmul.f32 0.01, %v1534_v22 }
 0x362   : > { %v1731_v50 = vadd.f32 %v1730_v59, %v12965_v48  ;;  %v1732_v51 = vpop.f32.mrb[53].mxu0  ;;  %v2362_v25 = vmax.f32 %v1532_v7, %v2106_v44  ;;  %v13098_v52 = vpack.c.bf16 %v2364_v18, %v2356_v62  ;;  %1972 = vmatmul.mubr.bf16.gmra.mrb[136].mxu1 %v12729_v33 }
 0x363   : > { %v1733_v32 = vadd.f32 %v1732_v51, %v12971_v57  ;;  %v1734_v63 = vpop.f32.mrb[54].mxu0  ;;  %v2363_v38 = vmax.f32 %v1534_v22, %v2107_v39  ;;  %v1537_v13 = vpop.f32.mrb[52].mxu1  ;;  %v13101_v2 = vpack.c.bf16 %v2365_v6, %v2357_v12  ;;  %1981 = vmatprep.mubr.bf16.mxu1 %v14965_v0 }
 0x364   : > { %v2116_v11 = vmul.f32 0.01, %v1731_v50  ;;  %v1735_v34 = vadd.f32 %v1734_v63, %v12965_v48  ;;  %v1736_v53 = vpop.f32.mrb[55].mxu0  ;;  %v1538_v9 = vadd.f32 %v1537_v13, %v12992_v27  ;;  %v1539_v21 = vpop.f32.mrb[53].mxu1  ;;  %v13105_v8 = vpack.c.bf16 %v2362_v25, %v2354_v49 }
 0x365   : > { %v2117_v1 = vmul.f32 0.01, %v1733_v32  ;;  %v1737_v62 = vadd.f32 %v1736_v53, %v12971_v57  ;;  %v1540_v7 = vadd.f32 %v1539_v21, %v12998_v28  ;;  %v1541_v40 = vpop.f32.mrb[54].mxu1  ;;  %v13109_v18 = vpack.c.bf16 %v2363_v38, %v2355_v26 }
 0x366   : > { %3605 = vmatmul.mubr.bf16.gmra.mrb[144].mxu0 %v12940_v15  ;;  %v2372_v12 = vmax.f32 %v1731_v50, %v2116_v11  ;;  %v2124_v22 = vmul.f32 0.01, %v1735_v34  ;;  %v2114_v44 = vmul.f32 0.01, %v1538_v9  ;;  %v1542_v6 = vadd.f32 %v1541_v40, %v12992_v27  ;;  %v1543_v59 = vpop.f32.mrb[55].mxu1 }
 0x367   : > { %3614 = vmatprep.mubr.bf16.mxu0 %v12960_v30  ;;  %v2373_v49 = vmax.f32 %v1733_v32, %v2117_v1  ;;  %v2125_v39 = vmul.f32 0.01, %v1737_v62  ;;  %v2115_v51 = vmul.f32 0.01, %v1540_v7  ;;  %v1544_v25 = vadd.f32 %v1543_v59, %v12998_v28 }
 0x368   : > { %v2380_v63 = vmax.f32 %v1735_v34, %v2124_v22  ;;  %v2370_v13 = vmax.f32 %v1538_v9, %v2114_v44  ;;  %v2122_v53 = vmul.f32 0.01, %v1542_v6 }
 0x369   : > { %v2381_v26 = vmax.f32 %v1737_v62, %v2125_v39  ;;  %v1740_v15 = vpop.f32.mrb[56].mxu0  ;;  %v2371_v50 = vmax.f32 %v1540_v7, %v2115_v51  ;;  %v2123_v38 = vmul.f32 0.01, %v1544_v25 }
 0x36a   : > { %v1741_v11 = vadd.f32 %v1740_v15, %v12965_v48  ;;  %v1742_v21 = vpop.f32.mrb[57].mxu0  ;;  %v2378_v30 = vmax.f32 %v1542_v6, %v2122_v53  ;;  %v13118_v32 = vpack.c.bf16 %v2380_v63, %v2372_v12  ;;  %1982 = vmatmul.mubr.bf16.gmra.mrb[140].mxu1 %v12741_v54 }
 0x36b   : > { %v1743_v1 = vadd.f32 %v1742_v21, %v12971_v57  ;;  %v1744_v40 = vpop.f32.mrb[58].mxu0  ;;  %v2379_v34 = vmax.f32 %v1544_v25, %v2123_v38  ;;  %v1547_v9 = vpop.f32.mrb[56].mxu1  ;;  %v13121_v22 = vpack.c.bf16 %v2381_v26, %v2373_v49  ;;  %1991 = vmatprep.mubr.bf16.mxu1 %v14965_v0 }
 0x36c   : > { %v2132_v33 = vmul.f32 0.01, %v1741_v11  ;;  %v1745_v62 = vadd.f32 %v1744_v40, %v12965_v48  ;;  %v1746_v7 = vpop.f32.mrb[59].mxu0  ;;  %v1548_v44 = vadd.f32 %v1547_v9, %v12992_v27  ;;  %v1549_v59 = vpop.f32.mrb[57].mxu1  ;;  %v13125_v39 = vpack.c.bf16 %v2378_v30, %v2370_v13 }
 0x36d   : > { %v2133_v51 = vmul.f32 0.01, %v1743_v1  ;;  %v1747_v12 = vadd.f32 %v1746_v7, %v12971_v57  ;;  %v1550_v6 = vadd.f32 %v1549_v59, %v12998_v28  ;;  %v1551_v63 = vpop.f32.mrb[58].mxu1  ;;  %v13129_v53 = vpack.c.bf16 %v2379_v34, %v2371_v50 }
 0x36e   : > { %3615 = vmatmul.mubr.bf16.gmra.mrb[148].mxu0 %v12956_v29  ;;  %v2388_v49 = vmax.f32 %v1741_v11, %v2132_v33  ;;  %v2140_v25 = vmul.f32 0.01, %v1745_v62  ;;  %v2130_v26 = vmul.f32 0.01, %v1548_v44  ;;  %v1552_v15 = vadd.f32 %v1551_v63, %v12992_v27  ;;  %v1553_v38 = vpop.f32.mrb[59].mxu1 }
 0x36f   : > { %3624 = vmatprep.mubr.bf16.mxu0 %v12986_v4  ;;  %v2389_v13 = vmax.f32 %v1743_v1, %v2133_v51  ;;  %v2141_v21 = vmul.f32 0.01, %v1747_v12  ;;  %v2131_v30 = vmul.f32 0.01, %v1550_v6  ;;  %v1554_v40 = vadd.f32 %v1553_v38, %v12998_v28 }
 0x370   : > { %v2396_v9 = vmax.f32 %v1745_v62, %v2140_v25  ;;  %v2386_v7 = vmax.f32 %v1548_v44, %v2130_v26  ;;  %v2138_v59 = vmul.f32 0.01, %v1552_v15 }
 0x371   : > { %v2397_v50 = vmax.f32 %v1747_v12, %v2141_v21  ;;  %v1750_v29 = vpop.f32.mrb[60].mxu0  ;;  %v2387_v11 = vmax.f32 %v1550_v6, %v2131_v30  ;;  %v2139_v34 = vmul.f32 0.01, %v1554_v40 }
 0x372   : > { %v1751_v33 = vadd.f32 %v1750_v29, %v12965_v48  ;;  %v1752_v63 = vpop.f32.mrb[61].mxu0  ;;  %v2394_v4 = vmax.f32 %v1552_v15, %v2138_v59  ;;  %v13138_v1 = vpack.c.bf16 %v2396_v9, %v2388_v49  ;;  %1992 = vmatmul.mubr.bf16.gmra.mrb[144].mxu1 %v12753_v3 }
 0x373   : > { %v1753_v51 = vadd.f32 %v1752_v63, %v12971_v57  ;;  %v1754_v38 = vpop.f32.mrb[62].mxu0  ;;  %v2395_v62 = vmax.f32 %v1554_v40, %v2139_v34  ;;  %v1557_v44 = vpop.f32.mrb[60].mxu1  ;;  %v13141_v25 = vpack.c.bf16 %v2397_v50, %v2389_v13 }
 0x374   : > { %v2148_v54 = vmul.f32 0.01, %v1751_v33  ;;  %v1755_v12 = vadd.f32 %v1754_v38, %v12965_v48  ;;  %v1756_v6 = vpop.f32.mrb[63].mxu0  ;;  %v1558_v26 = vadd.f32 %v1557_v44, %v12992_v27  ;;  %v1559_v21 = vpop.f32.mrb[61].mxu1  ;;  %v13145_v30 = vpack.c.bf16 %v2394_v4, %v2386_v7 }
 0x375   : > { %v2149_v29 = vmul.f32 0.01, %v1753_v51  ;;  %v1757_v49 = vadd.f32 %v1756_v6, %v12971_v57  ;;  %v1560_v15 = vadd.f32 %v1559_v21, %v12998_v28  ;;  %v1561_v9 = vpop.f32.mrb[62].mxu1  ;;  %v13149_v59 = vpack.c.bf16 %v2395_v62, %v2387_v11 }
 0x376   : > { %3625 = vmatmul.mubr.bf16.gmra.mrb[152].mxu0 %v12982_v47  ;;  %v2404_v13 = vmax.f32 %v1751_v33, %v2148_v54  ;;  %v2156_v40 = vmul.f32 0.01, %v1755_v12  ;;  %v2146_v50 = vmul.f32 0.01, %v1558_v26  ;;  %v1562_v34 = vadd.f32 %v1561_v9, %v12992_v27  ;;  %v1563_v63 = vpop.f32.mrb[63].mxu1 }
 0x377   : > { %3634 = vmatprep.mubr.bf16.mxu0 %v13010_v19  ;;  %v2405_v7 = vmax.f32 %v1753_v51, %v2149_v29  ;;  %v2157_v4 = vmul.f32 0.01, %v1757_v49  ;;  %v2147_v38 = vmul.f32 0.01, %v1560_v15  ;;  %v1564_v44 = vadd.f32 %v1563_v63, %v12998_v28 }
 0x378   : > { %v2412_v6 = vmax.f32 %v1755_v12, %v2156_v40  ;;  %v2402_v21 = vmax.f32 %v1558_v26, %v2146_v50  ;;  %v2154_v0 = vmul.f32 0.01, %v1562_v34  ;;  %v15031_v54 = vmov 0  }
 0x379   : > { %v2413_v11 = vmax.f32 %v1757_v49, %v2157_v4  ;;  %v1760_v47 = vpop.f32.mrb[64].mxu0  ;;  %v2403_v33 = vmax.f32 %v1560_v15, %v2147_v38  ;;  %v2155_v62 = vmul.f32 0.01, %v1564_v44  ;;  %2001 = vmatprep.mubr.bf16.mxu1 %v15031_v54 }
 0x37a   : > { %v1761_v9 = vadd.f32 %v1760_v47, %v12965_v48  ;;  %v1762_v37 = vpop.f32.mrb[65].mxu0  ;;  %v2410_v19 = vmax.f32 %v1562_v34, %v2154_v0  ;;  %v13158_v51 = vpack.c.bf16 %v2412_v6, %v2404_v13  ;;  %2002 = vmatmul.mubr.bf16.gmra.mrb[148].mxu1 %v12765_v10  ;;  %v11303_v10 = vld [vmem:[#allocation8 + $0x214] ss:$8 sps:$4 sm:$0xff]  }
 0x37b   : > { %v1763_v29 = vadd.f32 %v1762_v37, %v12971_v57  ;;  %v1764_v63 = vpop.f32.mrb[66].mxu0  ;;  %v2411_v12 = vmax.f32 %v1564_v44, %v2155_v62  ;;  %v1567_v26 = vpop.f32.mrb[64].mxu1  ;;  %v13161_v40 = vpack.c.bf16 %v2413_v11, %v2405_v7  ;;  %2011 = vmatprep.mubr.bf16.mxu1 %v15031_v54 }
 0x37c   : > { %15032 = vst [vmem:[#allocation48_spill] sm:$0xff] %v13158_v51  ;;  %v2164_v3 = vmul.f32 0.01, %v1761_v9  ;;  %v1765_v49 = vadd.f32 %v1764_v63, %v12965_v48  ;;  %v1766_v15 = vpop.f32.mrb[67].mxu0  ;;  %v1568_v50 = vadd.f32 %v1567_v26, %v12992_v27  ;;  %v1569_v4 = vpop.f32.mrb[65].mxu1  ;;  %v13165_v38 = vpack.c.bf16 %v2410_v19, %v2402_v21 }
 0x37d   : > { %15033 = vst [vmem:[#allocation49_spill] sm:$0xff] %v13161_v40  ;;  %v2165_v47 = vmul.f32 0.01, %v1763_v29  ;;  %v1767_v0 = vadd.f32 %v1766_v15, %v12971_v57  ;;  %v1570_v13 = vadd.f32 %v1569_v4, %v12998_v28  ;;  %v1571_v37 = vpop.f32.mrb[66].mxu1  ;;  %v13169_v34 = vpack.c.bf16 %v2411_v12, %v2403_v33 }
 0x37e   : > { %3635 = vmatmul.mubr.bf16.gmra.mrb[156].mxu0 %v13006_v5  ;;  %v2420_v7 = vmax.f32 %v1761_v9, %v2164_v3  ;;  %v2172_v44 = vmul.f32 0.01, %v1765_v49  ;;  %v2162_v6 = vmul.f32 0.01, %v1568_v50  ;;  %v1572_v11 = vadd.f32 %v1571_v37, %v12992_v27  ;;  %v1573_v62 = vpop.f32.mrb[67].mxu1 }
 0x37f   : > { %3677 = vmatprep.mubr.bf16.mxu0 %v13029_v20  ;;  %v2421_v21 = vmax.f32 %v1763_v29, %v2165_v47  ;;  %v2173_v19 = vmul.f32 0.01, %v1767_v0  ;;  %v2163_v63 = vmul.f32 0.01, %v1570_v13  ;;  %v1574_v26 = vadd.f32 %v1573_v62, %v12998_v28  ;;  %v11298_v47 = vld [vmem:[#allocation8 + $0x200] ss:$8 sps:$4 sm:$0xff]  }
 0x380   : > { %v2428_v15 = vmax.f32 %v1765_v49, %v2172_v44  ;;  %v2418_v4 = vmax.f32 %v1568_v50, %v2162_v6  ;;  %v2170_v51 = vmul.f32 0.01, %v1572_v11 }
 0x381   : > { %v2429_v33 = vmax.f32 %v1767_v0, %v2173_v19  ;;  %v1770_v5 = vpop.f32.mrb[68].mxu0  ;;  %v2419_v9 = vmax.f32 %v1570_v13, %v2163_v63  ;;  %v2171_v12 = vmul.f32 0.01, %v1574_v26 }
 0x382   : > { %v1771_v3 = vadd.f32 %v1770_v5, %v12965_v48  ;;  %v1772_v37 = vpop.f32.mrb[69].mxu0  ;;  %v2426_v20 = vmax.f32 %v1572_v11, %v2170_v51  ;;  %v13178_v29 = vpack.c.bf16 %v2428_v15, %v2420_v7  ;;  %2012 = vmatmul.mubr.bf16.gmra.mrb[152].mxu1 %v12777_v17 }
 0x383   : > { %v1773_v62 = vadd.f32 %v1772_v37, %v12971_v57  ;;  %v1774_v49 = vpop.f32.mrb[70].mxu0  ;;  %v2427_v50 = vmax.f32 %v1574_v26, %v2171_v12  ;;  %v1577_v44 = vpop.f32.mrb[68].mxu1  ;;  %v13181_v6 = vpack.c.bf16 %v2429_v33, %v2421_v21  ;;  %2021 = vmatprep.mubr.bf16.mxu1 %v15031_v54 }
 0x384   : > { %15034 = vst [vmem:[#allocation50_spill] sm:$0xff] %v13178_v29  ;;  %v2180_v0 = vmul.f32 0.01, %v1771_v3  ;;  %v1775_v13 = vadd.f32 %v1774_v49, %v12965_v48  ;;  %v1776_v19 = vpop.f32.mrb[71].mxu0  ;;  %v1578_v63 = vadd.f32 %v1577_v44, %v12992_v27  ;;  %v1579_v5 = vpop.f32.mrb[69].mxu1  ;;  %v13185_v40 = vpack.c.bf16 %v2426_v20, %v2418_v4 }
 0x385   : > { %15035 = vst [vmem:[#allocation51_spill] sm:$0xff] %v13181_v6  ;;  %v2181_v51 = vmul.f32 0.01, %v1773_v62  ;;  %v1777_v7 = vadd.f32 %v1776_v19, %v12971_v57  ;;  %v1580_v11 = vadd.f32 %v1579_v5, %v12998_v28  ;;  %v1581_v15 = vpop.f32.mrb[70].mxu1  ;;  %v13189_v26 = vpack.c.bf16 %v2427_v50, %v2419_v9  ;;  %v11301_v4 = vld [vmem:[#allocation8 + $0x210] ss:$8 sps:$4 sm:$0xff]  }
 0x386   : > { %3678 = vmatmul.mubr.bf16.vlgmr.msra.gmra.mrb[96].mxu0 %v13024_v43  ;;  %v2436_v21 = vmax.f32 %v1771_v3, %v2180_v0  ;;  %v2188_v33 = vmul.f32 0.01, %v1775_v13  ;;  %v2178_v12 = vmul.f32 0.01, %v1578_v63  ;;  %v1582_v37 = vadd.f32 %v1581_v15, %v12992_v27  ;;  %v1583_v49 = vpop.f32.mrb[71].mxu1 }
 0x387   : > { %3839 = vmatpush1.bf16.msra.mxu0 %v11298_v47  ;;  %3687 = vmatprep.mubr.bf16.mxu0 %v13049_v41  ;;  %v2437_v20 = vmax.f32 %v1773_v62, %v2181_v51  ;;  %v2189_v44 = vmul.f32 0.01, %v1777_v7  ;;  %v2179_v19 = vmul.f32 0.01, %v1580_v11  ;;  %v1584_v5 = vadd.f32 %v1583_v49, %v12998_v28  ;;  %v11306_v9 = vld [vmem:[#allocation8 + $0x224] ss:$8 sps:$4 sm:$0xff]  }
 0x388   : > { %3840 = vmatprep.subr.bf16.mxu0 %v11303_v10  ;;  %v2444_v50 = vmax.f32 %v1775_v13, %v2188_v33  ;;  %v2434_v29 = vmax.f32 %v1578_v63, %v2178_v12  ;;  %v2186_v43 = vmul.f32 0.01, %v1582_v37  ;;  %v11304_v10 = vld [vmem:[#allocation8 + $0x220] ss:$8 sps:$4 sm:$0xff]  }
 0x389   : > { %v2445_v3 = vmax.f32 %v1777_v7, %v2189_v44  ;;  %v1780_v0 = vpop.f32.mrb[72].mxu0  ;;  %v2435_v15 = vmax.f32 %v1580_v11, %v2179_v19  ;;  %v2187_v6 = vmul.f32 0.01, %v1584_v5  ;;  %v11309_v7 = vld [vmem:[#allocation8 + $0x234] ss:$8 sps:$4 sm:$0xff]  }
 0x38a   : > { %v1781_v41 = vadd.f32 %v1780_v0, %v12965_v48  ;;  %v1782_v47 = vpop.f32.mrb[73].mxu0  ;;  %v2442_v62 = vmax.f32 %v1582_v37, %v2186_v43  ;;  %v13198_v51 = vpack.c.bf16 %v2444_v50, %v2436_v21  ;;  %2022 = vmatmul.mubr.bf16.gmra.mrb[156].mxu1 %v12789_v23 }
 0x38b   : > { %3841 = vmatpush1.bf16.msra.mxu0 %v11301_v4  ;;  %v1783_v13 = vadd.f32 %v1782_v47, %v12971_v57  ;;  %v1784_v63 = vpop.f32.mrb[74].mxu0  ;;  %v2443_v33 = vmax.f32 %v1584_v5, %v2187_v6  ;;  %v1587_v12 = vpop.f32.mrb[72].mxu1  ;;  %v13201_v17 = vpack.c.bf16 %v2445_v3, %v2437_v20 }
 0x38c   : > { %15036 = vst [vmem:[#allocation52_spill] sm:$0xff] %v13198_v51  ;;  %3842 = vmatprep.subr.bf16.mxu0 %v11306_v9  ;;  %v2196_v11 = vmul.f32 0.01, %v1781_v41  ;;  %v1785_v49 = vadd.f32 %v1784_v63, %v12965_v48  ;;  %v1786_v44 = vpop.f32.mrb[75].mxu0  ;;  %v1588_v19 = vadd.f32 %v1587_v12, %v12992_v27  ;;  %v1589_v37 = vpop.f32.mrb[73].mxu1  ;;  %v13205_v21 = vpack.c.bf16 %v2442_v62, %v2434_v29 }
 0x38d   : > { %v2197_v4 = vmul.f32 0.01, %v1783_v13  ;;  %v1787_v50 = vadd.f32 %v1786_v44, %v12971_v57  ;;  %v1590_v43 = vadd.f32 %v1589_v37, %v12998_v28  ;;  %v1591_v6 = vpop.f32.mrb[74].mxu1  ;;  %v13209_v5 = vpack.c.bf16 %v2443_v33, %v2435_v15  ;;  %v11307_v29 = vld [vmem:[#allocation8 + $0x230] ss:$8 sps:$4 sm:$0xff]  }
 0x38e   : > { %3688 = vmatmul.mubr.bf16.gmra.mrb[100].mxu0 %v13045_v42  ;;  %v2452_v20 = vmax.f32 %v1781_v41, %v2196_v11  ;;  %v2204_v9 = vmul.f32 0.01, %v1785_v49  ;;  %v2194_v3 = vmul.f32 0.01, %v1588_v19  ;;  %v1592_v0 = vadd.f32 %v1591_v6, %v12992_v27  ;;  %v1593_v47 = vpop.f32.mrb[75].mxu1 }
 0x38f   : > { %3697 = vmatprep.mubr.bf16.mxu0 %v13069_v35  ;;  %3843 = vmatpush1.bf16.msra.mxu0 %v11304_v10  ;;  %v2453_v62 = vmax.f32 %v1783_v13, %v2197_v4  ;;  %v2205_v63 = vmul.f32 0.01, %v1787_v50  ;;  %v2195_v12 = vmul.f32 0.01, %v1590_v43  ;;  %v1594_v44 = vadd.f32 %v1593_v47, %v12998_v28  ;;  %v11312_v15 = vld [vmem:[#allocation8 + $0x244] ss:$8 sps:$4 sm:$0xff]  }
 0x390   : > { %3844 = vmatprep.subr.bf16.mxu0 %v11309_v7  ;;  %v2460_v33 = vmax.f32 %v1785_v49, %v2204_v9  ;;  %v2450_v37 = vmax.f32 %v1588_v19, %v2194_v3  ;;  %v2202_v42 = vmul.f32 0.01, %v1592_v0  ;;  %v11310_v4 = vld [vmem:[#allocation8 + $0x240] ss:$8 sps:$4 sm:$0xff]  }
 0x391   : > { %v2461_v41 = vmax.f32 %v1787_v50, %v2205_v63  ;;  %v1790_v11 = vpop.f32.mrb[76].mxu0  ;;  %v2451_v6 = vmax.f32 %v1590_v43, %v2195_v12  ;;  %v2203_v54 = vmul.f32 0.01, %v1594_v44  ;;  %v11315_v50 = vld [vmem:[#allocation8 + $0x254] ss:$8 sps:$4 sm:$0xff]  }
 0x392   : > { %v1791_v35 = vadd.f32 %v1790_v11, %v12965_v48  ;;  %v1792_v10 = vpop.f32.mrb[77].mxu0  ;;  %v2458_v51 = vmax.f32 %v1592_v0, %v2202_v42  ;;  %v13217_v13 = vpack.c.bf16 %v2460_v33, %v2452_v20 }
 0x393   : > { %3845 = vmatpush1.bf16.msra.mxu0 %v11307_v29  ;;  %v1793_v7 = vadd.f32 %v1792_v10, %v12971_v57  ;;  %v1794_v47 = vpop.f32.mrb[78].mxu0  ;;  %v2459_v49 = vmax.f32 %v1594_v44, %v2203_v54  ;;  %v1597_v19 = vpop.f32.mrb[76].mxu1  ;;  %v13220_v9 = vpack.c.bf16 %v2461_v41, %v2453_v62 }
 0x394   : > { %15037 = vst [vmem:[#allocation53_spill] sm:$0xff] %v13217_v13  ;;  %3846 = vmatprep.subr.bf16.mxu0 %v11312_v15  ;;  %v2212_v23 = vmul.f32 0.01, %v1791_v35  ;;  %v1795_v43 = vadd.f32 %v1794_v47, %v12965_v48  ;;  %v1796_v3 = vpop.f32.mrb[79].mxu0  ;;  %v1598_v63 = vadd.f32 %v1597_v19, %v12992_v27  ;;  %v1599_v0 = vpop.f32.mrb[77].mxu1  ;;  %v13224_v20 = vpack.c.bf16 %v2458_v51, %v2450_v37 }
 0x395   : > { %15038 = vst [vmem:[#allocation54_spill] sm:$0xff] %v13220_v9  ;;  %v2213_v29 = vmul.f32 0.01, %v1793_v7  ;;  %v1797_v12 = vadd.f32 %v1796_v3, %v12971_v57  ;;  %v1600_v33 = vadd.f32 %v1599_v0, %v12998_v28  ;;  %v1601_v54 = vpop.f32.mrb[78].mxu1  ;;  %v13228_v44 = vpack.c.bf16 %v2459_v49, %v2451_v6  ;;  %v11313_v37 = vld [vmem:[#allocation8 + $0x250] ss:$8 sps:$4 sm:$0xff]  }
 0x396   : > { %3698 = vmatmul.mubr.bf16.gmra.mrb[104].mxu0 %v13065_v60  ;;  %v2468_v62 = vmax.f32 %v1791_v35, %v2212_v23  ;;  %v2220_v15 = vmul.f32 0.01, %v1795_v43  ;;  %v2210_v42 = vmul.f32 0.01, %v1598_v63  ;;  %v1602_v41 = vadd.f32 %v1601_v54, %v12992_v27  ;;  %v1603_v11 = vpop.f32.mrb[79].mxu1 }
 0x397   : > { %3707 = vmatprep.mubr.bf16.mxu0 %v13089_v55  ;;  %3847 = vmatpush1.bf16.msra.mxu0 %v11310_v4  ;;  %v2469_v51 = vmax.f32 %v1793_v7, %v2213_v29  ;;  %v2221_v10 = vmul.f32 0.01, %v1797_v12  ;;  %v2211_v47 = vmul.f32 0.01, %v1600_v33  ;;  %v1604_v19 = vadd.f32 %v1603_v11, %v12998_v28  ;;  %v11318_v49 = vld [vmem:[#allocation8 + $0x264] ss:$8 sps:$4 sm:$0xff]  }
 0x398   : > { %3848 = vmatprep.subr.bf16.mxu0 %v11315_v50  ;;  %v2476_v6 = vmax.f32 %v1795_v43, %v2220_v15  ;;  %v2466_v3 = vmax.f32 %v1598_v63, %v2210_v42  ;;  %v2218_v60 = vmul.f32 0.01, %v1602_v41  ;;  %v11316_v29 = vld [vmem:[#allocation8 + $0x260] ss:$8 sps:$4 sm:$0xff]   ;;  %v11321_v42 = vld [vmem:[#allocation8 + $0x274] ss:$8 sps:$4 sm:$0xff]  }
 0x399   : > { %v2477_v35 = vmax.f32 %v1797_v12, %v2221_v10  ;;  %v1800_v23 = vpop.f32.mrb[80].mxu0  ;;  %v2467_v0 = vmax.f32 %v1600_v33, %v2211_v47  ;;  %v2219_v13 = vmul.f32 0.01, %v1604_v19 }
 0x39a   : > { %v1801_v54 = vadd.f32 %v1800_v23, %v12965_v48  ;;  %v1802_v9 = vpop.f32.mrb[81].mxu0  ;;  %v2474_v55 = vmax.f32 %v1602_v41, %v2218_v60  ;;  %v13235_v4 = vpack.c.bf16 %v2476_v6, %v2468_v62 }
 0x39b   : > { %3849 = vmatpush1.bf16.msra.mxu0 %v11313_v37  ;;  %v1803_v7 = vadd.f32 %v1802_v9, %v12971_v57  ;;  %v1804_v11 = vpop.f32.mrb[82].mxu0  ;;  %v2475_v50 = vmax.f32 %v1604_v19, %v2219_v13  ;;  %v1607_v43 = vpop.f32.mrb[80].mxu1  ;;  %v13238_v15 = vpack.c.bf16 %v2477_v35, %v2469_v51 }
 0x39c   : > { %15039 = vst [vmem:[#allocation55_spill] sm:$0xff] %v13235_v4  ;;  %v2228_v63 = vmul.f32 0.01, %v1801_v54  ;;  %3850 = vmatprep.subr.bf16.mxu0 %v11318_v49  ;;  %v1805_v12 = vadd.f32 %v1804_v11, %v12965_v48  ;;  %v1806_v33 = vpop.f32.mrb[83].mxu0  ;;  %v1608_v10 = vadd.f32 %v1607_v43, %v12992_v27  ;;  %v1609_v41 = vpop.f32.mrb[81].mxu1  ;;  %v13242_v62 = vpack.c.bf16 %v2474_v55, %v2466_v3 }
 0x39d   : > { %15040 = vst [vmem:[#allocation56_spill] sm:$0xff] %v13238_v15  ;;  %v2229_v37 = vmul.f32 0.01, %v1803_v7  ;;  %v1807_v9 = vadd.f32 %v1806_v33, %v12971_v57  ;;  %v1610_v47 = vadd.f32 %v1609_v41, %v12998_v28  ;;  %v1611_v13 = vpop.f32.mrb[82].mxu1  ;;  %v13246_v19 = vpack.c.bf16 %v2475_v50, %v2467_v0  ;;  %v11319_v55 = vld [vmem:[#allocation8 + $0x270] ss:$8 sps:$4 sm:$0xff]  }
 0x39e   : > { %3708 = vmatmul.mubr.bf16.gmra.mrb[108].mxu0 %v13085_v56  ;;  %v2484_v51 = vmax.f32 %v1801_v54, %v2228_v63  ;;  %v2236_v6 = vmul.f32 0.01, %v1805_v12  ;;  %v2226_v49 = vmul.f32 0.01, %v1608_v10  ;;  %v1612_v60 = vadd.f32 %v1611_v13, %v12992_v27  ;;  %v1613_v35 = vpop.f32.mrb[83].mxu1 }
 0x39f   : > { %3717 = vmatprep.mubr.bf16.mxu0 %v13109_v18  ;;  %v2485_v3 = vmax.f32 %v1803_v7, %v2229_v37  ;;  %3851 = vmatpush1.bf16.msra.mxu0 %v11316_v29  ;;  %v2237_v23 = vmul.f32 0.01, %v1807_v9  ;;  %v2227_v11 = vmul.f32 0.01, %v1610_v47  ;;  %v1614_v43 = vadd.f32 %v1613_v35, %v12998_v28  ;;  %v11324_v0 = vld [vmem:[#allocation8 + $0x284] ss:$8 sps:$4 sm:$0xff]  }
 0x3a0   : > { %v2492_v33 = vmax.f32 %v1805_v12, %v2236_v6  ;;  %3852 = vmatprep.subr.bf16.mxu0 %v11321_v42  ;;  %v2482_v50 = vmax.f32 %v1608_v10, %v2226_v49  ;;  %v2234_v56 = vmul.f32 0.01, %v1612_v60  ;;  %v11322_v35 = vld [vmem:[#allocation8 + $0x280] ss:$8 sps:$4 sm:$0xff]   ;;  %v11327_v49 = vld [vmem:[#allocation8 + $0x294] ss:$8 sps:$4 sm:$0xff]  }
 0x3a1   : > { %v2493_v54 = vmax.f32 %v1807_v9, %v2237_v23  ;;  %v1810_v63 = vpop.f32.mrb[84].mxu0  ;;  %v2483_v41 = vmax.f32 %v1610_v47, %v2227_v11  ;;  %v2235_v4 = vmul.f32 0.01, %v1614_v43 }
 0x3a2   : > { %v1811_v13 = vadd.f32 %v1810_v63, %v12965_v48  ;;  %v1812_v15 = vpop.f32.mrb[85].mxu0  ;;  %v2490_v18 = vmax.f32 %v1612_v60, %v2234_v56  ;;  %v13253_v7 = vpack.c.bf16 %v2492_v33, %v2484_v51 }
 0x3a3   : > { %v1813_v29 = vadd.f32 %v1812_v15, %v12971_v57  ;;  %v1814_v37 = vpop.f32.mrb[86].mxu0  ;;  %3853 = vmatpush1.bf16.msra.mxu0 %v11319_v55  ;;  %v2491_v12 = vmax.f32 %v1614_v43, %v2235_v4  ;;  %v1617_v42 = vpop.f32.mrb[84].mxu1  ;;  %v13256_v6 = vpack.c.bf16 %v2493_v54, %v2485_v3 }
 0x3a4   : > { %15041 = vst [vmem:[#allocation57_spill] sm:$0xff] %v13253_v7  ;;  %v2244_v10 = vmul.f32 0.01, %v1811_v13  ;;  %v1815_v9 = vadd.f32 %v1814_v37, %v12965_v48  ;;  %v1816_v47 = vpop.f32.mrb[87].mxu0  ;;  %3854 = vmatprep.subr.bf16.mxu0 %v11324_v0  ;;  %v1618_v23 = vadd.f32 %v1617_v42, %v12992_v27  ;;  %v1619_v60 = vpop.f32.mrb[85].mxu1  ;;  %v13260_v51 = vpack.c.bf16 %v2490_v18, %v2482_v50 }
 0x3a5   : > { %15042 = vst [vmem:[#allocation58_spill] sm:$0xff] %v13256_v6  ;;  %v2245_v11 = vmul.f32 0.01, %v1813_v29  ;;  %v1817_v15 = vadd.f32 %v1816_v47, %v12971_v57  ;;  %v1620_v55 = vadd.f32 %v1619_v60, %v12998_v28  ;;  %v1621_v4 = vpop.f32.mrb[86].mxu1  ;;  %v13264_v43 = vpack.c.bf16 %v2491_v12, %v2483_v41  ;;  %v11325_v18 = vld [vmem:[#allocation8 + $0x290] ss:$8 sps:$4 sm:$0xff]  }
 0x3a6   : > { %3718 = vmatmul.mubr.bf16.gmra.mrb[112].mxu0 %v13105_v8  ;;  %v2500_v3 = vmax.f32 %v1811_v13, %v2244_v10  ;;  %v2252_v33 = vmul.f32 0.01, %v1815_v9  ;;  %v2242_v56 = vmul.f32 0.01, %v1618_v23  ;;  %v1622_v0 = vadd.f32 %v1621_v4, %v12992_v27  ;;  %v1623_v54 = vpop.f32.mrb[87].mxu1 }
 0x3a7   : > { %3727 = vmatprep.mubr.bf16.mxu0 %v13129_v53  ;;  %v2501_v50 = vmax.f32 %v1813_v29, %v2245_v11  ;;  %v2253_v63 = vmul.f32 0.01, %v1817_v15  ;;  %3855 = vmatpush1.bf16.msra.mxu0 %v11322_v35  ;;  %v2243_v37 = vmul.f32 0.01, %v1620_v55  ;;  %v1624_v42 = vadd.f32 %v1623_v54, %v12998_v28  ;;  %v11330_v41 = vld [vmem:[#allocation8 + $0x2a4] ss:$8 sps:$4 sm:$0xff]  }
 0x3a8   : > { %v2508_v47 = vmax.f32 %v1815_v9, %v2252_v33  ;;  %3856 = vmatprep.subr.bf16.mxu0 %v11327_v49  ;;  %v2498_v12 = vmax.f32 %v1618_v23, %v2242_v56  ;;  %v2250_v8 = vmul.f32 0.01, %v1622_v0  ;;  %v11328_v54 = vld [vmem:[#allocation8 + $0x2a0] ss:$8 sps:$4 sm:$0xff]   ;;  %v11333_v56 = vld [vmem:[#allocation8 + $0x2b4] ss:$8 sps:$4 sm:$0xff]  }
 0x3a9   : > { %v2509_v13 = vmax.f32 %v1817_v15, %v2253_v63  ;;  %v1820_v10 = vpop.f32.mrb[88].mxu0  ;;  %v2499_v60 = vmax.f32 %v1620_v55, %v2243_v37  ;;  %v2251_v7 = vmul.f32 0.01, %v1624_v42 }
 0x3aa   : > { %v1821_v4 = vadd.f32 %v1820_v10, %v12965_v48  ;;  %v1822_v6 = vpop.f32.mrb[89].mxu0  ;;  %v2506_v53 = vmax.f32 %v1622_v0, %v2250_v8  ;;  %v13271_v29 = vpack.c.bf16 %v2508_v47, %v2500_v3 }
 0x3ab   : > { %v1823_v35 = vadd.f32 %v1822_v6, %v12971_v57  ;;  %v1824_v11 = vpop.f32.mrb[90].mxu0  ;;  %3857 = vmatpush1.bf16.msra.mxu0 %v11325_v18  ;;  %v2507_v9 = vmax.f32 %v1624_v42, %v2251_v7  ;;  %v1627_v49 = vpop.f32.mrb[88].mxu1  ;;  %v13274_v33 = vpack.c.bf16 %v2509_v13, %v2501_v50 }
 0x3ac   : > { %15043 = vst [vmem:[#allocation59_spill] sm:$0xff] %v13271_v29  ;;  %v2260_v23 = vmul.f32 0.01, %v1821_v4  ;;  %v1825_v15 = vadd.f32 %v1824_v11, %v12965_v48  ;;  %v1826_v55 = vpop.f32.mrb[91].mxu0  ;;  %3858 = vmatprep.subr.bf16.mxu0 %v11330_v41  ;;  %v1628_v63 = vadd.f32 %v1627_v49, %v12992_v27  ;;  %v1629_v0 = vpop.f32.mrb[89].mxu1  ;;  %v13278_v3 = vpack.c.bf16 %v2506_v53, %v2498_v12 }
 0x3ad   : > { %15044 = vst [vmem:[#allocation60_spill] sm:$0xff] %v13274_v33  ;;  %v2261_v37 = vmul.f32 0.01, %v1823_v35  ;;  %v1827_v6 = vadd.f32 %v1826_v55, %v12971_v57  ;;  %v1630_v18 = vadd.f32 %v1629_v0, %v12998_v28  ;;  %v1631_v7 = vpop.f32.mrb[90].mxu1  ;;  %v13282_v42 = vpack.c.bf16 %v2507_v9, %v2499_v60  ;;  %v11331_v53 = vld [vmem:[#allocation8 + $0x2b0] ss:$8 sps:$4 sm:$0xff]  }
 0x3ae   : > { %3728 = vmatmul.mubr.bf16.gmra.mrb[116].mxu0 %v13125_v39  ;;  %v2516_v50 = vmax.f32 %v1821_v4, %v2260_v23  ;;  %v2268_v47 = vmul.f32 0.01, %v1825_v15  ;;  %v2258_v8 = vmul.f32 0.01, %v1628_v63  ;;  %v1632_v41 = vadd.f32 %v1631_v7, %v12992_v27  ;;  %v1633_v13 = vpop.f32.mrb[91].mxu1 }
 0x3af   : > { %3737 = vmatprep.mubr.bf16.mxu0 %v13149_v59  ;;  %v2517_v12 = vmax.f32 %v1823_v35, %v2261_v37  ;;  %v2269_v10 = vmul.f32 0.01, %v1827_v6  ;;  %3859 = vmatpush1.bf16.msra.mxu0 %v11328_v54  ;;  %v2259_v11 = vmul.f32 0.01, %v1630_v18  ;;  %v1634_v49 = vadd.f32 %v1633_v13, %v12998_v28  ;;  %v11336_v9 = vld [vmem:[#allocation8 + $0x2c4] ss:$8 sps:$4 sm:$0xff]  }
 0x3b0   : > { %v2524_v55 = vmax.f32 %v1825_v15, %v2268_v47  ;;  %3860 = vmatprep.subr.bf16.mxu0 %v11333_v56  ;;  %v2514_v60 = vmax.f32 %v1628_v63, %v2258_v8  ;;  %v2266_v39 = vmul.f32 0.01, %v1632_v41  ;;  %v11334_v13 = vld [vmem:[#allocation8 + $0x2c0] ss:$8 sps:$4 sm:$0xff]  }
 0x3b1   : > { %v2525_v4 = vmax.f32 %v1827_v6, %v2269_v10  ;;  %v1830_v23 = vpop.f32.mrb[92].mxu0  ;;  %v2515_v0 = vmax.f32 %v1630_v18, %v2259_v11  ;;  %v2267_v29 = vmul.f32 0.01, %v1634_v49 }
 0x3b2   : > { %v1831_v7 = vadd.f32 %v1830_v23, %v12965_v48  ;;  %v1832_v33 = vpop.f32.mrb[93].mxu0  ;;  %v2522_v59 = vmax.f32 %v1632_v41, %v2266_v39  ;;  %v13289_v35 = vpack.c.bf16 %v2524_v55, %v2516_v50  ;;  %v11339_v41 = vld [vmem:[#allocation8 + $0x2d4] ss:$8 sps:$4 sm:$0xff]  }
 0x3b3   : > { %v1833_v54 = vadd.f32 %v1832_v33, %v12971_v57  ;;  %v1834_v37 = vpop.f32.mrb[94].mxu0  ;;  %3861 = vmatpush1.bf16.msra.mxu0 %v11331_v53  ;;  %v2523_v15 = vmax.f32 %v1634_v49, %v2267_v29  ;;  %v1637_v56 = vpop.f32.mrb[92].mxu1  ;;  %v13292_v63 = vpack.c.bf16 %v2525_v4, %v2517_v12 }
 0x3b4   : > { %v2276_v47 = vmul.f32 0.01, %v1831_v7  ;;  %v1835_v6 = vadd.f32 %v1834_v37, %v12965_v48  ;;  %v1836_v18 = vpop.f32.mrb[95].mxu0  ;;  %3862 = vmatprep.subr.bf16.mxu0 %v11336_v9  ;;  %v1638_v8 = vadd.f32 %v1637_v56, %v12992_v27  ;;  %v1639_v10 = vpop.f32.mrb[93].mxu1  ;;  %v13296_v50 = vpack.c.bf16 %v2522_v59, %v2514_v60  ;;  %v11337_v59 = vld [vmem:[#allocation8 + $0x2d0] ss:$8 sps:$4 sm:$0xff]  }
 0x3b5   : > { %v2277_v11 = vmul.f32 0.01, %v1833_v54  ;;  %v1837_v33 = vadd.f32 %v1836_v18, %v12971_v57  ;;  %v1640_v53 = vadd.f32 %v1639_v10, %v12998_v28  ;;  %v1641_v29 = vpop.f32.mrb[94].mxu1  ;;  %v2659_v49 = vpack.c.bf16 %v2523_v15, %v2515_v0 }
 0x3b6   : > { %3738 = vmatmul.mubr.bf16.gmra.mrb[120].mxu0 %v13145_v30  ;;  %v2532_v12 = vmax.f32 %v1831_v7, %v2276_v47  ;;  %v2284_v55 = vmul.f32 0.01, %v1835_v6  ;;  %v2274_v48 = vmul.f32 0.01, %v1638_v8  ;;  %v1642_v9 = vadd.f32 %v1641_v29, %v12992_v27  ;;  %v1643_v39 = vpop.f32.mrb[95].mxu1 }
 0x3b7   : > { %3747 = vmatprep.mubr.bf16.mxu0 %v13169_v34  ;;  %v2533_v4 = vmax.f32 %v1833_v54, %v2277_v11  ;;  %v2285_v60 = vmul.f32 0.01, %v1837_v33  ;;  %3863 = vmatpush1.bf16.msra.mxu0 %v11334_v13  ;;  %v2275_v23 = vmul.f32 0.01, %v1640_v53  ;;  %v1644_v57 = vadd.f32 %v1643_v39, %v12998_v28  ;;  %v11342_v30 = vld [vmem:[#allocation8 + $0x2e4] ss:$8 sps:$4 sm:$0xff]  }
 0x3b8   : > { %v2540_v37 = vmax.f32 %v1835_v6, %v2284_v55  ;;  %v2530_v56 = vmax.f32 %v1638_v8, %v2274_v48  ;;  %3864 = vmatprep.subr.bf16.mxu0 %v11339_v41  ;;  %v2282_v0 = vmul.f32 0.01, %v1642_v9  ;;  %v11340_v54 = vld [vmem:[#allocation8 + $0x2e0] ss:$8 sps:$4 sm:$0xff]   ;;  %v11345_v13 = vld [vmem:[#allocation8 + $0x2f4] ss:$8 sps:$4 sm:$0xff]  }
 0x3b9   : > { %v2541_v7 = vmax.f32 %v1837_v33, %v2285_v60  ;;  %v2531_v15 = vmax.f32 %v1640_v53, %v2275_v23  ;;  %v2283_v47 = vmul.f32 0.01, %v1644_v57  ;;  %v11343_v6 = vld [vmem:[#allocation8 + $0x2f0] ss:$8 sps:$4 sm:$0xff]   ;;  %v11348_v8 = vld [vmem:[#allocation8 + $0x304] ss:$8 sps:$4 sm:$0xff]  }
 0x3ba   : > { %v2538_v18 = vmax.f32 %v1642_v9, %v2282_v0  ;;  %v13304_v27 = vpack.c.bf16 %v2540_v37, %v2532_v12 }
 0x3bb   : > { %3865 = vmatpush1.bf16.msra.mxu0 %v11337_v59  ;;  %v2539_v34 = vmax.f32 %v1644_v57, %v2283_v47  ;;  %v13306_v10 = vpack.c.bf16 %v2541_v7, %v2533_v4 }
 0x3bc   : > { %3866 = vmatprep.subr.bf16.mxu0 %v11342_v30  ;;  %v2666_v11 = vpack.c.bf16 %v2538_v18, %v2530_v56 }
 0x3bd   : > { %v2667_v28 = vpack.c.bf16 %v2539_v34, %v2531_v15 }
 0x3be   : > { %3748 = vmatmul.mubr.bf16.gmra.mrb[124].mxu0 %v13165_v38 }
 0x3bf   : > { %3757 = vmatprep.mubr.bf16.mxu0 %v13189_v26  ;;  %3867 = vmatpush1.bf16.msra.mxu0 %v11340_v54  ;;  %v930_v26 = vsub.s32 7, %v12858_v31 }
 0x3c0   : > { %3868 = vmatprep.subr.bf16.mxu0 %v11345_v13 }
 0x3c3   : > { %3869 = vmatpush1.bf16.msra.mxu0 %v11343_v6 }
 0x3c4   : > { %4031 = vmatprep.subr.bf16.mxu0 %v11348_v8 }
 0x3c6   : > { %3758 = vmatmul.mubr.bf16.gmra.mrb[128].mxu0 %v13185_v40  ;;  %v926_v40 = vsub.s32 6, %v12858_v31 }
 0x3c7   : > { %3767 = vmatprep.mubr.bf16.mxu0 %v13209_v5  ;;  %v11498_v5 = vld [vmem:[#allocation7] sm:$0xff] }
 0x3ce   : > { %3768 = vmatmul.mubr.bf16.gmra.mrb[132].mxu0 %v13205_v21 }
 0x3cf   : > { %3777 = vmatprep.mubr.bf16.mxu0 %v13228_v44  ;;  %v13329_v44 = vrot.slane %v11498_v5, %v930_v26 }
 0x3d6   : > { %3778 = vmatmul.mubr.bf16.gmra.mrb[136].mxu0 %v13224_v20  ;;  %v13325_v20 = vrot.slane %v11498_v5, %v926_v40  ;;  %v11351_v5 = vld [vmem:[#allocation8 + $0x314] ss:$8 sps:$4 sm:$0xff]  }
 0x3d7   : > { %3787 = vmatprep.mubr.bf16.mxu0 %v13246_v19 }
 0x3de   : > { %3788 = vmatmul.mubr.bf16.gmra.mrb[140].mxu0 %v13242_v62 }
 0x3df   : > { %3797 = vmatprep.mubr.bf16.mxu0 %v13264_v43 }
 0x3e5   : > { %v1873_v38 = vpop.f32.mrb[96].mxu1 }
 0x3e6   : > { %3798 = vmatmul.mubr.bf16.gmra.mrb[144].mxu0 %v13260_v51  ;;  %v1875_v21 = vpop.f32.mrb[97].mxu1  ;;  %v1874_v19 = vadd.f32 %v1873_v38, %v13325_v20  ;;  %v11346_v38 = vld [vmem:[#allocation8 + $0x300] ss:$8 sps:$4 sm:$0xff]  }
 0x3e7   : > { %3807 = vmatprep.mubr.bf16.mxu0 %v13282_v42  ;;  %v1877_v62 = vpop.f32.mrb[98].mxu1  ;;  %v1876_v51 = vadd.f32 %v1875_v21, %v13329_v44 }
 0x3e8   : > { %v1878_v43 = vadd.f32 %v1877_v62, %v13325_v20  ;;  %v1879_v33 = vpop.f32.mrb[99].mxu1 }
 0x3e9   : > { %v2039_v41 = vmul.f32 0.01, %v1876_v51 }
 0x3ea   : > { %v2046_v42 = vmul.f32 0.01, %v1878_v43 }
 0x3eb   : > { %v2295_v60 = vmax.f32 %v1876_v51, %v2039_v41 }
 0x3ec   : > { %v2302_v29 = vmax.f32 %v1878_v43, %v2046_v42  ;;  %v11349_v42 = vld [vmem:[#allocation8 + $0x310] ss:$8 sps:$4 sm:$0xff]  }
 0x3ed   : > { %v1883_v12 = vpop.f32.mrb[100].mxu1 }
 0x3ee   : > { %3808 = vmatmul.mubr.bf16.gmra.mrb[148].mxu0 %v13278_v3  ;;  %v2038_v3 = vmul.f32 0.01, %v1874_v19  ;;  %v1885_v55 = vpop.f32.mrb[101].mxu1  ;;  %v1884_v39 = vadd.f32 %v1883_v12, %v13325_v20 }
 0x3ef   : > { %3817 = vmatprep.mubr.bf16.mxu0 %v2659_v49  ;;  %v1880_v49 = vadd.f32 %v1879_v33, %v13329_v44  ;;  %v1887_v4 = vpop.f32.mrb[102].mxu1  ;;  %v1886_v23 = vadd.f32 %v1885_v55, %v13329_v44 }
 0x3f0   : > { %v2294_v53 = vmax.f32 %v1874_v19, %v2038_v3  ;;  %v2054_v57 = vmul.f32 0.01, %v1884_v39  ;;  %v1889_v0 = vpop.f32.mrb[103].mxu1 }
 0x3f1   : > { %v2047_v9 = vmul.f32 0.01, %v1880_v49  ;;  %v2055_v37 = vmul.f32 0.01, %v1886_v23  ;;  %v1890_v7 = vadd.f32 %v1889_v0, %v13329_v44 }
 0x3f2   : > { %v13336_v48 = vpack.c.bf16 %v2302_v29, %v2294_v53  ;;  %v2310_v18 = vmax.f32 %v1884_v39, %v2054_v57  ;;  %v11354_v53 = vld [vmem:[#allocation8 + $0x324] ss:$8 sps:$4 sm:$0xff]  }
 0x3f3   : > { %v2303_v59 = vmax.f32 %v1880_v49, %v2047_v9  ;;  %v2063_v34 = vmul.f32 0.01, %v1890_v7 }
 0x3f5   : > { %v13341_v30 = vpack.c.bf16 %v2303_v59, %v2295_v60  ;;  %v1893_v15 = vpop.f32.mrb[104].mxu1  ;;  %v2319_v21 = vmax.f32 %v1890_v7, %v2063_v34  ;;  %v11360_v34 = vld [vmem:[#allocation8 + $0x344] ss:$8 sps:$4 sm:$0xff]  }
 0x3f6   : > { %3818 = vmatmul.mubr.bf16.gmra.mrb[152].mxu0 %v13296_v50  ;;  %v1888_v50 = vadd.f32 %v1887_v4, %v13325_v20  ;;  %v1895_v47 = vpop.f32.mrb[105].mxu1  ;;  %v1894_v54 = vadd.f32 %v1893_v15, %v13325_v20  ;;  %v11355_v15 = vld [vmem:[#allocation8 + $0x330] ss:$8 sps:$4 sm:$0xff]  }
 0x3f7   : > { %3827 = vmatprep.mubr.bf16.mxu0 %v2667_v28  ;;  %v1897_v13 = vpop.f32.mrb[106].mxu1  ;;  %v2311_v28 = vmax.f32 %v1886_v23, %v2055_v37 }
 0x3f8   : > { %v2062_v56 = vmul.f32 0.01, %v1888_v50  ;;  %v1898_v8 = vadd.f32 %v1897_v13, %v13325_v20  ;;  %v2070_v62 = vmul.f32 0.01, %v1894_v54  ;;  %v1899_v51 = vpop.f32.mrb[107].mxu1 }
 0x3f9   : > { %v13349_v43 = vpack.c.bf16 %v2319_v21, %v2311_v28  ;;  %v1900_v41 = vadd.f32 %v1899_v51, %v13329_v44 }
 0x3fa   : > { %v2318_v6 = vmax.f32 %v1888_v50, %v2062_v56  ;;  %v2078_v19 = vmul.f32 0.01, %v1898_v8  ;;  %v2326_v49 = vmax.f32 %v1894_v54, %v2070_v62  ;;  %v11357_v50 = vld [vmem:[#allocation8 + $0x334] ss:$8 sps:$4 sm:$0xff]  }
 0x3fb   : > { %v2079_v12 = vmul.f32 0.01, %v1900_v41  ;;  %v11363_v62 = vld [vmem:[#allocation8 + $0x354] ss:$8 sps:$4 sm:$0xff]  }
 0x3fc   : > { %v13351_v3 = vpack.c.bf16 %v2318_v6, %v2310_v18  ;;  %v2334_v39 = vmax.f32 %v1898_v8, %v2078_v19 }
 0x3fd   : > { %v1903_v33 = vpop.f32.mrb[108].mxu1  ;;  %v2335_v23 = vmax.f32 %v1900_v41, %v2079_v12  ;;  %v11366_v12 = vld [vmem:[#allocation8 + $0x364] ss:$8 sps:$4 sm:$0xff]  }
 0x3fe   : > { %3828 = vmatmul.mubr.bf16.gmra.mrb[156].mxu0 %v2666_v11  ;;  %v1896_v11 = vadd.f32 %v1895_v47, %v13329_v44  ;;  %v1905_v29 = vpop.f32.mrb[109].mxu1  ;;  %v13361_v7 = vpack.c.bf16 %v2334_v39, %v2326_v49 }
 0x3ff   : > { %3870 = vmatprep.mubr.bf16.mxu0 %v13021_v45  ;;  %v1907_v55 = vpop.f32.mrb[110].mxu1  ;;  %v1906_v4 = vadd.f32 %v1905_v29, %v13329_v44 }
 0x400   : > { %v2071_v45 = vmul.f32 0.01, %v1896_v11  ;;  %v1908_v60 = vadd.f32 %v1907_v55, %v13325_v20  ;;  %v1909_v56 = vpop.f32.mrb[111].mxu1 }
 0x401   : > { %v2087_v57 = vmul.f32 0.01, %v1906_v4  ;;  %v1910_v47 = vadd.f32 %v1909_v56, %v13329_v44 }
 0x402   : > { %v2327_v9 = vmax.f32 %v1896_v11, %v2071_v45  ;;  %v2094_v37 = vmul.f32 0.01, %v1908_v60 }
 0x403   : > { %v2095_v28 = vmul.f32 0.01, %v1910_v47  ;;  %v2343_v11 = vmax.f32 %v1906_v4, %v2087_v57 }
 0x404   : > { %v13359_v0 = vpack.c.bf16 %v2335_v23, %v2327_v9  ;;  %v2350_v8 = vmax.f32 %v1908_v60, %v2094_v37 }
 0x405   : > { %v1913_v18 = vpop.f32.mrb[112].mxu1 }
 0x406   : > { %3871 = vmatmul.mubr.bf16.vlgmr.msra.gmra.mrb[96].mxu0 %v13017_v61  ;;  %v1904_v61 = vadd.f32 %v1903_v33, %v13325_v20  ;;  %v1915_v54 = vpop.f32.mrb[113].mxu1 }
 0x407   : > { %4032 = vmatpush1.bf16.msra.mxu0 %v11346_v38  ;;  %3880 = vmatprep.mubr.bf16.mxu0 %v13041_v36  ;;  %v11352_v36 = vld [vmem:[#allocation8 + $0x320] ss:$8 sps:$4 sm:$0xff]   ;;  %v1917_v6 = vpop.f32.mrb[114].mxu1  ;;  %v1916_v38 = vadd.f32 %v1915_v54, %v13329_v44 }
 0x408   : > { %4033 = vmatprep.subr.bf16.mxu0 %v11351_v5  ;;  %v2086_v59 = vmul.f32 0.01, %v1904_v61  ;;  %v1918_v21 = vadd.f32 %v1917_v6, %v13325_v20  ;;  %v2351_v5 = vmax.f32 %v1910_v47, %v2095_v28  ;;  %v11372_v28 = vld [vmem:[#allocation8 + $0x384] ss:$8 sps:$4 sm:$0xff]  }
 0x409   : > { %v2103_v19 = vmul.f32 0.01, %v1916_v38 }
 0x40a   : > { %v2342_v13 = vmax.f32 %v1904_v61, %v2086_v59  ;;  %v2110_v51 = vmul.f32 0.01, %v1918_v21  ;;  %v13369_v41 = vpack.c.bf16 %v2351_v5, %v2343_v11  ;;  %v11369_v59 = vld [vmem:[#allocation8 + $0x374] ss:$8 sps:$4 sm:$0xff]  }
 0x40b   : > { %4034 = vmatpush1.bf16.msra.mxu0 %v11349_v42  ;;  %v1919_v42 = vpop.f32.mrb[115].mxu1  ;;  %v2359_v4 = vmax.f32 %v1916_v38, %v2103_v19 }
 0x40c   : > { %4035 = vmatprep.subr.bf16.mxu0 %v11354_v53  ;;  %v13371_v33 = vpack.c.bf16 %v2350_v8, %v2342_v13  ;;  %v11361_v53 = vld [vmem:[#allocation8 + $0x350] ss:$8 sps:$4 sm:$0xff]   ;;  %v1920_v29 = vadd.f32 %v1919_v42, %v13329_v44  ;;  %v2366_v60 = vmax.f32 %v1918_v21, %v2110_v51 }
 0x40d   : > { %v1923_v49 = vpop.f32.mrb[116].mxu1 }
 0x40e   : > { %3881 = vmatmul.mubr.bf16.gmra.mrb[100].mxu0 %v13038_v46  ;;  %v1914_v46 = vadd.f32 %v1913_v18, %v13325_v20  ;;  %v1925_v61 = vpop.f32.mrb[117].mxu1  ;;  %v2111_v9 = vmul.f32 0.01, %v1920_v29 }
 0x40f   : > { %3890 = vmatprep.mubr.bf16.mxu0 %v13061_v24  ;;  %4036 = vmatpush1.bf16.msra.mxu0 %v11352_v36  ;;  %v11358_v24 = vld [vmem:[#allocation8 + $0x340] ss:$8 sps:$4 sm:$0xff]   ;;  %v1927_v39 = vpop.f32.mrb[118].mxu1  ;;  %v1926_v36 = vadd.f32 %v1925_v61, %v13329_v44 }
 0x410   : > { %4037 = vmatprep.subr.bf16.mxu0 %v11357_v50  ;;  %v2102_v45 = vmul.f32 0.01, %v1914_v46  ;;  %v1928_v23 = vadd.f32 %v1927_v39, %v13325_v20  ;;  %v2367_v50 = vmax.f32 %v1920_v29, %v2111_v9  ;;  %v11378_v9 = vld [vmem:[#allocation8 + $0x3a4] ss:$8 sps:$4 sm:$0xff]  }
 0x411   : > { %v2119_v37 = vmul.f32 0.01, %v1926_v36 }
 0x412   : > { %v2358_v55 = vmax.f32 %v1914_v46, %v2102_v45  ;;  %v2126_v56 = vmul.f32 0.01, %v1928_v23  ;;  %v13379_v47 = vpack.c.bf16 %v2367_v50, %v2359_v4  ;;  %v11375_v45 = vld [vmem:[#allocation8 + $0x394] ss:$8 sps:$4 sm:$0xff]  }
 0x413   : > { %4038 = vmatpush1.bf16.msra.mxu0 %v11355_v15  ;;  %v1929_v15 = vpop.f32.mrb[119].mxu1  ;;  %v2375_v38 = vmax.f32 %v1926_v36, %v2119_v37 }
 0x414   : > { %4039 = vmatprep.subr.bf16.mxu0 %v11360_v34  ;;  %v13381_v18 = vpack.c.bf16 %v2366_v60, %v2358_v55  ;;  %v11367_v34 = vld [vmem:[#allocation8 + $0x370] ss:$8 sps:$4 sm:$0xff]   ;;  %v1930_v54 = vadd.f32 %v1929_v15, %v13329_v44  ;;  %v2382_v21 = vmax.f32 %v1928_v23, %v2126_v56 }
 0x415   : > { %v1933_v13 = vpop.f32.mrb[120].mxu1 }
 0x416   : > { %3891 = vmatmul.mubr.bf16.gmra.mrb[104].mxu0 %v13058_v58  ;;  %v1924_v58 = vadd.f32 %v1923_v49, %v13325_v20  ;;  %v1935_v46 = vpop.f32.mrb[121].mxu1  ;;  %v2127_v11 = vmul.f32 0.01, %v1930_v54 }
 0x417   : > { %3900 = vmatprep.mubr.bf16.mxu0 %v13081_v14  ;;  %4040 = vmatpush1.bf16.msra.mxu0 %v11358_v24  ;;  %v11364_v14 = vld [vmem:[#allocation8 + $0x360] ss:$8 sps:$4 sm:$0xff]   ;;  %v1937_v8 = vpop.f32.mrb[122].mxu1  ;;  %v1936_v24 = vadd.f32 %v1935_v46, %v13329_v44 }
 0x418   : > { %4041 = vmatprep.subr.bf16.mxu0 %v11363_v62  ;;  %v2118_v57 = vmul.f32 0.01, %v1924_v58  ;;  %v1938_v5 = vadd.f32 %v1937_v8, %v13325_v20  ;;  %v2383_v62 = vmax.f32 %v1930_v54, %v2127_v11  ;;  %v11384_v11 = vld [vmem:[#allocation8 + $0x3c4] ss:$8 sps:$4 sm:$0xff]  }
 0x419   : > { %v2135_v51 = vmul.f32 0.01, %v1936_v24 }
 0x41a   : > { %v2374_v6 = vmax.f32 %v1924_v58, %v2118_v57  ;;  %v2142_v42 = vmul.f32 0.01, %v1938_v5  ;;  %v13389_v29 = vpack.c.bf16 %v2383_v62, %v2375_v38  ;;  %v11381_v57 = vld [vmem:[#allocation8 + $0x3b4] ss:$8 sps:$4 sm:$0xff]  }
 0x41b   : > { %4042 = vmatpush1.bf16.msra.mxu0 %v11361_v53  ;;  %v1939_v53 = vpop.f32.mrb[123].mxu1  ;;  %v2391_v36 = vmax.f32 %v1936_v24, %v2135_v51 }
 0x41c   : > { %4043 = vmatprep.subr.bf16.mxu0 %v11366_v12  ;;  %v13391_v49 = vpack.c.bf16 %v2382_v21, %v2374_v6  ;;  %v11373_v12 = vld [vmem:[#allocation8 + $0x390] ss:$8 sps:$4 sm:$0xff]   ;;  %v1940_v61 = vadd.f32 %v1939_v53, %v13329_v44  ;;  %v2398_v23 = vmax.f32 %v1938_v5, %v2142_v42 }
 0x41d   : > { %v1943_v55 = vpop.f32.mrb[124].mxu1 }
 0x41e   : > { %3901 = vmatmul.mubr.bf16.gmra.mrb[108].mxu0 %v13078_v16  ;;  %v1934_v16 = vadd.f32 %v1933_v13, %v13325_v20  ;;  %v1945_v58 = vpop.f32.mrb[125].mxu1  ;;  %v2143_v4 = vmul.f32 0.01, %v1940_v61 }
 0x41f   : > { %3910 = vmatprep.mubr.bf16.mxu0 %v13101_v2  ;;  %4044 = vmatpush1.bf16.msra.mxu0 %v11364_v14  ;;  %v11370_v2 = vld [vmem:[#allocation8 + $0x380] ss:$8 sps:$4 sm:$0xff]   ;;  %v1947_v60 = vpop.f32.mrb[126].mxu1  ;;  %v1946_v14 = vadd.f32 %v1945_v58, %v13329_v44  ;;  %v11385_v58 = vld [vmem:[#allocation8 + $0x3d0] ss:$8 sps:$4 sm:$0xff]  }
 0x420   : > { %4045 = vmatprep.subr.bf16.mxu0 %v11369_v59  ;;  %v2134_v19 = vmul.f32 0.01, %v1934_v16  ;;  %v1948_v50 = vadd.f32 %v1947_v60, %v13325_v20  ;;  %v2399_v59 = vmax.f32 %v1940_v61, %v2143_v4 }
 0x421   : > { %v2151_v56 = vmul.f32 0.01, %v1946_v14 }
 0x422   : > { %v2390_v39 = vmax.f32 %v1934_v16, %v2134_v19  ;;  %v2158_v15 = vmul.f32 0.01, %v1948_v50  ;;  %v13399_v54 = vpack.c.bf16 %v2399_v59, %v2391_v36  ;;  %v11387_v19 = vld [vmem:[#allocation8 + $0x3d4] ss:$8 sps:$4 sm:$0xff]  }
 0x423   : > { %4046 = vmatpush1.bf16.msra.mxu0 %v11367_v34  ;;  %v1949_v34 = vpop.f32.mrb[127].mxu1  ;;  %v2407_v24 = vmax.f32 %v1946_v14, %v2151_v56 }
 0x424   : > { %4047 = vmatprep.subr.bf16.mxu0 %v11372_v28  ;;  %v13401_v13 = vpack.c.bf16 %v2398_v23, %v2390_v39  ;;  %v11379_v28 = vld [vmem:[#allocation8 + $0x3b0] ss:$8 sps:$4 sm:$0xff]   ;;  %v1950_v46 = vadd.f32 %v1949_v34, %v13329_v44  ;;  %v2414_v5 = vmax.f32 %v1948_v50, %v2158_v15  ;;  %v11393_v15 = vld [vmem:[#allocation8 + $0x3f4] ss:$8 sps:$4 sm:$0xff]  }
 0x425   : > { %v1953_v6 = vpop.f32.mrb[128].mxu1 }
 0x426   : > { %3911 = vmatmul.mubr.bf16.gmra.mrb[112].mxu0 %v13098_v52  ;;  %v1944_v52 = vadd.f32 %v1943_v55, %v13325_v20  ;;  %v1955_v16 = vpop.f32.mrb[129].mxu1  ;;  %v2159_v38 = vmul.f32 0.01, %v1950_v46 }
 0x427   : > { %3920 = vmatprep.mubr.bf16.mxu0 %v13121_v22  ;;  %4048 = vmatpush1.bf16.msra.mxu0 %v11370_v2  ;;  %v11376_v22 = vld [vmem:[#allocation8 + $0x3a0] ss:$8 sps:$4 sm:$0xff]   ;;  %v1957_v21 = vpop.f32.mrb[130].mxu1  ;;  %v1956_v2 = vadd.f32 %v1955_v16, %v13329_v44 }
 0x428   : > { %4049 = vmatprep.subr.bf16.mxu0 %v11375_v45  ;;  %v2150_v37 = vmul.f32 0.01, %v1944_v52  ;;  %v1958_v62 = vadd.f32 %v1957_v21, %v13325_v20  ;;  %v2415_v45 = vmax.f32 %v1950_v46, %v2159_v38  ;;  %v15047_v38 = vld [vmem:[#allocation51_spill] sm:$0xff] }
 0x429   : > { %v2167_v42 = vmul.f32 0.01, %v1956_v2 }
 0x42a   : > { %v2406_v8 = vmax.f32 %v1944_v52, %v2150_v37  ;;  %v2174_v53 = vmul.f32 0.01, %v1958_v62  ;;  %v13409_v61 = vpack.c.bf16 %v2415_v45, %v2407_v24  ;;  %v11390_v52 = vld [vmem:[#allocation8 + $0x3e4] ss:$8 sps:$4 sm:$0xff]   ;;  %v11388_v37 = vld [vmem:[#allocation8 + $0x3e0] ss:$8 sps:$4 sm:$0xff]  }
 0x42b   : > { %4050 = vmatpush1.bf16.msra.mxu0 %v11373_v12  ;;  %v1959_v12 = vpop.f32.mrb[131].mxu1  ;;  %v2423_v50 = vmax.f32 %v1956_v2, %v2167_v42 }
 0x42c   : > { %4051 = vmatprep.subr.bf16.mxu0 %v11378_v9  ;;  %v13411_v55 = vpack.c.bf16 %v2414_v5, %v2406_v8  ;;  %v15045_v9 = vld [vmem:[#allocation49_spill] sm:$0xff]  ;;  %v1960_v39 = vadd.f32 %v1959_v12, %v13329_v44 }
 0x42d   : > { %v1963_v4 = vpop.f32.mrb[132].mxu1 }
 0x42e   : > { %3921 = vmatmul.mubr.bf16.gmra.mrb[116].mxu0 %v13118_v32  ;;  %v1954_v32 = vadd.f32 %v1953_v6, %v13325_v20  ;;  %v1965_v60 = vpop.f32.mrb[133].mxu1  ;;  %v2175_v23 = vmul.f32 0.01, %v1960_v39 }
 0x42f   : > { %3930 = vmatprep.mubr.bf16.mxu0 %v13141_v25  ;;  %4052 = vmatpush1.bf16.msra.mxu0 %v11376_v22  ;;  %v11382_v25 = vld [vmem:[#allocation8 + $0x3c0] ss:$8 sps:$4 sm:$0xff]   ;;  %v1967_v14 = vpop.f32.mrb[134].mxu1  ;;  %v2430_v22 = vmax.f32 %v1958_v62, %v2174_v53  ;;  %v1966_v59 = vadd.f32 %v1965_v60, %v13329_v44 }
 0x430   : > { %4053 = vmatprep.subr.bf16.mxu0 %v11381_v57  ;;  %v2166_v51 = vmul.f32 0.01, %v1954_v32  ;;  %v1968_v57 = vadd.f32 %v1967_v14, %v13325_v20  ;;  %v2431_v56 = vmax.f32 %v1960_v39, %v2175_v23 }
 0x431   : > { %v2183_v46 = vmul.f32 0.01, %v1966_v59 }
 0x432   : > { %v2422_v36 = vmax.f32 %v1954_v32, %v2166_v51  ;;  %v2190_v6 = vmul.f32 0.01, %v1968_v57  ;;  %v13419_v16 = vpack.c.bf16 %v2431_v56, %v2423_v50  ;;  %v11391_v32 = vld [vmem:[#allocation8 + $0x3f0] ss:$8 sps:$4 sm:$0xff]  }
 0x433   : > { %4054 = vmatpush1.bf16.msra.mxu0 %v11379_v28  ;;  %v15046_v28 = vld [vmem:[#allocation48_spill] sm:$0xff] }
 0x434   : > { %4055 = vmatprep.subr.bf16.mxu0 %v11384_v11  ;;  %v1969_v11 = vpop.f32.mrb[135].mxu1  ;;  %v13421_v8 = vpack.c.bf16 %v2430_v22, %v2422_v36  ;;  %v2446_v51 = vmax.f32 %v1968_v57, %v2190_v6  ;;  %v15049_v6 = vld [vmem:[#allocation52_spill] sm:$0xff] }
 0x435   : > { %v1970_v21 = vadd.f32 %v1969_v11, %v13329_v44  ;;  %v1973_v24 = vpop.f32.mrb[136].mxu1 }
 0x436   : > { %3931 = vmatmul.mubr.bf16.gmra.mrb[120].mxu0 %v13138_v1  ;;  %v1964_v1 = vadd.f32 %v1963_v4, %v13325_v20  ;;  %v1975_v5 = vpop.f32.mrb[137].mxu1 }
 0x437   : > { %3940 = vmatprep.mubr.bf16.mxu0 %v15045_v9  ;;  %4056 = vmatpush1.bf16.msra.mxu0 %v11382_v25  ;;  %v2191_v62 = vmul.f32 0.01, %v1970_v21  ;;  %v1974_v25 = vadd.f32 %v1973_v24, %v13325_v20  ;;  %v1977_v45 = vpop.f32.mrb[138].mxu1  ;;  %v1976_v42 = vadd.f32 %v1975_v5, %v13329_v44  ;;  %v15050_v24 = vld [vmem:[#allocation54_spill] sm:$0xff] }
 0x438   : > { %4057 = vmatprep.subr.bf16.mxu0 %v11387_v19  ;;  %v2182_v34 = vmul.f32 0.01, %v1964_v1  ;;  %v2439_v19 = vmax.f32 %v1966_v59, %v2183_v46  ;;  %v1978_v53 = vadd.f32 %v1977_v45, %v13325_v20 }
 0x439   : > { %v2447_v12 = vmax.f32 %v1970_v21, %v2191_v62  ;;  %v2198_v9 = vmul.f32 0.01, %v1974_v25  ;;  %v2199_v39 = vmul.f32 0.01, %v1976_v42 }
 0x43a   : > { %v2438_v2 = vmax.f32 %v1964_v1, %v2182_v34  ;;  %v2206_v4 = vmul.f32 0.01, %v1978_v53 }
 0x43b   : > { %4058 = vmatpush1.bf16.msra.mxu0 %v11385_v58  ;;  %v15048_v58 = vld [vmem:[#allocation50_spill] sm:$0xff]  ;;  %v13429_v60 = vpack.c.bf16 %v2447_v12, %v2439_v19  ;;  %v2454_v50 = vmax.f32 %v1974_v25, %v2198_v9 }
 0x43c   : > { %4059 = vmatprep.subr.bf16.mxu0 %v11390_v52  ;;  %v1979_v52 = vpop.f32.mrb[139].mxu1  ;;  %v13431_v36 = vpack.c.bf16 %v2446_v51, %v2438_v2  ;;  %v2462_v56 = vmax.f32 %v1978_v53, %v2206_v4  ;;  %v15051_v4 = vld [vmem:[#allocation53_spill] sm:$0xff] }
 0x43d   : > { %v1980_v23 = vadd.f32 %v1979_v52, %v13329_v44  ;;  %v1983_v1 = vpop.f32.mrb[140].mxu1 }
 0x43e   : > { %3941 = vmatmul.mubr.bf16.gmra.mrb[124].mxu0 %v15046_v28  ;;  %v1985_v14 = vpop.f32.mrb[141].mxu1  ;;  %v1984_v59 = vadd.f32 %v1983_v1, %v13325_v20  ;;  %v13441_v21 = vpack.c.bf16 %v2462_v56, %v2454_v50 }
 0x43f   : > { %3950 = vmatprep.mubr.bf16.mxu0 %v15047_v38  ;;  %4060 = vmatpush1.bf16.msra.mxu0 %v11388_v37  ;;  %v2207_v22 = vmul.f32 0.01, %v1980_v23  ;;  %v1987_v57 = vpop.f32.mrb[142].mxu1  ;;  %v2455_v37 = vmax.f32 %v1976_v42, %v2199_v39 }
 0x440   : > { %4061 = vmatprep.subr.bf16.mxu0 %v11393_v15  ;;  %v1986_v15 = vadd.f32 %v1985_v14, %v13329_v44  ;;  %v1988_v34 = vadd.f32 %v1987_v57, %v13325_v20  ;;  %v2214_v46 = vmul.f32 0.01, %v1984_v59  ;;  %v1989_v38 = vpop.f32.mrb[143].mxu1 }
 0x441   : > { %v2463_v28 = vmax.f32 %v1980_v23, %v2207_v22  ;;  %v1990_v5 = vadd.f32 %v1989_v38, %v13329_v44  ;;  %v15052_v22 = vld [vmem:[#allocation56_spill] sm:$0xff] }
 0x442   : > { %v2222_v11 = vmul.f32 0.01, %v1988_v34  ;;  %v2470_v25 = vmax.f32 %v1984_v59, %v2214_v46 }
 0x443   : > { %4062 = vmatpush1.bf16.msra.mxu0 %v11391_v32  ;;  %v13439_v32 = vpack.c.bf16 %v2463_v28, %v2455_v37  ;;  %v2223_v45 = vmul.f32 0.01, %v1990_v5 }
 0x444   : > { %v2478_v53 = vmax.f32 %v1988_v34, %v2222_v11 }
 0x445   : > { %v1993_v2 = vpop.f32.mrb[144].mxu1 }
 0x446   : > { %3951 = vmatmul.mubr.bf16.gmra.mrb[128].mxu0 %v15048_v58  ;;  %v1995_v62 = vpop.f32.mrb[145].mxu1  ;;  %v1994_v19 = vadd.f32 %v1993_v2, %v13325_v20  ;;  %v2479_v58 = vmax.f32 %v1990_v5, %v2223_v45  ;;  %v13451_v50 = vpack.c.bf16 %v2478_v53, %v2470_v25  ;;  %v15053_v5 = vld [vmem:[#allocation55_spill] sm:$0xff] }
 0x447   : > { %3960 = vmatprep.mubr.bf16.mxu0 %v13201_v17  ;;  %v2215_v17 = vmul.f32 0.01, %v1986_v15  ;;  %v1997_v51 = vpop.f32.mrb[146].mxu1  ;;  %v1996_v12 = vadd.f32 %v1995_v62, %v13329_v44 }
 0x448   : > { %v1998_v9 = vadd.f32 %v1997_v51, %v13325_v20  ;;  %v2230_v39 = vmul.f32 0.01, %v1994_v19  ;;  %v1999_v1 = vpop.f32.mrb[147].mxu1  ;;  %v15054_v51 = vld [vmem:[#allocation58_spill] sm:$0xff] }
 0x449   : > { %v2471_v42 = vmax.f32 %v1986_v15, %v2215_v17  ;;  %v2231_v52 = vmul.f32 0.01, %v1996_v12  ;;  %v2000_v59 = vadd.f32 %v1999_v1, %v13329_v44 }
 0x44a   : > { %v2238_v23 = vmul.f32 0.01, %v1998_v9  ;;  %v2486_v56 = vmax.f32 %v1994_v19, %v2230_v39 }
 0x44b   : > { %v13449_v14 = vpack.c.bf16 %v2479_v58, %v2471_v42  ;;  %v2239_v15 = vmul.f32 0.01, %v2000_v59  ;;  %v2487_v46 = vmax.f32 %v1996_v12, %v2231_v52  ;;  %v11394_v12 = vld [vmem:[#allocation11 + $0x40] sm:$0xff]  }
 0x44c   : > { %10022 = vmatprep.subr.bf16.mxu1 %v11394_v12 }
 0x44d   : > { %v2003_v57 = vpop.f32.mrb[148].mxu1  ;;  %v2495_v38 = vmax.f32 %v2000_v59, %v2239_v15 }
 0x44e   : > { %3961 = vmatmul.mubr.bf16.gmra.mrb[132].mxu0 %v15049_v6  ;;  %v2005_v37 = vpop.f32.mrb[149].mxu1  ;;  %v2004_v34 = vadd.f32 %v2003_v57, %v13325_v20  ;;  %v2494_v6 = vmax.f32 %v1998_v9, %v2238_v23 }
 0x44f   : > { %3970 = vmatprep.mubr.bf16.mxu0 %v15050_v24  ;;  %v2007_v28 = vpop.f32.mrb[150].mxu1  ;;  %v2006_v17 = vadd.f32 %v2005_v37, %v13329_v44  ;;  %v13459_v45 = vpack.c.bf16 %v2495_v38, %v2487_v46  ;;  %v11395_v46 = vld [vmem:[#allocation11] sm:$0xff]  }
 0x450   : > { %v2008_v11 = vadd.f32 %v2007_v28, %v13325_v20  ;;  %v2246_v24 = vmul.f32 0.01, %v2004_v34  ;;  %v2009_v25 = vpop.f32.mrb[151].mxu1  ;;  %v13461_v19 = vpack.c.bf16 %v2494_v6, %v2486_v56  ;;  %v15055_v56 = vld [vmem:[#allocation57_spill] sm:$0xff]  ;;  %10023 = vmatpush3.bf16.msra.mxu1 %v11395_v46 }
 0x451   : > { %v2247_v2 = vmul.f32 0.01, %v2006_v17  ;;  %v2010_v42 = vadd.f32 %v2009_v25, %v13329_v44 }
 0x452   : > { %v2254_v62 = vmul.f32 0.01, %v2008_v11  ;;  %v2502_v58 = vmax.f32 %v2004_v34, %v2246_v24  ;;  %v15056_v24 = vld [vmem:[#allocation60_spill] sm:$0xff] }
 0x453   : > { %v2255_v39 = vmul.f32 0.01, %v2010_v42  ;;  %v2503_v23 = vmax.f32 %v2006_v17, %v2247_v2 }
 0x454   : > { %v2510_v1 = vmax.f32 %v2008_v11, %v2254_v62 }
 0x455   : > { %v2013_v53 = vpop.f32.mrb[152].mxu1  ;;  %v2511_v57 = vmax.f32 %v2010_v42, %v2255_v39 }
 0x456   : > { %3971 = vmatmul.mubr.bf16.gmra.mrb[136].mxu0 %v15051_v4  ;;  %v2015_v9 = vpop.f32.mrb[153].mxu1  ;;  %v2014_v4 = vadd.f32 %v2013_v53, %v13325_v20  ;;  %v13471_v38 = vpack.c.bf16 %v2510_v1, %v2502_v58 }
 0x457   : > { %3980 = vmatprep.mubr.bf16.mxu0 %v15052_v22  ;;  %v2017_v52 = vpop.f32.mrb[154].mxu1  ;;  %v2016_v22 = vadd.f32 %v2015_v9, %v13329_v44  ;;  %v13469_v34 = vpack.c.bf16 %v2511_v57, %v2503_v23 }
 0x458   : > { %v2018_v59 = vadd.f32 %v2017_v52, %v13325_v20  ;;  %v2262_v37 = vmul.f32 0.01, %v2014_v4  ;;  %v2019_v6 = vpop.f32.mrb[155].mxu1  ;;  %v15057_v52 = vld [vmem:[#allocation59_spill] sm:$0xff] }
 0x459   : > { %v2263_v15 = vmul.f32 0.01, %v2016_v22  ;;  %v2020_v17 = vadd.f32 %v2019_v6, %v13329_v44  ;;  %v11397_v6 = vld [vmem:[#allocation11 + $0x8] sm:$0xff]  }
 0x45a   : > { %v2270_v28 = vmul.f32 0.01, %v2018_v59  ;;  %v2518_v2 = vmax.f32 %v2014_v4, %v2262_v37 }
 0x45b   : > { %v2271_v62 = vmul.f32 0.01, %v2020_v17  ;;  %v2519_v42 = vmax.f32 %v2016_v22, %v2263_v15 }
 0x45c   : > { %v2526_v53 = vmax.f32 %v2018_v59, %v2270_v28  ;;  %v11396_v59 = vld [vmem:[#allocation11 + $0x48] sm:$0xff]  }
 0x45d   : > { %v2023_v11 = vpop.f32.mrb[156].mxu1  ;;  %v2527_v58 = vmax.f32 %v2020_v17, %v2271_v62  ;;  %10024 = vmatprep.subr.bf16.mxu1 %v11396_v59  ;;  %v11404_v62 = vld [vmem:[#allocation11 + $0x68] sm:$0xff]  }
 0x45e   : > { %3981 = vmatmul.mubr.bf16.gmra.mrb[140].mxu0 %v15053_v5  ;;  %v2025_v5 = vpop.f32.mrb[157].mxu1  ;;  %v2024_v25 = vadd.f32 %v2023_v11, %v13325_v20  ;;  %v13481_v4 = vpack.c.bf16 %v2526_v53, %v2518_v2  ;;  %10025 = vmatpush3.bf16.msra.mxu1 %v11397_v6  ;;  %v11399_v11 = vld [vmem:[#allocation11 + $0x10] sm:$0xff]   ;;  %v11402_v2 = vld [vmem:[#allocation11 + $0x60] sm:$0xff]  }
 0x45f   : > { %3990 = vmatprep.mubr.bf16.mxu0 %v15054_v51  ;;  %v2027_v51 = vpop.f32.mrb[158].mxu1  ;;  %v2026_v12 = vadd.f32 %v2025_v5, %v13329_v44  ;;  %v11401_v5 = vld [vmem:[#allocation11 + $0x18] sm:$0xff]  }
 0x460   : > { %v2028_v9 = vadd.f32 %v2027_v51, %v13325_v20  ;;  %v2278_v39 = vmul.f32 0.01, %v2024_v25  ;;  %v2029_v57 = vpop.f32.mrb[159].mxu1  ;;  %v11409_v51 = vld [vmem:[#allocation11 + $0x38] sm:$0xff]  }
 0x461   : > { %v2279_v23 = vmul.f32 0.01, %v2026_v12  ;;  %v2030_v22 = vadd.f32 %v2029_v57, %v13329_v44  ;;  %v11400_v44 = vld [vmem:[#allocation11 + $0x58] sm:$0xff]  }
 0x462   : > { %v2286_v1 = vmul.f32 0.01, %v2028_v9  ;;  %v2534_v15 = vmax.f32 %v2024_v25, %v2278_v39  ;;  %v11407_v25 = vld [vmem:[#allocation11 + $0x30] sm:$0xff]  }
 0x463   : > { %v2287_v37 = vmul.f32 0.01, %v2030_v22  ;;  %v2535_v20 = vmax.f32 %v2026_v12, %v2279_v23  ;;  %v11411_v39 = vld [vmem:[#allocation14 + $0x8] sm:$0xff]  }
 0x464   : > { %v2542_v28 = vmax.f32 %v2028_v9, %v2286_v1 }
 0x465   : > { %v2543_v46 = vmax.f32 %v2030_v22, %v2287_v37  ;;  %v11412_v22 = vld [vmem:[#allocation14 + $0x10] sm:$0xff]  }
 0x466   : > { %3991 = vmatmul.mubr.bf16.gmra.mrb[144].mxu0 %v15055_v56  ;;  %v13479_v56 = vpack.c.bf16 %v2527_v58, %v2519_v42  ;;  %v2670_v17 = vpack.c.bf16 %v2542_v28, %v2534_v15 }
 0x467   : > { %4000 = vmatprep.mubr.bf16.mxu0 %v15056_v24  ;;  %v2671_v24 = vpack.c.bf16 %v2543_v46, %v2535_v20 }
 0x46e   : > { %4001 = vmatmul.mubr.bf16.gmra.mrb[148].mxu0 %v15057_v52 }
 0x46f   : > { %4010 = vmatprep.mubr.bf16.mxu0 %v13292_v63  ;;  %v11398_v63 = vld [vmem:[#allocation11 + $0x50] sm:$0xff]  }
 0x470   : > { %10026 = vmatprep.subr.bf16.mxu1 %v11398_v63 }
 0x471   : > { %10027 = vmatpush3.bf16.msra.mxu1 %v11399_v11 }
 0x472   : > { %10028 = vmatprep.subr.bf16.mxu1 %v11400_v44 }
 0x475   : > { %10029 = vmatpush3.bf16.msra.mxu1 %v11401_v5  ;;  %v11413_v5 = vld [vmem:[#allocation14 + $0x18] sm:$0xff]  }
 0x476   : > { %4011 = vmatmul.mubr.bf16.gmra.mrb[152].mxu0 %v13289_v35  ;;  %v11403_v35 = vld [vmem:[#allocation11 + $0x20] sm:$0xff]   ;;  %10030 = vmatprep.subr.bf16.mxu1 %v11402_v2 }
 0x477   : > { %4020 = vmatprep.mubr.bf16.mxu0 %v13306_v10  ;;  %v11406_v10 = vld [vmem:[#allocation11 + $0x70] sm:$0xff]  }
 0x479   : > { %10031 = vmatpush3.bf16.msra.mxu1 %v11403_v35 }
 0x47a   : > { %10032 = vmatprep.subr.bf16.mxu1 %v11404_v62 }
 0x47e   : > { %4021 = vmatmul.mubr.bf16.gmra.mrb[156].mxu0 %v13304_v27  ;;  %v11405_v27 = vld [vmem:[#allocation11 + $0x28] sm:$0xff]  }
 0x47f   : > { %4063 = vmatprep.mubr.bf16.mxu0 %v13341_v30  ;;  %10033 = vmatpush3.bf16.msra.mxu1 %v11405_v27  ;;  %v11408_v30 = vld [vmem:[#allocation11 + $0x78] sm:$0xff]  }
 0x480   : > { %10034 = vmatprep.subr.bf16.mxu1 %v11406_v10 }
 0x483   : > { %10035 = vmatpush3.bf16.msra.mxu1 %v11407_v25 }
 0x484   : > { %10036 = vmatprep.subr.bf16.mxu1 %v11408_v30 }
 0x486   : > { %4064 = vmatmul.mubr.bf16.vlgmr.msra.gmra.mrb[96].mxu0 %v13336_v48  ;;  %v11410_v48 = vld [vmem:[#allocation14] sm:$0xff]  }
 0x487   : > { %4073 = vmatprep.mubr.bf16.mxu0 %v13349_v43  ;;  %10037 = vmatpush3.bf16.msra.mxu1 %v11409_v51  ;;  %v2800_v43 = vld [vmem:[#allocation10] sm:$0x3] }
 0x488   : > { %10626 = vmatprep.subr.bf16.mxu1 %v11410_v48 }
 0x48e   : > { %4074 = vmatmul.mubr.bf16.gmra.mrb[100].mxu0 %v13351_v3  ;;  %v15058_v3 = vld [vmem:[#allocation46_spill] sm:$0xff] }
 0x48f   : > { %4083 = vmatprep.mubr.bf16.mxu0 %v13359_v0  ;;  %v13519_v0 = vrot.slane %v2800_v43, %v15058_v3 }
 0x496   : > { %4084 = vmatmul.mubr.bf16.gmra.mrb[104].mxu0 %v13361_v7  ;;  %v15059_v7 = vld [vmem:[#allocation47_spill] sm:$0xff] }
 0x497   : > { %4093 = vmatprep.mubr.bf16.mxu0 %v13369_v41  ;;  %v13522_v41 = vrot.slane %v2800_v43, %v15059_v7 }
 0x49e   : > { %4094 = vmatmul.mubr.bf16.gmra.mrb[108].mxu0 %v13371_v33 }
 0x49f   : > { %4103 = vmatprep.mubr.bf16.mxu0 %v13379_v47 }
 0x4a6   : > { %4104 = vmatmul.mubr.bf16.gmra.mrb[112].mxu0 %v13381_v18 }
 0x4a7   : > { %4113 = vmatprep.mubr.bf16.mxu0 %v13389_v29 }
 0x4ae   : > { %4114 = vmatmul.mubr.bf16.gmra.mrb[116].mxu0 %v13391_v49 }
 0x4af   : > { %4123 = vmatprep.mubr.bf16.mxu0 %v13399_v54 }
 0x4b6   : > { %4124 = vmatmul.mubr.bf16.gmra.mrb[120].mxu0 %v13401_v13 }
 0x4b7   : > { %4133 = vmatprep.mubr.bf16.mxu0 %v13409_v61 }
 0x4be   : > { %4134 = vmatmul.mubr.bf16.gmra.mrb[124].mxu0 %v13411_v55 }
 0x4bf   : > { %4143 = vmatprep.mubr.bf16.mxu0 %v13419_v16 }
 0x4c6   : > { %4144 = vmatmul.mubr.bf16.gmra.mrb[128].mxu0 %v13421_v8 }
 0x4c7   : > { %4153 = vmatprep.mubr.bf16.mxu0 %v13429_v60 }
 0x4ce   : > { %4154 = vmatmul.mubr.bf16.gmra.mrb[132].mxu0 %v13431_v36 }
 0x4cf   : > { %4163 = vmatprep.mubr.bf16.mxu0 %v13439_v32 }
 0x4d6   : > { %4164 = vmatmul.mubr.bf16.gmra.mrb[136].mxu0 %v13441_v21 }
 0x4d7   : > { %4173 = vmatprep.mubr.bf16.mxu0 %v13449_v14 }
 0x4de   : > { %4174 = vmatmul.mubr.bf16.gmra.mrb[140].mxu0 %v13451_v50 }
 0x4df   : > { %4183 = vmatprep.mubr.bf16.mxu0 %v13459_v45 }
 0x4e6   : > { %4184 = vmatmul.mubr.bf16.gmra.mrb[144].mxu0 %v13461_v19 }
 0x4e7   : > { %4193 = vmatprep.mubr.bf16.mxu0 %v13469_v34 }
 0x4ee   : > { %4194 = vmatmul.mubr.bf16.gmra.mrb[148].mxu0 %v13471_v38 }
 0x4ef   : > { %4203 = vmatprep.mubr.bf16.mxu0 %v13479_v56 }
 0x4f6   : > { %4204 = vmatmul.mubr.bf16.gmra.mrb[152].mxu0 %v13481_v4 }
 0x4f7   : > { %4213 = vmatprep.mubr.bf16.mxu0 %v2671_v24 }
 0x4fe   : > { %4214 = vmatmul.mubr.bf16.gmra.mrb[156].mxu0 %v2670_v17 }
 0x559   : > { %v4065_v33 = vpop.f32.mrb[96].mxu0 }
 0x55a   : > { %v10730_v47 = vadd.f32 %v4065_v33, %v13519_v0  ;;  %v4067_v18 = vpop.f32.mrb[97].mxu0 }
 0x55b   : > { %v10731_v29 = vadd.f32 %v4067_v18, %v13522_v41  ;;  %v4069_v49 = vpop.f32.mrb[98].mxu0 }
 0x55c   : > { %v4224_v54 = vmul.f32 0.01, %v10730_v47  ;;  %v10732_v13 = vadd.f32 %v4069_v49, %v13519_v0  ;;  %v4071_v61 = vpop.f32.mrb[99].mxu0 }
 0x55d   : > { %v4225_v55 = vmul.f32 0.01, %v10731_v29  ;;  %v10733_v16 = vadd.f32 %v4071_v61, %v13522_v41 }
 0x55e   : > { %v4226_v8 = vmul.f32 0.01, %v10732_v13  ;;  %v4288_v36 = vmax.f32 %v10730_v47, %v4224_v54 }
 0x55f   : > { %v4227_v60 = vmul.f32 0.01, %v10733_v16  ;;  %v4289_v21 = vmax.f32 %v10731_v29, %v4225_v55 }
 0x560   : > { %v4290_v32 = vmax.f32 %v10732_v13, %v4226_v8 }
 0x561   : > { %v4291_v14 = vmax.f32 %v10733_v16, %v4227_v60  ;;  %v4075_v50 = vpop.f32.mrb[100].mxu0 }
 0x562   : > { %v4352_v45 = vpack.c.bf16 %v4290_v32, %v4288_v36  ;;  %v10734_v19 = vadd.f32 %v4075_v50, %v13519_v0  ;;  %v4077_v34 = vpop.f32.mrb[101].mxu0 }
 0x563   : > { %v10735_v38 = vadd.f32 %v4077_v34, %v13522_v41  ;;  %v4079_v42 = vpop.f32.mrb[102].mxu0  ;;  %v4353_v53 = vpack.c.bf16 %v4291_v14, %v4289_v21 }
 0x564   : > { %v4228_v12 = vmul.f32 0.01, %v10734_v19  ;;  %v10736_v9 = vadd.f32 %v4079_v42, %v13519_v0  ;;  %v4081_v58 = vpop.f32.mrb[103].mxu0 }
 0x565   : > { %v4229_v52 = vmul.f32 0.01, %v10735_v38  ;;  %v10737_v23 = vadd.f32 %v4081_v58, %v13522_v41  ;;  %4551 = vmatprep.mubr.bf16.mxu1 %v4353_v53 }
 0x566   : > { %v4230_v1 = vmul.f32 0.01, %v10736_v9  ;;  %4552 = vmatmul.mubr.bf16.vlgmr.msra.gmra.mrb[160].mxu1 %v4352_v45  ;;  %v4292_v56 = vmax.f32 %v10734_v19, %v4228_v12 }
 0x567   : > { %v4231_v57 = vmul.f32 0.01, %v10737_v23  ;;  %10627 = vmatpush3.bf16.msra.mxu1 %v11410_v48  ;;  %v4293_v59 = vmax.f32 %v10735_v38, %v4229_v52 }
 0x568   : > { %v4294_v4 = vmax.f32 %v10736_v9, %v4230_v1  ;;  %10628 = vmatprep.subr.bf16.mxu1 %v11411_v39 }
 0x569   : > { %v4295_v37 = vmax.f32 %v10737_v23, %v4231_v57  ;;  %v4085_v15 = vpop.f32.mrb[104].mxu0 }
 0x56a   : > { %v10738_v20 = vadd.f32 %v4085_v15, %v13519_v0  ;;  %v4087_v28 = vpop.f32.mrb[105].mxu0  ;;  %v4354_v46 = vpack.c.bf16 %v4294_v4, %v4292_v56 }
 0x56b   : > { %v10739_v6 = vadd.f32 %v4087_v28, %v13522_v41  ;;  %v4089_v24 = vpop.f32.mrb[106].mxu0  ;;  %v4355_v17 = vpack.c.bf16 %v4295_v37, %v4293_v59  ;;  %10629 = vmatpush3.bf16.msra.mxu1 %v11411_v39 }
 0x56c   : > { %v4232_v63 = vmul.f32 0.01, %v10738_v20  ;;  %v10740_v11 = vadd.f32 %v4089_v24, %v13519_v0  ;;  %v4091_v44 = vpop.f32.mrb[107].mxu0  ;;  %10630 = vmatprep.subr.bf16.mxu1 %v11412_v22 }
 0x56d   : > { %v4233_v2 = vmul.f32 0.01, %v10739_v6  ;;  %v10741_v35 = vadd.f32 %v4091_v44, %v13522_v41  ;;  %4559 = vmatprep.mubr.bf16.mxu1 %v4355_v17 }
 0x56e   : > { %v4234_v62 = vmul.f32 0.01, %v10740_v11  ;;  %4560 = vmatmul.mubr.bf16.gmra.mrb[164].mxu1 %v4354_v46  ;;  %v4296_v10 = vmax.f32 %v10738_v20, %v4232_v63 }
 0x56f   : > { %v4235_v27 = vmul.f32 0.01, %v10741_v35  ;;  %10631 = vmatpush3.bf16.msra.mxu1 %v11412_v22  ;;  %v4297_v30 = vmax.f32 %v10739_v6, %v4233_v2 }
 0x570   : > { %v4298_v25 = vmax.f32 %v10740_v11, %v4234_v62  ;;  %10632 = vmatprep.subr.bf16.mxu1 %v11413_v5 }
 0x571   : > { %v4299_v51 = vmax.f32 %v10741_v35, %v4235_v27  ;;  %v4095_v48 = vpop.f32.mrb[108].mxu0 }
 0x572   : > { %v10742_v43 = vadd.f32 %v4095_v48, %v13519_v0  ;;  %v4097_v33 = vpop.f32.mrb[109].mxu0  ;;  %v4356_v47 = vpack.c.bf16 %v4298_v25, %v4296_v10 }
 0x573   : > { %v10743_v18 = vadd.f32 %v4097_v33, %v13522_v41  ;;  %v4099_v29 = vpop.f32.mrb[110].mxu0  ;;  %v4357_v49 = vpack.c.bf16 %v4299_v51, %v4297_v30  ;;  %10633 = vmatpush3.bf16.msra.mxu1 %v11413_v5 }
 0x574   : > { %v4236_v54 = vmul.f32 0.01, %v10742_v43  ;;  %v10744_v13 = vadd.f32 %v4099_v29, %v13519_v0  ;;  %v4101_v61 = vpop.f32.mrb[111].mxu0 }
 0x575   : > { %v4237_v55 = vmul.f32 0.01, %v10743_v18  ;;  %v10745_v16 = vadd.f32 %v4101_v61, %v13522_v41  ;;  %4567 = vmatprep.mubr.bf16.mxu1 %v4357_v49 }
 0x576   : > { %v4238_v8 = vmul.f32 0.01, %v10744_v13  ;;  %4568 = vmatmul.mubr.bf16.gmra.mrb[168].mxu1 %v4356_v47  ;;  %v4300_v36 = vmax.f32 %v10742_v43, %v4236_v54 }
 0x577   : > { %v4239_v60 = vmul.f32 0.01, %v10745_v16  ;;  %v4301_v21 = vmax.f32 %v10743_v18, %v4237_v55 }
 0x578   : > { %v4302_v32 = vmax.f32 %v10744_v13, %v4238_v8 }
 0x579   : > { %v4303_v14 = vmax.f32 %v10745_v16, %v4239_v60  ;;  %v4105_v50 = vpop.f32.mrb[112].mxu0 }
 0x57a   : > { %v10746_v45 = vadd.f32 %v4105_v50, %v13519_v0  ;;  %v4107_v19 = vpop.f32.mrb[113].mxu0  ;;  %v4358_v34 = vpack.c.bf16 %v4302_v32, %v4300_v36 }
 0x57b   : > { %v10747_v38 = vadd.f32 %v4107_v19, %v13522_v41  ;;  %v4109_v42 = vpop.f32.mrb[114].mxu0  ;;  %v4359_v53 = vpack.c.bf16 %v4303_v14, %v4301_v21 }
 0x57c   : > { %v4240_v12 = vmul.f32 0.01, %v10746_v45  ;;  %v10748_v9 = vadd.f32 %v4109_v42, %v13519_v0  ;;  %v4111_v58 = vpop.f32.mrb[115].mxu0 }
 0x57d   : > { %v4241_v39 = vmul.f32 0.01, %v10747_v38  ;;  %v10749_v52 = vadd.f32 %v4111_v58, %v13522_v41  ;;  %4575 = vmatprep.mubr.bf16.mxu1 %v4359_v53 }
 0x57e   : > { %v4242_v23 = vmul.f32 0.01, %v10748_v9  ;;  %4576 = vmatmul.mubr.bf16.gmra.mrb[172].mxu1 %v4358_v34  ;;  %v4304_v57 = vmax.f32 %v10746_v45, %v4240_v12 }
 0x57f   : > { %v4243_v1 = vmul.f32 0.01, %v10749_v52  ;;  %v4305_v4 = vmax.f32 %v10747_v38, %v4241_v39 }
 0x580   : > { %v4306_v56 = vmax.f32 %v10748_v9, %v4242_v23 }
 0x581   : > { %v4307_v22 = vmax.f32 %v10749_v52, %v4243_v1  ;;  %v4115_v59 = vpop.f32.mrb[116].mxu0 }
 0x582   : > { %v10750_v37 = vadd.f32 %v4115_v59, %v13519_v0  ;;  %v4117_v15 = vpop.f32.mrb[117].mxu0  ;;  %v4360_v20 = vpack.c.bf16 %v4306_v56, %v4304_v57 }
 0x583   : > { %v10751_v28 = vadd.f32 %v4117_v15, %v13522_v41  ;;  %v4119_v46 = vpop.f32.mrb[118].mxu0  ;;  %v4361_v6 = vpack.c.bf16 %v4307_v22, %v4305_v4 }
 0x584   : > { %v4244_v24 = vmul.f32 0.01, %v10750_v37  ;;  %v10752_v17 = vadd.f32 %v4119_v46, %v13519_v0  ;;  %v4121_v63 = vpop.f32.mrb[119].mxu0 }
 0x585   : > { %v4245_v11 = vmul.f32 0.01, %v10751_v28  ;;  %v10753_v44 = vadd.f32 %v4121_v63, %v13522_v41  ;;  %4583 = vmatprep.mubr.bf16.mxu1 %v4361_v6 }
 0x586   : > { %v4246_v5 = vmul.f32 0.01, %v10752_v17  ;;  %4584 = vmatmul.mubr.bf16.gmra.mrb[176].mxu1 %v4360_v20  ;;  %v4308_v35 = vmax.f32 %v10750_v37, %v4244_v24 }
 0x587   : > { %v4247_v2 = vmul.f32 0.01, %v10753_v44  ;;  %v4309_v27 = vmax.f32 %v10751_v28, %v4245_v11 }
 0x588   : > { %v4310_v62 = vmax.f32 %v10752_v17, %v4246_v5 }
 0x589   : > { %v4311_v10 = vmax.f32 %v10753_v44, %v4247_v2  ;;  %v4125_v25 = vpop.f32.mrb[120].mxu0 }
 0x58a   : > { %v10754_v30 = vadd.f32 %v4125_v25, %v13519_v0  ;;  %v4127_v51 = vpop.f32.mrb[121].mxu0  ;;  %v4362_v48 = vpack.c.bf16 %v4310_v62, %v4308_v35 }
 0x58b   : > { %v10755_v43 = vadd.f32 %v4127_v51, %v13522_v41  ;;  %v4129_v33 = vpop.f32.mrb[122].mxu0  ;;  %v4363_v47 = vpack.c.bf16 %v4311_v10, %v4309_v27 }
 0x58c   : > { %v4248_v18 = vmul.f32 0.01, %v10754_v30  ;;  %v10756_v29 = vadd.f32 %v4129_v33, %v13519_v0  ;;  %v4131_v49 = vpop.f32.mrb[123].mxu0 }
 0x58d   : > { %v4249_v54 = vmul.f32 0.01, %v10755_v43  ;;  %v10757_v13 = vadd.f32 %v4131_v49, %v13522_v41  ;;  %4591 = vmatprep.mubr.bf16.mxu1 %v4363_v47 }
 0x58e   : > { %v4250_v61 = vmul.f32 0.01, %v10756_v29  ;;  %4592 = vmatmul.mubr.bf16.gmra.mrb[180].mxu1 %v4362_v48  ;;  %v4312_v16 = vmax.f32 %v10754_v30, %v4248_v18 }
 0x58f   : > { %v4251_v55 = vmul.f32 0.01, %v10757_v13  ;;  %v4313_v60 = vmax.f32 %v10755_v43, %v4249_v54 }
 0x590   : > { %v4314_v8 = vmax.f32 %v10756_v29, %v4250_v61 }
 0x591   : > { %v4315_v36 = vmax.f32 %v10757_v13, %v4251_v55  ;;  %v4135_v32 = vpop.f32.mrb[124].mxu0 }
 0x592   : > { %v10758_v21 = vadd.f32 %v4135_v32, %v13519_v0  ;;  %v4137_v14 = vpop.f32.mrb[125].mxu0  ;;  %v4364_v50 = vpack.c.bf16 %v4314_v8, %v4312_v16 }
 0x593   : > { %v10759_v45 = vadd.f32 %v4137_v14, %v13522_v41  ;;  %v4139_v19 = vpop.f32.mrb[126].mxu0  ;;  %v4365_v34 = vpack.c.bf16 %v4315_v36, %v4313_v60 }
 0x594   : > { %v4252_v38 = vmul.f32 0.01, %v10758_v21  ;;  %v10760_v42 = vadd.f32 %v4139_v19, %v13519_v0  ;;  %v4141_v53 = vpop.f32.mrb[127].mxu0 }
 0x595   : > { %v4253_v12 = vmul.f32 0.01, %v10759_v45  ;;  %v10761_v9 = vadd.f32 %v4141_v53, %v13522_v41  ;;  %4599 = vmatprep.mubr.bf16.mxu1 %v4365_v34 }
 0x596   : > { %v4254_v58 = vmul.f32 0.01, %v10760_v42  ;;  %4600 = vmatmul.mubr.bf16.gmra.mrb[184].mxu1 %v4364_v50  ;;  %v4316_v52 = vmax.f32 %v10758_v21, %v4252_v38 }
 0x597   : > { %v4255_v39 = vmul.f32 0.01, %v10761_v9  ;;  %v4317_v1 = vmax.f32 %v10759_v45, %v4253_v12 }
 0x598   : > { %v4318_v23 = vmax.f32 %v10760_v42, %v4254_v58 }
 0x599   : > { %v4319_v57 = vmax.f32 %v10761_v9, %v4255_v39  ;;  %v4145_v56 = vpop.f32.mrb[128].mxu0 }
 0x59a   : > { %v10762_v4 = vadd.f32 %v4145_v56, %v13519_v0  ;;  %v4147_v22 = vpop.f32.mrb[129].mxu0  ;;  %v4366_v59 = vpack.c.bf16 %v4318_v23, %v4316_v52 }
 0x59b   : > { %v10763_v37 = vadd.f32 %v4147_v22, %v13522_v41  ;;  %v4149_v15 = vpop.f32.mrb[130].mxu0  ;;  %v4367_v20 = vpack.c.bf16 %v4319_v57, %v4317_v1 }
 0x59c   : > { %v4256_v28 = vmul.f32 0.01, %v10762_v4  ;;  %v10764_v46 = vadd.f32 %v4149_v15, %v13519_v0  ;;  %v4151_v6 = vpop.f32.mrb[131].mxu0 }
 0x59d   : > { %v4257_v24 = vmul.f32 0.01, %v10763_v37  ;;  %v10765_v17 = vadd.f32 %v4151_v6, %v13522_v41  ;;  %4607 = vmatprep.mubr.bf16.mxu1 %v4367_v20 }
 0x59e   : > { %v4258_v63 = vmul.f32 0.01, %v10764_v46  ;;  %4608 = vmatmul.mubr.bf16.gmra.mrb[188].mxu1 %v4366_v59  ;;  %v4320_v44 = vmax.f32 %v10762_v4, %v4256_v28 }
 0x59f   : > { %v4259_v11 = vmul.f32 0.01, %v10765_v17  ;;  %v4321_v2 = vmax.f32 %v10763_v37, %v4257_v24 }
 0x5a0   : > { %v4322_v5 = vmax.f32 %v10764_v46, %v4258_v63 }
 0x5a1   : > { %v4323_v35 = vmax.f32 %v10765_v17, %v4259_v11  ;;  %v4155_v62 = vpop.f32.mrb[132].mxu0 }
 0x5a2   : > { %v10766_v27 = vadd.f32 %v4155_v62, %v13519_v0  ;;  %v4157_v10 = vpop.f32.mrb[133].mxu0  ;;  %v4368_v25 = vpack.c.bf16 %v4322_v5, %v4320_v44 }
 0x5a3   : > { %v10767_v30 = vadd.f32 %v4157_v10, %v13522_v41  ;;  %v4159_v51 = vpop.f32.mrb[134].mxu0  ;;  %v4369_v48 = vpack.c.bf16 %v4323_v35, %v4321_v2 }
 0x5a4   : > { %v4260_v43 = vmul.f32 0.01, %v10766_v27  ;;  %v10768_v33 = vadd.f32 %v4159_v51, %v13519_v0  ;;  %v4161_v47 = vpop.f32.mrb[135].mxu0 }
 0x5a5   : > { %v4261_v18 = vmul.f32 0.01, %v10767_v30  ;;  %v10769_v29 = vadd.f32 %v4161_v47, %v13522_v41  ;;  %4615 = vmatprep.mubr.bf16.mxu1 %v4369_v48 }
 0x5a6   : > { %v4262_v49 = vmul.f32 0.01, %v10768_v33  ;;  %4616 = vmatmul.mubr.bf16.gmra.mrb[192].mxu1 %v4368_v25  ;;  %v4324_v13 = vmax.f32 %v10766_v27, %v4260_v43 }
 0x5a7   : > { %v4263_v54 = vmul.f32 0.01, %v10769_v29  ;;  %v4325_v55 = vmax.f32 %v10767_v30, %v4261_v18 }
 0x5a8   : > { %v4326_v61 = vmax.f32 %v10768_v33, %v4262_v49 }
 0x5a9   : > { %v4327_v16 = vmax.f32 %v10769_v29, %v4263_v54  ;;  %v4165_v8 = vpop.f32.mrb[136].mxu0 }
 0x5aa   : > { %v10770_v60 = vadd.f32 %v4165_v8, %v13519_v0  ;;  %v4167_v36 = vpop.f32.mrb[137].mxu0  ;;  %v4370_v32 = vpack.c.bf16 %v4326_v61, %v4324_v13 }
 0x5ab   : > { %v10771_v21 = vadd.f32 %v4167_v36, %v13522_v41  ;;  %v4169_v14 = vpop.f32.mrb[138].mxu0  ;;  %v4371_v50 = vpack.c.bf16 %v4327_v16, %v4325_v55 }
 0x5ac   : > { %v4264_v45 = vmul.f32 0.01, %v10770_v60  ;;  %v10772_v19 = vadd.f32 %v4169_v14, %v13519_v0  ;;  %v4171_v34 = vpop.f32.mrb[139].mxu0 }
 0x5ad   : > { %v4265_v38 = vmul.f32 0.01, %v10771_v21  ;;  %v10773_v42 = vadd.f32 %v4171_v34, %v13522_v41  ;;  %4623 = vmatprep.mubr.bf16.mxu1 %v4371_v50 }
 0x5ae   : > { %v4266_v53 = vmul.f32 0.01, %v10772_v19  ;;  %4624 = vmatmul.mubr.bf16.gmra.mrb[196].mxu1 %v4370_v32  ;;  %v4328_v9 = vmax.f32 %v10770_v60, %v4264_v45 }
 0x5af   : > { %v4267_v12 = vmul.f32 0.01, %v10773_v42  ;;  %v4329_v39 = vmax.f32 %v10771_v21, %v4265_v38 }
 0x5b0   : > { %v4330_v58 = vmax.f32 %v10772_v19, %v4266_v53 }
 0x5b1   : > { %v4331_v52 = vmax.f32 %v10773_v42, %v4267_v12  ;;  %v4175_v23 = vpop.f32.mrb[140].mxu0 }
 0x5b2   : > { %v10774_v1 = vadd.f32 %v4175_v23, %v13519_v0  ;;  %v4177_v57 = vpop.f32.mrb[141].mxu0  ;;  %v4372_v56 = vpack.c.bf16 %v4330_v58, %v4328_v9 }
 0x5b3   : > { %v10775_v4 = vadd.f32 %v4177_v57, %v13522_v41  ;;  %v4179_v22 = vpop.f32.mrb[142].mxu0  ;;  %v4373_v59 = vpack.c.bf16 %v4331_v52, %v4329_v39 }
 0x5b4   : > { %v4268_v37 = vmul.f32 0.01, %v10774_v1  ;;  %v10776_v15 = vadd.f32 %v4179_v22, %v13519_v0  ;;  %v4181_v20 = vpop.f32.mrb[143].mxu0 }
 0x5b5   : > { %v4269_v28 = vmul.f32 0.01, %v10775_v4  ;;  %v10777_v46 = vadd.f32 %v4181_v20, %v13522_v41  ;;  %4631 = vmatprep.mubr.bf16.mxu1 %v4373_v59 }
 0x5b6   : > { %v4270_v6 = vmul.f32 0.01, %v10776_v15  ;;  %4632 = vmatmul.mubr.bf16.gmra.mrb[200].mxu1 %v4372_v56  ;;  %v4332_v17 = vmax.f32 %v10774_v1, %v4268_v37 }
 0x5b7   : > { %v4271_v24 = vmul.f32 0.01, %v10777_v46  ;;  %v4333_v11 = vmax.f32 %v10775_v4, %v4269_v28 }
 0x5b8   : > { %v4334_v63 = vmax.f32 %v10776_v15, %v4270_v6 }
 0x5b9   : > { %v4335_v44 = vmax.f32 %v10777_v46, %v4271_v24  ;;  %v4185_v5 = vpop.f32.mrb[144].mxu0 }
 0x5ba   : > { %v10778_v2 = vadd.f32 %v4185_v5, %v13519_v0  ;;  %v4187_v35 = vpop.f32.mrb[145].mxu0  ;;  %v4374_v62 = vpack.c.bf16 %v4334_v63, %v4332_v17 }
 0x5bb   : > { %v10779_v27 = vadd.f32 %v4187_v35, %v13522_v41  ;;  %v4189_v10 = vpop.f32.mrb[146].mxu0  ;;  %v4375_v25 = vpack.c.bf16 %v4335_v44, %v4333_v11 }
 0x5bc   : > { %v4272_v30 = vmul.f32 0.01, %v10778_v2  ;;  %v10780_v51 = vadd.f32 %v4189_v10, %v13519_v0  ;;  %v4191_v48 = vpop.f32.mrb[147].mxu0 }
 0x5bd   : > { %v4273_v43 = vmul.f32 0.01, %v10779_v27  ;;  %v10781_v33 = vadd.f32 %v4191_v48, %v13522_v41  ;;  %4639 = vmatprep.mubr.bf16.mxu1 %v4375_v25 }
 0x5be   : > { %v4274_v47 = vmul.f32 0.01, %v10780_v51  ;;  %4640 = vmatmul.mubr.bf16.gmra.mrb[204].mxu1 %v4374_v62  ;;  %v4336_v29 = vmax.f32 %v10778_v2, %v4272_v30 }
 0x5bf   : > { %v4275_v18 = vmul.f32 0.01, %v10781_v33  ;;  %v4337_v54 = vmax.f32 %v10779_v27, %v4273_v43 }
 0x5c0   : > { %v4338_v49 = vmax.f32 %v10780_v51, %v4274_v47 }
 0x5c1   : > { %v4339_v13 = vmax.f32 %v10781_v33, %v4275_v18  ;;  %v4195_v61 = vpop.f32.mrb[148].mxu0 }
 0x5c2   : > { %v10782_v55 = vadd.f32 %v4195_v61, %v13519_v0  ;;  %v4197_v16 = vpop.f32.mrb[149].mxu0  ;;  %v4376_v8 = vpack.c.bf16 %v4338_v49, %v4336_v29  ;;  %v13588_v61 = vld [vmem:[#allocation13] ss:$0 sm:$0xff] }
 0x5c3   : > { %v10783_v60 = vadd.f32 %v4197_v16, %v13522_v41  ;;  %v4199_v36 = vpop.f32.mrb[150].mxu0  ;;  %v4377_v32 = vpack.c.bf16 %v4339_v13, %v4337_v54 }
 0x5c4   : > { %v4276_v21 = vmul.f32 0.01, %v10782_v55  ;;  %v10784_v14 = vadd.f32 %v4199_v36, %v13519_v0  ;;  %v4201_v50 = vpop.f32.mrb[151].mxu0 }
 0x5c5   : > { %v4277_v45 = vmul.f32 0.01, %v10783_v60  ;;  %v10785_v19 = vadd.f32 %v4201_v50, %v13522_v41  ;;  %4647 = vmatprep.mubr.bf16.mxu1 %v4377_v32 }
 0x5c6   : > { %v4278_v34 = vmul.f32 0.01, %v10784_v14  ;;  %4648 = vmatmul.mubr.bf16.gmra.mrb[208].mxu1 %v4376_v8  ;;  %v4340_v42 = vmax.f32 %v10782_v55, %v4276_v21  ;;  %v11414_v21 = vld [vmem:[#allocation17] sm:$0xff]  }
 0x5c7   : > { %v4279_v38 = vmul.f32 0.01, %v10785_v19  ;;  %v4341_v12 = vmax.f32 %v10783_v60, %v4277_v45  ;;  %10666 = vmatprep.subr.bf16.mxu1 %v11414_v21 }
 0x5c8   : > { %v4342_v53 = vmax.f32 %v10784_v14, %v4278_v34 }
 0x5c9   : > { %v4343_v9 = vmax.f32 %v10785_v19, %v4279_v38  ;;  %v4205_v58 = vpop.f32.mrb[152].mxu0 }
 0x5ca   : > { %v10786_v39 = vadd.f32 %v4205_v58, %v13519_v0  ;;  %v4207_v52 = vpop.f32.mrb[153].mxu0  ;;  %v4378_v23 = vpack.c.bf16 %v4342_v53, %v4340_v42 }
 0x5cb   : > { %v10787_v1 = vadd.f32 %v4207_v52, %v13522_v41  ;;  %v4209_v57 = vpop.f32.mrb[154].mxu0  ;;  %v4379_v56 = vpack.c.bf16 %v4343_v9, %v4341_v12 }
 0x5cc   : > { %v4280_v4 = vmul.f32 0.01, %v10786_v39  ;;  %v10788_v22 = vadd.f32 %v4209_v57, %v13519_v0  ;;  %v4211_v59 = vpop.f32.mrb[155].mxu0 }
 0x5cd   : > { %v4281_v37 = vmul.f32 0.01, %v10787_v1  ;;  %v10789_v15 = vadd.f32 %v4211_v59, %v13522_v41  ;;  %4655 = vmatprep.mubr.bf16.mxu1 %v4379_v56 }
 0x5ce   : > { %v4282_v20 = vmul.f32 0.01, %v10788_v22  ;;  %4656 = vmatmul.mubr.bf16.gmra.mrb[212].mxu1 %v4378_v23  ;;  %v4344_v46 = vmax.f32 %v10786_v39, %v4280_v4 }
 0x5cf   : > { %v4283_v28 = vmul.f32 0.01, %v10789_v15  ;;  %v4345_v24 = vmax.f32 %v10787_v1, %v4281_v37 }
 0x5d0   : > { %v4346_v6 = vmax.f32 %v10788_v22, %v4282_v20 }
 0x5d1   : > { %v4347_v17 = vmax.f32 %v10789_v15, %v4283_v28  ;;  %v4215_v63 = vpop.f32.mrb[156].mxu0 }
 0x5d2   : > { %v10790_v11 = vadd.f32 %v4215_v63, %v13519_v0  ;;  %v4217_v44 = vpop.f32.mrb[157].mxu0  ;;  %v4380_v5 = vpack.c.bf16 %v4346_v6, %v4344_v46  ;;  %v11415_v46 = vld [vmem:[#allocation17 + $0x8] sm:$0xff]  }
 0x5d3   : > { %v10791_v2 = vadd.f32 %v4217_v44, %v13522_v41  ;;  %v4219_v35 = vpop.f32.mrb[158].mxu0  ;;  %v4381_v62 = vpack.c.bf16 %v4347_v17, %v4345_v24 }
 0x5d4   : > { %v4284_v27 = vmul.f32 0.01, %v10790_v11  ;;  %v10792_v10 = vadd.f32 %v4219_v35, %v13519_v0  ;;  %v4221_v25 = vpop.f32.mrb[159].mxu0 }
 0x5d5   : > { %v4285_v30 = vmul.f32 0.01, %v10791_v2  ;;  %v10793_v51 = vadd.f32 %v4221_v25, %v13522_v41  ;;  %4663 = vmatprep.mubr.bf16.mxu1 %v4381_v62 }
 0x5d6   : > { %v4286_v48 = vmul.f32 0.01, %v10792_v10  ;;  %4664 = vmatmul.mubr.bf16.gmra.mrb[216].mxu1 %v4380_v5  ;;  %v4348_v33 = vmax.f32 %v10790_v11, %v4284_v27  ;;  %v11416_v11 = vld [vmem:[#allocation17 + $0x10] sm:$0xff]  }
 0x5d7   : > { %v4287_v43 = vmul.f32 0.01, %v10793_v51  ;;  %v4349_v18 = vmax.f32 %v10791_v2, %v4285_v30 }
 0x5d8   : > { %v4350_v47 = vmax.f32 %v10792_v10, %v4286_v48 }
 0x5d9   : > { %v4351_v29 = vmax.f32 %v10793_v51, %v4287_v43  ;;  %v11417_v51 = vld [vmem:[#allocation17 + $0x18] sm:$0xff]  }
 0x5da   : > { %v4382_v49 = vpack.c.bf16 %v4350_v47, %v4348_v33 }
 0x5db   : > { %v4383_v54 = vpack.c.bf16 %v4351_v29, %v4349_v18  ;;  %v11418_v18 = vld [vmem:[#allocation17 + $0x20] sm:$0xff]  }
 0x5dd   : > { %4671 = vmatprep.mubr.bf16.mxu1 %v4383_v54 }
 0x5de   : > { %4672 = vmatmul.mubr.bf16.gmra.mrb[220].mxu1 %v4382_v49 }
 0x639   : > { %v10038_v13 = vpop.f32.mrb[160].mxu1 }
 0x63a   : > { %v10039_v0 = vpop.f32.mrb[161].mxu1 }
 0x63b   : > { %v10040_v55 = vadd.f32 %v10039_v0, %v10038_v13  ;;  %v10041_v16 = vpop.f32.mrb[162].mxu1 }
 0x63c   : > { %v10042_v8 = vpop.f32.mrb[163].mxu1 }
 0x63d   : > { %v4554_v41 = vadd.f32 %v10040_v55, %v13588_v61  ;;  %v10043_v60 = vadd.f32 %v10042_v8, %v10041_v16 }
 0x63f   : > { %v4680_v36 = vmul.f32 0.01, %v4554_v41  ;;  %v4557_v32 = vadd.f32 %v10043_v60, %v13588_v61  ;;  %v11419_v60 = vld [vmem:[#allocation17 + $0x28] sm:$0xff]  }
 0x641   : > { %v4681_v14 = vmul.f32 0.01, %v4557_v32  ;;  %v10044_v50 = vpop.f32.mrb[164].mxu1  ;;  %v4712_v19 = vmax.f32 %v4554_v41, %v4680_v36 }
 0x642   : > { %v10045_v45 = vpop.f32.mrb[165].mxu1 }
 0x643   : > { %v4713_v34 = vmax.f32 %v4557_v32, %v4681_v14  ;;  %v10046_v38 = vadd.f32 %v10045_v45, %v10044_v50  ;;  %v10047_v42 = vpop.f32.mrb[166].mxu1  ;;  %v11420_v50 = vld [vmem:[#allocation17 + $0x30] sm:$0xff]  }
 0x644   : > { %v10048_v53 = vpop.f32.mrb[167].mxu1 }
 0x645   : > { %v4562_v12 = vadd.f32 %v10046_v38, %v13588_v61  ;;  %v10049_v9 = vadd.f32 %v10048_v53, %v10047_v42  ;;  %v4744_v58 = vpack.c.bf16 %v4713_v34, %v4712_v19 }
 0x647   : > { %v4682_v39 = vmul.f32 0.01, %v4562_v12  ;;  %v4565_v52 = vadd.f32 %v10049_v9, %v13588_v61  ;;  %10634 = vmatprep.mubr.msk.bf16.mxu1 %vm4799_vm0, %v4744_v58 }
 0x649   : > { %v4683_v23 = vmul.f32 0.01, %v4565_v52  ;;  %v10050_v1 = vpop.f32.mrb[168].mxu1  ;;  %v4714_v56 = vmax.f32 %v4562_v12, %v4682_v39 }
 0x64a   : > { %v10051_v57 = vpop.f32.mrb[169].mxu1 }
 0x64b   : > { %v4715_v4 = vmax.f32 %v4565_v52, %v4683_v23  ;;  %v10052_v22 = vadd.f32 %v10051_v57, %v10050_v1  ;;  %v10053_v59 = vpop.f32.mrb[170].mxu1 }
 0x64c   : > { %v10054_v37 = vpop.f32.mrb[171].mxu1 }
 0x64d   : > { %v4745_v15 = vpack.c.bf16 %v4715_v4, %v4714_v56  ;;  %v4570_v20 = vadd.f32 %v10052_v22, %v13588_v61  ;;  %v10055_v28 = vadd.f32 %v10054_v37, %v10053_v59 }
 0x64f   : > { %v4684_v6 = vmul.f32 0.01, %v4570_v20  ;;  %v4573_v24 = vadd.f32 %v10055_v28, %v13588_v61  ;;  %10635 = vmatmul.mubr.msk.bf16.vlgmr.msra.gmra.mrb[224].mxu1 %vm4799_vm0, %v4745_v15 }
 0x650   : > { %10667 = vmatpush3.bf16.msra.mxu1 %v11414_v21 }
 0x651   : > { %v4685_v17 = vmul.f32 0.01, %v4573_v24  ;;  %v10056_v63 = vpop.f32.mrb[172].mxu1  ;;  %10668 = vmatprep.subr.bf16.mxu1 %v11415_v46  ;;  %v4716_v5 = vmax.f32 %v4570_v20, %v4684_v6 }
 0x652   : > { %v10057_v44 = vpop.f32.mrb[173].mxu1 }
 0x653   : > { %v4717_v2 = vmax.f32 %v4573_v24, %v4685_v17  ;;  %v10058_v35 = vadd.f32 %v10057_v44, %v10056_v63  ;;  %v10059_v62 = vpop.f32.mrb[174].mxu1 }
 0x654   : > { %v10060_v27 = vpop.f32.mrb[175].mxu1  ;;  %10669 = vmatpush3.bf16.msra.mxu1 %v11415_v46 }
 0x655   : > { %v4578_v10 = vadd.f32 %v10058_v35, %v13588_v61  ;;  %v10061_v25 = vadd.f32 %v10060_v27, %v10059_v62  ;;  %v4746_v30 = vpack.c.bf16 %v4717_v2, %v4716_v5  ;;  %10670 = vmatprep.subr.bf16.mxu1 %v11416_v11 }
 0x657   : > { %v4686_v48 = vmul.f32 0.01, %v4578_v10  ;;  %v4581_v43 = vadd.f32 %v10061_v25, %v13588_v61  ;;  %10638 = vmatprep.mubr.msk.bf16.mxu1 %vm4799_vm0, %v4746_v30 }
 0x658   : > { %10671 = vmatpush3.bf16.msra.mxu1 %v11416_v11 }
 0x659   : > { %v4687_v33 = vmul.f32 0.01, %v4581_v43  ;;  %v10062_v47 = vpop.f32.mrb[176].mxu1  ;;  %10672 = vmatprep.subr.bf16.mxu1 %v11417_v51  ;;  %v4718_v49 = vmax.f32 %v4578_v10, %v4686_v48 }
 0x65a   : > { %v10063_v29 = vpop.f32.mrb[177].mxu1 }
 0x65b   : > { %v4719_v54 = vmax.f32 %v4581_v43, %v4687_v33  ;;  %v10064_v13 = vadd.f32 %v10063_v29, %v10062_v47  ;;  %v10065_v0 = vpop.f32.mrb[178].mxu1 }
 0x65c   : > { %v10066_v55 = vpop.f32.mrb[179].mxu1  ;;  %10673 = vmatpush3.bf16.msra.mxu1 %v11417_v51 }
 0x65d   : > { %v4586_v16 = vadd.f32 %v10064_v13, %v13588_v61  ;;  %v10067_v8 = vadd.f32 %v10066_v55, %v10065_v0  ;;  %v4747_v41 = vpack.c.bf16 %v4719_v54, %v4718_v49  ;;  %10674 = vmatprep.subr.bf16.mxu1 %v11418_v18 }
 0x65f   : > { %v4688_v36 = vmul.f32 0.01, %v4586_v16  ;;  %v4589_v32 = vadd.f32 %v10067_v8, %v13588_v61  ;;  %10639 = vmatmul.mubr.msk.bf16.gmra.mrb[228].mxu1 %vm4799_vm0, %v4747_v41 }
 0x660   : > { %10675 = vmatpush3.bf16.msra.mxu1 %v11418_v18 }
 0x661   : > { %v4689_v21 = vmul.f32 0.01, %v4589_v32  ;;  %v10068_v14 = vpop.f32.mrb[180].mxu1  ;;  %10676 = vmatprep.subr.bf16.mxu1 %v11419_v60  ;;  %v4720_v19 = vmax.f32 %v4586_v16, %v4688_v36 }
 0x662   : > { %v10069_v45 = vpop.f32.mrb[181].mxu1 }
 0x663   : > { %v4721_v34 = vmax.f32 %v4589_v32, %v4689_v21  ;;  %v10070_v38 = vadd.f32 %v10069_v45, %v10068_v14  ;;  %v10071_v42 = vpop.f32.mrb[182].mxu1 }
 0x664   : > { %v10072_v53 = vpop.f32.mrb[183].mxu1  ;;  %10677 = vmatpush3.bf16.msra.mxu1 %v11419_v60 }
 0x665   : > { %v4594_v12 = vadd.f32 %v10070_v38, %v13588_v61  ;;  %v10073_v9 = vadd.f32 %v10072_v53, %v10071_v42  ;;  %v4748_v58 = vpack.c.bf16 %v4721_v34, %v4720_v19  ;;  %10678 = vmatprep.subr.bf16.mxu1 %v11420_v50 }
 0x667   : > { %v4690_v39 = vmul.f32 0.01, %v4594_v12  ;;  %v4597_v52 = vadd.f32 %v10073_v9, %v13588_v61  ;;  %10642 = vmatprep.mubr.msk.bf16.mxu1 %vm4799_vm0, %v4748_v58 }
 0x668   : > { %10679 = vmatpush3.bf16.msra.mxu1 %v11420_v50 }
 0x669   : > { %v4691_v23 = vmul.f32 0.01, %v4597_v52  ;;  %v10074_v1 = vpop.f32.mrb[184].mxu1  ;;  %v4722_v56 = vmax.f32 %v4594_v12, %v4690_v39 }
 0x66a   : > { %v10075_v57 = vpop.f32.mrb[185].mxu1 }
 0x66b   : > { %v4723_v4 = vmax.f32 %v4597_v52, %v4691_v23  ;;  %v10076_v22 = vadd.f32 %v10075_v57, %v10074_v1  ;;  %v10077_v59 = vpop.f32.mrb[186].mxu1 }
 0x66c   : > { %v10078_v37 = vpop.f32.mrb[187].mxu1 }
 0x66d   : > { %v4602_v15 = vadd.f32 %v10076_v22, %v13588_v61  ;;  %v10079_v20 = vadd.f32 %v10078_v37, %v10077_v59  ;;  %v4749_v28 = vpack.c.bf16 %v4723_v4, %v4722_v56 }
 0x66f   : > { %v4692_v46 = vmul.f32 0.01, %v4602_v15  ;;  %v4605_v6 = vadd.f32 %v10079_v20, %v13588_v61  ;;  %10643 = vmatmul.mubr.msk.bf16.gmra.mrb[232].mxu1 %vm4799_vm0, %v4749_v28 }
 0x671   : > { %v4693_v24 = vmul.f32 0.01, %v4605_v6  ;;  %v10080_v17 = vpop.f32.mrb[188].mxu1  ;;  %v4724_v11 = vmax.f32 %v4602_v15, %v4692_v46 }
 0x672   : > { %v10081_v63 = vpop.f32.mrb[189].mxu1 }
 0x673   : > { %v4725_v44 = vmax.f32 %v4605_v6, %v4693_v24  ;;  %v10082_v5 = vadd.f32 %v10081_v63, %v10080_v17  ;;  %v10083_v2 = vpop.f32.mrb[190].mxu1 }
 0x674   : > { %v10084_v35 = vpop.f32.mrb[191].mxu1 }
 0x675   : > { %v4610_v62 = vadd.f32 %v10082_v5, %v13588_v61  ;;  %v10085_v27 = vadd.f32 %v10084_v35, %v10083_v2  ;;  %v4750_v10 = vpack.c.bf16 %v4725_v44, %v4724_v11 }
 0x677   : > { %v4694_v25 = vmul.f32 0.01, %v4610_v62  ;;  %v4613_v30 = vadd.f32 %v10085_v27, %v13588_v61  ;;  %10646 = vmatprep.mubr.msk.bf16.mxu1 %vm4799_vm0, %v4750_v10 }
 0x679   : > { %v4695_v51 = vmul.f32 0.01, %v4613_v30  ;;  %v10086_v48 = vpop.f32.mrb[192].mxu1  ;;  %v4726_v33 = vmax.f32 %v4610_v62, %v4694_v25 }
 0x67a   : > { %v10087_v43 = vpop.f32.mrb[193].mxu1 }
 0x67b   : > { %v4727_v47 = vmax.f32 %v4613_v30, %v4695_v51  ;;  %v10088_v18 = vadd.f32 %v10087_v43, %v10086_v48  ;;  %v10089_v29 = vpop.f32.mrb[194].mxu1 }
 0x67c   : > { %v10090_v49 = vpop.f32.mrb[195].mxu1 }
 0x67d   : > { %v4618_v54 = vadd.f32 %v10088_v18, %v13588_v61  ;;  %v10091_v13 = vadd.f32 %v10090_v49, %v10089_v29  ;;  %v4751_v0 = vpack.c.bf16 %v4727_v47, %v4726_v33 }
 0x67f   : > { %v4696_v55 = vmul.f32 0.01, %v4618_v54  ;;  %v4621_v16 = vadd.f32 %v10091_v13, %v13588_v61  ;;  %10647 = vmatmul.mubr.msk.bf16.gmra.mrb[236].mxu1 %vm4799_vm0, %v4751_v0 }
 0x681   : > { %v4697_v8 = vmul.f32 0.01, %v4621_v16  ;;  %v10092_v41 = vpop.f32.mrb[196].mxu1  ;;  %v4728_v36 = vmax.f32 %v4618_v54, %v4696_v55 }
 0x682   : > { %v10093_v60 = vpop.f32.mrb[197].mxu1 }
 0x683   : > { %v4729_v32 = vmax.f32 %v4621_v16, %v4697_v8  ;;  %v10094_v21 = vadd.f32 %v10093_v60, %v10092_v41  ;;  %v10095_v14 = vpop.f32.mrb[198].mxu1 }
 0x684   : > { %v10096_v50 = vpop.f32.mrb[199].mxu1 }
 0x685   : > { %v4626_v45 = vadd.f32 %v10094_v21, %v13588_v61  ;;  %v10097_v19 = vadd.f32 %v10096_v50, %v10095_v14  ;;  %v4752_v34 = vpack.c.bf16 %v4729_v32, %v4728_v36 }
 0x687   : > { %v4698_v38 = vmul.f32 0.01, %v4626_v45  ;;  %v4629_v42 = vadd.f32 %v10097_v19, %v13588_v61  ;;  %10650 = vmatprep.mubr.msk.bf16.mxu1 %vm4799_vm0, %v4752_v34  ;;  %v11421_v19 = vld [vmem:[#allocation17 + $0x38] sm:$0xff]  }
 0x688   : > { %10680 = vmatprep.subr.bf16.mxu1 %v11421_v19 }
 0x689   : > { %v4699_v53 = vmul.f32 0.01, %v4629_v42  ;;  %v10098_v12 = vpop.f32.mrb[200].mxu1  ;;  %v4730_v58 = vmax.f32 %v4626_v45, %v4698_v38  ;;  %10681 = vmatpush3.bf16.msra.mxu1 %v11421_v19 }
 0x68a   : > { %v10099_v9 = vpop.f32.mrb[201].mxu1 }
 0x68b   : > { %v4731_v39 = vmax.f32 %v4629_v42, %v4699_v53  ;;  %v10100_v52 = vadd.f32 %v10099_v9, %v10098_v12  ;;  %v10101_v23 = vpop.f32.mrb[202].mxu1 }
 0x68c   : > { %v10102_v1 = vpop.f32.mrb[203].mxu1 }
 0x68d   : > { %v4634_v57 = vadd.f32 %v10100_v52, %v13588_v61  ;;  %v10103_v56 = vadd.f32 %v10102_v1, %v10101_v23  ;;  %v4753_v4 = vpack.c.bf16 %v4731_v39, %v4730_v58 }
 0x68f   : > { %v4700_v22 = vmul.f32 0.01, %v4634_v57  ;;  %v4637_v59 = vadd.f32 %v10103_v56, %v13588_v61  ;;  %10651 = vmatmul.mubr.msk.bf16.gmra.mrb[240].mxu1 %vm4799_vm0, %v4753_v4 }
 0x691   : > { %v4701_v37 = vmul.f32 0.01, %v4637_v59  ;;  %v10104_v15 = vpop.f32.mrb[204].mxu1  ;;  %v4732_v28 = vmax.f32 %v4634_v57, %v4700_v22 }
 0x692   : > { %v10105_v20 = vpop.f32.mrb[205].mxu1 }
 0x693   : > { %v4733_v46 = vmax.f32 %v4637_v59, %v4701_v37  ;;  %v10106_v6 = vadd.f32 %v10105_v20, %v10104_v15  ;;  %v10107_v24 = vpop.f32.mrb[206].mxu1 }
 0x694   : > { %v10108_v17 = vpop.f32.mrb[207].mxu1 }
 0x695   : > { %v4642_v63 = vadd.f32 %v10106_v6, %v13588_v61  ;;  %v10109_v11 = vadd.f32 %v10108_v17, %v10107_v24  ;;  %v4754_v44 = vpack.c.bf16 %v4733_v46, %v4732_v28 }
 0x697   : > { %v4702_v5 = vmul.f32 0.01, %v4642_v63  ;;  %v4645_v2 = vadd.f32 %v10109_v11, %v13588_v61  ;;  %10654 = vmatprep.mubr.msk.bf16.mxu1 %vm4799_vm0, %v4754_v44 }
 0x699   : > { %v4703_v35 = vmul.f32 0.01, %v4645_v2  ;;  %v10110_v62 = vpop.f32.mrb[208].mxu1  ;;  %v4734_v10 = vmax.f32 %v4642_v63, %v4702_v5 }
 0x69a   : > { %v10111_v27 = vpop.f32.mrb[209].mxu1 }
 0x69b   : > { %v4735_v25 = vmax.f32 %v4645_v2, %v4703_v35  ;;  %v10112_v30 = vadd.f32 %v10111_v27, %v10110_v62  ;;  %v10113_v51 = vpop.f32.mrb[210].mxu1  ;;  %v11424_v2 = vld [vmem:[#allocation20 + $0x4] ss:$8 sps:$4 sm:$0xff]   ;;  %v13638_v35 = vld [vmem:[#allocation16] ss:$0 sm:$0xff] }
 0x69c   : > { %v10114_v48 = vpop.f32.mrb[211].mxu1  ;;  %5509 = vmatprep.subr.bf16.mxu1 %v11424_v2 }
 0x69d   : > { %v4650_v43 = vadd.f32 %v10112_v30, %v13588_v61  ;;  %v10115_v33 = vadd.f32 %v10114_v48, %v10113_v51  ;;  %v4755_v47 = vpack.c.bf16 %v4735_v25, %v4734_v10 }
 0x69f   : > { %v4704_v18 = vmul.f32 0.01, %v4650_v43  ;;  %v4653_v29 = vadd.f32 %v10115_v33, %v13588_v61  ;;  %10655 = vmatmul.mubr.msk.bf16.gmra.mrb[244].mxu1 %vm4799_vm0, %v4755_v47 }
 0x6a1   : > { %v4705_v49 = vmul.f32 0.01, %v4653_v29  ;;  %v10116_v54 = vpop.f32.mrb[212].mxu1  ;;  %v4736_v0 = vmax.f32 %v4650_v43, %v4704_v18 }
 0x6a2   : > { %v10117_v13 = vpop.f32.mrb[213].mxu1 }
 0x6a3   : > { %v4737_v55 = vmax.f32 %v4653_v29, %v4705_v49  ;;  %v10118_v16 = vadd.f32 %v10117_v13, %v10116_v54  ;;  %v10119_v8 = vpop.f32.mrb[214].mxu1 }
 0x6a4   : > { %v10120_v41 = vpop.f32.mrb[215].mxu1 }
 0x6a5   : > { %v4658_v60 = vadd.f32 %v10118_v16, %v13588_v61  ;;  %v10121_v36 = vadd.f32 %v10120_v41, %v10119_v8  ;;  %v4756_v32 = vpack.c.bf16 %v4737_v55, %v4736_v0  ;;  %v11422_v16 = vld [vmem:[#allocation20] ss:$8 sps:$4 sm:$0xff]   ;;  %v11427_v8 = vld [vmem:[#allocation20 + $0x14] ss:$8 sps:$4 sm:$0xff]   ;;  %v11425_v41 = vld [vmem:[#allocation20 + $0x10] ss:$8 sps:$4 sm:$0xff]  }
 0x6a7   : > { %v4706_v21 = vmul.f32 0.01, %v4658_v60  ;;  %v4661_v14 = vadd.f32 %v10121_v36, %v13588_v61  ;;  %10658 = vmatprep.mubr.msk.bf16.mxu1 %vm4799_vm0, %v4756_v32 }
 0x6a9   : > { %v4707_v50 = vmul.f32 0.01, %v4661_v14  ;;  %v10122_v45 = vpop.f32.mrb[216].mxu1  ;;  %v4738_v38 = vmax.f32 %v4658_v60, %v4706_v21  ;;  %v11430_v60 = vld [vmem:[#allocation20 + $0x24] ss:$8 sps:$4 sm:$0xff]  }
 0x6aa   : > { %v10123_v34 = vpop.f32.mrb[217].mxu1 }
 0x6ab   : > { %v4739_v42 = vmax.f32 %v4661_v14, %v4707_v50  ;;  %v10124_v53 = vadd.f32 %v10123_v34, %v10122_v45  ;;  %v10125_v12 = vpop.f32.mrb[218].mxu1  ;;  %v11428_v45 = vld [vmem:[#allocation20 + $0x20] ss:$8 sps:$4 sm:$0xff]  }
 0x6ac   : > { %v10126_v9 = vpop.f32.mrb[219].mxu1 }
 0x6ad   : > { %v4666_v58 = vadd.f32 %v10124_v53, %v13588_v61  ;;  %v10127_v39 = vadd.f32 %v10126_v9, %v10125_v12  ;;  %v4757_v52 = vpack.c.bf16 %v4739_v42, %v4738_v38  ;;  %v11433_v42 = vld [vmem:[#allocation20 + $0x34] ss:$8 sps:$4 sm:$0xff]  }
 0x6af   : > { %v4708_v23 = vmul.f32 0.01, %v4666_v58  ;;  %v4669_v1 = vadd.f32 %v10127_v39, %v13588_v61  ;;  %10659 = vmatmul.mubr.msk.bf16.gmra.mrb[248].mxu1 %vm4799_vm0, %v4757_v52  ;;  %v11431_v39 = vld [vmem:[#allocation20 + $0x30] ss:$8 sps:$4 sm:$0xff]  }
 0x6b1   : > { %v4709_v57 = vmul.f32 0.01, %v4669_v1  ;;  %v10128_v56 = vpop.f32.mrb[220].mxu1  ;;  %v4740_v22 = vmax.f32 %v4666_v58, %v4708_v23 }
 0x6b2   : > { %v10129_v4 = vpop.f32.mrb[221].mxu1 }
 0x6b3   : > { %v4741_v59 = vmax.f32 %v4669_v1, %v4709_v57  ;;  %v10130_v37 = vadd.f32 %v10129_v4, %v10128_v56  ;;  %v10131_v15 = vpop.f32.mrb[222].mxu1 }
 0x6b4   : > { %v10132_v20 = vpop.f32.mrb[223].mxu1 }
 0x6b5   : > { %v4674_v28 = vadd.f32 %v10130_v37, %v13588_v61  ;;  %v10133_v46 = vadd.f32 %v10132_v20, %v10131_v15  ;;  %v4758_v6 = vpack.c.bf16 %v4741_v59, %v4740_v22 }
 0x6b7   : > { %v4710_v24 = vmul.f32 0.01, %v4674_v28  ;;  %v4677_v17 = vadd.f32 %v10133_v46, %v13588_v61  ;;  %10662 = vmatprep.mubr.msk.bf16.mxu1 %vm4799_vm0, %v4758_v6 }
 0x6b9   : > { %v4711_v63 = vmul.f32 0.01, %v4677_v17  ;;  %v4742_v11 = vmax.f32 %v4674_v28, %v4710_v24 }
 0x6bb   : > { %v4743_v44 = vmax.f32 %v4677_v17, %v4711_v63 }
 0x6bd   : > { %v4759_v5 = vpack.c.bf16 %v4743_v44, %v4742_v11 }
 0x6bf   : > { %10663 = vmatmul.mubr.msk.bf16.gmra.mrb[252].mxu1 %vm4799_vm0, %v4759_v5 }
 0x722   : > { %v10636_v62 = vpop.f32.mrb[224].mxu1 }
 0x723   : > { %v4891_v27 = vadd.f32 %v10636_v62, %v13638_v35  ;;  %v4882_v10 = vpop.f32.mrb[225].mxu1 }
 0x724   : > { %v4883_v25 = vadd.f32 %v13638_v35, %v4882_v10  ;;  %v10637_v30 = vpop.f32.mrb[226].mxu1 }
 0x725   : > { %v5011_v61 = vmul.f32 0.01, %v4891_v27  ;;  %v4894_v51 = vadd.f32 %v10637_v30, %v13638_v35  ;;  %v4885_v48 = vpop.f32.mrb[227].mxu1 }
 0x726   : > { %v5009_v43 = vmul.f32 0.01, %v4883_v25  ;;  %v4886_v33 = vadd.f32 %v13638_v35, %v4885_v48 }
 0x727   : > { %v5012_v47 = vmul.f32 0.01, %v4894_v51  ;;  %v5043_v29 = vmax.f32 %v4891_v27, %v5011_v61 }
 0x728   : > { %v5010_v18 = vmul.f32 0.01, %v4886_v33  ;;  %v5041_v54 = vmax.f32 %v4883_v25, %v5009_v43 }
 0x729   : > { %v5044_v49 = vmax.f32 %v4894_v51, %v5012_v47 }
 0x72a   : > { %v5042_v13 = vmax.f32 %v4886_v33, %v5010_v18 }
 0x72b   : > { %v5074_v0 = vpack.c.bf16 %v5044_v49, %v5043_v29 }
 0x72c   : > { %v5073_v55 = vpack.c.bf16 %v5042_v13, %v5041_v54 }
 0x72e   : > { %10682 = vmatprep.mubr.bf16.mxu1 %v5073_v55 }
 0x72f   : > { %10683 = vmatmul.mubr.bf16.vlgmr.msra.gmra.mrb[0].mxu1 %v5074_v0 }
 0x730   : > { %5510 = vmatpush1.bf16.msra.mxu1 %v11422_v16 }
 0x731   : > { %5511 = vmatprep.subr.bf16.mxu1 %v11427_v8 }
 0x732   : > { %v10640_v36 = vpop.f32.mrb[228].mxu1 }
 0x733   : > { %v4907_v32 = vadd.f32 %v10640_v36, %v13638_v35  ;;  %v4898_v21 = vpop.f32.mrb[229].mxu1 }
 0x734   : > { %v4899_v14 = vadd.f32 %v13638_v35, %v4898_v21  ;;  %v10641_v50 = vpop.f32.mrb[230].mxu1  ;;  %5512 = vmatpush1.bf16.msra.mxu1 %v11425_v41 }
 0x735   : > { %v5015_v19 = vmul.f32 0.01, %v4907_v32  ;;  %v4910_v34 = vadd.f32 %v10641_v50, %v13638_v35  ;;  %v4901_v38 = vpop.f32.mrb[231].mxu1  ;;  %5513 = vmatprep.subr.bf16.mxu1 %v11430_v60 }
 0x736   : > { %v5013_v53 = vmul.f32 0.01, %v4899_v14  ;;  %v4902_v12 = vadd.f32 %v13638_v35, %v4901_v38 }
 0x737   : > { %v5016_v9 = vmul.f32 0.01, %v4910_v34  ;;  %v5047_v52 = vmax.f32 %v4907_v32, %v5015_v19 }
 0x738   : > { %v5014_v58 = vmul.f32 0.01, %v4902_v12  ;;  %5514 = vmatpush1.bf16.msra.mxu1 %v11428_v45  ;;  %v5045_v1 = vmax.f32 %v4899_v14, %v5013_v53 }
 0x739   : > { %v5048_v23 = vmax.f32 %v4910_v34, %v5016_v9  ;;  %5515 = vmatprep.subr.bf16.mxu1 %v11433_v42 }
 0x73a   : > { %v5046_v57 = vmax.f32 %v4902_v12, %v5014_v58 }
 0x73b   : > { %v5076_v56 = vpack.c.bf16 %v5048_v23, %v5047_v52 }
 0x73c   : > { %v5075_v4 = vpack.c.bf16 %v5046_v57, %v5045_v1  ;;  %5516 = vmatpush1.bf16.msra.mxu1 %v11431_v39 }
 0x73e   : > { %10686 = vmatprep.mubr.bf16.mxu1 %v5075_v4 }
 0x73f   : > { %10687 = vmatmul.mubr.bf16.gmra.mrb[4].mxu1 %v5076_v56 }
 0x742   : > { %v10644_v22 = vpop.f32.mrb[232].mxu1 }
 0x743   : > { %v4923_v59 = vadd.f32 %v10644_v22, %v13638_v35  ;;  %v4914_v37 = vpop.f32.mrb[233].mxu1 }
 0x744   : > { %v4915_v15 = vadd.f32 %v13638_v35, %v4914_v37  ;;  %v10645_v20 = vpop.f32.mrb[234].mxu1 }
 0x745   : > { %v5019_v28 = vmul.f32 0.01, %v4923_v59  ;;  %v4926_v46 = vadd.f32 %v10645_v20, %v13638_v35  ;;  %v4917_v6 = vpop.f32.mrb[235].mxu1 }
 0x746   : > { %v5017_v24 = vmul.f32 0.01, %v4915_v15  ;;  %v4918_v17 = vadd.f32 %v13638_v35, %v4917_v6 }
 0x747   : > { %v5020_v63 = vmul.f32 0.01, %v4926_v46  ;;  %v5051_v44 = vmax.f32 %v4923_v59, %v5019_v28 }
 0x748   : > { %v5018_v11 = vmul.f32 0.01, %v4918_v17  ;;  %v5049_v2 = vmax.f32 %v4915_v15, %v5017_v24 }
 0x749   : > { %v5052_v5 = vmax.f32 %v4926_v46, %v5020_v63 }
 0x74a   : > { %v5050_v62 = vmax.f32 %v4918_v17, %v5018_v11 }
 0x74b   : > { %v5078_v27 = vpack.c.bf16 %v5052_v5, %v5051_v44 }
 0x74c   : > { %v5077_v10 = vpack.c.bf16 %v5050_v62, %v5049_v2 }
 0x74e   : > { %10690 = vmatprep.mubr.bf16.mxu1 %v5077_v10 }
 0x74f   : > { %10691 = vmatmul.mubr.bf16.gmra.mrb[8].mxu1 %v5078_v27 }
 0x752   : > { %v10648_v25 = vpop.f32.mrb[236].mxu1 }
 0x753   : > { %v4939_v30 = vadd.f32 %v10648_v25, %v13638_v35  ;;  %v4930_v61 = vpop.f32.mrb[237].mxu1 }
 0x754   : > { %v4931_v51 = vadd.f32 %v13638_v35, %v4930_v61  ;;  %v10649_v48 = vpop.f32.mrb[238].mxu1 }
 0x755   : > { %v5023_v43 = vmul.f32 0.01, %v4939_v30  ;;  %v4942_v33 = vadd.f32 %v10649_v48, %v13638_v35  ;;  %v4933_v47 = vpop.f32.mrb[239].mxu1 }
 0x756   : > { %v5021_v18 = vmul.f32 0.01, %v4931_v51  ;;  %v4934_v29 = vadd.f32 %v13638_v35, %v4933_v47 }
 0x757   : > { %v5024_v49 = vmul.f32 0.01, %v4942_v33  ;;  %v5055_v13 = vmax.f32 %v4939_v30, %v5023_v43 }
 0x758   : > { %v5022_v54 = vmul.f32 0.01, %v4934_v29  ;;  %v5053_v55 = vmax.f32 %v4931_v51, %v5021_v18 }
 0x759   : > { %v5056_v0 = vmax.f32 %v4942_v33, %v5024_v49 }
 0x75a   : > { %v5054_v16 = vmax.f32 %v4934_v29, %v5022_v54 }
 0x75b   : > { %v5080_v8 = vpack.c.bf16 %v5056_v0, %v5055_v13 }
 0x75c   : > { %v5079_v41 = vpack.c.bf16 %v5054_v16, %v5053_v55 }
 0x75e   : > { %10694 = vmatprep.mubr.bf16.mxu1 %v5079_v41 }
 0x75f   : > { %10695 = vmatmul.mubr.bf16.gmra.mrb[12].mxu1 %v5080_v8 }
 0x762   : > { %v10652_v60 = vpop.f32.mrb[240].mxu1 }
 0x763   : > { %v4955_v36 = vadd.f32 %v10652_v60, %v13638_v35  ;;  %v4946_v32 = vpop.f32.mrb[241].mxu1 }
 0x764   : > { %v4947_v21 = vadd.f32 %v13638_v35, %v4946_v32  ;;  %v10653_v14 = vpop.f32.mrb[242].mxu1 }
 0x765   : > { %v5027_v50 = vmul.f32 0.01, %v4955_v36  ;;  %v4958_v45 = vadd.f32 %v10653_v14, %v13638_v35  ;;  %v4949_v19 = vpop.f32.mrb[243].mxu1 }
 0x766   : > { %v5025_v34 = vmul.f32 0.01, %v4947_v21  ;;  %v4950_v38 = vadd.f32 %v13638_v35, %v4949_v19 }
 0x767   : > { %v5028_v42 = vmul.f32 0.01, %v4958_v45  ;;  %v5059_v12 = vmax.f32 %v4955_v36, %v5027_v50 }
 0x768   : > { %v5026_v53 = vmul.f32 0.01, %v4950_v38  ;;  %v5057_v58 = vmax.f32 %v4947_v21, %v5025_v34 }
 0x769   : > { %v5060_v9 = vmax.f32 %v4958_v45, %v5028_v42 }
 0x76a   : > { %v5058_v39 = vmax.f32 %v4950_v38, %v5026_v53 }
 0x76b   : > { %v5082_v52 = vpack.c.bf16 %v5060_v9, %v5059_v12 }
 0x76c   : > { %v5081_v23 = vpack.c.bf16 %v5058_v39, %v5057_v58  ;;  %v15060_v58 = vmov 0   ;;  %v13673_v39 = vld [vmem:[#allocation23] sm:$0xff] }
 0x76e   : > { %10698 = vmatprep.mubr.bf16.mxu1 %v5081_v23 }
 0x76f   : > { %10699 = vmatmul.mubr.bf16.gmra.mrb[16].mxu1 %v5082_v52  ;;  %v13675_v52 = vld [vmem:[#allocation23 + $0x20] sm:$0xff] }
 0x770   : > { %v9823_v23 = vcombine.high %v13673_v39, %v13675_v52 }
 0x772   : > { %v10656_v1 = vpop.f32.mrb[244].mxu1  ;;  %6672 = vmatprep.subr.bf16.mxu1 %v9823_v23  ;;  %v5923_v23 = vld [vmem:[#allocation23 + $0x1e8] sm:$0xff] }
 0x773   : > { %v4971_v57 = vadd.f32 %v10656_v1, %v13638_v35  ;;  %v4962_v56 = vpop.f32.mrb[245].mxu1  ;;  %v5867_v1 = vld [vmem:[#allocation23 + $0x28] sm:$0xff] }
 0x774   : > { %v4963_v4 = vadd.f32 %v13638_v35, %v4962_v56  ;;  %v10657_v22 = vpop.f32.mrb[246].mxu1 }
 0x775   : > { %v5031_v59 = vmul.f32 0.01, %v4971_v57  ;;  %v4974_v37 = vadd.f32 %v10657_v22, %v13638_v35  ;;  %v4965_v15 = vpop.f32.mrb[247].mxu1  ;;  %v5875_v22 = vld [vmem:[#allocation23 + $0x68] sm:$0xff] }
 0x776   : > { %v5029_v20 = vmul.f32 0.01, %v4963_v4  ;;  %v4966_v28 = vadd.f32 %v13638_v35, %v4965_v15  ;;  %v5879_v15 = vld [vmem:[#allocation23 + $0x88] sm:$0xff] }
 0x777   : > { %v5032_v46 = vmul.f32 0.01, %v4974_v37  ;;  %v5063_v24 = vmax.f32 %v4971_v57, %v5031_v59 }
 0x778   : > { %v5030_v6 = vmul.f32 0.01, %v4966_v28  ;;  %v5061_v63 = vmax.f32 %v4963_v4, %v5029_v20  ;;  %v5871_v4 = vld [vmem:[#allocation23 + $0x48] sm:$0xff] }
 0x779   : > { %v5064_v17 = vmax.f32 %v4974_v37, %v5032_v46  ;;  %v9832_v59 = vcombine.low %v5871_v4, %v5875_v22  ;;  %v9833_v37 = vcombine.high %v5871_v4, %v5875_v22  ;;  %v5883_v20 = vld [vmem:[#allocation23 + $0xa8] sm:$0xff]  ;;  %v13679_v46 = vld [vmem:[#allocation19] ss:$0 sm:$0xff] }
 0x77a   : > { %v5062_v11 = vmax.f32 %v4966_v28, %v5030_v6  ;;  %v9841_v28 = vcombine.high %v5879_v15, %v5883_v20  ;;  %v9840_v6 = vcombine.low %v5879_v15, %v5883_v20  ;;  %v5927_v20 = vld [vmem:[#allocation23 + $0x208] sm:$0xff] }
 0x77b   : > { %v5084_v44 = vpack.c.bf16 %v5064_v17, %v5063_v24 }
 0x77c   : > { %v5083_v5 = vpack.c.bf16 %v5062_v11, %v5061_v63 }
 0x77e   : > { %10702 = vmatprep.mubr.bf16.mxu1 %v5083_v5 }
 0x77f   : > { %10703 = vmatmul.mubr.bf16.gmra.mrb[20].mxu1 %v5084_v44 }
 0x782   : > { %v10660_v2 = vpop.f32.mrb[248].mxu1 }
 0x783   : > { %v4987_v62 = vadd.f32 %v10660_v2, %v13638_v35  ;;  %v4978_v27 = vpop.f32.mrb[249].mxu1 }
 0x784   : > { %v4979_v10 = vadd.f32 %v13638_v35, %v4978_v27  ;;  %v10661_v25 = vpop.f32.mrb[250].mxu1 }
 0x785   : > { %v5035_v30 = vmul.f32 0.01, %v4987_v62  ;;  %v4990_v61 = vadd.f32 %v10661_v25, %v13638_v35  ;;  %v4981_v51 = vpop.f32.mrb[251].mxu1  ;;  %v5887_v25 = vld [vmem:[#allocation23 + $0xc8] sm:$0xff] }
 0x786   : > { %v5033_v48 = vmul.f32 0.01, %v4979_v10  ;;  %v4982_v43 = vadd.f32 %v13638_v35, %v4981_v51 }
 0x787   : > { %v5036_v33 = vmul.f32 0.01, %v4990_v61  ;;  %v5067_v18 = vmax.f32 %v4987_v62, %v5035_v30  ;;  %v5891_v30 = vld [vmem:[#allocation23 + $0xe8] sm:$0xff] }
 0x788   : > { %v5034_v47 = vmul.f32 0.01, %v4982_v43  ;;  %v5065_v49 = vmax.f32 %v4979_v10, %v5033_v48  ;;  %v9848_v51 = vcombine.low %v5887_v25, %v5891_v30  ;;  %v9849_v48 = vcombine.high %v5887_v25, %v5891_v30 }
 0x789   : > { %v5068_v29 = vmax.f32 %v4990_v61, %v5036_v33  ;;  %v5899_v33 = vld [vmem:[#allocation23 + $0x128] sm:$0xff] }
 0x78a   : > { %v5066_v54 = vmax.f32 %v4982_v43, %v5034_v47  ;;  %v5895_v43 = vld [vmem:[#allocation23 + $0x108] sm:$0xff] }
 0x78b   : > { %v5086_v13 = vpack.c.bf16 %v5068_v29, %v5067_v18  ;;  %v5870_v18 = vld [vmem:[#allocation23 + $0x40] sm:$0xff] }
 0x78c   : > { %v5085_v0 = vpack.c.bf16 %v5066_v54, %v5065_v49  ;;  %v5874_v54 = vld [vmem:[#allocation23 + $0x60] sm:$0xff] }
 0x78e   : > { %10706 = vmatprep.mubr.bf16.mxu1 %v5085_v0  ;;  %v5903_v0 = vld [vmem:[#allocation23 + $0x148] sm:$0xff] }
 0x78f   : > { %10707 = vmatmul.mubr.bf16.gmra.mrb[24].mxu1 %v5086_v13  ;;  %v9857_v13 = vcombine.high %v5895_v43, %v5899_v33 }
 0x792   : > { %v10664_v55 = vpop.f32.mrb[252].mxu1 }
 0x793   : > { %v5003_v16 = vadd.f32 %v10664_v55, %v13638_v35  ;;  %v4994_v8 = vpop.f32.mrb[253].mxu1  ;;  %v5907_v55 = vld [vmem:[#allocation23 + $0x168] sm:$0xff] }
 0x794   : > { %v4995_v41 = vadd.f32 %v13638_v35, %v4994_v8  ;;  %v10665_v60 = vpop.f32.mrb[254].mxu1 }
 0x795   : > { %v5039_v36 = vmul.f32 0.01, %v5003_v16  ;;  %v5006_v32 = vadd.f32 %v10665_v60, %v13638_v35  ;;  %v4997_v21 = vpop.f32.mrb[255].mxu1 }
 0x796   : > { %v5037_v14 = vmul.f32 0.01, %v4995_v41  ;;  %v4998_v50 = vadd.f32 %v13638_v35, %v4997_v21  ;;  %v5863_v35 = vld [vmem:[#allocation23 + $0x8] sm:$0xff]  ;;  %v9831_v21 = vcombine.high %v5870_v18, %v5874_v54 }
 0x797   : > { %v5040_v45 = vmul.f32 0.01, %v5006_v32  ;;  %v5071_v34 = vmax.f32 %v5003_v16, %v5039_v36  ;;  %v9824_v57 = vcombine.low %v5863_v35, %v5867_v1  ;;  %v9825_v56 = vcombine.high %v5863_v35, %v5867_v1 }
 0x798   : > { %v5038_v19 = vmul.f32 0.01, %v4998_v50  ;;  %v5069_v42 = vmax.f32 %v4995_v41, %v5037_v14  ;;  %v9856_v41 = vcombine.low %v5895_v43, %v5899_v33  ;;  %v9822_v36 = vcombine.low %v13673_v39, %v13675_v52  ;;  %v5890_v39 = vld [vmem:[#allocation23 + $0xe0] sm:$0xff]  ;;  %v5919_v52 = vld [vmem:[#allocation23 + $0x1c8] sm:$0xff] }
 0x799   : > { %v5072_v38 = vmax.f32 %v5006_v32, %v5040_v45  ;;  %6865 = vmatprep.subr.bf16.mxu0 %v9825_v56  ;;  %v9865_v14 = vcombine.high %v5903_v0, %v5907_v55  ;;  %v5915_v45 = vld [vmem:[#allocation23 + $0x1a8] sm:$0xff]  ;;  %v9881_v15 = vcombine.high %v5919_v52, %v5923_v23  ;;  %v5906_v43 = vld [vmem:[#allocation23 + $0x160] sm:$0xff] }
 0x79a   : > { %v5070_v53 = vmax.f32 %v4998_v50, %v5038_v19  ;;  %6866 = vmatpush1.bf16.msra.mxu0 %v9824_v57  ;;  %v5911_v50 = vld [vmem:[#allocation23 + $0x188] sm:$0xff]  ;;  %v5878_v19 = vld [vmem:[#allocation23 + $0x80] sm:$0xff] }
 0x79b   : > { %v5088_v12 = vpack.c.bf16 %v5072_v38, %v5071_v34  ;;  %6867 = vmatprep.subr.bf16.mxu0 %v9833_v37  ;;  %v5882_v34 = vld [vmem:[#allocation23 + $0xa0] sm:$0xff]  ;;  %v9864_v38 = vcombine.low %v5903_v0, %v5907_v55  ;;  %v9872_v1 = vcombine.low %v5911_v50, %v5915_v45  ;;  %v5935_v33 = vld [vmem:[#allocation23 + $0x248] sm:$0xff] }
 0x79c   : > { %v5087_v9 = vpack.c.bf16 %v5070_v53, %v5069_v42  ;;  %v9830_v42 = vcombine.low %v5870_v18, %v5874_v54  ;;  %v9873_v53 = vcombine.high %v5911_v50, %v5915_v45  ;;  %v9838_v4 = vcombine.low %v5878_v19, %v5882_v34  ;;  %v5918_v45 = vld [vmem:[#allocation23 + $0x1c0] sm:$0xff] }
 0x79e   : > { %10710 = vmatprep.mubr.bf16.mxu1 %v5087_v9  ;;  %6868 = vmatpush1.bf16.msra.mxu0 %v9832_v59  ;;  %v5886_v9 = vld [vmem:[#allocation23 + $0xc0] sm:$0xff] }
 0x79f   : > { %10711 = vmatmul.mubr.bf16.gmra.mrb[28].mxu1 %v5088_v12  ;;  %6869 = vmatprep.subr.bf16.mxu0 %v9841_v28  ;;  %v9839_v12 = vcombine.high %v5878_v19, %v5882_v34  ;;  %v9847_v37 = vcombine.high %v5886_v9, %v5890_v39  ;;  %v5931_v28 = vld [vmem:[#allocation23 + $0x228] sm:$0xff]  ;;  %v5922_v19 = vld [vmem:[#allocation23 + $0x1e0] sm:$0xff] }
 0x7a0   : > { %5541 = vmatprep.mubr.bf16.mxu1 %v15060_v58  ;;  %v5951_v34 = vld [vmem:[#allocation23 + $0x2c8] sm:$0xff] }
 0x7a2   : > { %6870 = vmatpush1.bf16.msra.mxu0 %v9840_v6 }
 0x7a3   : > { %6871 = vmatprep.subr.bf16.mxu0 %v9849_v48 }
 0x7a6   : > { %6872 = vmatpush1.bf16.msra.mxu0 %v9848_v51 }
 0x7a7   : > { %6873 = vmatprep.subr.bf16.mxu0 %v9857_v13 }
 0x7aa   : > { %6874 = vmatpush1.bf16.msra.mxu0 %v9856_v41  ;;  %v5947_v41 = vld [vmem:[#allocation23 + $0x2a8] sm:$0xff] }
 0x7ab   : > { %6875 = vmatprep.subr.bf16.mxu0 %v9865_v14 }
 0x7ae   : > { %6876 = vmatpush1.bf16.msra.mxu0 %v9864_v38  ;;  %v5955_v38 = vld [vmem:[#allocation23 + $0x2e8] sm:$0xff] }
 0x7af   : > { %6877 = vmatprep.subr.bf16.mxu0 %v9873_v53 }
 0x7b2   : > { %6878 = vmatpush1.bf16.msra.mxu0 %v9872_v1  ;;  %v9913_v1 = vcombine.high %v5951_v34, %v5955_v38 }
 0x7b3   : > { %6879 = vmatprep.subr.bf16.mxu0 %v9881_v15  ;;  %v5930_v15 = vld [vmem:[#allocation23 + $0x220] sm:$0xff] }
 0x802   : > { %v10684_v24 = vpop.f32.mrb[0].mxu1 }
 0x803   : > { %v5203_v17 = vadd.f32 %v10684_v24, %v13679_v46  ;;  %v5194_v63 = vpop.f32.mrb[1].mxu1 }
 0x804   : > { %v5195_v11 = vadd.f32 %v13679_v46, %v5194_v63  ;;  %v10685_v44 = vpop.f32.mrb[2].mxu1  ;;  %v5894_v63 = vld [vmem:[#allocation23 + $0x100] sm:$0xff] }
 0x805   : > { %v5323_v5 = vmul.f32 0.01, %v5203_v17  ;;  %v5206_v2 = vadd.f32 %v10685_v44, %v13679_v46  ;;  %v5197_v62 = vpop.f32.mrb[3].mxu1 }
 0x806   : > { %v5321_v27 = vmul.f32 0.01, %v5195_v11  ;;  %v5198_v10 = vadd.f32 %v13679_v46, %v5197_v62 }
 0x807   : > { %v5324_v61 = vmul.f32 0.01, %v5206_v2  ;;  %v5355_v29 = vmax.f32 %v5203_v17, %v5323_v5 }
 0x808   : > { %v5322_v47 = vmul.f32 0.01, %v5198_v10  ;;  %v5353_v16 = vmax.f32 %v5195_v11, %v5321_v27  ;;  %v5898_v11 = vld [vmem:[#allocation23 + $0x120] sm:$0xff]  ;;  %v9846_v27 = vcombine.low %v5886_v9, %v5890_v39 }
 0x809   : > { %v5356_v49 = vmax.f32 %v5206_v2, %v5324_v61  ;;  %v9880_v2 = vcombine.low %v5919_v52, %v5923_v23  ;;  %v9855_v30 = vcombine.high %v5894_v63, %v5898_v11  ;;  %v5902_v61 = vld [vmem:[#allocation23 + $0x140] sm:$0xff]  ;;  %v9854_v13 = vcombine.low %v5894_v63, %v5898_v11 }
 0x80a   : > { %v5354_v8 = vmax.f32 %v5198_v10, %v5322_v47  ;;  %v9889_v10 = vcombine.high %v5927_v20, %v5931_v28  ;;  %v5939_v47 = vld [vmem:[#allocation23 + $0x268] sm:$0xff]  ;;  %v9863_v55 = vcombine.high %v5902_v61, %v5906_v43 }
 0x80b   : > { %v5386_v60 = vpack.c.bf16 %v5356_v49, %v5355_v29  ;;  %6880 = vmatpush1.bf16.msra.mxu0 %v9880_v2  ;;  %v9888_v49 = vcombine.low %v5927_v20, %v5931_v28 }
 0x80c   : > { %v5385_v32 = vpack.c.bf16 %v5354_v8, %v5353_v16  ;;  %6881 = vmatprep.subr.bf16.mxu0 %v9889_v10  ;;  %v9897_v16 = vcombine.high %v5935_v33, %v5939_v47  ;;  %v5943_v8 = vld [vmem:[#allocation23 + $0x288] sm:$0xff] }
 0x80d   : > { %v9905_v14 = vcombine.high %v5943_v8, %v5947_v41  ;;  %v9904_v53 = vcombine.low %v5943_v8, %v5947_v41  ;;  %v5967_v10 = vld [vmem:[#allocation23 + $0x348] sm:$0xff]  ;;  %v5950_v41 = vld [vmem:[#allocation23 + $0x2c0] sm:$0xff] }
 0x80e   : > { %9806 = vmatmul.mubr.msk.bf16.vlgmr.msra.gmra.mrb[32].mxu1 %vm4799_vm0, %v5385_v32  ;;  %v9896_v32 = vcombine.low %v5935_v33, %v5939_v47 }
 0x80f   : > { %5551 = vmatprep.mubr.bf16.mxu1 %v15060_v58  ;;  %6673 = vmatpush1.bf16.msra.mxu1 %v9822_v36  ;;  %v5914_v36 = vld [vmem:[#allocation23 + $0x1a0] sm:$0xff] }
 0x810   : > { %6674 = vmatprep.subr.bf16.mxu1 %v9831_v21  ;;  %6882 = vmatpush1.bf16.msra.mxu0 %v9888_v49  ;;  %v9862_v21 = vcombine.low %v5902_v61, %v5906_v43  ;;  %v5979_v49 = vld [vmem:[#allocation23 + $0x3a8] sm:$0xff] }
 0x811   : > { %6883 = vmatprep.subr.bf16.mxu0 %v9897_v16 }
 0x812   : > { %v10688_v35 = vpop.f32.mrb[4].mxu1 }
 0x813   : > { %v5219_v57 = vadd.f32 %v10688_v35, %v13679_v46  ;;  %v5210_v56 = vpop.f32.mrb[5].mxu1  ;;  %6675 = vmatpush1.bf16.msra.mxu1 %v9830_v42  ;;  %v9879_v35 = vcombine.high %v5918_v45, %v5922_v19 }
 0x814   : > { %v5211_v22 = vadd.f32 %v13679_v46, %v5210_v56  ;;  %v10689_v59 = vpop.f32.mrb[6].mxu1  ;;  %6676 = vmatprep.subr.bf16.mxu1 %v9839_v12  ;;  %6884 = vmatpush1.bf16.msra.mxu0 %v9896_v32  ;;  %v5963_v56 = vld [vmem:[#allocation23 + $0x328] sm:$0xff] }
 0x815   : > { %v5327_v6 = vmul.f32 0.01, %v5219_v57  ;;  %v5222_v24 = vadd.f32 %v10689_v59, %v13679_v46  ;;  %v5213_v17 = vpop.f32.mrb[7].mxu1  ;;  %6885 = vmatprep.subr.bf16.mxu0 %v9905_v14 }
 0x816   : > { %v5325_v44 = vmul.f32 0.01, %v5211_v22  ;;  %v5214_v5 = vadd.f32 %v13679_v46, %v5213_v17  ;;  %9807 = vmatmul.mubr.msk.bf16.gmra.mrb[36].mxu1 %vm4799_vm0, %v5386_v60  ;;  %v5910_v60 = vld [vmem:[#allocation23 + $0x180] sm:$0xff]  ;;  %v9878_v17 = vcombine.low %v5918_v45, %v5922_v19 }
 0x817   : > { %v5328_v62 = vmul.f32 0.01, %v5222_v24  ;;  %5561 = vmatprep.mubr.bf16.mxu1 %v15060_v58  ;;  %6677 = vmatpush1.bf16.msra.mxu1 %v9838_v4  ;;  %v5359_v51 = vmax.f32 %v5219_v57, %v5327_v6  ;;  %v9871_v50 = vcombine.high %v5910_v60, %v5914_v36  ;;  %v9870_v39 = vcombine.low %v5910_v60, %v5914_v36  ;;  %v5959_v57 = vld [vmem:[#allocation23 + $0x308] sm:$0xff]  ;;  %v5954_v60 = vld [vmem:[#allocation23 + $0x2e0] sm:$0xff] }
 0x818   : > { %v5326_v25 = vmul.f32 0.01, %v5214_v5  ;;  %6678 = vmatprep.subr.bf16.mxu1 %v9847_v37  ;;  %v5357_v18 = vmax.f32 %v5211_v22, %v5325_v44  ;;  %v5926_v37 = vld [vmem:[#allocation23 + $0x200] sm:$0xff]  ;;  %6886 = vmatpush1.bf16.msra.mxu0 %v9904_v53  ;;  %v9912_v6 = vcombine.low %v5951_v34, %v5955_v38  ;;  %v9921_v63 = vcombine.high %v5959_v57, %v5963_v56 }
 0x819   : > { %v5360_v48 = vmax.f32 %v5222_v24, %v5328_v62  ;;  %v9887_v44 = vcombine.high %v5926_v37, %v5930_v15  ;;  %6887 = vmatprep.subr.bf16.mxu0 %v9913_v1  ;;  %v9886_v43 = vcombine.low %v5926_v37, %v5930_v15  ;;  %v9911_v34 = vcombine.high %v5950_v41, %v5954_v60 }
 0x81a   : > { %v5358_v29 = vmax.f32 %v5214_v5, %v5326_v25  ;;  %v5934_v5 = vld [vmem:[#allocation23 + $0x240] sm:$0xff]  ;;  %v5971_v25 = vld [vmem:[#allocation23 + $0x368] sm:$0xff] }
 0x81b   : > { %v5388_v54 = vpack.c.bf16 %v5360_v48, %v5359_v51  ;;  %6679 = vmatpush1.bf16.msra.mxu1 %v9846_v27  ;;  %v5938_v27 = vld [vmem:[#allocation23 + $0x260] sm:$0xff]  ;;  %v9920_v51 = vcombine.low %v5959_v57, %v5963_v56 }
 0x81c   : > { %v5387_v0 = vpack.c.bf16 %v5358_v29, %v5357_v18  ;;  %6680 = vmatprep.subr.bf16.mxu1 %v9855_v30  ;;  %6888 = vmatpush1.bf16.msra.mxu0 %v9912_v6  ;;  %v9895_v47 = vcombine.high %v5934_v5, %v5938_v27  ;;  %v9929_v18 = vcombine.high %v5967_v10, %v5971_v25  ;;  %v5975_v29 = vld [vmem:[#allocation23 + $0x388] sm:$0xff] }
 0x81d   : > { %6889 = vmatprep.subr.bf16.mxu0 %v9921_v63  ;;  %v9937_v16 = vcombine.high %v5975_v29, %v5979_v49  ;;  %v9936_v32 = vcombine.low %v5975_v29, %v5979_v49  ;;  %v5978_v63 = vld [vmem:[#allocation23 + $0x3a0] sm:$0xff] }
 0x81e   : > { %9808 = vmatmul.mubr.msk.bf16.gmra.mrb[40].mxu1 %vm4799_vm0, %v5387_v0  ;;  %v9928_v0 = vcombine.low %v5967_v10, %v5971_v25 }
 0x81f   : > { %5571 = vmatprep.mubr.bf16.mxu1 %v15060_v58  ;;  %6681 = vmatpush1.bf16.msra.mxu1 %v9854_v13  ;;  %v5946_v13 = vld [vmem:[#allocation23 + $0x2a0] sm:$0xff] }
 0x820   : > { %6682 = vmatprep.subr.bf16.mxu1 %v9863_v55  ;;  %6890 = vmatpush1.bf16.msra.mxu0 %v9920_v51  ;;  %v9894_v55 = vcombine.low %v5934_v5, %v5938_v27 }
 0x821   : > { %6891 = vmatprep.subr.bf16.mxu0 %v9929_v18 }
 0x822   : > { %v10692_v42 = vpop.f32.mrb[8].mxu1 }
 0x823   : > { %v5235_v12 = vadd.f32 %v10692_v42, %v13679_v46  ;;  %v5226_v9 = vpop.f32.mrb[9].mxu1  ;;  %6683 = vmatpush1.bf16.msra.mxu1 %v9862_v21 }
 0x824   : > { %v5227_v52 = vadd.f32 %v13679_v46, %v5226_v9  ;;  %v10693_v23 = vpop.f32.mrb[10].mxu1  ;;  %6684 = vmatprep.subr.bf16.mxu1 %v9871_v50  ;;  %6892 = vmatpush1.bf16.msra.mxu0 %v9928_v0  ;;  %v5962_v9 = vld [vmem:[#allocation23 + $0x320] sm:$0xff] }
 0x825   : > { %v5331_v4 = vmul.f32 0.01, %v5235_v12  ;;  %v5238_v22 = vadd.f32 %v10693_v23, %v13679_v46  ;;  %v5229_v59 = vpop.f32.mrb[11].mxu1  ;;  %6893 = vmatprep.subr.bf16.mxu0 %v9937_v16 }
 0x826   : > { %v5329_v20 = vmul.f32 0.01, %v5227_v52  ;;  %v5230_v28 = vadd.f32 %v13679_v46, %v5229_v59  ;;  %9809 = vmatmul.mubr.msk.bf16.gmra.mrb[44].mxu1 %vm4799_vm0, %v5388_v54  ;;  %v5942_v54 = vld [vmem:[#allocation23 + $0x280] sm:$0xff] }
 0x827   : > { %v5332_v24 = vmul.f32 0.01, %v5238_v22  ;;  %5581 = vmatprep.mubr.bf16.mxu1 %v15060_v58  ;;  %6685 = vmatpush1.bf16.msra.mxu1 %v9870_v39  ;;  %v5363_v2 = vmax.f32 %v5235_v12, %v5331_v4  ;;  %v9903_v8 = vcombine.high %v5942_v54, %v5946_v13  ;;  %v9902_v50 = vcombine.low %v5942_v54, %v5946_v13  ;;  %v5958_v12 = vld [vmem:[#allocation23 + $0x300] sm:$0xff] }
 0x828   : > { %v5330_v11 = vmul.f32 0.01, %v5230_v28  ;;  %6686 = vmatprep.subr.bf16.mxu1 %v9879_v35  ;;  %v5361_v30 = vmax.f32 %v5227_v52, %v5329_v20  ;;  %6894 = vmatpush1.bf16.msra.mxu0 %v9936_v32  ;;  %v9910_v35 = vcombine.low %v5950_v41, %v5954_v60  ;;  %v9919_v57 = vcombine.high %v5958_v12, %v5962_v9  ;;  %v5970_v59 = vld [vmem:[#allocation23 + $0x360] sm:$0xff] }
 0x829   : > { %v5364_v62 = vmax.f32 %v5238_v22, %v5332_v24  ;;  %v5966_v22 = vld [vmem:[#allocation23 + $0x340] sm:$0xff] }
 0x82a   : > { %v5362_v61 = vmax.f32 %v5230_v28, %v5330_v11  ;;  %v9918_v28 = vcombine.low %v5958_v12, %v5962_v9  ;;  %v9927_v24 = vcombine.high %v5966_v22, %v5970_v59  ;;  %v9926_v11 = vcombine.low %v5966_v22, %v5970_v59 }
 0x82b   : > { %v5390_v48 = vpack.c.bf16 %v5364_v62, %v5363_v2  ;;  %6687 = vmatpush1.bf16.msra.mxu1 %v9878_v17  ;;  %v5974_v17 = vld [vmem:[#allocation23 + $0x380] sm:$0xff] }
 0x82c   : > { %v5389_v33 = vpack.c.bf16 %v5362_v61, %v5361_v30  ;;  %6688 = vmatprep.subr.bf16.mxu1 %v9887_v44  ;;  %v9935_v44 = vcombine.high %v5974_v17, %v5978_v63  ;;  %v9934_v27 = vcombine.low %v5974_v17, %v5978_v63  ;;  %v5987_v63 = vld [vmem:[#allocation23 + $0x3e8] sm:$0xff] }
 0x82e   : > { %9810 = vmatmul.mubr.msk.bf16.gmra.mrb[48].mxu1 %vm4799_vm0, %v5389_v33 }
 0x82f   : > { %5591 = vmatprep.mubr.bf16.mxu1 %v15060_v58  ;;  %6689 = vmatpush1.bf16.msra.mxu1 %v9886_v43 }
 0x830   : > { %6690 = vmatprep.subr.bf16.mxu1 %v9895_v47 }
 0x832   : > { %v10696_v36 = vpop.f32.mrb[12].mxu1 }
 0x833   : > { %v5251_v21 = vadd.f32 %v10696_v36, %v13679_v46  ;;  %v5242_v14 = vpop.f32.mrb[13].mxu1  ;;  %6691 = vmatpush1.bf16.msra.mxu1 %v9894_v55 }
 0x834   : > { %v5243_v45 = vadd.f32 %v13679_v46, %v5242_v14  ;;  %v10697_v19 = vpop.f32.mrb[14].mxu1  ;;  %6692 = vmatprep.subr.bf16.mxu1 %v9903_v8 }
 0x835   : > { %v5335_v38 = vmul.f32 0.01, %v5251_v21  ;;  %v5254_v42 = vadd.f32 %v10697_v19, %v13679_v46  ;;  %v5245_v53 = vpop.f32.mrb[15].mxu1 }
 0x836   : > { %v5333_v39 = vmul.f32 0.01, %v5243_v45  ;;  %v5246_v52 = vadd.f32 %v13679_v46, %v5245_v53  ;;  %9811 = vmatmul.mubr.msk.bf16.gmra.mrb[52].mxu1 %vm4799_vm0, %v5390_v48 }
 0x837   : > { %v5336_v23 = vmul.f32 0.01, %v5254_v42  ;;  %5601 = vmatprep.mubr.bf16.mxu1 %v15060_v58  ;;  %6693 = vmatpush1.bf16.msra.mxu1 %v9902_v50  ;;  %v5367_v56 = vmax.f32 %v5251_v21, %v5335_v38 }
 0x838   : > { %v5334_v1 = vmul.f32 0.01, %v5246_v52  ;;  %6694 = vmatprep.subr.bf16.mxu1 %v9911_v34  ;;  %v5365_v37 = vmax.f32 %v5243_v45, %v5333_v39 }
 0x839   : > { %v5368_v4 = vmax.f32 %v5254_v42, %v5336_v23 }
 0x83a   : > { %v5366_v15 = vmax.f32 %v5246_v52, %v5334_v1 }
 0x83b   : > { %v5392_v20 = vpack.c.bf16 %v5368_v4, %v5367_v56  ;;  %6695 = vmatpush1.bf16.msra.mxu1 %v9910_v35 }
 0x83c   : > { %v5391_v6 = vpack.c.bf16 %v5366_v15, %v5365_v37  ;;  %6696 = vmatprep.subr.bf16.mxu1 %v9919_v57  ;;  %v5982_v15 = vld [vmem:[#allocation23 + $0x3c0] sm:$0xff] }
 0x83e   : > { %9812 = vmatmul.mubr.msk.bf16.gmra.mrb[56].mxu1 %vm4799_vm0, %v5391_v6 }
 0x83f   : > { %5611 = vmatprep.mubr.bf16.mxu1 %v15060_v58  ;;  %6697 = vmatpush1.bf16.msra.mxu1 %v9918_v28  ;;  %v5983_v28 = vld [vmem:[#allocation23 + $0x3c8] sm:$0xff] }
 0x840   : > { %6698 = vmatprep.subr.bf16.mxu1 %v9927_v24 }
 0x842   : > { %v10700_v5 = vpop.f32.mrb[16].mxu1 }
 0x843   : > { %v5267_v2 = vadd.f32 %v10700_v5, %v13679_v46  ;;  %v5258_v62 = vpop.f32.mrb[17].mxu1  ;;  %6699 = vmatpush1.bf16.msra.mxu1 %v9926_v11  ;;  %v9944_v5 = vcombine.low %v5983_v28, %v5987_v63 }
 0x844   : > { %v5259_v10 = vadd.f32 %v13679_v46, %v5258_v62  ;;  %v10701_v25 = vpop.f32.mrb[18].mxu1  ;;  %6700 = vmatprep.subr.bf16.mxu1 %v9935_v44 }
 0x845   : > { %v5339_v30 = vmul.f32 0.01, %v5267_v2  ;;  %v5270_v61 = vadd.f32 %v10701_v25, %v13679_v46  ;;  %v5261_v51 = vpop.f32.mrb[19].mxu1 }
 0x846   : > { %v5337_v48 = vmul.f32 0.01, %v5259_v10  ;;  %v5262_v43 = vadd.f32 %v13679_v46, %v5261_v51  ;;  %9813 = vmatmul.mubr.msk.bf16.gmra.mrb[60].mxu1 %vm4799_vm0, %v5392_v20  ;;  %v5986_v20 = vld [vmem:[#allocation23 + $0x3e0] sm:$0xff]  ;;  %v13739_v51 = vld [vmem:[#allocation23 + $0x30] sm:$0xff] }
 0x847   : > { %v5340_v33 = vmul.f32 0.01, %v5270_v61  ;;  %5621 = vmatprep.mubr.bf16.mxu1 %v15060_v58  ;;  %6701 = vmatpush1.bf16.msra.mxu1 %v9934_v27  ;;  %v5371_v18 = vmax.f32 %v5267_v2, %v5339_v30  ;;  %v9943_v17 = vcombine.high %v5982_v15, %v5986_v20  ;;  %v9942_v44 = vcombine.low %v5982_v15, %v5986_v20 }
 0x848   : > { %v5338_v47 = vmul.f32 0.01, %v5262_v43  ;;  %v5369_v49 = vmax.f32 %v5259_v10, %v5337_v48  ;;  %v9945_v2 = vcombine.high %v5983_v28, %v5987_v63  ;;  %v13741_v48 = vld [vmem:[#allocation23 + $0x18] sm:$0xff] }
 0x849   : > { %v5372_v29 = vmax.f32 %v5270_v61, %v5340_v33  ;;  %6702 = vmatprep.subr.bf16.mxu1 %v9943_v17  ;;  %v13737_v61 = vld [vmem:[#allocation23 + $0x10] sm:$0xff]  ;;  %v5877_v17 = vld [vmem:[#allocation23 + $0x78] sm:$0xff] }
 0x84a   : > { %v5370_v54 = vmax.f32 %v5262_v43, %v5338_v47  ;;  %6895 = vmatprep.subr.bf16.mxu0 %v9945_v2  ;;  %v9826_v47 = vcombine.low %v13737_v61, %v13739_v51 }
 0x84b   : > { %v5394_v13 = vpack.c.bf16 %v5372_v29, %v5371_v18  ;;  %6703 = vmatpush1.bf16.msra.mxu1 %v9942_v44  ;;  %6896 = vmatpush1.bf16.msra.mxu0 %v9944_v5  ;;  %v9827_v18 = vcombine.high %v13737_v61, %v13739_v51  ;;  %v13748_v29 = vld [vmem:[#allocation23 + $0x38] sm:$0xff] }
 0x84c   : > { %v5393_v0 = vpack.c.bf16 %v5370_v54, %v5369_v49  ;;  %v5893_v61 = vld [vmem:[#allocation23 + $0xf8] sm:$0xff] }
 0x84d   : > { %7058 = vmatprep.subr.bf16.mxu1 %v9827_v18  ;;  %v5884_v18 = vld [vmem:[#allocation23 + $0xb0] sm:$0xff] }
 0x84e   : > { %9814 = vmatmul.mubr.msk.bf16.gmra.mrb[64].mxu1 %vm4799_vm0, %v5393_v0  ;;  %v9829_v0 = vcombine.high %v13741_v48, %v13748_v29 }
 0x84f   : > { %5631 = vmatprep.mubr.bf16.mxu1 %v15060_v58 }
 0x850   : > { %7251 = vmatprep.subr.bf16.mxu0 %v9829_v0  ;;  %v5881_v0 = vld [vmem:[#allocation23 + $0x98] sm:$0xff] }
 0x852   : > { %v10704_v55 = vpop.f32.mrb[20].mxu1 }
 0x853   : > { %v5283_v16 = vadd.f32 %v10704_v55, %v13679_v46  ;;  %v5274_v8 = vpop.f32.mrb[21].mxu1 }
 0x854   : > { %v5275_v41 = vadd.f32 %v13679_v46, %v5274_v8  ;;  %v10705_v60 = vpop.f32.mrb[22].mxu1 }
 0x855   : > { %v5343_v36 = vmul.f32 0.01, %v5283_v16  ;;  %v5286_v32 = vadd.f32 %v10705_v60, %v13679_v46  ;;  %v5277_v21 = vpop.f32.mrb[23].mxu1 }
 0x856   : > { %v5341_v14 = vmul.f32 0.01, %v5275_v41  ;;  %v5278_v50 = vadd.f32 %v13679_v46, %v5277_v21  ;;  %9815 = vmatmul.mubr.msk.bf16.gmra.mrb[68].mxu1 %vm4799_vm0, %v5394_v13  ;;  %v9828_v13 = vcombine.low %v13741_v48, %v13748_v29 }
 0x857   : > { %v5344_v45 = vmul.f32 0.01, %v5286_v32  ;;  %5641 = vmatprep.mubr.bf16.mxu1 %v15060_v58  ;;  %v5375_v34 = vmax.f32 %v5283_v16, %v5343_v36 }
 0x858   : > { %v5342_v19 = vmul.f32 0.01, %v5278_v50  ;;  %v5373_v42 = vmax.f32 %v5275_v41, %v5341_v14 }
 0x859   : > { %v5376_v38 = vmax.f32 %v5286_v32, %v5344_v45 }
 0x85a   : > { %v5374_v53 = vmax.f32 %v5278_v50, %v5342_v19 }
 0x85b   : > { %v5396_v12 = vpack.c.bf16 %v5376_v38, %v5375_v34 }
 0x85c   : > { %v5395_v9 = vpack.c.bf16 %v5374_v53, %v5373_v42 }
 0x85e   : > { %9816 = vmatmul.mubr.msk.bf16.gmra.mrb[72].mxu1 %vm4799_vm0, %v5395_v9 }
 0x85f   : > { %5651 = vmatprep.mubr.bf16.mxu1 %v15060_v58 }
 0x862   : > { %v10708_v39 = vpop.f32.mrb[24].mxu1 }
 0x863   : > { %v5299_v52 = vadd.f32 %v10708_v39, %v13679_v46  ;;  %v5290_v23 = vpop.f32.mrb[25].mxu1 }
 0x864   : > { %v5291_v35 = vadd.f32 %v13679_v46, %v5290_v23  ;;  %v10709_v1 = vpop.f32.mrb[26].mxu1 }
 0x865   : > { %v5347_v57 = vmul.f32 0.01, %v5299_v52  ;;  %v5302_v56 = vadd.f32 %v10709_v1, %v13679_v46  ;;  %v5293_v4 = vpop.f32.mrb[27].mxu1 }
 0x866   : > { %v5345_v22 = vmul.f32 0.01, %v5291_v35  ;;  %v5294_v59 = vadd.f32 %v13679_v46, %v5293_v4  ;;  %9817 = vmatmul.mubr.msk.bf16.gmra.mrb[76].mxu1 %vm4799_vm0, %v5396_v12 }
 0x867   : > { %v5348_v37 = vmul.f32 0.01, %v5302_v56  ;;  %5661 = vmatprep.mubr.bf16.mxu1 %v15060_v58  ;;  %v5379_v6 = vmax.f32 %v5299_v52, %v5347_v57 }
 0x868   : > { %v5346_v24 = vmul.f32 0.01, %v5294_v59  ;;  %v5377_v62 = vmax.f32 %v5291_v35, %v5345_v22 }
 0x869   : > { %v5380_v11 = vmax.f32 %v5302_v56, %v5348_v37  ;;  %v5872_v37 = vld [vmem:[#allocation23 + $0x50] sm:$0xff] }
 0x86a   : > { %v5378_v27 = vmax.f32 %v5294_v59, %v5346_v24  ;;  %v5873_v24 = vld [vmem:[#allocation23 + $0x58] sm:$0xff] }
 0x86b   : > { %v5398_v10 = vpack.c.bf16 %v5380_v11, %v5379_v6  ;;  %v5876_v6 = vld [vmem:[#allocation23 + $0x70] sm:$0xff] }
 0x86c   : > { %v5397_v25 = vpack.c.bf16 %v5378_v27, %v5377_v62 }
 0x86e   : > { %9818 = vmatmul.mubr.msk.bf16.gmra.mrb[80].mxu1 %vm4799_vm0, %v5397_v25 }
 0x86f   : > { %5671 = vmatprep.mubr.bf16.mxu1 %v15060_v58 }
 0x872   : > { %v10712_v30 = vpop.f32.mrb[28].mxu1 }
 0x873   : > { %v5315_v43 = vadd.f32 %v10712_v30, %v13679_v46  ;;  %v5306_v33 = vpop.f32.mrb[29].mxu1  ;;  %v9835_v30 = vcombine.high %v5872_v37, %v5876_v6 }
 0x874   : > { %v5307_v49 = vadd.f32 %v13679_v46, %v5306_v33  ;;  %v10713_v54 = vpop.f32.mrb[30].mxu1  ;;  %v5880_v33 = vld [vmem:[#allocation23 + $0x90] sm:$0xff] }
 0x875   : > { %v5351_v55 = vmul.f32 0.01, %v5315_v43  ;;  %v5318_v16 = vadd.f32 %v10713_v54, %v13679_v46  ;;  %v5309_v8 = vpop.f32.mrb[31].mxu1  ;;  %v9842_v29 = vcombine.low %v5880_v33, %v5884_v18 }
 0x876   : > { %v5349_v41 = vmul.f32 0.01, %v5307_v49  ;;  %v5310_v60 = vadd.f32 %v13679_v46, %v5309_v8  ;;  %9819 = vmatmul.mubr.msk.bf16.gmra.mrb[84].mxu1 %vm4799_vm0, %v5398_v10  ;;  %v5409_v46 = vld [vmem:[#allocation22] sm:$0x3] }
 0x877   : > { %v5352_v36 = vmul.f32 0.01, %v5318_v16  ;;  %5681 = vmatprep.mubr.bf16.mxu1 %v15060_v58  ;;  %v5383_v21 = vmax.f32 %v5315_v43, %v5351_v55  ;;  %v13763_v38 = vrot.slane %v5409_v46, %v15058_v3  ;;  %v13766_v42 = vrot.slane %v5409_v46, %v15059_v7  ;;  %v5885_v55 = vld [vmem:[#allocation23 + $0xb8] sm:$0xff]  ;;  %v5892_v46 = vld [vmem:[#allocation23 + $0xf0] sm:$0xff] }
 0x878   : > { %v5350_v32 = vmul.f32 0.01, %v5310_v60  ;;  %v5381_v50 = vmax.f32 %v5307_v49, %v5349_v41  ;;  %v9837_v43 = vcombine.high %v5873_v24, %v5877_v17  ;;  %v9834_v41 = vcombine.low %v5872_v37, %v5876_v6  ;;  %v5901_v37 = vld [vmem:[#allocation23 + $0x138] sm:$0xff] }
 0x879   : > { %v5384_v14 = vmax.f32 %v5318_v16, %v5352_v36  ;;  %v9843_v36 = vcombine.high %v5880_v33, %v5884_v18 }
 0x87a   : > { %v5382_v45 = vmax.f32 %v5310_v60, %v5350_v32  ;;  %v9836_v60 = vcombine.low %v5873_v24, %v5877_v17 }
 0x87b   : > { %v5400_v19 = vpack.c.bf16 %v5384_v14, %v5383_v21  ;;  %v9845_v14 = vcombine.high %v5881_v0, %v5885_v55 }
 0x87c   : > { %v5399_v34 = vpack.c.bf16 %v5382_v45, %v5381_v50  ;;  %v5888_v50 = vld [vmem:[#allocation23 + $0xd0] sm:$0xff] }
 0x87e   : > { %9820 = vmatmul.mubr.msk.bf16.gmra.mrb[88].mxu1 %vm4799_vm0, %v5399_v34 }
 0x87f   : > { %5691 = vmatprep.mubr.bf16.mxu1 %v15060_v58 }
 0x886   : > { %9821 = vmatmul.mubr.msk.bf16.gmra.mrb[92].mxu1 %vm4799_vm0, %v5400_v19 }
 0x8e1   : > { %v5543_v53 = vpop.f32.mrb[32].mxu1 }
 0x8e2   : > { %v5544_v12 = vadd.f32 %v5543_v53, %v13763_v38  ;;  %v5545_v9 = vpop.f32.mrb[33].mxu1  ;;  %v5889_v53 = vld [vmem:[#allocation23 + $0xd8] sm:$0xff] }
 0x8e3   : > { %v5546_v39 = vadd.f32 %v5545_v9, %v13766_v42  ;;  %v5547_v52 = vpop.f32.mrb[34].mxu1  ;;  %v9852_v6 = vcombine.low %v5889_v53, %v5893_v61 }
 0x8e4   : > { %v5702_v23 = vmul.f32 0.01, %v5544_v12  ;;  %v5548_v35 = vadd.f32 %v5547_v52, %v13763_v38  ;;  %v5549_v58 = vpop.f32.mrb[35].mxu1 }
 0x8e5   : > { %v5703_v1 = vmul.f32 0.01, %v5546_v39  ;;  %v5550_v57 = vadd.f32 %v5549_v58, %v13766_v42  ;;  %v9851_v58 = vcombine.high %v5888_v50, %v5892_v46 }
 0x8e6   : > { %v5704_v56 = vmul.f32 0.01, %v5548_v35  ;;  %v5766_v22 = vmax.f32 %v5544_v12, %v5702_v23 }
 0x8e7   : > { %v5705_v4 = vmul.f32 0.01, %v5550_v57  ;;  %v5767_v15 = vmax.f32 %v5546_v39, %v5703_v1  ;;  %v9844_v39 = vcombine.low %v5881_v0, %v5885_v55  ;;  %v9853_v1 = vcombine.high %v5889_v53, %v5893_v61 }
 0x8e8   : > { %v5768_v59 = vmax.f32 %v5548_v35, %v5704_v56  ;;  %v5900_v56 = vld [vmem:[#allocation23 + $0x130] sm:$0xff] }
 0x8e9   : > { %v5769_v20 = vmax.f32 %v5550_v57, %v5705_v4  ;;  %v5553_v28 = vpop.f32.mrb[36].mxu1  ;;  %v5896_v57 = vld [vmem:[#allocation23 + $0x110] sm:$0xff] }
 0x8ea   : > { %v13772_v63 = vpack.c.bf16 %v5768_v59, %v5766_v22  ;;  %v5554_v11 = vadd.f32 %v5553_v28, %v13763_v38  ;;  %v5555_v44 = vpop.f32.mrb[37].mxu1  ;;  %v5897_v59 = vld [vmem:[#allocation23 + $0x118] sm:$0xff]  ;;  %v9850_v28 = vcombine.low %v5888_v50, %v5892_v46  ;;  %v9859_v24 = vcombine.high %v5896_v57, %v5900_v56  ;;  %v5916_v50 = vld [vmem:[#allocation23 + $0x1b0] sm:$0xff] }
 0x8eb   : > { %v5556_v5 = vadd.f32 %v5555_v44, %v13766_v42  ;;  %v5557_v2 = vpop.f32.mrb[38].mxu1  ;;  %v13776_v62 = vpack.c.bf16 %v5769_v20, %v5767_v15  ;;  %v9861_v44 = vcombine.high %v5897_v59, %v5901_v37  ;;  %v5917_v46 = vld [vmem:[#allocation23 + $0x1b8] sm:$0xff] }
 0x8ec   : > { %v5706_v27 = vmul.f32 0.01, %v5554_v11  ;;  %v5558_v10 = vadd.f32 %v5557_v2, %v13763_v38  ;;  %v5559_v25 = vpop.f32.mrb[39].mxu1 }
 0x8ed   : > { %v5707_v49 = vmul.f32 0.01, %v5556_v5  ;;  %v5560_v54 = vadd.f32 %v5559_v25, %v13766_v42  ;;  %6704 = vmatprep.mubr.bf16.mxu1 %v13776_v62  ;;  %6897 = vmatprep.mubr.bf16.mxu0 %v13776_v62  ;;  %v5908_v25 = vld [vmem:[#allocation23 + $0x170] sm:$0xff] }
 0x8ee   : > { %v5708_v16 = vmul.f32 0.01, %v5558_v10  ;;  %6705 = vmatmul.mubr.bf16.vlgmr.msra.gmra.mrb[96].mxu1 %v13772_v63  ;;  %6898 = vmatmul.mubr.bf16.vlgmr.msra.gmra.mrb[160].mxu0 %v13772_v63  ;;  %v5770_v32 = vmax.f32 %v5554_v11, %v5706_v27 }
 0x8ef   : > { %v5709_v8 = vmul.f32 0.01, %v5560_v54  ;;  %7059 = vmatpush1.bf16.msra.mxu1 %v9826_v47  ;;  %7252 = vmatpush1.bf16.msra.mxu0 %v9828_v13  ;;  %v5771_v45 = vmax.f32 %v5556_v5, %v5707_v49  ;;  %v5904_v5 = vld [vmem:[#allocation23 + $0x150] sm:$0xff] }
 0x8f0   : > { %v5772_v21 = vmax.f32 %v5558_v10, %v5708_v16  ;;  %7060 = vmatprep.subr.bf16.mxu1 %v9835_v30  ;;  %7253 = vmatprep.subr.bf16.mxu0 %v9837_v43  ;;  %v5905_v30 = vld [vmem:[#allocation23 + $0x158] sm:$0xff] }
 0x8f1   : > { %v5773_v19 = vmax.f32 %v5560_v54, %v5709_v8  ;;  %v5563_v34 = vpop.f32.mrb[40].mxu1  ;;  %v5909_v43 = vld [vmem:[#allocation23 + $0x178] sm:$0xff]  ;;  %v9858_v54 = vcombine.low %v5896_v57, %v5900_v56  ;;  %v9860_v8 = vcombine.low %v5897_v59, %v5901_v37 }
 0x8f2   : > { %v13790_v51 = vpack.c.bf16 %v5772_v21, %v5770_v32  ;;  %v5564_v48 = vadd.f32 %v5563_v34, %v13763_v38  ;;  %v5565_v47 = vpop.f32.mrb[41].mxu1  ;;  %v9867_v32 = vcombine.high %v5904_v5, %v5908_v25  ;;  %v9869_v21 = vcombine.high %v5905_v30, %v5909_v43  ;;  %v5913_v34 = vld [vmem:[#allocation23 + $0x198] sm:$0xff] }
 0x8f3   : > { %v5566_v13 = vadd.f32 %v5565_v47, %v13766_v42  ;;  %v5567_v12 = vpop.f32.mrb[42].mxu1  ;;  %v13794_v9 = vpack.c.bf16 %v5773_v19, %v5771_v45  ;;  %7061 = vmatpush1.bf16.msra.mxu1 %v9834_v41  ;;  %7254 = vmatpush1.bf16.msra.mxu0 %v9836_v60  ;;  %v9868_v47 = vcombine.low %v5905_v30, %v5909_v43  ;;  %v5921_v57 = vld [vmem:[#allocation23 + $0x1d8] sm:$0xff] }
 0x8f4   : > { %v5710_v52 = vmul.f32 0.01, %v5564_v48  ;;  %v5568_v23 = vadd.f32 %v5567_v12, %v13763_v38  ;;  %v5569_v35 = vpop.f32.mrb[43].mxu1  ;;  %7062 = vmatprep.subr.bf16.mxu1 %v9843_v36  ;;  %7255 = vmatprep.subr.bf16.mxu0 %v9845_v14  ;;  %v5912_v14 = vld [vmem:[#allocation23 + $0x190] sm:$0xff]  ;;  %v5925_v56 = vld [vmem:[#allocation23 + $0x1f8] sm:$0xff] }
 0x8f5   : > { %v5711_v4 = vmul.f32 0.01, %v5566_v13  ;;  %v5570_v22 = vadd.f32 %v5569_v35, %v13766_v42  ;;  %6714 = vmatprep.mubr.bf16.mxu1 %v13794_v9  ;;  %6907 = vmatprep.mubr.bf16.mxu0 %v13794_v9  ;;  %v9874_v37 = vcombine.low %v5912_v14, %v5916_v50  ;;  %v5929_v30 = vld [vmem:[#allocation23 + $0x218] sm:$0xff] }
 0x8f6   : > { %v5712_v15 = vmul.f32 0.01, %v5568_v23  ;;  %6715 = vmatmul.mubr.bf16.gmra.mrb[100].mxu1 %v13790_v51  ;;  %6908 = vmatmul.mubr.bf16.gmra.mrb[164].mxu0 %v13790_v51  ;;  %v5774_v17 = vmax.f32 %v5564_v48, %v5710_v52  ;;  %v9866_v48 = vcombine.low %v5904_v5, %v5908_v25  ;;  %v5920_v52 = vld [vmem:[#allocation23 + $0x1d0] sm:$0xff]  ;;  %v9885_v5 = vcombine.high %v5921_v57, %v5925_v56  ;;  %v5933_v43 = vld [vmem:[#allocation23 + $0x238] sm:$0xff] }
 0x8f7   : > { %v5713_v20 = vmul.f32 0.01, %v5570_v22  ;;  %7063 = vmatpush1.bf16.msra.mxu1 %v9842_v29  ;;  %7256 = vmatpush1.bf16.msra.mxu0 %v9844_v39  ;;  %v5775_v2 = vmax.f32 %v5566_v13, %v5711_v4  ;;  %v9875_v29 = vcombine.high %v5912_v14, %v5916_v50  ;;  %v9877_v39 = vcombine.high %v5913_v34, %v5917_v46  ;;  %v5940_v50 = vld [vmem:[#allocation23 + $0x270] sm:$0xff] }
 0x8f8   : > { %v5776_v11 = vmax.f32 %v5568_v23, %v5712_v15  ;;  %7064 = vmatprep.subr.bf16.mxu1 %v9851_v58  ;;  %7257 = vmatprep.subr.bf16.mxu0 %v9853_v1  ;;  %v5924_v1 = vld [vmem:[#allocation23 + $0x1f0] sm:$0xff] }
 0x8f9   : > { %v5777_v27 = vmax.f32 %v5570_v22, %v5713_v20  ;;  %v5573_v10 = vpop.f32.mrb[44].mxu1 }
 0x8fa   : > { %v13802_v33 = vpack.c.bf16 %v5776_v11, %v5774_v17  ;;  %v5574_v18 = vadd.f32 %v5573_v10, %v13763_v38  ;;  %v5575_v49 = vpop.f32.mrb[45].mxu1 }
 0x8fb   : > { %v5576_v0 = vadd.f32 %v5575_v49, %v13766_v42  ;;  %v5577_v55 = vpop.f32.mrb[46].mxu1  ;;  %v13806_v16 = vpack.c.bf16 %v5777_v27, %v5775_v2  ;;  %7065 = vmatpush1.bf16.msra.mxu1 %v9850_v28  ;;  %7258 = vmatpush1.bf16.msra.mxu0 %v9852_v6  ;;  %v9876_v6 = vcombine.low %v5913_v34, %v5917_v46  ;;  %v5928_v2 = vld [vmem:[#allocation23 + $0x210] sm:$0xff] }
 0x8fc   : > { %v5714_v41 = vmul.f32 0.01, %v5574_v18  ;;  %v5578_v60 = vadd.f32 %v5577_v55, %v13763_v38  ;;  %v5579_v36 = vpop.f32.mrb[47].mxu1  ;;  %7066 = vmatprep.subr.bf16.mxu1 %v9859_v24  ;;  %7259 = vmatprep.subr.bf16.mxu0 %v9861_v44  ;;  %v9883_v44 = vcombine.high %v5920_v52, %v5924_v1  ;;  %v5932_v27 = vld [vmem:[#allocation23 + $0x230] sm:$0xff] }
 0x8fd   : > { %v5715_v45 = vmul.f32 0.01, %v5576_v0  ;;  %v5580_v19 = vadd.f32 %v5579_v36, %v13766_v42  ;;  %6724 = vmatprep.mubr.bf16.mxu1 %v13806_v16  ;;  %6917 = vmatprep.mubr.bf16.mxu0 %v13806_v16  ;;  %v9891_v55 = vcombine.high %v5928_v2, %v5932_v27  ;;  %v5936_v36 = vld [vmem:[#allocation23 + $0x250] sm:$0xff] }
 0x8fe   : > { %v5716_v53 = vmul.f32 0.01, %v5578_v60  ;;  %6725 = vmatmul.mubr.bf16.gmra.mrb[104].mxu1 %v13802_v33  ;;  %6918 = vmatmul.mubr.bf16.gmra.mrb[168].mxu0 %v13802_v33  ;;  %v5778_v13 = vmax.f32 %v5574_v18, %v5714_v41 }
 0x8ff   : > { %v5717_v61 = vmul.f32 0.01, %v5580_v19  ;;  %7067 = vmatpush1.bf16.msra.mxu1 %v9858_v54  ;;  %7260 = vmatpush1.bf16.msra.mxu0 %v9860_v8  ;;  %v5779_v23 = vmax.f32 %v5576_v0, %v5715_v45  ;;  %v9882_v54 = vcombine.low %v5920_v52, %v5924_v1  ;;  %v9884_v0 = vcombine.low %v5921_v57, %v5925_v56  ;;  %v5937_v45 = vld [vmem:[#allocation23 + $0x258] sm:$0xff]  ;;  %v5948_v1 = vld [vmem:[#allocation23 + $0x2b0] sm:$0xff] }
 0x900   : > { %v5780_v12 = vmax.f32 %v5578_v60, %v5716_v53  ;;  %7068 = vmatprep.subr.bf16.mxu1 %v9867_v32  ;;  %7261 = vmatprep.subr.bf16.mxu0 %v9869_v21  ;;  %v9893_v60 = vcombine.high %v5929_v30, %v5933_v43 }
 0x901   : > { %v5781_v35 = vmax.f32 %v5580_v19, %v5717_v61  ;;  %v5583_v58 = vpop.f32.mrb[48].mxu1  ;;  %v5941_v19 = vld [vmem:[#allocation23 + $0x278] sm:$0xff]  ;;  %v9890_v61 = vcombine.low %v5928_v2, %v5932_v27 }
 0x902   : > { %v13814_v4 = vpack.c.bf16 %v5780_v12, %v5778_v13  ;;  %v5584_v22 = vadd.f32 %v5583_v58, %v13763_v38  ;;  %v5585_v59 = vpop.f32.mrb[49].mxu1  ;;  %v9892_v13 = vcombine.low %v5929_v30, %v5933_v43  ;;  %v5944_v58 = vld [vmem:[#allocation23 + $0x290] sm:$0xff]  ;;  %v5953_v30 = vld [vmem:[#allocation23 + $0x2d8] sm:$0xff] }
 0x903   : > { %v5586_v15 = vadd.f32 %v5585_v59, %v13766_v42  ;;  %v5587_v20 = vpop.f32.mrb[50].mxu1  ;;  %v13818_v28 = vpack.c.bf16 %v5781_v35, %v5779_v23  ;;  %7069 = vmatpush1.bf16.msra.mxu1 %v9866_v48  ;;  %7262 = vmatpush1.bf16.msra.mxu0 %v9868_v47  ;;  %v9899_v23 = vcombine.high %v5936_v36, %v5940_v50  ;;  %v5949_v59 = vld [vmem:[#allocation23 + $0x2b8] sm:$0xff] }
 0x904   : > { %v5718_v24 = vmul.f32 0.01, %v5584_v22  ;;  %v5588_v17 = vadd.f32 %v5587_v20, %v13763_v38  ;;  %v5589_v11 = vpop.f32.mrb[51].mxu1  ;;  %7070 = vmatprep.subr.bf16.mxu1 %v9875_v29  ;;  %7263 = vmatprep.subr.bf16.mxu0 %v9877_v39  ;;  %v9901_v35 = vcombine.high %v5937_v45, %v5941_v19  ;;  %v9898_v20 = vcombine.low %v5936_v36, %v5940_v50  ;;  %v5957_v43 = vld [vmem:[#allocation23 + $0x2f8] sm:$0xff] }
 0x905   : > { %v5719_v10 = vmul.f32 0.01, %v5586_v15  ;;  %v5590_v25 = vadd.f32 %v5589_v11, %v13766_v42  ;;  %6734 = vmatprep.mubr.bf16.mxu1 %v13818_v28  ;;  %6927 = vmatprep.mubr.bf16.mxu0 %v13818_v28  ;;  %v9917_v50 = vcombine.high %v5953_v30, %v5957_v43 }
 0x906   : > { %v5720_v18 = vmul.f32 0.01, %v5588_v17  ;;  %6735 = vmatmul.mubr.bf16.gmra.mrb[108].mxu1 %v13814_v4  ;;  %6928 = vmatmul.mubr.bf16.gmra.mrb[172].mxu0 %v13814_v4  ;;  %v5782_v8 = vmax.f32 %v5584_v22, %v5718_v24  ;;  %v5945_v22 = vld [vmem:[#allocation23 + $0x298] sm:$0xff]  ;;  %v9907_v24 = vcombine.high %v5944_v58, %v5948_v1 }
 0x907   : > { %v5721_v49 = vmul.f32 0.01, %v5590_v25  ;;  %7071 = vmatpush1.bf16.msra.mxu1 %v9874_v37  ;;  %7264 = vmatpush1.bf16.msra.mxu0 %v9876_v6  ;;  %v5783_v32 = vmax.f32 %v5586_v15, %v5719_v10  ;;  %v9900_v6 = vcombine.low %v5937_v45, %v5941_v19  ;;  %v5960_v45 = vld [vmem:[#allocation23 + $0x310] sm:$0xff] }
 0x908   : > { %v5784_v41 = vmax.f32 %v5588_v17, %v5720_v18  ;;  %7072 = vmatprep.subr.bf16.mxu1 %v9883_v44  ;;  %7265 = vmatprep.subr.bf16.mxu0 %v9885_v5  ;;  %v9909_v44 = vcombine.high %v5945_v22, %v5949_v59  ;;  %v5952_v5 = vld [vmem:[#allocation23 + $0x2d0] sm:$0xff] }
 0x909   : > { %v5785_v21 = vmax.f32 %v5590_v25, %v5721_v49  ;;  %v5593_v14 = vpop.f32.mrb[52].mxu1  ;;  %v5956_v25 = vld [vmem:[#allocation23 + $0x2f0] sm:$0xff] }
 0x90a   : > { %v13826_v34 = vpack.c.bf16 %v5784_v41, %v5782_v8  ;;  %v5594_v46 = vadd.f32 %v5593_v14, %v13763_v38  ;;  %v5595_v53 = vpop.f32.mrb[53].mxu1  ;;  %v9915_v14 = vcombine.high %v5952_v5, %v5956_v25  ;;  %v5964_v19 = vld [vmem:[#allocation23 + $0x330] sm:$0xff] }
 0x90b   : > { %v5596_v48 = vadd.f32 %v5595_v53, %v13766_v42  ;;  %v5597_v47 = vpop.f32.mrb[54].mxu1  ;;  %v13830_v29 = vpack.c.bf16 %v5785_v21, %v5783_v32  ;;  %7073 = vmatpush1.bf16.msra.mxu1 %v9882_v54  ;;  %7266 = vmatpush1.bf16.msra.mxu0 %v9884_v0  ;;  %v9906_v0 = vcombine.low %v5944_v58, %v5948_v1  ;;  %v5968_v1 = vld [vmem:[#allocation23 + $0x350] sm:$0xff] }
 0x90c   : > { %v5722_v12 = vmul.f32 0.01, %v5594_v46  ;;  %v5598_v39 = vadd.f32 %v5597_v47, %v13763_v38  ;;  %v5599_v52 = vpop.f32.mrb[55].mxu1  ;;  %7074 = vmatprep.subr.bf16.mxu1 %v9891_v55  ;;  %7267 = vmatprep.subr.bf16.mxu0 %v9893_v60  ;;  %v9908_v60 = vcombine.low %v5945_v22, %v5949_v59  ;;  %v5972_v59 = vld [vmem:[#allocation23 + $0x370] sm:$0xff] }
 0x90d   : > { %v5723_v57 = vmul.f32 0.01, %v5596_v48  ;;  %v5600_v56 = vadd.f32 %v5599_v52, %v13766_v42  ;;  %6744 = vmatprep.mubr.bf16.mxu1 %v13830_v29  ;;  %6937 = vmatprep.mubr.bf16.mxu0 %v13830_v29  ;;  %v9923_v52 = vcombine.high %v5960_v45, %v5964_v19 }
 0x90e   : > { %v5724_v37 = vmul.f32 0.01, %v5598_v39  ;;  %6745 = vmatmul.mubr.bf16.gmra.mrb[112].mxu1 %v13826_v34  ;;  %6938 = vmatmul.mubr.bf16.gmra.mrb[176].mxu0 %v13826_v34  ;;  %v5786_v17 = vmax.f32 %v5594_v46, %v5722_v12  ;;  %v9914_v12 = vcombine.low %v5952_v5, %v5956_v25 }
 0x90f   : > { %v5725_v15 = vmul.f32 0.01, %v5600_v56  ;;  %7075 = vmatpush1.bf16.msra.mxu1 %v9890_v61  ;;  %7268 = vmatpush1.bf16.msra.mxu0 %v9892_v13  ;;  %v5787_v2 = vmax.f32 %v5596_v48, %v5723_v57  ;;  %v5961_v61 = vld [vmem:[#allocation23 + $0x318] sm:$0xff] }
 0x910   : > { %v5788_v11 = vmax.f32 %v5598_v39, %v5724_v37  ;;  %7076 = vmatprep.subr.bf16.mxu1 %v9899_v23  ;;  %7269 = vmatprep.subr.bf16.mxu0 %v9901_v35  ;;  %v5965_v48 = vld [vmem:[#allocation23 + $0x338] sm:$0xff]  ;;  %v9916_v39 = vcombine.low %v5953_v30, %v5957_v43  ;;  %v9931_v30 = vcombine.high %v5968_v1, %v5972_v59 }
 0x911   : > { %v5789_v27 = vmax.f32 %v5600_v56, %v5725_v15  ;;  %v5603_v10 = vpop.f32.mrb[56].mxu1  ;;  %v9925_v58 = vcombine.high %v5961_v61, %v5965_v48  ;;  %v5969_v37 = vld [vmem:[#allocation23 + $0x358] sm:$0xff] }
 0x912   : > { %v13838_v18 = vpack.c.bf16 %v5788_v11, %v5786_v17  ;;  %v5604_v49 = vadd.f32 %v5603_v10, %v13763_v38  ;;  %v5605_v54 = vpop.f32.mrb[57].mxu1  ;;  %v5973_v15 = vld [vmem:[#allocation23 + $0x378] sm:$0xff]  ;;  %v9922_v17 = vcombine.low %v5960_v45, %v5964_v19 }
 0x913   : > { %v5606_v55 = vadd.f32 %v5605_v54, %v13766_v42  ;;  %v5607_v8 = vpop.f32.mrb[58].mxu1  ;;  %v13842_v41 = vpack.c.bf16 %v5789_v27, %v5787_v2  ;;  %7077 = vmatpush1.bf16.msra.mxu1 %v9898_v20  ;;  %7270 = vmatpush1.bf16.msra.mxu0 %v9900_v6  ;;  %v9924_v2 = vcombine.low %v5961_v61, %v5965_v48  ;;  %v5980_v54 = vld [vmem:[#allocation23 + $0x3b0] sm:$0xff] }
 0x914   : > { %v5726_v36 = vmul.f32 0.01, %v5604_v49  ;;  %v5608_v32 = vadd.f32 %v5607_v8, %v13763_v38  ;;  %v5609_v21 = vpop.f32.mrb[59].mxu1  ;;  %7078 = vmatprep.subr.bf16.mxu1 %v9907_v24  ;;  %7271 = vmatprep.subr.bf16.mxu0 %v9909_v44  ;;  %v9933_v43 = vcombine.high %v5969_v37, %v5973_v15  ;;  %v5977_v8 = vld [vmem:[#allocation23 + $0x398] sm:$0xff] }
 0x915   : > { %v5727_v46 = vmul.f32 0.01, %v5606_v55  ;;  %v5610_v53 = vadd.f32 %v5609_v21, %v13766_v42  ;;  %6754 = vmatprep.mubr.bf16.mxu1 %v13842_v41  ;;  %6947 = vmatprep.mubr.bf16.mxu0 %v13842_v41  ;;  %v9930_v21 = vcombine.low %v5968_v1, %v5972_v59 }
 0x916   : > { %v5728_v47 = vmul.f32 0.01, %v5608_v32  ;;  %6755 = vmatmul.mubr.bf16.gmra.mrb[116].mxu1 %v13838_v18  ;;  %6948 = vmatmul.mubr.bf16.gmra.mrb[180].mxu0 %v13838_v18  ;;  %v5790_v23 = vmax.f32 %v5604_v49, %v5726_v36  ;;  %v5976_v49 = vld [vmem:[#allocation23 + $0x390] sm:$0xff] }
 0x917   : > { %v5729_v13 = vmul.f32 0.01, %v5610_v53  ;;  %7079 = vmatpush1.bf16.msra.mxu1 %v9906_v0  ;;  %7272 = vmatpush1.bf16.msra.mxu0 %v9908_v60  ;;  %v5791_v57 = vmax.f32 %v5606_v55, %v5727_v46  ;;  %v5981_v60 = vld [vmem:[#allocation23 + $0x3b8] sm:$0xff] }
 0x918   : > { %v5792_v35 = vmax.f32 %v5608_v32, %v5728_v47  ;;  %7080 = vmatprep.subr.bf16.mxu1 %v9915_v14  ;;  %7273 = vmatprep.subr.bf16.mxu0 %v9917_v50  ;;  %v9932_v14 = vcombine.low %v5969_v37, %v5973_v15  ;;  %v9939_v50 = vcombine.high %v5976_v49, %v5980_v54 }
 0x919   : > { %v5793_v56 = vmax.f32 %v5610_v53, %v5729_v13  ;;  %v5613_v22 = vpop.f32.mrb[60].mxu1  ;;  %v9941_v46 = vcombine.high %v5977_v8, %v5981_v60  ;;  %v5984_v53 = vld [vmem:[#allocation23 + $0x3d0] sm:$0xff] }
 0x91a   : > { %v13850_v20 = vpack.c.bf16 %v5792_v35, %v5790_v23  ;;  %v5614_v6 = vadd.f32 %v5613_v22, %v13763_v38  ;;  %v5615_v24 = vpop.f32.mrb[61].mxu1  ;;  %v5988_v13 = vld [vmem:[#allocation23 + $0x3f0] sm:$0xff]  ;;  %v9940_v22 = vcombine.low %v5977_v8, %v5981_v60 }
 0x91b   : > { %v5616_v11 = vadd.f32 %v5615_v24, %v13766_v42  ;;  %v5617_v44 = vpop.f32.mrb[62].mxu1  ;;  %v13854_v5 = vpack.c.bf16 %v5793_v56, %v5791_v57  ;;  %7081 = vmatpush1.bf16.msra.mxu1 %v9914_v12  ;;  %7274 = vmatpush1.bf16.msra.mxu0 %v9916_v39  ;;  %v5985_v12 = vld [vmem:[#allocation23 + $0x3d8] sm:$0xff] }
 0x91c   : > { %v5730_v27 = vmul.f32 0.01, %v5614_v6  ;;  %v5618_v10 = vadd.f32 %v5617_v44, %v13763_v38  ;;  %v5619_v25 = vpop.f32.mrb[63].mxu1  ;;  %7082 = vmatprep.subr.bf16.mxu1 %v9923_v52  ;;  %7275 = vmatprep.subr.bf16.mxu0 %v9925_v58  ;;  %v5989_v39 = vld [vmem:[#allocation23 + $0x3f8] sm:$0xff]  ;;  %v9938_v58 = vcombine.low %v5976_v49, %v5980_v54  ;;  %v11436_v49 = vld [vmem:[#allocation26 + $0xc0] sm:$0xff]  }
 0x91d   : > { %v5731_v0 = vmul.f32 0.01, %v5616_v11  ;;  %v5620_v55 = vadd.f32 %v5619_v25, %v13766_v42  ;;  %6764 = vmatprep.mubr.bf16.mxu1 %v13854_v5  ;;  %6957 = vmatprep.mubr.bf16.mxu0 %v13854_v5  ;;  %v9949_v24 = vcombine.high %v5985_v12, %v5989_v39 }
 0x91e   : > { %v5732_v36 = vmul.f32 0.01, %v5618_v10  ;;  %6765 = vmatmul.mubr.bf16.gmra.mrb[120].mxu1 %v13850_v20  ;;  %6958 = vmatmul.mubr.bf16.gmra.mrb[184].mxu0 %v13850_v20  ;;  %v5794_v45 = vmax.f32 %v5614_v6, %v5730_v27  ;;  %v9947_v6 = vcombine.high %v5984_v53, %v5988_v13  ;;  %v9946_v27 = vcombine.low %v5984_v53, %v5988_v13 }
 0x91f   : > { %v5733_v32 = vmul.f32 0.01, %v5620_v55  ;;  %7083 = vmatpush1.bf16.msra.mxu1 %v9922_v17  ;;  %7276 = vmatpush1.bf16.msra.mxu0 %v9924_v2  ;;  %v5795_v61 = vmax.f32 %v5616_v11, %v5731_v0 }
 0x920   : > { %v5796_v19 = vmax.f32 %v5618_v10, %v5732_v36  ;;  %7084 = vmatprep.subr.bf16.mxu1 %v9931_v30  ;;  %7277 = vmatprep.subr.bf16.mxu0 %v9933_v43  ;;  %v9948_v10 = vcombine.low %v5985_v12, %v5989_v39  ;;  %v11434_v43 = vld [vmem:[#allocation26 + $0x40] sm:$0xff]  }
 0x921   : > { %v5797_v48 = vmax.f32 %v5620_v55, %v5733_v32  ;;  %v5623_v47 = vpop.f32.mrb[64].mxu1 }
 0x922   : > { %v13862_v52 = vpack.c.bf16 %v5796_v19, %v5794_v45  ;;  %v5624_v23 = vadd.f32 %v5623_v47, %v13763_v38  ;;  %v5625_v35 = vpop.f32.mrb[65].mxu1 }
 0x923   : > { %v5626_v1 = vadd.f32 %v5625_v35, %v13766_v42  ;;  %v5627_v57 = vpop.f32.mrb[66].mxu1  ;;  %v13866_v56 = vpack.c.bf16 %v5797_v48, %v5795_v61  ;;  %7085 = vmatpush1.bf16.msra.mxu1 %v9930_v21  ;;  %7278 = vmatpush1.bf16.msra.mxu0 %v9932_v14 }
 0x924   : > { %v5734_v59 = vmul.f32 0.01, %v5624_v23  ;;  %v5628_v37 = vadd.f32 %v5627_v57, %v13763_v38  ;;  %v5629_v15 = vpop.f32.mrb[67].mxu1  ;;  %7086 = vmatprep.subr.bf16.mxu1 %v9939_v50  ;;  %7279 = vmatprep.subr.bf16.mxu0 %v9941_v46 }
 0x925   : > { %v5735_v17 = vmul.f32 0.01, %v5626_v1  ;;  %v5630_v11 = vadd.f32 %v5629_v15, %v13766_v42  ;;  %6774 = vmatprep.mubr.bf16.mxu1 %v13866_v56  ;;  %6967 = vmatprep.mubr.bf16.mxu0 %v13866_v56 }
 0x926   : > { %v5736_v44 = vmul.f32 0.01, %v5628_v37  ;;  %6775 = vmatmul.mubr.bf16.gmra.mrb[124].mxu1 %v13862_v52  ;;  %6968 = vmatmul.mubr.bf16.gmra.mrb[188].mxu0 %v13862_v52  ;;  %v5798_v25 = vmax.f32 %v5624_v23, %v5734_v59 }
 0x927   : > { %v5737_v2 = vmul.f32 0.01, %v5630_v11  ;;  %7087 = vmatpush1.bf16.msra.mxu1 %v9938_v58  ;;  %7280 = vmatpush1.bf16.msra.mxu0 %v9940_v22  ;;  %v5799_v54 = vmax.f32 %v5626_v1, %v5735_v17 }
 0x928   : > { %v5800_v30 = vmax.f32 %v5628_v37, %v5736_v44  ;;  %7088 = vmatprep.subr.bf16.mxu1 %v9947_v6  ;;  %7281 = vmatprep.subr.bf16.mxu0 %v9949_v24 }
 0x929   : > { %v5801_v0 = vmax.f32 %v5630_v11, %v5737_v2  ;;  %v5633_v55 = vpop.f32.mrb[68].mxu1 }
 0x92a   : > { %v13874_v8 = vpack.c.bf16 %v5800_v30, %v5798_v25  ;;  %v5634_v60 = vadd.f32 %v5633_v55, %v13763_v38  ;;  %v5635_v36 = vpop.f32.mrb[69].mxu1 }
 0x92b   : > { %v5636_v32 = vadd.f32 %v5635_v36, %v13766_v42  ;;  %v5637_v21 = vpop.f32.mrb[70].mxu1  ;;  %v13878_v14 = vpack.c.bf16 %v5801_v0, %v5799_v54  ;;  %7089 = vmatpush1.bf16.msra.mxu1 %v9946_v27  ;;  %7282 = vmatpush1.bf16.msra.mxu0 %v9948_v10 }
 0x92c   : > { %v5738_v50 = vmul.f32 0.01, %v5634_v60  ;;  %v5638_v45 = vadd.f32 %v5637_v21, %v13763_v38  ;;  %v5639_v19 = vpop.f32.mrb[71].mxu1  ;;  %10178 = vmatprep.subr.bf16.mxu1 %v11434_v43  ;;  %10290 = vmatprep.subr.bf16.mxu0 %v11436_v49 }
 0x92d   : > { %v5739_v46 = vmul.f32 0.01, %v5636_v32  ;;  %v5640_v53 = vadd.f32 %v5639_v19, %v13766_v42  ;;  %6784 = vmatprep.mubr.bf16.mxu1 %v13878_v14  ;;  %6977 = vmatprep.mubr.bf16.mxu0 %v13878_v14 }
 0x92e   : > { %v5740_v61 = vmul.f32 0.01, %v5638_v45  ;;  %6785 = vmatmul.mubr.bf16.gmra.mrb[128].mxu1 %v13874_v8  ;;  %6978 = vmatmul.mubr.bf16.gmra.mrb[192].mxu0 %v13874_v8  ;;  %v5802_v47 = vmax.f32 %v5634_v60, %v5738_v50 }
 0x92f   : > { %v5741_v48 = vmul.f32 0.01, %v5640_v53  ;;  %v5803_v12 = vmax.f32 %v5636_v32, %v5739_v46 }
 0x930   : > { %v5804_v13 = vmax.f32 %v5638_v45, %v5740_v61 }
 0x931   : > { %v5805_v39 = vmax.f32 %v5640_v53, %v5741_v48  ;;  %v5643_v23 = vpop.f32.mrb[72].mxu1 }
 0x932   : > { %v13886_v35 = vpack.c.bf16 %v5804_v13, %v5802_v47  ;;  %v5644_v58 = vadd.f32 %v5643_v23, %v13763_v38  ;;  %v5645_v1 = vpop.f32.mrb[73].mxu1 }
 0x933   : > { %v5646_v57 = vadd.f32 %v5645_v1, %v13766_v42  ;;  %v5647_v22 = vpop.f32.mrb[74].mxu1  ;;  %v13890_v59 = vpack.c.bf16 %v5805_v39, %v5803_v12 }
 0x934   : > { %v5742_v37 = vmul.f32 0.01, %v5644_v58  ;;  %v5648_v15 = vadd.f32 %v5647_v22, %v13763_v38  ;;  %v5649_v6 = vpop.f32.mrb[75].mxu1 }
 0x935   : > { %v5743_v24 = vmul.f32 0.01, %v5646_v57  ;;  %v5650_v17 = vadd.f32 %v5649_v6, %v13766_v42  ;;  %6794 = vmatprep.mubr.bf16.mxu1 %v13890_v59  ;;  %6987 = vmatprep.mubr.bf16.mxu0 %v13890_v59 }
 0x936   : > { %v5744_v11 = vmul.f32 0.01, %v5648_v15  ;;  %6795 = vmatmul.mubr.bf16.gmra.mrb[132].mxu1 %v13886_v35  ;;  %6988 = vmatmul.mubr.bf16.gmra.mrb[196].mxu0 %v13886_v35  ;;  %v5806_v2 = vmax.f32 %v5644_v58, %v5742_v37 }
 0x937   : > { %v5745_v44 = vmul.f32 0.01, %v5650_v17  ;;  %v5807_v10 = vmax.f32 %v5646_v57, %v5743_v24 }
 0x938   : > { %v5808_v27 = vmax.f32 %v5648_v15, %v5744_v11 }
 0x939   : > { %v5809_v25 = vmax.f32 %v5650_v17, %v5745_v44  ;;  %v5653_v30 = vpop.f32.mrb[76].mxu1 }
 0x93a   : > { %v13898_v43 = vpack.c.bf16 %v5808_v27, %v5806_v2  ;;  %v5654_v49 = vadd.f32 %v5653_v30, %v13763_v38  ;;  %v5655_v54 = vpop.f32.mrb[77].mxu1 }
 0x93b   : > { %v5656_v0 = vadd.f32 %v5655_v54, %v13766_v42  ;;  %v5657_v55 = vpop.f32.mrb[78].mxu1  ;;  %v13902_v60 = vpack.c.bf16 %v5809_v25, %v5807_v10 }
 0x93c   : > { %v5746_v36 = vmul.f32 0.01, %v5654_v49  ;;  %v5658_v32 = vadd.f32 %v5657_v55, %v13763_v38  ;;  %v5659_v21 = vpop.f32.mrb[79].mxu1 }
 0x93d   : > { %v5747_v50 = vmul.f32 0.01, %v5656_v0  ;;  %v5660_v45 = vadd.f32 %v5659_v21, %v13766_v42  ;;  %6804 = vmatprep.mubr.bf16.mxu1 %v13902_v60  ;;  %6997 = vmatprep.mubr.bf16.mxu0 %v13902_v60 }
 0x93e   : > { %v5748_v19 = vmul.f32 0.01, %v5658_v32  ;;  %6805 = vmatmul.mubr.bf16.gmra.mrb[136].mxu1 %v13898_v43  ;;  %6998 = vmatmul.mubr.bf16.gmra.mrb[200].mxu0 %v13898_v43  ;;  %v5810_v53 = vmax.f32 %v5654_v49, %v5746_v36 }
 0x93f   : > { %v5749_v46 = vmul.f32 0.01, %v5660_v45  ;;  %v5811_v48 = vmax.f32 %v5656_v0, %v5747_v50 }
 0x940   : > { %v5812_v61 = vmax.f32 %v5658_v32, %v5748_v19 }
 0x941   : > { %v5813_v47 = vmax.f32 %v5660_v45, %v5749_v46  ;;  %v5663_v13 = vpop.f32.mrb[80].mxu1 }
 0x942   : > { %v13910_v12 = vpack.c.bf16 %v5812_v61, %v5810_v53  ;;  %v5664_v39 = vadd.f32 %v5663_v13, %v13763_v38  ;;  %v5665_v23 = vpop.f32.mrb[81].mxu1 }
 0x943   : > { %v5666_v58 = vadd.f32 %v5665_v23, %v13766_v42  ;;  %v5667_v1 = vpop.f32.mrb[82].mxu1  ;;  %v13914_v57 = vpack.c.bf16 %v5813_v47, %v5811_v48 }
 0x944   : > { %v5750_v22 = vmul.f32 0.01, %v5664_v39  ;;  %v5668_v37 = vadd.f32 %v5667_v1, %v13763_v38  ;;  %v5669_v15 = vpop.f32.mrb[83].mxu1 }
 0x945   : > { %v5751_v6 = vmul.f32 0.01, %v5666_v58  ;;  %v5670_v24 = vadd.f32 %v5669_v15, %v13766_v42  ;;  %6814 = vmatprep.mubr.bf16.mxu1 %v13914_v57  ;;  %7007 = vmatprep.mubr.bf16.mxu0 %v13914_v57 }
 0x946   : > { %v5752_v17 = vmul.f32 0.01, %v5668_v37  ;;  %6815 = vmatmul.mubr.bf16.gmra.mrb[140].mxu1 %v13910_v12  ;;  %7008 = vmatmul.mubr.bf16.gmra.mrb[204].mxu0 %v13910_v12  ;;  %v5814_v44 = vmax.f32 %v5664_v39, %v5750_v22 }
 0x947   : > { %v5753_v11 = vmul.f32 0.01, %v5670_v24  ;;  %v5815_v27 = vmax.f32 %v5666_v58, %v5751_v6 }
 0x948   : > { %v5816_v2 = vmax.f32 %v5668_v37, %v5752_v17 }
 0x949   : > { %v5817_v10 = vmax.f32 %v5670_v24, %v5753_v11  ;;  %v5673_v25 = vpop.f32.mrb[84].mxu1 }
 0x94a   : > { %v13922_v30 = vpack.c.bf16 %v5816_v2, %v5814_v44  ;;  %v5674_v49 = vadd.f32 %v5673_v25, %v13763_v38  ;;  %v5675_v54 = vpop.f32.mrb[85].mxu1 }
 0x94b   : > { %v5676_v0 = vadd.f32 %v5675_v54, %v13766_v42  ;;  %v5677_v55 = vpop.f32.mrb[86].mxu1  ;;  %v13926_v36 = vpack.c.bf16 %v5817_v10, %v5815_v27 }
 0x94c   : > { %v5754_v32 = vmul.f32 0.01, %v5674_v49  ;;  %v5678_v21 = vadd.f32 %v5677_v55, %v13763_v38  ;;  %v5679_v50 = vpop.f32.mrb[87].mxu1 }
 0x94d   : > { %v5755_v45 = vmul.f32 0.01, %v5676_v0  ;;  %v5680_v19 = vadd.f32 %v5679_v50, %v13766_v42  ;;  %6824 = vmatprep.mubr.bf16.mxu1 %v13926_v36  ;;  %7017 = vmatprep.mubr.bf16.mxu0 %v13926_v36 }
 0x94e   : > { %v5756_v46 = vmul.f32 0.01, %v5678_v21  ;;  %6825 = vmatmul.mubr.bf16.gmra.mrb[144].mxu1 %v13922_v30  ;;  %7018 = vmatmul.mubr.bf16.gmra.mrb[208].mxu0 %v13922_v30  ;;  %v5818_v61 = vmax.f32 %v5674_v49, %v5754_v32 }
 0x94f   : > { %v5757_v53 = vmul.f32 0.01, %v5680_v19  ;;  %v5819_v47 = vmax.f32 %v5676_v0, %v5755_v45 }
 0x950   : > { %v5820_v48 = vmax.f32 %v5678_v21, %v5756_v46 }
 0x951   : > { %v5821_v13 = vmax.f32 %v5680_v19, %v5757_v53  ;;  %v5683_v39 = vpop.f32.mrb[88].mxu1 }
 0x952   : > { %v13934_v23 = vpack.c.bf16 %v5820_v48, %v5818_v61  ;;  %v5684_v58 = vadd.f32 %v5683_v39, %v13763_v38  ;;  %v5685_v1 = vpop.f32.mrb[89].mxu1 }
 0x953   : > { %v5686_v22 = vadd.f32 %v5685_v1, %v13766_v42  ;;  %v5687_v37 = vpop.f32.mrb[90].mxu1  ;;  %v13938_v15 = vpack.c.bf16 %v5821_v13, %v5819_v47 }
 0x954   : > { %v5758_v6 = vmul.f32 0.01, %v5684_v58  ;;  %v5688_v24 = vadd.f32 %v5687_v37, %v13763_v38  ;;  %v5689_v17 = vpop.f32.mrb[91].mxu1 }
 0x955   : > { %v5759_v11 = vmul.f32 0.01, %v5686_v22  ;;  %v5690_v44 = vadd.f32 %v5689_v17, %v13766_v42  ;;  %6834 = vmatprep.mubr.bf16.mxu1 %v13938_v15  ;;  %7027 = vmatprep.mubr.bf16.mxu0 %v13938_v15  ;;  %v11438_v17 = vld [vmem:[#allocation26 + $0x48] sm:$0xff]  }
 0x956   : > { %v5760_v2 = vmul.f32 0.01, %v5688_v24  ;;  %6835 = vmatmul.mubr.bf16.gmra.mrb[148].mxu1 %v13934_v23  ;;  %7028 = vmatmul.mubr.bf16.gmra.mrb[212].mxu0 %v13934_v23  ;;  %v5822_v10 = vmax.f32 %v5684_v58, %v5758_v6 }
 0x957   : > { %v5761_v27 = vmul.f32 0.01, %v5690_v44  ;;  %v5823_v49 = vmax.f32 %v5686_v22, %v5759_v11  ;;  %v11440_v11 = vld [vmem:[#allocation26 + $0xc8] sm:$0xff]  }
 0x958   : > { %v5824_v25 = vmax.f32 %v5688_v24, %v5760_v2  ;;  %v11437_v24 = vld [vmem:[#allocation26 + $0x80] sm:$0xff]   ;;  %v11441_v2 = vld [vmem:[#allocation26 + $0x88] sm:$0xff]  }
 0x959   : > { %v5825_v54 = vmax.f32 %v5690_v44, %v5761_v27  ;;  %v5693_v0 = vpop.f32.mrb[92].mxu1  ;;  %v11439_v44 = vld [vmem:[#allocation26 + $0x8] sm:$0xff]   ;;  %v11442_v27 = vld [vmem:[#allocation26 + $0x50] sm:$0xff]  }
 0x95a   : > { %v13946_v55 = vpack.c.bf16 %v5824_v25, %v5822_v10  ;;  %v5694_v32 = vadd.f32 %v5693_v0, %v13763_v38  ;;  %v5695_v21 = vpop.f32.mrb[93].mxu1  ;;  %v11443_v10 = vld [vmem:[#allocation26 + $0x10] sm:$0xff]   ;;  %v11450_v0 = vld [vmem:[#allocation26 + $0x60] sm:$0xff]  }
 0x95b   : > { %v5696_v50 = vadd.f32 %v5695_v21, %v13766_v42  ;;  %v5697_v45 = vpop.f32.mrb[94].mxu1  ;;  %v13950_v19 = vpack.c.bf16 %v5825_v54, %v5823_v49  ;;  %v11445_v25 = vld [vmem:[#allocation26 + $0x90] sm:$0xff]   ;;  %v11446_v49 = vld [vmem:[#allocation26 + $0x58] sm:$0xff]   ;;  %v11451_v21 = vld [vmem:[#allocation26 + $0x20] sm:$0xff]  }
 0x95c   : > { %v5762_v46 = vmul.f32 0.01, %v5694_v32  ;;  %v5698_v53 = vadd.f32 %v5697_v45, %v13763_v38  ;;  %v5699_v61 = vpop.f32.mrb[95].mxu1  ;;  %v11449_v54 = vld [vmem:[#allocation26 + $0x98] sm:$0xff]   ;;  %v11454_v45 = vld [vmem:[#allocation26 + $0x68] sm:$0xff]  }
 0x95d   : > { %v5763_v48 = vmul.f32 0.01, %v5696_v50  ;;  %v5700_v47 = vadd.f32 %v5699_v61, %v13766_v42  ;;  %6844 = vmatprep.mubr.bf16.mxu1 %v13950_v19  ;;  %7037 = vmatprep.mubr.bf16.mxu0 %v13950_v19  ;;  %v11435_v42 = vld [vmem:[#allocation26] sm:$0xff]   ;;  %v11460_v61 = vld [vmem:[#allocation26 + $0xf0] sm:$0xff]  }
 0x95e   : > { %v5764_v13 = vmul.f32 0.01, %v5698_v53  ;;  %6845 = vmatmul.mubr.bf16.gmra.mrb[152].mxu1 %v13946_v55  ;;  %7038 = vmatmul.mubr.bf16.gmra.mrb[216].mxu0 %v13946_v55  ;;  %v5826_v58 = vmax.f32 %v5694_v32, %v5762_v46  ;;  %v11452_v32 = vld [vmem:[#allocation26 + $0xe0] sm:$0xff]   ;;  %v11457_v46 = vld [vmem:[#allocation26 + $0xa8] sm:$0xff]  }
 0x95f   : > { %v5765_v39 = vmul.f32 0.01, %v5700_v47  ;;  %v5827_v22 = vmax.f32 %v5696_v50, %v5763_v48  ;;  %v11453_v50 = vld [vmem:[#allocation26 + $0xa0] sm:$0xff]   ;;  %v11459_v48 = vld [vmem:[#allocation26 + $0x30] sm:$0xff]  }
 0x960   : > { %v5828_v1 = vmax.f32 %v5698_v53, %v5764_v13  ;;  %v11458_v53 = vld [vmem:[#allocation26 + $0x70] sm:$0xff]   ;;  %v11462_v13 = vld [vmem:[#allocation26 + $0x78] sm:$0xff]  }
 0x961   : > { %v5829_v37 = vmax.f32 %v5700_v47, %v5765_v39  ;;  %v11461_v47 = vld [vmem:[#allocation26 + $0xb0] sm:$0xff]   ;;  %v11465_v39 = vld [vmem:[#allocation26 + $0xb8] sm:$0xff]  }
 0x962   : > { %v13958_v6 = vpack.c.bf16 %v5828_v1, %v5826_v58  ;;  %v11466_v58 = vld [vmem:[#allocation26 + $0x140] sm:$0xff]  }
 0x963   : > { %v13960_v38 = vpack.c.bf16 %v5829_v37, %v5827_v22  ;;  %v11468_v1 = vld [vmem:[#allocation26 + $0x1c0] sm:$0xff]  }
 0x965   : > { %6854 = vmatprep.mubr.bf16.mxu1 %v13960_v38  ;;  %7047 = vmatprep.mubr.bf16.mxu0 %v13960_v38 }
 0x966   : > { %6855 = vmatmul.mubr.bf16.gmra.mrb[156].mxu1 %v13958_v6  ;;  %7048 = vmatmul.mubr.bf16.gmra.mrb[220].mxu0 %v13958_v6 }
 0x967   : > { %7090 = vmatprep.mubr.bf16.mxu1 %v13776_v62  ;;  %7283 = vmatprep.mubr.bf16.mxu0 %v13776_v62  ;;  %v11444_v62 = vld [vmem:[#allocation26 + $0xd0] sm:$0xff]  }
 0x96e   : > { %7091 = vmatmul.mubr.bf16.vlgmr.msra.gmra.mrb[160].mxu1 %v13772_v63  ;;  %7284 = vmatmul.mubr.bf16.vlgmr.msra.gmra.mrb[224].mxu0 %v13772_v63  ;;  %v11448_v63 = vld [vmem:[#allocation26 + $0xd8] sm:$0xff]  }
 0x96f   : > { %10179 = vmatpush3.bf16.msra.mxu1 %v11435_v42  ;;  %7100 = vmatprep.mubr.bf16.mxu1 %v13794_v9 }
 0x970   : > { %7293 = vmatprep.mubr.bf16.mxu0 %v13794_v9  ;;  %10291 = vmatpush3.bf16.msra.mxu0 %v11437_v24  ;;  %v11447_v9 = vld [vmem:[#allocation26 + $0x18] sm:$0xff]  }
 0x971   : > { %10180 = vmatprep.subr.bf16.mxu1 %v11438_v17  ;;  %10292 = vmatprep.subr.bf16.mxu0 %v11440_v11 }
 0x973   : > { %10181 = vmatpush3.bf16.msra.mxu1 %v11439_v44 }
 0x974   : > { %10293 = vmatpush3.bf16.msra.mxu0 %v11441_v2  ;;  %10182 = vmatprep.subr.bf16.mxu1 %v11442_v27 }
 0x975   : > { %10294 = vmatprep.subr.bf16.mxu0 %v11444_v62 }
 0x976   : > { %7101 = vmatmul.mubr.bf16.gmra.mrb[164].mxu1 %v13790_v51  ;;  %7294 = vmatmul.mubr.bf16.gmra.mrb[228].mxu0 %v13790_v51  ;;  %v11456_v51 = vld [vmem:[#allocation26 + $0xe8] sm:$0xff]  }
 0x977   : > { %7110 = vmatprep.mubr.bf16.mxu1 %v13806_v16  ;;  %7303 = vmatprep.mubr.bf16.mxu0 %v13806_v16  ;;  %v11455_v16 = vld [vmem:[#allocation26 + $0x28] sm:$0xff]  }
 0x978   : > { %10183 = vmatpush3.bf16.msra.mxu1 %v11443_v10  ;;  %10295 = vmatpush3.bf16.msra.mxu0 %v11445_v25 }
 0x979   : > { %10184 = vmatprep.subr.bf16.mxu1 %v11446_v49  ;;  %10296 = vmatprep.subr.bf16.mxu0 %v11448_v63 }
 0x97c   : > { %10185 = vmatpush3.bf16.msra.mxu1 %v11447_v9  ;;  %10297 = vmatpush3.bf16.msra.mxu0 %v11449_v54 }
 0x97d   : > { %10186 = vmatprep.subr.bf16.mxu1 %v11450_v0  ;;  %10298 = vmatprep.subr.bf16.mxu0 %v11452_v32 }
 0x97e   : > { %7111 = vmatmul.mubr.bf16.gmra.mrb[168].mxu1 %v13802_v33  ;;  %7304 = vmatmul.mubr.bf16.gmra.mrb[232].mxu0 %v13802_v33  ;;  %v11464_v33 = vld [vmem:[#allocation26 + $0xf8] sm:$0xff]  }
 0x97f   : > { %7120 = vmatprep.mubr.bf16.mxu1 %v13818_v28  ;;  %7313 = vmatprep.mubr.bf16.mxu0 %v13818_v28  ;;  %v11463_v28 = vld [vmem:[#allocation26 + $0x38] sm:$0xff]  }
 0x980   : > { %10187 = vmatpush3.bf16.msra.mxu1 %v11451_v21  ;;  %10299 = vmatpush3.bf16.msra.mxu0 %v11453_v50 }
 0x981   : > { %10188 = vmatprep.subr.bf16.mxu1 %v11454_v45  ;;  %10300 = vmatprep.subr.bf16.mxu0 %v11456_v51 }
 0x984   : > { %10189 = vmatpush3.bf16.msra.mxu1 %v11455_v16  ;;  %10301 = vmatpush3.bf16.msra.mxu0 %v11457_v46 }
 0x985   : > { %10190 = vmatprep.subr.bf16.mxu1 %v11458_v53  ;;  %10302 = vmatprep.subr.bf16.mxu0 %v11460_v61 }
 0x986   : > { %7121 = vmatmul.mubr.bf16.gmra.mrb[172].mxu1 %v13814_v4  ;;  %7314 = vmatmul.mubr.bf16.gmra.mrb[236].mxu0 %v13814_v4  ;;  %v5990_v4 = vld [vmem:[#allocation25] sm:$0xff] }
 0x987   : > { %7130 = vmatprep.mubr.bf16.mxu1 %v13830_v29  ;;  %7323 = vmatprep.mubr.bf16.mxu0 %v13830_v29  ;;  %v15061_v29 = vsub.s32 2, %v12858_v31 }
 0x988   : > { %10191 = vmatpush3.bf16.msra.mxu1 %v11459_v48  ;;  %10303 = vmatpush3.bf16.msra.mxu0 %v11461_v47 }
 0x989   : > { %10192 = vmatprep.subr.bf16.mxu1 %v11462_v13  ;;  %10304 = vmatprep.subr.bf16.mxu0 %v11464_v33 }
 0x98c   : > { %10193 = vmatpush3.bf16.msra.mxu1 %v11463_v28  ;;  %10305 = vmatpush3.bf16.msra.mxu0 %v11465_v39 }
 0x98d   : > { %10402 = vmatprep.subr.bf16.mxu1 %v11466_v58  ;;  %10514 = vmatprep.subr.bf16.mxu0 %v11468_v1 }
 0x98e   : > { %7131 = vmatmul.mubr.bf16.gmra.mrb[176].mxu1 %v13826_v34  ;;  %7324 = vmatmul.mubr.bf16.gmra.mrb[240].mxu0 %v13826_v34  ;;  %v14011_v34 = vrot.slane %v5990_v4, %v15058_v3 }
 0x98f   : > { %7140 = vmatprep.mubr.bf16.mxu1 %v13842_v41  ;;  %7333 = vmatprep.mubr.bf16.mxu0 %v13842_v41  ;;  %v14020_v41 = vrot.slane %v5990_v4, %v15059_v7 }
 0x996   : > { %7141 = vmatmul.mubr.bf16.gmra.mrb[180].mxu1 %v13838_v18  ;;  %7334 = vmatmul.mubr.bf16.gmra.mrb[244].mxu0 %v13838_v18  ;;  %v14015_v18 = vrot.slane %v5990_v4, %v15061_v29 }
 0x997   : > { %7150 = vmatprep.mubr.bf16.mxu1 %v13854_v5  ;;  %7343 = vmatprep.mubr.bf16.mxu0 %v13854_v5 }
 0x99e   : > { %7151 = vmatmul.mubr.bf16.gmra.mrb[184].mxu1 %v13850_v20  ;;  %7344 = vmatmul.mubr.bf16.gmra.mrb[248].mxu0 %v13850_v20  ;;  %v15062_v20 = vsub.s32 3, %v12858_v31 }
 0x99f   : > { %7160 = vmatprep.mubr.bf16.mxu1 %v13866_v56  ;;  %7353 = vmatprep.mubr.bf16.mxu0 %v13866_v56 }
 0x9a0   : > { %v14024_v5 = vrot.slane %v5990_v4, %v15062_v20 }
 0x9a6   : > { %7161 = vmatmul.mubr.bf16.gmra.mrb[188].mxu1 %v13862_v52  ;;  %7354 = vmatmul.mubr.bf16.gmra.mrb[252].mxu0 %v13862_v52 }
 0x9a7   : > { %7170 = vmatprep.mubr.bf16.mxu1 %v13878_v14  ;;  %7363 = vmatprep.mubr.bf16.mxu0 %v13878_v14 }
 0x9ae   : > { %7171 = vmatmul.mubr.bf16.gmra.mrb[192].mxu1 %v13874_v8  ;;  %7364 = vmatmul.mubr.bf16.gmra.mrb[0].mxu0 %v13874_v8 }
 0x9af   : > { %7180 = vmatprep.mubr.bf16.mxu1 %v13890_v59  ;;  %7373 = vmatprep.mubr.bf16.mxu0 %v13890_v59 }
 0x9b6   : > { %7181 = vmatmul.mubr.bf16.gmra.mrb[196].mxu1 %v13886_v35  ;;  %7374 = vmatmul.mubr.bf16.gmra.mrb[4].mxu0 %v13886_v35 }
 0x9b7   : > { %7190 = vmatprep.mubr.bf16.mxu1 %v13902_v60  ;;  %7383 = vmatprep.mubr.bf16.mxu0 %v13902_v60 }
 0x9be   : > { %7191 = vmatmul.mubr.bf16.gmra.mrb[200].mxu1 %v13898_v43  ;;  %7384 = vmatmul.mubr.bf16.gmra.mrb[8].mxu0 %v13898_v43 }
 0x9bf   : > { %7200 = vmatprep.mubr.bf16.mxu1 %v13914_v57  ;;  %7393 = vmatprep.mubr.bf16.mxu0 %v13914_v57 }
 0x9c1   : > { %v6706_v52 = vpop.f32.mrb[96].mxu1  ;;  %v6899_v56 = vpop.f32.mrb[160].mxu0 }
 0x9c2   : > { %v6707_v3 = vadd.f32 %v6706_v52, %v14011_v34  ;;  %v6900_v8 = vadd.f32 %v6899_v56, %v14015_v18  ;;  %v6708_v14 = vpop.f32.mrb[97].mxu1  ;;  %v6901_v35 = vpop.f32.mrb[161].mxu0 }
 0x9c3   : > { %v6709_v59 = vadd.f32 %v6708_v14, %v14020_v41  ;;  %v6902_v43 = vadd.f32 %v6901_v35, %v14024_v5  ;;  %v6710_v60 = vpop.f32.mrb[98].mxu1  ;;  %v6903_v57 = vpop.f32.mrb[162].mxu0 }
 0x9c4   : > { %v7444_v7 = vmul.f32 0.01, %v6707_v3  ;;  %v7446_v22 = vmul.f32 0.01, %v6900_v8  ;;  %v6711_v37 = vadd.f32 %v6710_v60, %v14011_v34  ;;  %v6904_v42 = vadd.f32 %v6903_v57, %v14015_v18  ;;  %v6712_v24 = vpop.f32.mrb[99].mxu1  ;;  %v6905_v17 = vpop.f32.mrb[163].mxu0 }
 0x9c5   : > { %v7445_v11 = vmul.f32 0.01, %v6709_v59  ;;  %v7447_v44 = vmul.f32 0.01, %v6902_v43  ;;  %v6713_v2 = vadd.f32 %v6712_v24, %v14020_v41  ;;  %v6906_v27 = vadd.f32 %v6905_v17, %v14024_v5 }
 0x9c6   : > { %v7452_v62 = vmul.f32 0.01, %v6711_v37  ;;  %v7454_v10 = vmul.f32 0.01, %v6904_v42  ;;  %7201 = vmatmul.mubr.bf16.gmra.mrb[204].mxu1 %v13910_v12  ;;  %7394 = vmatmul.mubr.bf16.gmra.mrb[12].mxu0 %v13910_v12  ;;  %v7700_v63 = vmax.f32 %v6707_v3, %v7444_v7  ;;  %v7702_v9 = vmax.f32 %v6900_v8, %v7446_v22 }
 0x9c7   : > { %v7453_v25 = vmul.f32 0.01, %v6713_v2  ;;  %v7455_v49 = vmul.f32 0.01, %v6906_v27  ;;  %7210 = vmatprep.mubr.bf16.mxu1 %v13926_v36  ;;  %7403 = vmatprep.mubr.bf16.mxu0 %v13926_v36  ;;  %v7701_v32 = vmax.f32 %v6709_v59, %v7445_v11  ;;  %v7703_v21 = vmax.f32 %v6902_v43, %v7447_v44 }
 0x9c8   : > { %v7708_v54 = vmax.f32 %v6711_v37, %v7452_v62  ;;  %v7710_v0 = vmax.f32 %v6904_v42, %v7454_v10 }
 0x9c9   : > { %v7709_v50 = vmax.f32 %v6713_v2, %v7453_v25  ;;  %v7711_v45 = vmax.f32 %v6906_v27, %v7455_v49  ;;  %v6716_v51 = vpop.f32.mrb[100].mxu1  ;;  %v6909_v16 = vpop.f32.mrb[164].mxu0 }
 0x9ca   : > { %v14038_v46 = vpack.c.bf16 %v7708_v54, %v7700_v63  ;;  %v14040_v53 = vpack.c.bf16 %v7710_v0, %v7702_v9  ;;  %v6717_v12 = vadd.f32 %v6716_v51, %v14011_v34  ;;  %v6910_v61 = vadd.f32 %v6909_v16, %v14015_v18  ;;  %v6718_v48 = vpop.f32.mrb[101].mxu1  ;;  %v6911_v36 = vpop.f32.mrb[165].mxu0 }
 0x9cb   : > { %v6719_v47 = vadd.f32 %v6718_v48, %v14020_v41  ;;  %v6912_v13 = vadd.f32 %v6911_v36, %v14024_v5  ;;  %v6720_v33 = vpop.f32.mrb[102].mxu1  ;;  %v6913_v28 = vpop.f32.mrb[166].mxu0  ;;  %v14046_v39 = vpack.c.bf16 %v7709_v50, %v7701_v32  ;;  %v14048_v58 = vpack.c.bf16 %v7711_v45, %v7703_v21 }
 0x9cc   : > { %v7460_v1 = vmul.f32 0.01, %v6717_v12  ;;  %v7462_v4 = vmul.f32 0.01, %v6910_v61  ;;  %v6721_v29 = vadd.f32 %v6720_v33, %v14011_v34  ;;  %v6914_v20 = vadd.f32 %v6913_v28, %v14015_v18  ;;  %v6722_v52 = vpop.f32.mrb[103].mxu1  ;;  %v6915_v56 = vpop.f32.mrb[167].mxu0 }
 0x9cd   : > { %v7461_v3 = vmul.f32 0.01, %v6719_v47  ;;  %v7463_v8 = vmul.f32 0.01, %v6912_v13  ;;  %v6723_v14 = vadd.f32 %v6722_v52, %v14020_v41  ;;  %v6916_v35 = vadd.f32 %v6915_v56, %v14024_v5 }
 0x9ce   : > { %v7468_v59 = vmul.f32 0.01, %v6721_v29  ;;  %v7470_v43 = vmul.f32 0.01, %v6914_v20  ;;  %7211 = vmatmul.mubr.bf16.gmra.mrb[208].mxu1 %v13922_v30  ;;  %7404 = vmatmul.mubr.bf16.gmra.mrb[16].mxu0 %v13922_v30  ;;  %v7716_v7 = vmax.f32 %v6717_v12, %v7460_v1  ;;  %v7718_v22 = vmax.f32 %v6910_v61, %v7462_v4 }
 0x9cf   : > { %v7469_v60 = vmul.f32 0.01, %v6723_v14  ;;  %v7471_v57 = vmul.f32 0.01, %v6916_v35  ;;  %7220 = vmatprep.mubr.bf16.mxu1 %v13938_v15  ;;  %7413 = vmatprep.mubr.bf16.mxu0 %v13938_v15  ;;  %v7717_v24 = vmax.f32 %v6719_v47, %v7461_v3  ;;  %v7719_v17 = vmax.f32 %v6912_v13, %v7463_v8 }
 0x9d0   : > { %v7724_v37 = vmax.f32 %v6721_v29, %v7468_v59  ;;  %v7726_v42 = vmax.f32 %v6914_v20, %v7470_v43 }
 0x9d1   : > { %v7725_v11 = vmax.f32 %v6723_v14, %v7469_v60  ;;  %v7727_v44 = vmax.f32 %v6916_v35, %v7471_v57  ;;  %v6726_v2 = vpop.f32.mrb[104].mxu1  ;;  %v6919_v27 = vpop.f32.mrb[168].mxu0 }
 0x9d2   : > { %v14058_v62 = vpack.c.bf16 %v7724_v37, %v7716_v7  ;;  %v14060_v10 = vpack.c.bf16 %v7726_v42, %v7718_v22  ;;  %v6727_v30 = vadd.f32 %v6726_v2, %v14011_v34  ;;  %v6920_v25 = vadd.f32 %v6919_v27, %v14015_v18  ;;  %v6728_v49 = vpop.f32.mrb[105].mxu1  ;;  %v6921_v15 = vpop.f32.mrb[169].mxu0 }
 0x9d3   : > { %v6729_v63 = vadd.f32 %v6728_v49, %v14020_v41  ;;  %v6922_v9 = vadd.f32 %v6921_v15, %v14024_v5  ;;  %v6730_v54 = vpop.f32.mrb[106].mxu1  ;;  %v6923_v0 = vpop.f32.mrb[170].mxu0  ;;  %v14066_v32 = vpack.c.bf16 %v7725_v11, %v7717_v24  ;;  %v14068_v21 = vpack.c.bf16 %v7727_v44, %v7719_v17 }
 0x9d4   : > { %v7476_v50 = vmul.f32 0.01, %v6727_v30  ;;  %v7478_v45 = vmul.f32 0.01, %v6920_v25  ;;  %v6731_v51 = vadd.f32 %v6730_v54, %v14011_v34  ;;  %v6924_v16 = vadd.f32 %v6923_v0, %v14015_v18  ;;  %v6732_v12 = vpop.f32.mrb[107].mxu1  ;;  %v6925_v61 = vpop.f32.mrb[171].mxu0 }
 0x9d5   : > { %v7477_v48 = vmul.f32 0.01, %v6729_v63  ;;  %v7479_v36 = vmul.f32 0.01, %v6922_v9  ;;  %v6733_v47 = vadd.f32 %v6732_v12, %v14020_v41  ;;  %v6926_v13 = vadd.f32 %v6925_v61, %v14024_v5 }
 0x9d6   : > { %v7484_v33 = vmul.f32 0.01, %v6731_v51  ;;  %v7486_v28 = vmul.f32 0.01, %v6924_v16  ;;  %7221 = vmatmul.mubr.bf16.gmra.mrb[212].mxu1 %v13934_v23  ;;  %7414 = vmatmul.mubr.bf16.gmra.mrb[20].mxu0 %v13934_v23  ;;  %v7732_v29 = vmax.f32 %v6727_v30, %v7476_v50  ;;  %v7734_v20 = vmax.f32 %v6920_v25, %v7478_v45 }
 0x9d7   : > { %v7485_v1 = vmul.f32 0.01, %v6733_v47  ;;  %v7487_v4 = vmul.f32 0.01, %v6926_v13  ;;  %7230 = vmatprep.mubr.bf16.mxu1 %v13950_v19  ;;  %7423 = vmatprep.mubr.bf16.mxu0 %v13950_v19  ;;  %v7733_v3 = vmax.f32 %v6729_v63, %v7477_v48  ;;  %v7735_v8 = vmax.f32 %v6922_v9, %v7479_v36 }
 0x9d8   : > { %v7740_v52 = vmax.f32 %v6731_v51, %v7484_v33  ;;  %v7742_v56 = vmax.f32 %v6924_v16, %v7486_v28 }
 0x9d9   : > { %v7741_v14 = vmax.f32 %v6733_v47, %v7485_v1  ;;  %v7743_v35 = vmax.f32 %v6926_v13, %v7487_v4  ;;  %v6736_v59 = vpop.f32.mrb[108].mxu1  ;;  %v6929_v43 = vpop.f32.mrb[172].mxu0 }
 0x9da   : > { %v14078_v60 = vpack.c.bf16 %v7740_v52, %v7732_v29  ;;  %v14080_v57 = vpack.c.bf16 %v7742_v56, %v7734_v20  ;;  %v6737_v23 = vadd.f32 %v6736_v59, %v14011_v34  ;;  %v6930_v7 = vadd.f32 %v6929_v43, %v14015_v18  ;;  %v6738_v22 = vpop.f32.mrb[109].mxu1  ;;  %v6931_v19 = vpop.f32.mrb[173].mxu0 }
 0x9db   : > { %v6739_v37 = vadd.f32 %v6738_v22, %v14020_v41  ;;  %v6932_v42 = vadd.f32 %v6931_v19, %v14024_v5  ;;  %v6740_v24 = vpop.f32.mrb[110].mxu1  ;;  %v6933_v17 = vpop.f32.mrb[174].mxu0  ;;  %v14086_v11 = vpack.c.bf16 %v7741_v14, %v7733_v3  ;;  %v14088_v44 = vpack.c.bf16 %v7743_v35, %v7735_v8 }
 0x9dc   : > { %v7492_v2 = vmul.f32 0.01, %v6737_v23  ;;  %v7494_v27 = vmul.f32 0.01, %v6930_v7  ;;  %v6741_v30 = vadd.f32 %v6740_v24, %v14011_v34  ;;  %v6934_v25 = vadd.f32 %v6933_v17, %v14015_v18  ;;  %v6742_v49 = vpop.f32.mrb[111].mxu1  ;;  %v6935_v15 = vpop.f32.mrb[175].mxu0 }
 0x9dd   : > { %v7493_v63 = vmul.f32 0.01, %v6739_v37  ;;  %v7495_v9 = vmul.f32 0.01, %v6932_v42  ;;  %v6743_v54 = vadd.f32 %v6742_v49, %v14020_v41  ;;  %v6936_v0 = vadd.f32 %v6935_v15, %v14024_v5 }
 0x9de   : > { %v7500_v50 = vmul.f32 0.01, %v6741_v30  ;;  %v7502_v45 = vmul.f32 0.01, %v6934_v25  ;;  %7231 = vmatmul.mubr.bf16.gmra.mrb[216].mxu1 %v13946_v55  ;;  %7424 = vmatmul.mubr.bf16.gmra.mrb[24].mxu0 %v13946_v55  ;;  %v7748_v12 = vmax.f32 %v6737_v23, %v7492_v2  ;;  %v7750_v61 = vmax.f32 %v6930_v7, %v7494_v27 }
 0x9df   : > { %v7501_v51 = vmul.f32 0.01, %v6743_v54  ;;  %v7503_v16 = vmul.f32 0.01, %v6936_v0  ;;  %7240 = vmatprep.mubr.bf16.mxu1 %v13960_v38  ;;  %7433 = vmatprep.mubr.bf16.mxu0 %v13960_v38  ;;  %v7749_v47 = vmax.f32 %v6739_v37, %v7493_v63  ;;  %v7751_v13 = vmax.f32 %v6932_v42, %v7495_v9 }
 0x9e0   : > { %v7756_v48 = vmax.f32 %v6741_v30, %v7500_v50  ;;  %v7758_v36 = vmax.f32 %v6934_v25, %v7502_v45 }
 0x9e1   : > { %v7757_v33 = vmax.f32 %v6743_v54, %v7501_v51  ;;  %v7759_v28 = vmax.f32 %v6936_v0, %v7503_v16  ;;  %v6746_v1 = vpop.f32.mrb[112].mxu1  ;;  %v6939_v4 = vpop.f32.mrb[176].mxu0 }
 0x9e2   : > { %v14098_v29 = vpack.c.bf16 %v7756_v48, %v7748_v12  ;;  %v14100_v20 = vpack.c.bf16 %v7758_v36, %v7750_v61  ;;  %v6747_v55 = vadd.f32 %v6746_v1, %v14011_v34  ;;  %v6940_v52 = vadd.f32 %v6939_v4, %v14015_v18  ;;  %v6748_v56 = vpop.f32.mrb[113].mxu1  ;;  %v6941_v38 = vpop.f32.mrb[177].mxu0  ;;  %v11467_v4 = vld [vmem:[#allocation26 + $0x100] sm:$0xff]  }
 0x9e3   : > { %v6749_v3 = vadd.f32 %v6748_v56, %v14020_v41  ;;  %v6942_v8 = vadd.f32 %v6941_v38, %v14024_v5  ;;  %v6750_v14 = vpop.f32.mrb[114].mxu1  ;;  %v6943_v35 = vpop.f32.mrb[178].mxu0  ;;  %v14106_v59 = vpack.c.bf16 %v7757_v33, %v7749_v47  ;;  %v14108_v43 = vpack.c.bf16 %v7759_v28, %v7751_v13 }
 0x9e4   : > { %v7508_v23 = vmul.f32 0.01, %v6747_v55  ;;  %v7510_v7 = vmul.f32 0.01, %v6940_v52  ;;  %v6751_v22 = vadd.f32 %v6750_v14, %v14011_v34  ;;  %v6944_v19 = vadd.f32 %v6943_v35, %v14015_v18  ;;  %v6752_v37 = vpop.f32.mrb[115].mxu1  ;;  %v6945_v42 = vpop.f32.mrb[179].mxu0 }
 0x9e5   : > { %v7509_v24 = vmul.f32 0.01, %v6749_v3  ;;  %v7511_v17 = vmul.f32 0.01, %v6942_v8  ;;  %v6753_v2 = vadd.f32 %v6752_v37, %v14020_v41  ;;  %v6946_v27 = vadd.f32 %v6945_v42, %v14024_v5  ;;  %v11470_v42 = vld [vmem:[#allocation26 + $0x148] sm:$0xff]  }
 0x9e6   : > { %v7516_v30 = vmul.f32 0.01, %v6751_v22  ;;  %v7518_v25 = vmul.f32 0.01, %v6944_v19  ;;  %7241 = vmatmul.mubr.bf16.gmra.mrb[220].mxu1 %v13958_v6  ;;  %7434 = vmatmul.mubr.bf16.gmra.mrb[28].mxu0 %v13958_v6  ;;  %v7764_v63 = vmax.f32 %v6747_v55, %v7508_v23  ;;  %v7766_v9 = vmax.f32 %v6940_v52, %v7510_v7  ;;  %v11469_v55 = vld [vmem:[#allocation26 + $0x180] sm:$0xff]  }
 0x9e7   : > { %v7517_v49 = vmul.f32 0.01, %v6753_v2  ;;  %v7519_v15 = vmul.f32 0.01, %v6946_v27  ;;  %8635 = vmatprep.mubr.bf16.mxu1 %v14046_v39  ;;  %8796 = vmatprep.mubr.bf16.mxu0 %v14048_v58  ;;  %v7765_v50 = vmax.f32 %v6749_v3, %v7509_v24  ;;  %v7767_v45 = vmax.f32 %v6942_v8, %v7511_v17  ;;  %v11472_v24 = vld [vmem:[#allocation26 + $0x1c8] sm:$0xff]  }
 0x9e8   : > { %v7772_v54 = vmax.f32 %v6751_v22, %v7516_v30  ;;  %v7774_v0 = vmax.f32 %v6944_v19, %v7518_v25 }
 0x9e9   : > { %v7773_v51 = vmax.f32 %v6753_v2, %v7517_v49  ;;  %v7775_v16 = vmax.f32 %v6946_v27, %v7519_v15  ;;  %v6756_v12 = vpop.f32.mrb[116].mxu1  ;;  %v6949_v61 = vpop.f32.mrb[180].mxu0  ;;  %v11471_v15 = vld [vmem:[#allocation26 + $0x108] sm:$0xff]  }
 0x9ea   : > { %v14118_v48 = vpack.c.bf16 %v7772_v54, %v7764_v63  ;;  %v14120_v36 = vpack.c.bf16 %v7774_v0, %v7766_v9  ;;  %v6757_v6 = vadd.f32 %v6756_v12, %v14011_v34  ;;  %v6950_v39 = vadd.f32 %v6949_v61, %v14015_v18  ;;  %v6758_v47 = vpop.f32.mrb[117].mxu1  ;;  %v6951_v58 = vpop.f32.mrb[181].mxu0  ;;  %v11473_v0 = vld [vmem:[#allocation26 + $0x188] sm:$0xff]   ;;  %v11476_v12 = vld [vmem:[#allocation26 + $0x1d0] sm:$0xff]  }
 0x9eb   : > { %v6759_v13 = vadd.f32 %v6758_v47, %v14020_v41  ;;  %v6952_v33 = vadd.f32 %v6951_v58, %v14024_v5  ;;  %v6760_v28 = vpop.f32.mrb[118].mxu1  ;;  %v6953_v1 = vpop.f32.mrb[182].mxu0  ;;  %v14126_v52 = vpack.c.bf16 %v7773_v51, %v7765_v50  ;;  %v14128_v56 = vpack.c.bf16 %v7775_v16, %v7767_v45  ;;  %v11474_v50 = vld [vmem:[#allocation26 + $0x150] sm:$0xff]  }
 0x9ec   : > { %v7524_v38 = vmul.f32 0.01, %v6757_v6  ;;  %v7526_v3 = vmul.f32 0.01, %v6950_v39  ;;  %v6761_v8 = vadd.f32 %v6760_v28, %v14011_v34  ;;  %v6954_v14 = vadd.f32 %v6953_v1, %v14015_v18  ;;  %v6762_v35 = vpop.f32.mrb[119].mxu1  ;;  %v6955_v23 = vpop.f32.mrb[183].mxu0 }
 0x9ed   : > { %v7525_v7 = vmul.f32 0.01, %v6759_v13  ;;  %v7527_v22 = vmul.f32 0.01, %v6952_v33  ;;  %v6763_v19 = vadd.f32 %v6762_v35, %v14020_v41  ;;  %v6956_v37 = vadd.f32 %v6955_v23, %v14024_v5  ;;  %v11475_v1 = vld [vmem:[#allocation26 + $0x110] sm:$0xff]  }
 0x9ee   : > { %v7532_v17 = vmul.f32 0.01, %v6761_v8  ;;  %v7534_v2 = vmul.f32 0.01, %v6954_v14  ;;  %8636 = vmatmul.mubr.bf16.vlgmr.msra.gmra.mrb[224].mxu1 %v14038_v46  ;;  %8797 = vmatmul.mubr.bf16.vlgmr.msra.gmra.mrb[32].mxu0 %v14040_v53  ;;  %v7780_v27 = vmax.f32 %v6757_v6, %v7524_v38  ;;  %v7782_v30 = vmax.f32 %v6950_v39, %v7526_v3  ;;  %v11477_v38 = vld [vmem:[#allocation26 + $0x190] sm:$0xff]  }
 0x9ef   : > { %v7533_v25 = vmul.f32 0.01, %v6763_v19  ;;  %v7535_v49 = vmul.f32 0.01, %v6956_v37  ;;  %10403 = vmatpush3.bf16.msra.mxu1 %v11467_v4  ;;  %8643 = vmatprep.mubr.bf16.mxu1 %v14066_v32  ;;  %v7781_v63 = vmax.f32 %v6759_v13, %v7525_v7  ;;  %v7783_v45 = vmax.f32 %v6952_v33, %v7527_v22 }
 0x9f0   : > { %v7788_v9 = vmax.f32 %v6761_v8, %v7532_v17  ;;  %v7790_v54 = vmax.f32 %v6954_v14, %v7534_v2  ;;  %8804 = vmatprep.mubr.bf16.mxu0 %v14068_v21  ;;  %10515 = vmatpush3.bf16.msra.mxu0 %v11469_v55  ;;  %v11480_v17 = vld [vmem:[#allocation26 + $0x1d8] sm:$0xff]  }
 0x9f1   : > { %v7789_v46 = vmax.f32 %v6763_v19, %v7533_v25  ;;  %v7791_v51 = vmax.f32 %v6956_v37, %v7535_v49  ;;  %v6766_v53 = vpop.f32.mrb[120].mxu1  ;;  %v6959_v16 = vpop.f32.mrb[184].mxu0  ;;  %10404 = vmatprep.subr.bf16.mxu1 %v11470_v42  ;;  %10516 = vmatprep.subr.bf16.mxu0 %v11472_v24  ;;  %v11478_v24 = vld [vmem:[#allocation26 + $0x158] sm:$0xff]  }
 0x9f2   : > { %v14138_v61 = vpack.c.bf16 %v7788_v9, %v7780_v27  ;;  %v14140_v32 = vpack.c.bf16 %v7790_v54, %v7782_v30  ;;  %v6767_v6 = vadd.f32 %v6766_v53, %v14011_v34  ;;  %v6960_v39 = vadd.f32 %v6959_v16, %v14015_v18  ;;  %v6768_v21 = vpop.f32.mrb[121].mxu1  ;;  %v6961_v47 = vpop.f32.mrb[185].mxu0  ;;  %v11482_v53 = vld [vmem:[#allocation26 + $0x160] sm:$0xff]  }
 0x9f3   : > { %v6769_v58 = vadd.f32 %v6768_v21, %v14020_v41  ;;  %v6962_v13 = vadd.f32 %v6961_v47, %v14024_v5  ;;  %v6770_v33 = vpop.f32.mrb[122].mxu1  ;;  %v6963_v28 = vpop.f32.mrb[186].mxu0  ;;  %10405 = vmatpush3.bf16.msra.mxu1 %v11471_v15  ;;  %v14146_v4 = vpack.c.bf16 %v7789_v46, %v7781_v63  ;;  %v14148_v55 = vpack.c.bf16 %v7791_v51, %v7783_v45  ;;  %v11484_v16 = vld [vmem:[#allocation26 + $0x1e0] sm:$0xff]  }
 0x9f4   : > { %v7540_v3 = vmul.f32 0.01, %v6767_v6  ;;  %v7542_v8 = vmul.f32 0.01, %v6960_v39  ;;  %v6771_v14 = vadd.f32 %v6770_v33, %v14011_v34  ;;  %v6964_v35 = vadd.f32 %v6963_v28, %v14015_v18  ;;  %v6772_v23 = vpop.f32.mrb[123].mxu1  ;;  %v6965_v7 = vpop.f32.mrb[187].mxu0  ;;  %10517 = vmatpush3.bf16.msra.mxu0 %v11473_v0  ;;  %10406 = vmatprep.subr.bf16.mxu1 %v11474_v50 }
 0x9f5   : > { %v7541_v22 = vmul.f32 0.01, %v6769_v58  ;;  %v7543_v19 = vmul.f32 0.01, %v6962_v13  ;;  %v6773_v37 = vadd.f32 %v6772_v23, %v14020_v41  ;;  %v6966_v42 = vadd.f32 %v6965_v7, %v14024_v5  ;;  %10518 = vmatprep.subr.bf16.mxu0 %v11476_v12  ;;  %v11479_v0 = vld [vmem:[#allocation26 + $0x118] sm:$0xff]  }
 0x9f6   : > { %v7548_v2 = vmul.f32 0.01, %v6771_v14  ;;  %v7550_v27 = vmul.f32 0.01, %v6964_v35  ;;  %8644 = vmatmul.mubr.bf16.gmra.mrb[228].mxu1 %v14058_v62  ;;  %8805 = vmatmul.mubr.bf16.gmra.mrb[36].mxu0 %v14060_v10  ;;  %v7796_v30 = vmax.f32 %v6767_v6, %v7540_v3  ;;  %v7798_v25 = vmax.f32 %v6960_v39, %v7542_v8  ;;  %v11481_v50 = vld [vmem:[#allocation26 + $0x198] sm:$0xff]   ;;  %v11485_v3 = vld [vmem:[#allocation26 + $0x1a0] sm:$0xff]  }
 0x9f7   : > { %v7549_v49 = vmul.f32 0.01, %v6773_v37  ;;  %v7551_v15 = vmul.f32 0.01, %v6966_v42  ;;  %8651 = vmatprep.mubr.bf16.mxu1 %v14086_v11  ;;  %8812 = vmatprep.mubr.bf16.mxu0 %v14088_v44  ;;  %v7797_v63 = vmax.f32 %v6769_v58, %v7541_v22  ;;  %v7799_v45 = vmax.f32 %v6962_v13, %v7543_v19 }
 0x9f8   : > { %v7804_v9 = vmax.f32 %v6771_v14, %v7548_v2  ;;  %v7806_v54 = vmax.f32 %v6964_v35, %v7550_v27  ;;  %10407 = vmatpush3.bf16.msra.mxu1 %v11475_v1  ;;  %10519 = vmatpush3.bf16.msra.mxu0 %v11477_v38  ;;  %v11483_v38 = vld [vmem:[#allocation26 + $0x120] sm:$0xff]   ;;  %v11488_v2 = vld [vmem:[#allocation26 + $0x1e8] sm:$0xff]  }
 0x9f9   : > { %v7805_v46 = vmax.f32 %v6773_v37, %v7549_v49  ;;  %v7807_v62 = vmax.f32 %v6966_v42, %v7551_v15  ;;  %v6776_v51 = vpop.f32.mrb[124].mxu1  ;;  %v6969_v10 = vpop.f32.mrb[188].mxu0  ;;  %10408 = vmatprep.subr.bf16.mxu1 %v11478_v24  ;;  %10520 = vmatprep.subr.bf16.mxu0 %v11480_v17  ;;  %v11486_v17 = vld [vmem:[#allocation26 + $0x168] sm:$0xff]  }
 0x9fa   : > { %v14158_v12 = vpack.c.bf16 %v7804_v9, %v7796_v30  ;;  %v14160_v11 = vpack.c.bf16 %v7806_v54, %v7798_v25  ;;  %v6777_v44 = vadd.f32 %v6776_v51, %v14011_v34  ;;  %v6970_v6 = vadd.f32 %v6969_v10, %v14015_v18  ;;  %v6778_v39 = vpop.f32.mrb[125].mxu1  ;;  %v6971_v21 = vpop.f32.mrb[189].mxu0  ;;  %v11490_v10 = vld [vmem:[#allocation26 + $0x170] sm:$0xff]  }
 0x9fb   : > { %v6779_v47 = vadd.f32 %v6778_v39, %v14020_v41  ;;  %v6972_v58 = vadd.f32 %v6971_v21, %v14024_v5  ;;  %v6780_v13 = vpop.f32.mrb[126].mxu1  ;;  %v6973_v33 = vpop.f32.mrb[190].mxu0  ;;  %v14166_v28 = vpack.c.bf16 %v7805_v46, %v7797_v63  ;;  %v14168_v1 = vpack.c.bf16 %v7807_v62, %v7799_v45  ;;  %v11489_v45 = vld [vmem:[#allocation26 + $0x1a8] sm:$0xff]  }
 0x9fc   : > { %v7556_v8 = vmul.f32 0.01, %v6777_v44  ;;  %v7558_v14 = vmul.f32 0.01, %v6970_v6  ;;  %v6781_v35 = vadd.f32 %v6780_v13, %v14011_v34  ;;  %v6974_v23 = vadd.f32 %v6973_v33, %v14015_v18  ;;  %v6782_v7 = vpop.f32.mrb[127].mxu1  ;;  %v6975_v22 = vpop.f32.mrb[191].mxu0  ;;  %10409 = vmatpush3.bf16.msra.mxu1 %v11479_v0  ;;  %10521 = vmatpush3.bf16.msra.mxu0 %v11481_v50 }
 0x9fd   : > { %v7557_v19 = vmul.f32 0.01, %v6779_v47  ;;  %v7559_v37 = vmul.f32 0.01, %v6972_v58  ;;  %v6783_v42 = vadd.f32 %v6782_v7, %v14020_v41  ;;  %v6976_v24 = vadd.f32 %v6975_v22, %v14024_v5  ;;  %10410 = vmatprep.subr.bf16.mxu1 %v11482_v53  ;;  %10522 = vmatprep.subr.bf16.mxu0 %v11484_v16  ;;  %v11487_v50 = vld [vmem:[#allocation26 + $0x128] sm:$0xff]   ;;  %v11492_v53 = vld [vmem:[#allocation26 + $0x1f0] sm:$0xff]  }
 0x9fe   : > { %v7564_v27 = vmul.f32 0.01, %v6781_v35  ;;  %v7566_v30 = vmul.f32 0.01, %v6974_v23  ;;  %8652 = vmatmul.mubr.bf16.gmra.mrb[232].mxu1 %v14078_v60  ;;  %8813 = vmatmul.mubr.bf16.gmra.mrb[40].mxu0 %v14080_v57  ;;  %v7812_v25 = vmax.f32 %v6777_v44, %v7556_v8  ;;  %v7814_v49 = vmax.f32 %v6970_v6, %v7558_v14  ;;  %v11493_v8 = vld [vmem:[#allocation26 + $0x1b0] sm:$0xff]  }
 0x9ff   : > { %v7565_v15 = vmul.f32 0.01, %v6783_v42  ;;  %v7567_v63 = vmul.f32 0.01, %v6976_v24  ;;  %8659 = vmatprep.mubr.bf16.mxu1 %v14106_v59  ;;  %8820 = vmatprep.mubr.bf16.mxu0 %v14108_v43  ;;  %v7813_v9 = vmax.f32 %v6779_v47, %v7557_v19  ;;  %v7815_v46 = vmax.f32 %v6972_v58, %v7559_v37 }
 0xa00   : > { %v7820_v54 = vmax.f32 %v6781_v35, %v7564_v27  ;;  %v7822_v0 = vmax.f32 %v6974_v23, %v7566_v30  ;;  %10411 = vmatpush3.bf16.msra.mxu1 %v11483_v38  ;;  %10523 = vmatpush3.bf16.msra.mxu0 %v11485_v3  ;;  %v11491_v3 = vld [vmem:[#allocation26 + $0x130] sm:$0xff]   ;;  %v11496_v27 = vld [vmem:[#allocation26 + $0x1f8] sm:$0xff]  }
 0xa01   : > { %v7821_v62 = vmax.f32 %v6783_v42, %v7565_v15  ;;  %v7823_v60 = vmax.f32 %v6976_v24, %v7567_v63  ;;  %v6786_v51 = vpop.f32.mrb[128].mxu1  ;;  %v6979_v57 = vpop.f32.mrb[192].mxu0  ;;  %10412 = vmatprep.subr.bf16.mxu1 %v11486_v17  ;;  %10524 = vmatprep.subr.bf16.mxu0 %v11488_v2  ;;  %v11494_v2 = vld [vmem:[#allocation26 + $0x178] sm:$0xff]  }
 0xa02   : > { %v14178_v16 = vpack.c.bf16 %v7820_v54, %v7812_v25  ;;  %v14180_v59 = vpack.c.bf16 %v7822_v0, %v7814_v49  ;;  %v6787_v43 = vadd.f32 %v6786_v51, %v14011_v34  ;;  %v6980_v44 = vadd.f32 %v6979_v57, %v14015_v18  ;;  %v6788_v6 = vpop.f32.mrb[129].mxu1  ;;  %v6981_v39 = vpop.f32.mrb[193].mxu0 }
 0xa03   : > { %v6789_v21 = vadd.f32 %v6788_v6, %v14020_v41  ;;  %v6982_v47 = vadd.f32 %v6981_v39, %v14024_v5  ;;  %v6790_v58 = vpop.f32.mrb[130].mxu1  ;;  %v6983_v13 = vpop.f32.mrb[194].mxu0  ;;  %v14186_v33 = vpack.c.bf16 %v7821_v62, %v7813_v9  ;;  %v14188_v38 = vpack.c.bf16 %v7823_v60, %v7815_v46  ;;  %v11497_v46 = vld [vmem:[#allocation26 + $0x1b8] sm:$0xff]  }
 0xa04   : > { %v7572_v14 = vmul.f32 0.01, %v6787_v43  ;;  %v7574_v35 = vmul.f32 0.01, %v6980_v44  ;;  %v6791_v23 = vadd.f32 %v6790_v58, %v14011_v34  ;;  %v6984_v7 = vadd.f32 %v6983_v13, %v14015_v18  ;;  %v6792_v22 = vpop.f32.mrb[131].mxu1  ;;  %v6985_v19 = vpop.f32.mrb[195].mxu0  ;;  %10413 = vmatpush3.bf16.msra.mxu1 %v11487_v50  ;;  %10525 = vmatpush3.bf16.msra.mxu0 %v11489_v45 }
 0xa05   : > { %v7573_v37 = vmul.f32 0.01, %v6789_v21  ;;  %v7575_v42 = vmul.f32 0.01, %v6982_v47  ;;  %v6793_v24 = vadd.f32 %v6792_v22, %v14020_v41  ;;  %v6986_v17 = vadd.f32 %v6985_v19, %v14024_v5  ;;  %10414 = vmatprep.subr.bf16.mxu1 %v11490_v10  ;;  %10526 = vmatprep.subr.bf16.mxu0 %v11492_v53  ;;  %v11495_v45 = vld [vmem:[#allocation26 + $0x138] sm:$0xff]  }
 0xa06   : > { %v7580_v30 = vmul.f32 0.01, %v6791_v23  ;;  %v7582_v25 = vmul.f32 0.01, %v6984_v7  ;;  %8660 = vmatmul.mubr.bf16.gmra.mrb[236].mxu1 %v14098_v29  ;;  %8821 = vmatmul.mubr.bf16.gmra.mrb[44].mxu0 %v14100_v20  ;;  %v7828_v49 = vmax.f32 %v6787_v43, %v7572_v14  ;;  %v7830_v15 = vmax.f32 %v6980_v44, %v7574_v35 }
 0xa07   : > { %v7581_v63 = vmul.f32 0.01, %v6793_v24  ;;  %v7583_v9 = vmul.f32 0.01, %v6986_v17  ;;  %8667 = vmatprep.mubr.bf16.mxu1 %v14126_v52  ;;  %8828 = vmatprep.mubr.bf16.mxu0 %v14128_v56  ;;  %v7829_v54 = vmax.f32 %v6789_v21, %v7573_v37  ;;  %v7831_v62 = vmax.f32 %v6982_v47, %v7575_v42 }
 0xa08   : > { %v7836_v0 = vmax.f32 %v6791_v23, %v7580_v30  ;;  %v7838_v50 = vmax.f32 %v6984_v7, %v7582_v25  ;;  %10415 = vmatpush3.bf16.msra.mxu1 %v11491_v3  ;;  %10527 = vmatpush3.bf16.msra.mxu0 %v11493_v8 }
 0xa09   : > { %v7837_v60 = vmax.f32 %v6793_v24, %v7581_v63  ;;  %v7839_v29 = vmax.f32 %v6986_v17, %v7583_v9  ;;  %v6796_v51 = vpop.f32.mrb[132].mxu1  ;;  %v6989_v20 = vpop.f32.mrb[196].mxu0  ;;  %10416 = vmatprep.subr.bf16.mxu1 %v11494_v2  ;;  %10528 = vmatprep.subr.bf16.mxu0 %v11496_v27 }
 0xa0a   : > { %v14198_v57 = vpack.c.bf16 %v7836_v0, %v7828_v49  ;;  %v14200_v10 = vpack.c.bf16 %v7838_v50, %v7830_v15  ;;  %v6797_v52 = vadd.f32 %v6796_v51, %v14011_v34  ;;  %v6990_v56 = vadd.f32 %v6989_v20, %v14015_v18  ;;  %v6798_v53 = vpop.f32.mrb[133].mxu1  ;;  %v6991_v43 = vpop.f32.mrb[197].mxu0 }
 0xa0b   : > { %v6799_v44 = vadd.f32 %v6798_v53, %v14020_v41  ;;  %v6992_v6 = vadd.f32 %v6991_v43, %v14024_v5  ;;  %v6800_v39 = vpop.f32.mrb[134].mxu1  ;;  %v6993_v21 = vpop.f32.mrb[198].mxu0  ;;  %v14206_v47 = vpack.c.bf16 %v7837_v60, %v7829_v54  ;;  %v14208_v58 = vpack.c.bf16 %v7839_v29, %v7831_v62 }
 0xa0c   : > { %v7588_v13 = vmul.f32 0.01, %v6797_v52  ;;  %v7590_v3 = vmul.f32 0.01, %v6990_v56  ;;  %v6801_v8 = vadd.f32 %v6800_v39, %v14011_v34  ;;  %v6994_v14 = vadd.f32 %v6993_v21, %v14015_v18  ;;  %v6802_v35 = vpop.f32.mrb[135].mxu1  ;;  %v6995_v23 = vpop.f32.mrb[199].mxu0  ;;  %10417 = vmatpush3.bf16.msra.mxu1 %v11495_v45  ;;  %10529 = vmatpush3.bf16.msra.mxu0 %v11497_v46 }
 0xa0d   : > { %v7589_v7 = vmul.f32 0.01, %v6799_v44  ;;  %v7591_v22 = vmul.f32 0.01, %v6992_v6  ;;  %v6803_v19 = vadd.f32 %v6802_v35, %v14020_v41  ;;  %v6996_v37 = vadd.f32 %v6995_v23, %v14024_v5 }
 0xa0e   : > { %v7596_v42 = vmul.f32 0.01, %v6801_v8  ;;  %v7598_v24 = vmul.f32 0.01, %v6994_v14  ;;  %8668 = vmatmul.mubr.bf16.gmra.mrb[240].mxu1 %v14118_v48  ;;  %8829 = vmatmul.mubr.bf16.gmra.mrb[48].mxu0 %v14120_v36  ;;  %v7844_v27 = vmax.f32 %v6797_v52, %v7588_v13  ;;  %v7846_v30 = vmax.f32 %v6990_v56, %v7590_v3 }
 0xa0f   : > { %v7597_v17 = vmul.f32 0.01, %v6803_v19  ;;  %v7599_v2 = vmul.f32 0.01, %v6996_v37  ;;  %8675 = vmatprep.mubr.bf16.mxu1 %v14146_v4  ;;  %8836 = vmatprep.mubr.bf16.mxu0 %v14148_v55  ;;  %v7845_v15 = vmax.f32 %v6799_v44, %v7589_v7  ;;  %v7847_v63 = vmax.f32 %v6992_v6, %v7591_v22 }
 0xa10   : > { %v7852_v25 = vmax.f32 %v6801_v8, %v7596_v42  ;;  %v7854_v49 = vmax.f32 %v6994_v14, %v7598_v24 }
 0xa11   : > { %v7853_v9 = vmax.f32 %v6803_v19, %v7597_v17  ;;  %v7855_v54 = vmax.f32 %v6996_v37, %v7599_v2  ;;  %v6806_v0 = vpop.f32.mrb[136].mxu1  ;;  %v6999_v50 = vpop.f32.mrb[200].mxu0 }
 0xa12   : > { %v14218_v45 = vpack.c.bf16 %v7852_v25, %v7844_v27  ;;  %v14220_v48 = vpack.c.bf16 %v7854_v49, %v7846_v30  ;;  %v6807_v36 = vadd.f32 %v6806_v0, %v14011_v34  ;;  %v7000_v4 = vadd.f32 %v6999_v50, %v14015_v18  ;;  %v6808_v46 = vpop.f32.mrb[137].mxu1  ;;  %v7001_v55 = vpop.f32.mrb[201].mxu0 }
 0xa13   : > { %v6809_v62 = vadd.f32 %v6808_v46, %v14020_v41  ;;  %v7002_v60 = vadd.f32 %v7001_v55, %v14024_v5  ;;  %v6810_v29 = vpop.f32.mrb[138].mxu1  ;;  %v7003_v51 = vpop.f32.mrb[202].mxu0  ;;  %v14226_v20 = vpack.c.bf16 %v7853_v9, %v7845_v15  ;;  %v14228_v52 = vpack.c.bf16 %v7855_v54, %v7847_v63 }
 0xa14   : > { %v7604_v56 = vmul.f32 0.01, %v6807_v36  ;;  %v7606_v53 = vmul.f32 0.01, %v7000_v4  ;;  %v6811_v43 = vadd.f32 %v6810_v29, %v14011_v34  ;;  %v7004_v44 = vadd.f32 %v7003_v51, %v14015_v18  ;;  %v6812_v6 = vpop.f32.mrb[139].mxu1  ;;  %v7005_v39 = vpop.f32.mrb[203].mxu0 }
 0xa15   : > { %v7605_v21 = vmul.f32 0.01, %v6809_v62  ;;  %v7607_v13 = vmul.f32 0.01, %v7002_v60  ;;  %v6813_v3 = vadd.f32 %v6812_v6, %v14020_v41  ;;  %v7006_v8 = vadd.f32 %v7005_v39, %v14024_v5 }
 0xa16   : > { %v7612_v14 = vmul.f32 0.01, %v6811_v43  ;;  %v7614_v35 = vmul.f32 0.01, %v7004_v44  ;;  %8676 = vmatmul.mubr.bf16.gmra.mrb[244].mxu1 %v14138_v61  ;;  %8837 = vmatmul.mubr.bf16.gmra.mrb[52].mxu0 %v14140_v32  ;;  %v7860_v22 = vmax.f32 %v6807_v36, %v7604_v56  ;;  %v7862_v19 = vmax.f32 %v7000_v4, %v7606_v53 }
 0xa17   : > { %v7613_v23 = vmul.f32 0.01, %v6813_v3  ;;  %v7615_v7 = vmul.f32 0.01, %v7006_v8  ;;  %8683 = vmatprep.mubr.bf16.mxu1 %v14166_v28  ;;  %8844 = vmatprep.mubr.bf16.mxu0 %v14168_v1  ;;  %v7861_v24 = vmax.f32 %v6809_v62, %v7605_v21  ;;  %v7863_v17 = vmax.f32 %v7002_v60, %v7607_v13 }
 0xa18   : > { %v7868_v37 = vmax.f32 %v6811_v43, %v7612_v14  ;;  %v7870_v42 = vmax.f32 %v7004_v44, %v7614_v35 }
 0xa19   : > { %v7869_v2 = vmax.f32 %v6813_v3, %v7613_v23  ;;  %v7871_v27 = vmax.f32 %v7006_v8, %v7615_v7  ;;  %v6816_v30 = vpop.f32.mrb[140].mxu1  ;;  %v7009_v25 = vpop.f32.mrb[204].mxu0 }
 0xa1a   : > { %v14238_v49 = vpack.c.bf16 %v7868_v37, %v7860_v22  ;;  %v14240_v61 = vpack.c.bf16 %v7870_v42, %v7862_v19  ;;  %v6817_v32 = vadd.f32 %v6816_v30, %v14011_v34  ;;  %v7010_v28 = vadd.f32 %v7009_v25, %v14015_v18  ;;  %v6818_v15 = vpop.f32.mrb[141].mxu1  ;;  %v7011_v1 = vpop.f32.mrb[205].mxu0 }
 0xa1b   : > { %v6819_v63 = vadd.f32 %v6818_v15, %v14020_v41  ;;  %v7012_v9 = vadd.f32 %v7011_v1, %v14024_v5  ;;  %v6820_v54 = vpop.f32.mrb[142].mxu1  ;;  %v7013_v0 = vpop.f32.mrb[206].mxu0  ;;  %v14246_v50 = vpack.c.bf16 %v7869_v2, %v7861_v24  ;;  %v14248_v36 = vpack.c.bf16 %v7871_v27, %v7863_v17 }
 0xa1c   : > { %v7620_v4 = vmul.f32 0.01, %v6817_v32  ;;  %v7622_v46 = vmul.f32 0.01, %v7010_v28  ;;  %v6821_v55 = vadd.f32 %v6820_v54, %v14011_v34  ;;  %v7014_v62 = vadd.f32 %v7013_v0, %v14015_v18  ;;  %v6822_v60 = vpop.f32.mrb[143].mxu1  ;;  %v7015_v29 = vpop.f32.mrb[207].mxu0 }
 0xa1d   : > { %v7621_v51 = vmul.f32 0.01, %v6819_v63  ;;  %v7623_v56 = vmul.f32 0.01, %v7012_v9  ;;  %v6823_v53 = vadd.f32 %v6822_v60, %v14020_v41  ;;  %v7016_v43 = vadd.f32 %v7015_v29, %v14024_v5 }
 0xa1e   : > { %v7628_v44 = vmul.f32 0.01, %v6821_v55  ;;  %v7630_v6 = vmul.f32 0.01, %v7014_v62  ;;  %8684 = vmatmul.mubr.bf16.gmra.mrb[248].mxu1 %v14158_v12  ;;  %8845 = vmatmul.mubr.bf16.gmra.mrb[56].mxu0 %v14160_v11  ;;  %v7876_v13 = vmax.f32 %v6817_v32, %v7620_v4  ;;  %v7878_v3 = vmax.f32 %v7010_v28, %v7622_v46 }
 0xa1f   : > { %v7629_v39 = vmul.f32 0.01, %v6823_v53  ;;  %v7631_v21 = vmul.f32 0.01, %v7016_v43  ;;  %8691 = vmatprep.mubr.bf16.mxu1 %v14186_v33  ;;  %8852 = vmatprep.mubr.bf16.mxu0 %v14188_v38  ;;  %v7877_v35 = vmax.f32 %v6819_v63, %v7621_v51  ;;  %v7879_v23 = vmax.f32 %v7012_v9, %v7623_v56 }
 0xa20   : > { %v7884_v8 = vmax.f32 %v6821_v55, %v7628_v44  ;;  %v7886_v14 = vmax.f32 %v7014_v62, %v7630_v6 }
 0xa21   : > { %v7885_v7 = vmax.f32 %v6823_v53, %v7629_v39  ;;  %v7887_v22 = vmax.f32 %v7016_v43, %v7631_v21  ;;  %v6826_v19 = vpop.f32.mrb[144].mxu1  ;;  %v7019_v37 = vpop.f32.mrb[208].mxu0 }
 0xa22   : > { %v14258_v42 = vpack.c.bf16 %v7884_v8, %v7876_v13  ;;  %v14260_v12 = vpack.c.bf16 %v7886_v14, %v7878_v3  ;;  %v6827_v11 = vadd.f32 %v6826_v19, %v14011_v34  ;;  %v7020_v33 = vadd.f32 %v7019_v37, %v14015_v18  ;;  %v6828_v24 = vpop.f32.mrb[145].mxu1  ;;  %v7021_v38 = vpop.f32.mrb[209].mxu0 }
 0xa23   : > { %v6829_v17 = vadd.f32 %v6828_v24, %v14020_v41  ;;  %v7022_v2 = vadd.f32 %v7021_v38, %v14024_v5  ;;  %v6830_v27 = vpop.f32.mrb[146].mxu1  ;;  %v7023_v30 = vpop.f32.mrb[210].mxu0  ;;  %v14266_v25 = vpack.c.bf16 %v7885_v7, %v7877_v35  ;;  %v14268_v32 = vpack.c.bf16 %v7887_v22, %v7879_v23 }
 0xa24   : > { %v7636_v28 = vmul.f32 0.01, %v6827_v11  ;;  %v7638_v15 = vmul.f32 0.01, %v7020_v33  ;;  %v6831_v1 = vadd.f32 %v6830_v27, %v14011_v34  ;;  %v7024_v63 = vadd.f32 %v7023_v30, %v14015_v18  ;;  %v6832_v9 = vpop.f32.mrb[147].mxu1  ;;  %v7025_v54 = vpop.f32.mrb[211].mxu0 }
 0xa25   : > { %v7637_v0 = vmul.f32 0.01, %v6829_v17  ;;  %v7639_v4 = vmul.f32 0.01, %v7022_v2  ;;  %v6833_v46 = vadd.f32 %v6832_v9, %v14020_v41  ;;  %v7026_v55 = vadd.f32 %v7025_v54, %v14024_v5 }
 0xa26   : > { %v7644_v62 = vmul.f32 0.01, %v6831_v1  ;;  %v7646_v60 = vmul.f32 0.01, %v7024_v63  ;;  %8692 = vmatmul.mubr.bf16.gmra.mrb[252].mxu1 %v14178_v16  ;;  %8853 = vmatmul.mubr.bf16.gmra.mrb[60].mxu0 %v14180_v59  ;;  %v7892_v56 = vmax.f32 %v6827_v11, %v7636_v28  ;;  %v7894_v53 = vmax.f32 %v7020_v33, %v7638_v15 }
 0xa27   : > { %v7645_v29 = vmul.f32 0.01, %v6833_v46  ;;  %v7647_v51 = vmul.f32 0.01, %v7026_v55  ;;  %8699 = vmatprep.mubr.bf16.mxu1 %v14206_v47  ;;  %8860 = vmatprep.mubr.bf16.mxu0 %v14208_v58  ;;  %v7893_v6 = vmax.f32 %v6829_v17, %v7637_v0  ;;  %v7895_v39 = vmax.f32 %v7022_v2, %v7639_v4 }
 0xa28   : > { %v7900_v43 = vmax.f32 %v6831_v1, %v7644_v62  ;;  %v7902_v44 = vmax.f32 %v7024_v63, %v7646_v60 }
 0xa29   : > { %v7901_v21 = vmax.f32 %v6833_v46, %v7645_v29  ;;  %v7903_v13 = vmax.f32 %v7026_v55, %v7647_v51  ;;  %v6836_v3 = vpop.f32.mrb[148].mxu1  ;;  %v7029_v8 = vpop.f32.mrb[212].mxu0 }
 0xa2a   : > { %v14278_v14 = vpack.c.bf16 %v7900_v43, %v7892_v56  ;;  %v14280_v16 = vpack.c.bf16 %v7902_v44, %v7894_v53  ;;  %v6837_v59 = vadd.f32 %v6836_v3, %v14011_v34  ;;  %v7030_v47 = vadd.f32 %v7029_v8, %v14015_v18  ;;  %v6838_v35 = vpop.f32.mrb[149].mxu1  ;;  %v7031_v58 = vpop.f32.mrb[213].mxu0 }
 0xa2b   : > { %v6839_v23 = vadd.f32 %v6838_v35, %v14020_v41  ;;  %v7032_v7 = vadd.f32 %v7031_v58, %v14024_v5  ;;  %v6840_v22 = vpop.f32.mrb[150].mxu1  ;;  %v7033_v19 = vpop.f32.mrb[214].mxu0  ;;  %v14286_v37 = vpack.c.bf16 %v7901_v21, %v7893_v6  ;;  %v14288_v11 = vpack.c.bf16 %v7903_v13, %v7895_v39 }
 0xa2c   : > { %v7652_v33 = vmul.f32 0.01, %v6837_v59  ;;  %v7654_v24 = vmul.f32 0.01, %v7030_v47  ;;  %v6841_v38 = vadd.f32 %v6840_v22, %v14011_v34  ;;  %v7034_v17 = vadd.f32 %v7033_v19, %v14015_v18  ;;  %v6842_v2 = vpop.f32.mrb[151].mxu1  ;;  %v7035_v27 = vpop.f32.mrb[215].mxu0 }
 0xa2d   : > { %v7653_v30 = vmul.f32 0.01, %v6839_v23  ;;  %v7655_v28 = vmul.f32 0.01, %v7032_v7  ;;  %v6843_v15 = vadd.f32 %v6842_v2, %v14020_v41  ;;  %v7036_v1 = vadd.f32 %v7035_v27, %v14024_v5 }
 0xa2e   : > { %v7660_v63 = vmul.f32 0.01, %v6841_v38  ;;  %v7662_v9 = vmul.f32 0.01, %v7034_v17  ;;  %8700 = vmatmul.mubr.bf16.gmra.mrb[0].mxu1 %v14198_v57  ;;  %8861 = vmatmul.mubr.bf16.gmra.mrb[64].mxu0 %v14200_v10  ;;  %v7908_v4 = vmax.f32 %v6837_v59, %v7652_v33  ;;  %v7910_v46 = vmax.f32 %v7030_v47, %v7654_v24 }
 0xa2f   : > { %v7661_v54 = vmul.f32 0.01, %v6843_v15  ;;  %v7663_v0 = vmul.f32 0.01, %v7036_v1  ;;  %8707 = vmatprep.mubr.bf16.mxu1 %v14226_v20  ;;  %8868 = vmatprep.mubr.bf16.mxu0 %v14228_v52  ;;  %v7909_v60 = vmax.f32 %v6839_v23, %v7653_v30  ;;  %v7911_v29 = vmax.f32 %v7032_v7, %v7655_v28 }
 0xa30   : > { %v7916_v55 = vmax.f32 %v6841_v38, %v7660_v63  ;;  %v7918_v62 = vmax.f32 %v7034_v17, %v7662_v9 }
 0xa31   : > { %v7917_v51 = vmax.f32 %v6843_v15, %v7661_v54  ;;  %v7919_v56 = vmax.f32 %v7036_v1, %v7663_v0  ;;  %v6846_v53 = vpop.f32.mrb[152].mxu1  ;;  %v7039_v43 = vpop.f32.mrb[216].mxu0 }
 0xa32   : > { %v14298_v44 = vpack.c.bf16 %v7916_v55, %v7908_v4  ;;  %v14300_v57 = vpack.c.bf16 %v7918_v62, %v7910_v46  ;;  %v6847_v10 = vadd.f32 %v6846_v53, %v14011_v34  ;;  %v7040_v20 = vadd.f32 %v7039_v43, %v14015_v18  ;;  %v6848_v6 = vpop.f32.mrb[153].mxu1  ;;  %v7041_v52 = vpop.f32.mrb[217].mxu0 }
 0xa33   : > { %v6849_v39 = vadd.f32 %v6848_v6, %v14020_v41  ;;  %v7042_v21 = vadd.f32 %v7041_v52, %v14024_v5  ;;  %v6850_v13 = vpop.f32.mrb[154].mxu1  ;;  %v7043_v3 = vpop.f32.mrb[218].mxu0  ;;  %v14306_v8 = vpack.c.bf16 %v7917_v51, %v7909_v60  ;;  %v14308_v59 = vpack.c.bf16 %v7919_v56, %v7911_v29 }
 0xa34   : > { %v7668_v47 = vmul.f32 0.01, %v6847_v10  ;;  %v7670_v35 = vmul.f32 0.01, %v7040_v20  ;;  %v6851_v58 = vadd.f32 %v6850_v13, %v14011_v34  ;;  %v7044_v23 = vadd.f32 %v7043_v3, %v14015_v18  ;;  %v6852_v7 = vpop.f32.mrb[155].mxu1  ;;  %v7045_v22 = vpop.f32.mrb[219].mxu0 }
 0xa35   : > { %v7669_v19 = vmul.f32 0.01, %v6849_v39  ;;  %v7671_v33 = vmul.f32 0.01, %v7042_v21  ;;  %v6853_v24 = vadd.f32 %v6852_v7, %v14020_v41  ;;  %v7046_v38 = vadd.f32 %v7045_v22, %v14024_v5  ;;  %v11499_v22 = vld [vmem:[#allocation25] sm:$0xff] }
 0xa36   : > { %v7676_v17 = vmul.f32 0.01, %v6851_v58  ;;  %v7678_v2 = vmul.f32 0.01, %v7044_v23  ;;  %8708 = vmatmul.mubr.bf16.gmra.mrb[4].mxu1 %v14218_v45  ;;  %8869 = vmatmul.mubr.bf16.gmra.mrb[68].mxu0 %v14220_v48  ;;  %v7924_v28 = vmax.f32 %v6847_v10, %v7668_v47  ;;  %v7926_v15 = vmax.f32 %v7040_v20, %v7670_v35 }
 0xa37   : > { %v7677_v27 = vmul.f32 0.01, %v6853_v24  ;;  %v7679_v30 = vmul.f32 0.01, %v7046_v38  ;;  %8715 = vmatprep.mubr.bf16.mxu1 %v14246_v50  ;;  %8876 = vmatprep.mubr.bf16.mxu0 %v14248_v36  ;;  %v7925_v9 = vmax.f32 %v6849_v39, %v7669_v19  ;;  %v7927_v54 = vmax.f32 %v7042_v21, %v7671_v33 }
 0xa38   : > { %v7932_v1 = vmax.f32 %v6851_v58, %v7676_v17  ;;  %v7934_v63 = vmax.f32 %v7044_v23, %v7678_v2  ;;  %v15063_v19 = vsub.s32 4, %v12858_v31 }
 0xa39   : > { %v7933_v0 = vmax.f32 %v6853_v24, %v7677_v27  ;;  %v7935_v4 = vmax.f32 %v7046_v38, %v7679_v30  ;;  %v6856_v46 = vpop.f32.mrb[156].mxu1  ;;  %v7049_v55 = vpop.f32.mrb[220].mxu0 }
 0xa3a   : > { %v14318_v62 = vpack.c.bf16 %v7932_v1, %v7924_v28  ;;  %v14320_v45 = vpack.c.bf16 %v7934_v63, %v7926_v15  ;;  %v6857_v48 = vadd.f32 %v6856_v46, %v14011_v34  ;;  %v7050_v50 = vadd.f32 %v7049_v55, %v14015_v18  ;;  %v6858_v60 = vpop.f32.mrb[157].mxu1  ;;  %v7051_v36 = vpop.f32.mrb[221].mxu0 }
 0xa3b   : > { %v6859_v29 = vadd.f32 %v6858_v60, %v14020_v41  ;;  %v7052_v51 = vadd.f32 %v7051_v36, %v14024_v5  ;;  %v6860_v56 = vpop.f32.mrb[158].mxu1  ;;  %v7053_v53 = vpop.f32.mrb[222].mxu0  ;;  %v14326_v43 = vpack.c.bf16 %v7933_v0, %v7925_v9  ;;  %v14328_v10 = vpack.c.bf16 %v7935_v4, %v7927_v54 }
 0xa3c   : > { %v7684_v20 = vmul.f32 0.01, %v6857_v48  ;;  %v7686_v6 = vmul.f32 0.01, %v7050_v50  ;;  %v6861_v52 = vadd.f32 %v6860_v56, %v14011_v34  ;;  %v7054_v39 = vadd.f32 %v7053_v53, %v14015_v18  ;;  %v6862_v21 = vpop.f32.mrb[159].mxu1  ;;  %v7055_v13 = vpop.f32.mrb[223].mxu0 }
 0xa3d   : > { %v7685_v3 = vmul.f32 0.01, %v6859_v29  ;;  %v7687_v47 = vmul.f32 0.01, %v7052_v51  ;;  %v6863_v35 = vadd.f32 %v6862_v21, %v14020_v41  ;;  %v7056_v58 = vadd.f32 %v7055_v13, %v14024_v5 }
 0xa3e   : > { %v7692_v23 = vmul.f32 0.01, %v6861_v52  ;;  %v7694_v7 = vmul.f32 0.01, %v7054_v39  ;;  %8716 = vmatmul.mubr.bf16.gmra.mrb[8].mxu1 %v14238_v49  ;;  %8877 = vmatmul.mubr.bf16.gmra.mrb[72].mxu0 %v14240_v61  ;;  %v14338_v34 = vrot.slane %v11499_v22, %v15063_v19  ;;  %v14342_v18 = vrot.slane %v11499_v22, %v926_v40 }
 0xa3f   : > { %v7693_v33 = vmul.f32 0.01, %v6863_v35  ;;  %v7695_v24 = vmul.f32 0.01, %v7056_v58  ;;  %8723 = vmatprep.mubr.bf16.mxu1 %v14266_v25  ;;  %8884 = vmatprep.mubr.bf16.mxu0 %v14268_v32  ;;  %v15064_v41 = vsub.s32 5, %v12858_v31  ;;  %v14352_v49 = vrot.slane %v11499_v22, %v930_v26 }
 0xa40   : > { %v7940_v61 = vmax.f32 %v6857_v48, %v7684_v20  ;;  %v7942_v38 = vmax.f32 %v7050_v50, %v7686_v6  ;;  %v7948_v17 = vmax.f32 %v6861_v52, %v7692_v23  ;;  %v7950_v2 = vmax.f32 %v7054_v39, %v7694_v7 }
 0xa41   : > { %v14348_v5 = vrot.slane %v11499_v22, %v15064_v41  ;;  %v7941_v40 = vmax.f32 %v6859_v29, %v7685_v3  ;;  %v7943_v27 = vmax.f32 %v7052_v51, %v7687_v47  ;;  %v7949_v30 = vmax.f32 %v6863_v35, %v7693_v33  ;;  %v7092_v15 = vpop.f32.mrb[160].mxu1  ;;  %v7285_v25 = vpop.f32.mrb[224].mxu0 }
 0xa42   : > { %v7951_v28 = vmax.f32 %v7056_v58, %v7695_v24  ;;  %v14354_v1 = vpack.c.bf16 %v7948_v17, %v7940_v61  ;;  %v14356_v32 = vpack.c.bf16 %v7950_v2, %v7942_v38  ;;  %v7093_v63 = vadd.f32 %v7092_v15, %v14338_v34  ;;  %v7094_v26 = vpop.f32.mrb[161].mxu1  ;;  %v7287_v9 = vpop.f32.mrb[225].mxu0 }
 0xa43   : > { %v7286_v31 = vadd.f32 %v7285_v25, %v14342_v18  ;;  %v7095_v54 = vadd.f32 %v7094_v26, %v14348_v5  ;;  %v7288_v0 = vadd.f32 %v7287_v9, %v14352_v49  ;;  %v7096_v4 = vpop.f32.mrb[162].mxu1  ;;  %v7289_v46 = vpop.f32.mrb[226].mxu0  ;;  %v14362_v55 = vpack.c.bf16 %v7949_v30, %v7941_v40 }
 0xa44   : > { %v14364_v48 = vpack.c.bf16 %v7951_v28, %v7943_v27  ;;  %v7448_v50 = vmul.f32 0.01, %v7093_v63  ;;  %v7097_v36 = vadd.f32 %v7096_v4, %v14338_v34  ;;  %v7290_v29 = vadd.f32 %v7289_v46, %v14342_v18  ;;  %v7098_v51 = vpop.f32.mrb[163].mxu1  ;;  %v7291_v56 = vpop.f32.mrb[227].mxu0 }
 0xa45   : > { %v7450_v60 = vmul.f32 0.01, %v7286_v31  ;;  %v7449_v53 = vmul.f32 0.01, %v7095_v54  ;;  %v7451_v20 = vmul.f32 0.01, %v7288_v0  ;;  %v7099_v6 = vadd.f32 %v7098_v51, %v14348_v5 }
 0xa46   : > { %v7292_v52 = vadd.f32 %v7291_v56, %v14352_v49  ;;  %v7456_v39 = vmul.f32 0.01, %v7097_v36  ;;  %v7458_v21 = vmul.f32 0.01, %v7290_v29  ;;  %8724 = vmatmul.mubr.bf16.gmra.mrb[12].mxu1 %v14258_v42  ;;  %8885 = vmatmul.mubr.bf16.gmra.mrb[76].mxu0 %v14260_v12  ;;  %v7704_v47 = vmax.f32 %v7093_v63, %v7448_v50 }
 0xa47   : > { %v7457_v13 = vmul.f32 0.01, %v7099_v6  ;;  %8731 = vmatprep.mubr.bf16.mxu1 %v14286_v37  ;;  %8892 = vmatprep.mubr.bf16.mxu0 %v14288_v11  ;;  %v7706_v35 = vmax.f32 %v7286_v31, %v7450_v60  ;;  %v7705_v7 = vmax.f32 %v7095_v54, %v7449_v53  ;;  %v7707_v22 = vmax.f32 %v7288_v0, %v7451_v20 }
 0xa48   : > { %v7459_v3 = vmul.f32 0.01, %v7292_v52  ;;  %v7712_v58 = vmax.f32 %v7097_v36, %v7456_v39  ;;  %v7714_v23 = vmax.f32 %v7290_v29, %v7458_v21 }
 0xa49   : > { %v7713_v19 = vmax.f32 %v7099_v6, %v7457_v13  ;;  %v7102_v24 = vpop.f32.mrb[164].mxu1  ;;  %v7295_v41 = vpop.f32.mrb[228].mxu0 }
 0xa4a   : > { %v7715_v33 = vmax.f32 %v7292_v52, %v7459_v3  ;;  %v14374_v61 = vpack.c.bf16 %v7712_v58, %v7704_v47  ;;  %v14376_v42 = vpack.c.bf16 %v7714_v23, %v7706_v35  ;;  %v7103_v12 = vadd.f32 %v7102_v24, %v14338_v34  ;;  %v7104_v38 = vpop.f32.mrb[165].mxu1  ;;  %v7297_v11 = vpop.f32.mrb[229].mxu0 }
 0xa4b   : > { %v7296_v37 = vadd.f32 %v7295_v41, %v14342_v18  ;;  %v7105_v17 = vadd.f32 %v7104_v38, %v14348_v5  ;;  %v7298_v2 = vadd.f32 %v7297_v11, %v14352_v49  ;;  %v7106_v40 = vpop.f32.mrb[166].mxu1  ;;  %v7299_v27 = vpop.f32.mrb[230].mxu0  ;;  %v14382_v30 = vpack.c.bf16 %v7713_v19, %v7705_v7 }
 0xa4c   : > { %v14384_v28 = vpack.c.bf16 %v7715_v33, %v7707_v22  ;;  %v7464_v15 = vmul.f32 0.01, %v7103_v12  ;;  %v7107_v63 = vadd.f32 %v7106_v40, %v14338_v34  ;;  %v7300_v31 = vadd.f32 %v7299_v27, %v14342_v18  ;;  %v7108_v26 = vpop.f32.mrb[167].mxu1  ;;  %v7301_v9 = vpop.f32.mrb[231].mxu0 }
 0xa4d   : > { %v7466_v25 = vmul.f32 0.01, %v7296_v37  ;;  %v7465_v54 = vmul.f32 0.01, %v7105_v17  ;;  %v7467_v0 = vmul.f32 0.01, %v7298_v2  ;;  %v7109_v4 = vadd.f32 %v7108_v26, %v14348_v5 }
 0xa4e   : > { %v7302_v46 = vadd.f32 %v7301_v9, %v14352_v49  ;;  %v7472_v50 = vmul.f32 0.01, %v7107_v63  ;;  %v7474_v60 = vmul.f32 0.01, %v7300_v31  ;;  %8732 = vmatmul.mubr.bf16.gmra.mrb[16].mxu1 %v14278_v14  ;;  %8893 = vmatmul.mubr.bf16.gmra.mrb[80].mxu0 %v14280_v16  ;;  %v7720_v51 = vmax.f32 %v7103_v12, %v7464_v15 }
 0xa4f   : > { %v7473_v36 = vmul.f32 0.01, %v7109_v4  ;;  %8739 = vmatprep.mubr.bf16.mxu1 %v14306_v8  ;;  %8900 = vmatprep.mubr.bf16.mxu0 %v14308_v59  ;;  %v7722_v56 = vmax.f32 %v7296_v37, %v7466_v25  ;;  %v7721_v6 = vmax.f32 %v7105_v17, %v7465_v54  ;;  %v7723_v52 = vmax.f32 %v7298_v2, %v7467_v0 }
 0xa50   : > { %v7475_v29 = vmul.f32 0.01, %v7302_v46  ;;  %v7728_v53 = vmax.f32 %v7107_v63, %v7472_v50  ;;  %v7730_v20 = vmax.f32 %v7300_v31, %v7474_v60 }
 0xa51   : > { %v7729_v39 = vmax.f32 %v7109_v4, %v7473_v36  ;;  %v7112_v13 = vpop.f32.mrb[168].mxu1  ;;  %v7305_v3 = vpop.f32.mrb[232].mxu0 }
 0xa52   : > { %v7731_v21 = vmax.f32 %v7302_v46, %v7475_v29  ;;  %v14394_v47 = vpack.c.bf16 %v7728_v53, %v7720_v51  ;;  %v14396_v14 = vpack.c.bf16 %v7730_v20, %v7722_v56  ;;  %v7113_v16 = vadd.f32 %v7112_v13, %v14338_v34  ;;  %v7114_v35 = vpop.f32.mrb[169].mxu1  ;;  %v7307_v59 = vpop.f32.mrb[233].mxu0 }
 0xa53   : > { %v7306_v8 = vadd.f32 %v7305_v3, %v14342_v18  ;;  %v7115_v58 = vadd.f32 %v7114_v35, %v14348_v5  ;;  %v7308_v23 = vadd.f32 %v7307_v59, %v14352_v49  ;;  %v7116_v7 = vpop.f32.mrb[170].mxu1  ;;  %v7309_v22 = vpop.f32.mrb[234].mxu0  ;;  %v14402_v19 = vpack.c.bf16 %v7729_v39, %v7721_v6 }
 0xa54   : > { %v14404_v33 = vpack.c.bf16 %v7731_v21, %v7723_v52  ;;  %v7480_v24 = vmul.f32 0.01, %v7113_v16  ;;  %v7117_v12 = vadd.f32 %v7116_v7, %v14338_v34  ;;  %v7310_v37 = vadd.f32 %v7309_v22, %v14342_v18  ;;  %v7118_v38 = vpop.f32.mrb[171].mxu1  ;;  %v7311_v11 = vpop.f32.mrb[235].mxu0 }
 0xa55   : > { %v7482_v41 = vmul.f32 0.01, %v7306_v8  ;;  %v7481_v17 = vmul.f32 0.01, %v7115_v58  ;;  %v7483_v2 = vmul.f32 0.01, %v7308_v23  ;;  %v7119_v40 = vadd.f32 %v7118_v38, %v14348_v5 }
 0xa56   : > { %v7312_v27 = vadd.f32 %v7311_v11, %v14352_v49  ;;  %v7488_v15 = vmul.f32 0.01, %v7117_v12  ;;  %v7490_v25 = vmul.f32 0.01, %v7310_v37  ;;  %8740 = vmatmul.mubr.bf16.gmra.mrb[20].mxu1 %v14298_v44  ;;  %8901 = vmatmul.mubr.bf16.gmra.mrb[84].mxu0 %v14300_v57  ;;  %v7736_v26 = vmax.f32 %v7113_v16, %v7480_v24 }
 0xa57   : > { %v7489_v63 = vmul.f32 0.01, %v7119_v40  ;;  %8747 = vmatprep.mubr.bf16.mxu1 %v14326_v43  ;;  %8908 = vmatprep.mubr.bf16.mxu0 %v14328_v10  ;;  %v7738_v9 = vmax.f32 %v7306_v8, %v7482_v41  ;;  %v7737_v4 = vmax.f32 %v7115_v58, %v7481_v17  ;;  %v7739_v46 = vmax.f32 %v7308_v23, %v7483_v2 }
 0xa58   : > { %v7491_v31 = vmul.f32 0.01, %v7312_v27  ;;  %v7744_v54 = vmax.f32 %v7117_v12, %v7488_v15  ;;  %v7746_v0 = vmax.f32 %v7310_v37, %v7490_v25 }
 0xa59   : > { %v7745_v50 = vmax.f32 %v7119_v40, %v7489_v63  ;;  %v7122_v36 = vpop.f32.mrb[172].mxu1  ;;  %v7315_v29 = vpop.f32.mrb[236].mxu0 }
 0xa5a   : > { %v7747_v60 = vmax.f32 %v7312_v27, %v7491_v31  ;;  %v14414_v51 = vpack.c.bf16 %v7744_v54, %v7736_v26  ;;  %v14416_v44 = vpack.c.bf16 %v7746_v0, %v7738_v9  ;;  %v7123_v57 = vadd.f32 %v7122_v36, %v14338_v34  ;;  %v7124_v56 = vpop.f32.mrb[173].mxu1  ;;  %v7317_v10 = vpop.f32.mrb[237].mxu0 }
 0xa5b   : > { %v7316_v43 = vadd.f32 %v7315_v29, %v14342_v18  ;;  %v7125_v53 = vadd.f32 %v7124_v56, %v14348_v5  ;;  %v7318_v20 = vadd.f32 %v7317_v10, %v14352_v49  ;;  %v7126_v6 = vpop.f32.mrb[174].mxu1  ;;  %v7319_v52 = vpop.f32.mrb[238].mxu0  ;;  %v14422_v39 = vpack.c.bf16 %v7745_v50, %v7737_v4 }
 0xa5c   : > { %v14424_v21 = vpack.c.bf16 %v7747_v60, %v7739_v46  ;;  %v7496_v13 = vmul.f32 0.01, %v7123_v57  ;;  %v7127_v16 = vadd.f32 %v7126_v6, %v14338_v34  ;;  %v7320_v8 = vadd.f32 %v7319_v52, %v14342_v18  ;;  %v7128_v35 = vpop.f32.mrb[175].mxu1  ;;  %v7321_v59 = vpop.f32.mrb[239].mxu0 }
 0xa5d   : > { %v7498_v3 = vmul.f32 0.01, %v7316_v43  ;;  %v7497_v58 = vmul.f32 0.01, %v7125_v53  ;;  %v7499_v23 = vmul.f32 0.01, %v7318_v20  ;;  %v7129_v7 = vadd.f32 %v7128_v35, %v14348_v5 }
 0xa5e   : > { %v7322_v22 = vadd.f32 %v7321_v59, %v14352_v49  ;;  %v7504_v24 = vmul.f32 0.01, %v7127_v16  ;;  %v7506_v41 = vmul.f32 0.01, %v7320_v8  ;;  %8748 = vmatmul.mubr.bf16.gmra.mrb[24].mxu1 %v14318_v62  ;;  %8909 = vmatmul.mubr.bf16.gmra.mrb[88].mxu0 %v14320_v45  ;;  %v7752_v38 = vmax.f32 %v7123_v57, %v7496_v13 }
 0xa5f   : > { %v7505_v12 = vmul.f32 0.01, %v7129_v7  ;;  %8755 = vmatprep.mubr.bf16.mxu1 %v14362_v55  ;;  %8916 = vmatprep.mubr.bf16.mxu0 %v14364_v48  ;;  %v7754_v11 = vmax.f32 %v7316_v43, %v7498_v3  ;;  %v7753_v40 = vmax.f32 %v7125_v53, %v7497_v58  ;;  %v7755_v27 = vmax.f32 %v7318_v20, %v7499_v23 }
 0xa60   : > { %v7507_v37 = vmul.f32 0.01, %v7322_v22  ;;  %v7760_v17 = vmax.f32 %v7127_v16, %v7504_v24  ;;  %v7762_v2 = vmax.f32 %v7320_v8, %v7506_v41 }
 0xa61   : > { %v7761_v15 = vmax.f32 %v7129_v7, %v7505_v12  ;;  %v7132_v63 = vpop.f32.mrb[176].mxu1  ;;  %v7325_v31 = vpop.f32.mrb[240].mxu0 }
 0xa62   : > { %v7763_v25 = vmax.f32 %v7322_v22, %v7507_v37  ;;  %v14434_v26 = vpack.c.bf16 %v7760_v17, %v7752_v38  ;;  %v14436_v62 = vpack.c.bf16 %v7762_v2, %v7754_v11  ;;  %v7133_v45 = vadd.f32 %v7132_v63, %v14338_v34  ;;  %v7134_v9 = vpop.f32.mrb[177].mxu1  ;;  %v7327_v48 = vpop.f32.mrb[241].mxu0 }
 0xa63   : > { %v7326_v55 = vadd.f32 %v7325_v31, %v14342_v18  ;;  %v7135_v54 = vadd.f32 %v7134_v9, %v14348_v5  ;;  %v7328_v0 = vadd.f32 %v7327_v48, %v14352_v49  ;;  %v7136_v4 = vpop.f32.mrb[178].mxu1  ;;  %v7329_v46 = vpop.f32.mrb[242].mxu0  ;;  %v14442_v50 = vpack.c.bf16 %v7761_v15, %v7753_v40 }
 0xa64   : > { %v14444_v60 = vpack.c.bf16 %v7763_v25, %v7755_v27  ;;  %v7512_v36 = vmul.f32 0.01, %v7133_v45  ;;  %v7137_v57 = vadd.f32 %v7136_v4, %v14338_v34  ;;  %v7330_v43 = vadd.f32 %v7329_v46, %v14342_v18  ;;  %v7138_v56 = vpop.f32.mrb[179].mxu1  ;;  %v7331_v10 = vpop.f32.mrb[243].mxu0 }
 0xa65   : > { %v7514_v29 = vmul.f32 0.01, %v7326_v55  ;;  %v7513_v53 = vmul.f32 0.01, %v7135_v54  ;;  %v7515_v20 = vmul.f32 0.01, %v7328_v0  ;;  %v7139_v6 = vadd.f32 %v7138_v56, %v14348_v5 }
 0xa66   : > { %v7332_v52 = vadd.f32 %v7331_v10, %v14352_v49  ;;  %v7520_v13 = vmul.f32 0.01, %v7137_v57  ;;  %v7522_v3 = vmul.f32 0.01, %v7330_v43  ;;  %8756 = vmatmul.mubr.bf16.gmra.mrb[28].mxu1 %v14354_v1  ;;  %8917 = vmatmul.mubr.bf16.gmra.mrb[92].mxu0 %v14356_v32  ;;  %v7768_v35 = vmax.f32 %v7133_v45, %v7512_v36 }
 0xa67   : > { %v7521_v16 = vmul.f32 0.01, %v7139_v6  ;;  %8957 = vmatprep.mubr.bf16.mxu1 %v14382_v30  ;;  %9118 = vmatprep.mubr.bf16.mxu0 %v14384_v28  ;;  %v7770_v59 = vmax.f32 %v7326_v55, %v7514_v29  ;;  %v7769_v7 = vmax.f32 %v7135_v54, %v7513_v53  ;;  %v7771_v22 = vmax.f32 %v7328_v0, %v7515_v20 }
 0xa68   : > { %v7523_v8 = vmul.f32 0.01, %v7332_v52  ;;  %v7776_v58 = vmax.f32 %v7137_v57, %v7520_v13  ;;  %v7778_v23 = vmax.f32 %v7330_v43, %v7522_v3 }
 0xa69   : > { %v7777_v24 = vmax.f32 %v7139_v6, %v7521_v16  ;;  %v7142_v12 = vpop.f32.mrb[180].mxu1  ;;  %v7335_v37 = vpop.f32.mrb[244].mxu0 }
 0xa6a   : > { %v7779_v41 = vmax.f32 %v7332_v52, %v7523_v8  ;;  %v14454_v38 = vpack.c.bf16 %v7776_v58, %v7768_v35  ;;  %v14456_v1 = vpack.c.bf16 %v7778_v23, %v7770_v59  ;;  %v7143_v32 = vadd.f32 %v7142_v12, %v14338_v34  ;;  %v7144_v11 = vpop.f32.mrb[181].mxu1  ;;  %v7337_v28 = vpop.f32.mrb[245].mxu0 }
 0xa6b   : > { %v7336_v30 = vadd.f32 %v7335_v37, %v14342_v18  ;;  %v7145_v17 = vadd.f32 %v7144_v11, %v14348_v5  ;;  %v7338_v2 = vadd.f32 %v7337_v28, %v14352_v49  ;;  %v7146_v40 = vpop.f32.mrb[182].mxu1  ;;  %v7339_v27 = vpop.f32.mrb[246].mxu0  ;;  %v14462_v15 = vpack.c.bf16 %v7777_v24, %v7769_v7 }
 0xa6c   : > { %v14464_v25 = vpack.c.bf16 %v7779_v41, %v7771_v22  ;;  %v7528_v63 = vmul.f32 0.01, %v7143_v32  ;;  %v7147_v45 = vadd.f32 %v7146_v40, %v14338_v34  ;;  %v7340_v55 = vadd.f32 %v7339_v27, %v14342_v18  ;;  %v7148_v9 = vpop.f32.mrb[183].mxu1  ;;  %v7341_v48 = vpop.f32.mrb[247].mxu0 }
 0xa6d   : > { %v7530_v31 = vmul.f32 0.01, %v7336_v30  ;;  %v7529_v54 = vmul.f32 0.01, %v7145_v17  ;;  %v7531_v0 = vmul.f32 0.01, %v7338_v2  ;;  %v7149_v4 = vadd.f32 %v7148_v9, %v14348_v5 }
 0xa6e   : > { %v7342_v46 = vadd.f32 %v7341_v48, %v14352_v49  ;;  %v7536_v36 = vmul.f32 0.01, %v7147_v45  ;;  %v7538_v29 = vmul.f32 0.01, %v7340_v55  ;;  %8958 = vmatmul.mubr.bf16.vlgmr.msra.gmra.mrb[32].mxu1 %v14374_v61  ;;  %9119 = vmatmul.mubr.bf16.vlgmr.msra.gmra.mrb[96].mxu0 %v14376_v42  ;;  %v7784_v56 = vmax.f32 %v7143_v32, %v7528_v63 }
 0xa6f   : > { %v7537_v57 = vmul.f32 0.01, %v7149_v4  ;;  %8965 = vmatprep.mubr.bf16.mxu1 %v14402_v19  ;;  %9126 = vmatprep.mubr.bf16.mxu0 %v14404_v33  ;;  %v7786_v10 = vmax.f32 %v7336_v30, %v7530_v31  ;;  %v7785_v6 = vmax.f32 %v7145_v17, %v7529_v54  ;;  %v7787_v52 = vmax.f32 %v7338_v2, %v7531_v0 }
 0xa70   : > { %v7539_v43 = vmul.f32 0.01, %v7342_v46  ;;  %v7792_v53 = vmax.f32 %v7147_v45, %v7536_v36  ;;  %v7794_v20 = vmax.f32 %v7340_v55, %v7538_v29 }
 0xa71   : > { %v7793_v13 = vmax.f32 %v7149_v4, %v7537_v57  ;;  %v7152_v16 = vpop.f32.mrb[184].mxu1  ;;  %v7345_v8 = vpop.f32.mrb[248].mxu0 }
 0xa72   : > { %v7795_v3 = vmax.f32 %v7342_v46, %v7539_v43  ;;  %v14474_v35 = vpack.c.bf16 %v7792_v53, %v7784_v56  ;;  %v14476_v61 = vpack.c.bf16 %v7794_v20, %v7786_v10  ;;  %v7153_v42 = vadd.f32 %v7152_v16, %v14338_v34  ;;  %v7154_v59 = vpop.f32.mrb[185].mxu1  ;;  %v7347_v33 = vpop.f32.mrb[249].mxu0 }
 0xa73   : > { %v7346_v19 = vadd.f32 %v7345_v8, %v14342_v18  ;;  %v7155_v58 = vadd.f32 %v7154_v59, %v14348_v5  ;;  %v7348_v23 = vadd.f32 %v7347_v33, %v14352_v49  ;;  %v7156_v7 = vpop.f32.mrb[186].mxu1  ;;  %v7349_v22 = vpop.f32.mrb[250].mxu0  ;;  %v14482_v24 = vpack.c.bf16 %v7793_v13, %v7785_v6 }
 0xa74   : > { %v14484_v41 = vpack.c.bf16 %v7795_v3, %v7787_v52  ;;  %v7544_v12 = vmul.f32 0.01, %v7153_v42  ;;  %v7157_v32 = vadd.f32 %v7156_v7, %v14338_v34  ;;  %v7350_v30 = vadd.f32 %v7349_v22, %v14342_v18  ;;  %v7158_v11 = vpop.f32.mrb[187].mxu1  ;;  %v7351_v28 = vpop.f32.mrb[251].mxu0 }
 0xa75   : > { %v7546_v37 = vmul.f32 0.01, %v7346_v19  ;;  %v7545_v17 = vmul.f32 0.01, %v7155_v58  ;;  %v7547_v2 = vmul.f32 0.01, %v7348_v23  ;;  %v7159_v40 = vadd.f32 %v7158_v11, %v14348_v5 }
 0xa76   : > { %v7352_v27 = vadd.f32 %v7351_v28, %v14352_v49  ;;  %v7552_v63 = vmul.f32 0.01, %v7157_v32  ;;  %v7554_v31 = vmul.f32 0.01, %v7350_v30  ;;  %8966 = vmatmul.mubr.bf16.gmra.mrb[36].mxu1 %v14394_v47  ;;  %9127 = vmatmul.mubr.bf16.gmra.mrb[100].mxu0 %v14396_v14  ;;  %v7800_v9 = vmax.f32 %v7153_v42, %v7544_v12 }
 0xa77   : > { %v7553_v45 = vmul.f32 0.01, %v7159_v40  ;;  %8973 = vmatprep.mubr.bf16.mxu1 %v14422_v39  ;;  %9134 = vmatprep.mubr.bf16.mxu0 %v14424_v21  ;;  %v7802_v48 = vmax.f32 %v7346_v19, %v7546_v37  ;;  %v7801_v4 = vmax.f32 %v7155_v58, %v7545_v17  ;;  %v7803_v46 = vmax.f32 %v7348_v23, %v7547_v2 }
 0xa78   : > { %v7555_v55 = vmul.f32 0.01, %v7352_v27  ;;  %v7808_v54 = vmax.f32 %v7157_v32, %v7552_v63  ;;  %v7810_v0 = vmax.f32 %v7350_v30, %v7554_v31 }
 0xa79   : > { %v7809_v36 = vmax.f32 %v7159_v40, %v7553_v45  ;;  %v7162_v57 = vpop.f32.mrb[188].mxu1  ;;  %v7355_v43 = vpop.f32.mrb[252].mxu0 }
 0xa7a   : > { %v7811_v29 = vmax.f32 %v7352_v27, %v7555_v55  ;;  %v14494_v56 = vpack.c.bf16 %v7808_v54, %v7800_v9  ;;  %v14496_v47 = vpack.c.bf16 %v7810_v0, %v7802_v48  ;;  %v7163_v14 = vadd.f32 %v7162_v57, %v14338_v34  ;;  %v7164_v10 = vpop.f32.mrb[189].mxu1  ;;  %v7357_v21 = vpop.f32.mrb[253].mxu0 }
 0xa7b   : > { %v7356_v39 = vadd.f32 %v7355_v43, %v14342_v18  ;;  %v7165_v53 = vadd.f32 %v7164_v10, %v14348_v5  ;;  %v7358_v20 = vadd.f32 %v7357_v21, %v14352_v49  ;;  %v7166_v6 = vpop.f32.mrb[190].mxu1  ;;  %v7359_v52 = vpop.f32.mrb[254].mxu0  ;;  %v14502_v13 = vpack.c.bf16 %v7809_v36, %v7801_v4 }
 0xa7c   : > { %v14504_v3 = vpack.c.bf16 %v7811_v29, %v7803_v46  ;;  %v7560_v16 = vmul.f32 0.01, %v7163_v14  ;;  %v7167_v42 = vadd.f32 %v7166_v6, %v14338_v34  ;;  %v7360_v19 = vadd.f32 %v7359_v52, %v14342_v18  ;;  %v7168_v59 = vpop.f32.mrb[191].mxu1  ;;  %v7361_v33 = vpop.f32.mrb[255].mxu0 }
 0xa7d   : > { %v7562_v8 = vmul.f32 0.01, %v7356_v39  ;;  %v7561_v58 = vmul.f32 0.01, %v7165_v53  ;;  %v7563_v23 = vmul.f32 0.01, %v7358_v20  ;;  %v7169_v7 = vadd.f32 %v7168_v59, %v14348_v5 }
 0xa7e   : > { %v7362_v22 = vadd.f32 %v7361_v33, %v14352_v49  ;;  %v7568_v12 = vmul.f32 0.01, %v7167_v42  ;;  %v7570_v37 = vmul.f32 0.01, %v7360_v19  ;;  %8974 = vmatmul.mubr.bf16.gmra.mrb[40].mxu1 %v14414_v51  ;;  %9135 = vmatmul.mubr.bf16.gmra.mrb[104].mxu0 %v14416_v44  ;;  %v7816_v11 = vmax.f32 %v7163_v14, %v7560_v16 }
 0xa7f   : > { %v7569_v32 = vmul.f32 0.01, %v7169_v7  ;;  %8981 = vmatprep.mubr.bf16.mxu1 %v14442_v50  ;;  %9142 = vmatprep.mubr.bf16.mxu0 %v14444_v60  ;;  %v7818_v28 = vmax.f32 %v7356_v39, %v7562_v8  ;;  %v7817_v40 = vmax.f32 %v7165_v53, %v7561_v58  ;;  %v7819_v27 = vmax.f32 %v7358_v20, %v7563_v23 }
 0xa80   : > { %v7571_v30 = vmul.f32 0.01, %v7362_v22  ;;  %v7824_v17 = vmax.f32 %v7167_v42, %v7568_v12  ;;  %v7826_v2 = vmax.f32 %v7360_v19, %v7570_v37 }
 0xa81   : > { %v7825_v63 = vmax.f32 %v7169_v7, %v7569_v32  ;;  %v7172_v45 = vpop.f32.mrb[192].mxu1  ;;  %v7365_v55 = vpop.f32.mrb[0].mxu0 }
 0xa82   : > { %v7827_v31 = vmax.f32 %v7362_v22, %v7571_v30  ;;  %v14514_v9 = vpack.c.bf16 %v7824_v17, %v7816_v11  ;;  %v14516_v51 = vpack.c.bf16 %v7826_v2, %v7818_v28  ;;  %v7173_v44 = vadd.f32 %v7172_v45, %v14338_v34  ;;  %v7174_v48 = vpop.f32.mrb[193].mxu1  ;;  %v7367_v60 = vpop.f32.mrb[1].mxu0 }
 0xa83   : > { %v7366_v50 = vadd.f32 %v7365_v55, %v14342_v18  ;;  %v7175_v54 = vadd.f32 %v7174_v48, %v14348_v5  ;;  %v7368_v0 = vadd.f32 %v7367_v60, %v14352_v49  ;;  %v7176_v4 = vpop.f32.mrb[194].mxu1  ;;  %v7369_v46 = vpop.f32.mrb[2].mxu0  ;;  %v14522_v36 = vpack.c.bf16 %v7825_v63, %v7817_v40 }
 0xa84   : > { %v14524_v29 = vpack.c.bf16 %v7827_v31, %v7819_v27  ;;  %v7576_v57 = vmul.f32 0.01, %v7173_v44  ;;  %v7177_v14 = vadd.f32 %v7176_v4, %v14338_v34  ;;  %v7370_v39 = vadd.f32 %v7369_v46, %v14342_v18  ;;  %v7178_v10 = vpop.f32.mrb[195].mxu1  ;;  %v7371_v21 = vpop.f32.mrb[3].mxu0 }
 0xa85   : > { %v7578_v43 = vmul.f32 0.01, %v7366_v50  ;;  %v7577_v53 = vmul.f32 0.01, %v7175_v54  ;;  %v7579_v20 = vmul.f32 0.01, %v7368_v0  ;;  %v7179_v6 = vadd.f32 %v7178_v10, %v14348_v5 }
 0xa86   : > { %v7372_v52 = vadd.f32 %v7371_v21, %v14352_v49  ;;  %v7584_v16 = vmul.f32 0.01, %v7177_v14  ;;  %v7586_v8 = vmul.f32 0.01, %v7370_v39  ;;  %8982 = vmatmul.mubr.bf16.gmra.mrb[44].mxu1 %v14434_v26  ;;  %9143 = vmatmul.mubr.bf16.gmra.mrb[108].mxu0 %v14436_v62  ;;  %v7832_v59 = vmax.f32 %v7173_v44, %v7576_v57 }
 0xa87   : > { %v7585_v42 = vmul.f32 0.01, %v7179_v6  ;;  %8989 = vmatprep.mubr.bf16.mxu1 %v14462_v15  ;;  %9150 = vmatprep.mubr.bf16.mxu0 %v14464_v25  ;;  %v7834_v33 = vmax.f32 %v7366_v50, %v7578_v43  ;;  %v7833_v7 = vmax.f32 %v7175_v54, %v7577_v53  ;;  %v7835_v22 = vmax.f32 %v7368_v0, %v7579_v20 }
 0xa88   : > { %v7587_v19 = vmul.f32 0.01, %v7372_v52  ;;  %v7840_v58 = vmax.f32 %v7177_v14, %v7584_v16  ;;  %v7842_v23 = vmax.f32 %v7370_v39, %v7586_v8 }
 0xa89   : > { %v7841_v12 = vmax.f32 %v7179_v6, %v7585_v42  ;;  %v7182_v32 = vpop.f32.mrb[196].mxu1  ;;  %v7375_v30 = vpop.f32.mrb[4].mxu0 }
 0xa8a   : > { %v7843_v37 = vmax.f32 %v7372_v52, %v7587_v19  ;;  %v14534_v11 = vpack.c.bf16 %v7840_v58, %v7832_v59  ;;  %v14536_v26 = vpack.c.bf16 %v7842_v23, %v7834_v33  ;;  %v7183_v62 = vadd.f32 %v7182_v32, %v14338_v34  ;;  %v7184_v28 = vpop.f32.mrb[197].mxu1  ;;  %v7377_v25 = vpop.f32.mrb[5].mxu0 }
 0xa8b   : > { %v7376_v15 = vadd.f32 %v7375_v30, %v14342_v18  ;;  %v7185_v17 = vadd.f32 %v7184_v28, %v14348_v5  ;;  %v7378_v2 = vadd.f32 %v7377_v25, %v14352_v49  ;;  %v7186_v40 = vpop.f32.mrb[198].mxu1  ;;  %v7379_v27 = vpop.f32.mrb[6].mxu0  ;;  %v14542_v63 = vpack.c.bf16 %v7841_v12, %v7833_v7 }
 0xa8c   : > { %v14544_v31 = vpack.c.bf16 %v7843_v37, %v7835_v22  ;;  %v7592_v45 = vmul.f32 0.01, %v7183_v62  ;;  %v7187_v44 = vadd.f32 %v7186_v40, %v14338_v34  ;;  %v7380_v50 = vadd.f32 %v7379_v27, %v14342_v18  ;;  %v7188_v48 = vpop.f32.mrb[199].mxu1  ;;  %v7381_v60 = vpop.f32.mrb[7].mxu0 }
 0xa8d   : > { %v7594_v55 = vmul.f32 0.01, %v7376_v15  ;;  %v7593_v54 = vmul.f32 0.01, %v7185_v17  ;;  %v7595_v0 = vmul.f32 0.01, %v7378_v2  ;;  %v7189_v4 = vadd.f32 %v7188_v48, %v14348_v5 }
 0xa8e   : > { %v7382_v46 = vadd.f32 %v7381_v60, %v14352_v49  ;;  %v7600_v57 = vmul.f32 0.01, %v7187_v44  ;;  %v7602_v43 = vmul.f32 0.01, %v7380_v50  ;;  %8990 = vmatmul.mubr.bf16.gmra.mrb[48].mxu1 %v14454_v38  ;;  %9151 = vmatmul.mubr.bf16.gmra.mrb[112].mxu0 %v14456_v1  ;;  %v7848_v10 = vmax.f32 %v7183_v62, %v7592_v45 }
 0xa8f   : > { %v7601_v14 = vmul.f32 0.01, %v7189_v4  ;;  %8997 = vmatprep.mubr.bf16.mxu1 %v14482_v24  ;;  %9158 = vmatprep.mubr.bf16.mxu0 %v14484_v41  ;;  %v7850_v21 = vmax.f32 %v7376_v15, %v7594_v55  ;;  %v7849_v6 = vmax.f32 %v7185_v17, %v7593_v54  ;;  %v7851_v52 = vmax.f32 %v7378_v2, %v7595_v0 }
 0xa90   : > { %v7603_v39 = vmul.f32 0.01, %v7382_v46  ;;  %v7856_v53 = vmax.f32 %v7187_v44, %v7600_v57  ;;  %v7858_v20 = vmax.f32 %v7380_v50, %v7602_v43 }
 0xa91   : > { %v7857_v16 = vmax.f32 %v7189_v4, %v7601_v14  ;;  %v7192_v42 = vpop.f32.mrb[200].mxu1  ;;  %v7385_v19 = vpop.f32.mrb[8].mxu0 }
 0xa92   : > { %v7859_v8 = vmax.f32 %v7382_v46, %v7603_v39  ;;  %v14554_v59 = vpack.c.bf16 %v7856_v53, %v7848_v10  ;;  %v14556_v38 = vpack.c.bf16 %v7858_v20, %v7850_v21  ;;  %v7193_v1 = vadd.f32 %v7192_v42, %v14338_v34  ;;  %v7194_v33 = vpop.f32.mrb[201].mxu1  ;;  %v7387_v41 = vpop.f32.mrb[9].mxu0 }
 0xa93   : > { %v7386_v24 = vadd.f32 %v7385_v19, %v14342_v18  ;;  %v7195_v58 = vadd.f32 %v7194_v33, %v14348_v5  ;;  %v7388_v23 = vadd.f32 %v7387_v41, %v14352_v49  ;;  %v7196_v7 = vpop.f32.mrb[202].mxu1  ;;  %v7389_v22 = vpop.f32.mrb[10].mxu0  ;;  %v14562_v12 = vpack.c.bf16 %v7857_v16, %v7849_v6 }
 0xa94   : > { %v14564_v37 = vpack.c.bf16 %v7859_v8, %v7851_v52  ;;  %v7608_v32 = vmul.f32 0.01, %v7193_v1  ;;  %v7197_v62 = vadd.f32 %v7196_v7, %v14338_v34  ;;  %v7390_v15 = vadd.f32 %v7389_v22, %v14342_v18  ;;  %v7198_v28 = vpop.f32.mrb[203].mxu1  ;;  %v7391_v25 = vpop.f32.mrb[11].mxu0 }
 0xa95   : > { %v7610_v30 = vmul.f32 0.01, %v7386_v24  ;;  %v7609_v17 = vmul.f32 0.01, %v7195_v58  ;;  %v7611_v2 = vmul.f32 0.01, %v7388_v23  ;;  %v7199_v40 = vadd.f32 %v7198_v28, %v14348_v5 }
 0xa96   : > { %v7392_v27 = vadd.f32 %v7391_v25, %v14352_v49  ;;  %v7616_v45 = vmul.f32 0.01, %v7197_v62  ;;  %v7618_v55 = vmul.f32 0.01, %v7390_v15  ;;  %8998 = vmatmul.mubr.bf16.gmra.mrb[52].mxu1 %v14474_v35  ;;  %9159 = vmatmul.mubr.bf16.gmra.mrb[116].mxu0 %v14476_v61  ;;  %v7864_v48 = vmax.f32 %v7193_v1, %v7608_v32 }
 0xa97   : > { %v7617_v44 = vmul.f32 0.01, %v7199_v40  ;;  %9005 = vmatprep.mubr.bf16.mxu1 %v14502_v13  ;;  %9166 = vmatprep.mubr.bf16.mxu0 %v14504_v3  ;;  %v7866_v60 = vmax.f32 %v7386_v24, %v7610_v30  ;;  %v7865_v4 = vmax.f32 %v7195_v58, %v7609_v17  ;;  %v7867_v46 = vmax.f32 %v7388_v23, %v7611_v2 }
 0xa98   : > { %v7619_v50 = vmul.f32 0.01, %v7392_v27  ;;  %v7872_v54 = vmax.f32 %v7197_v62, %v7616_v45  ;;  %v7874_v0 = vmax.f32 %v7390_v15, %v7618_v55 }
 0xa99   : > { %v7873_v57 = vmax.f32 %v7199_v40, %v7617_v44  ;;  %v7202_v14 = vpop.f32.mrb[204].mxu1  ;;  %v7395_v39 = vpop.f32.mrb[12].mxu0 }
 0xa9a   : > { %v7875_v43 = vmax.f32 %v7392_v27, %v7619_v50  ;;  %v14574_v10 = vpack.c.bf16 %v7872_v54, %v7864_v48  ;;  %v14576_v35 = vpack.c.bf16 %v7874_v0, %v7866_v60  ;;  %v7203_v61 = vadd.f32 %v7202_v14, %v14338_v34  ;;  %v7204_v21 = vpop.f32.mrb[205].mxu1  ;;  %v7397_v3 = vpop.f32.mrb[13].mxu0 }
 0xa9b   : > { %v7396_v13 = vadd.f32 %v7395_v39, %v14342_v18  ;;  %v7205_v53 = vadd.f32 %v7204_v21, %v14348_v5  ;;  %v7398_v20 = vadd.f32 %v7397_v3, %v14352_v49  ;;  %v7206_v6 = vpop.f32.mrb[206].mxu1  ;;  %v7399_v52 = vpop.f32.mrb[14].mxu0  ;;  %v14582_v16 = vpack.c.bf16 %v7873_v57, %v7865_v4 }
 0xa9c   : > { %v14584_v8 = vpack.c.bf16 %v7875_v43, %v7867_v46  ;;  %v7624_v42 = vmul.f32 0.01, %v7203_v61  ;;  %v7207_v1 = vadd.f32 %v7206_v6, %v14338_v34  ;;  %v7400_v24 = vadd.f32 %v7399_v52, %v14342_v18  ;;  %v7208_v33 = vpop.f32.mrb[207].mxu1  ;;  %v7401_v41 = vpop.f32.mrb[15].mxu0 }
 0xa9d   : > { %v7626_v19 = vmul.f32 0.01, %v7396_v13  ;;  %v7625_v58 = vmul.f32 0.01, %v7205_v53  ;;  %v7627_v23 = vmul.f32 0.01, %v7398_v20  ;;  %v7209_v7 = vadd.f32 %v7208_v33, %v14348_v5 }
 0xa9e   : > { %v7402_v22 = vadd.f32 %v7401_v41, %v14352_v49  ;;  %v7632_v32 = vmul.f32 0.01, %v7207_v1  ;;  %v7634_v30 = vmul.f32 0.01, %v7400_v24  ;;  %9006 = vmatmul.mubr.bf16.gmra.mrb[56].mxu1 %v14494_v56  ;;  %9167 = vmatmul.mubr.bf16.gmra.mrb[120].mxu0 %v14496_v47  ;;  %v7880_v28 = vmax.f32 %v7203_v61, %v7624_v42 }
 0xa9f   : > { %v7633_v62 = vmul.f32 0.01, %v7209_v7  ;;  %9013 = vmatprep.mubr.bf16.mxu1 %v14522_v36  ;;  %9174 = vmatprep.mubr.bf16.mxu0 %v14524_v29  ;;  %v7882_v25 = vmax.f32 %v7396_v13, %v7626_v19  ;;  %v7881_v40 = vmax.f32 %v7205_v53, %v7625_v58  ;;  %v7883_v27 = vmax.f32 %v7398_v20, %v7627_v23 }
 0xaa0   : > { %v7635_v15 = vmul.f32 0.01, %v7402_v22  ;;  %v7888_v17 = vmax.f32 %v7207_v1, %v7632_v32  ;;  %v7890_v2 = vmax.f32 %v7400_v24, %v7634_v30 }
 0xaa1   : > { %v7889_v45 = vmax.f32 %v7209_v7, %v7633_v62  ;;  %v7212_v44 = vpop.f32.mrb[208].mxu1  ;;  %v7405_v50 = vpop.f32.mrb[16].mxu0 }
 0xaa2   : > { %v7891_v55 = vmax.f32 %v7402_v22, %v7635_v15  ;;  %v14594_v48 = vpack.c.bf16 %v7888_v17, %v7880_v28  ;;  %v14596_v56 = vpack.c.bf16 %v7890_v2, %v7882_v25  ;;  %v7213_v47 = vadd.f32 %v7212_v44, %v14338_v34  ;;  %v7214_v60 = vpop.f32.mrb[209].mxu1  ;;  %v7407_v29 = vpop.f32.mrb[17].mxu0 }
 0xaa3   : > { %v7406_v36 = vadd.f32 %v7405_v50, %v14342_v18  ;;  %v7215_v54 = vadd.f32 %v7214_v60, %v14348_v5  ;;  %v7408_v0 = vadd.f32 %v7407_v29, %v14352_v49  ;;  %v7216_v4 = vpop.f32.mrb[210].mxu1  ;;  %v7409_v46 = vpop.f32.mrb[18].mxu0  ;;  %v14602_v57 = vpack.c.bf16 %v7889_v45, %v7881_v40 }
 0xaa4   : > { %v14604_v43 = vpack.c.bf16 %v7891_v55, %v7883_v27  ;;  %v7640_v14 = vmul.f32 0.01, %v7213_v47  ;;  %v7217_v61 = vadd.f32 %v7216_v4, %v14338_v34  ;;  %v7410_v13 = vadd.f32 %v7409_v46, %v14342_v18  ;;  %v7218_v21 = vpop.f32.mrb[211].mxu1  ;;  %v7411_v3 = vpop.f32.mrb[19].mxu0 }
 0xaa5   : > { %v7642_v39 = vmul.f32 0.01, %v7406_v36  ;;  %v7641_v53 = vmul.f32 0.01, %v7215_v54  ;;  %v7643_v20 = vmul.f32 0.01, %v7408_v0  ;;  %v7219_v6 = vadd.f32 %v7218_v21, %v14348_v5 }
 0xaa6   : > { %v7412_v52 = vadd.f32 %v7411_v3, %v14352_v49  ;;  %v7648_v42 = vmul.f32 0.01, %v7217_v61  ;;  %v7650_v19 = vmul.f32 0.01, %v7410_v13  ;;  %9014 = vmatmul.mubr.bf16.gmra.mrb[60].mxu1 %v14514_v9  ;;  %9175 = vmatmul.mubr.bf16.gmra.mrb[124].mxu0 %v14516_v51  ;;  %v7896_v33 = vmax.f32 %v7213_v47, %v7640_v14 }
 0xaa7   : > { %v7649_v1 = vmul.f32 0.01, %v7219_v6  ;;  %9021 = vmatprep.mubr.bf16.mxu1 %v14542_v63  ;;  %9182 = vmatprep.mubr.bf16.mxu0 %v14544_v31  ;;  %v7898_v41 = vmax.f32 %v7406_v36, %v7642_v39  ;;  %v7897_v7 = vmax.f32 %v7215_v54, %v7641_v53  ;;  %v7899_v22 = vmax.f32 %v7408_v0, %v7643_v20 }
 0xaa8   : > { %v7651_v24 = vmul.f32 0.01, %v7412_v52  ;;  %v7904_v58 = vmax.f32 %v7217_v61, %v7648_v42  ;;  %v7906_v23 = vmax.f32 %v7410_v13, %v7650_v19 }
 0xaa9   : > { %v7905_v32 = vmax.f32 %v7219_v6, %v7649_v1  ;;  %v7222_v62 = vpop.f32.mrb[212].mxu1  ;;  %v7415_v15 = vpop.f32.mrb[20].mxu0 }
 0xaaa   : > { %v7907_v30 = vmax.f32 %v7412_v52, %v7651_v24  ;;  %v14614_v28 = vpack.c.bf16 %v7904_v58, %v7896_v33  ;;  %v14616_v9 = vpack.c.bf16 %v7906_v23, %v7898_v41  ;;  %v7223_v51 = vadd.f32 %v7222_v62, %v14338_v34  ;;  %v7224_v25 = vpop.f32.mrb[213].mxu1  ;;  %v7417_v31 = vpop.f32.mrb[21].mxu0 }
 0xaab   : > { %v7416_v63 = vadd.f32 %v7415_v15, %v14342_v18  ;;  %v7225_v17 = vadd.f32 %v7224_v25, %v14348_v5  ;;  %v7418_v2 = vadd.f32 %v7417_v31, %v14352_v49  ;;  %v7226_v40 = vpop.f32.mrb[214].mxu1  ;;  %v7419_v27 = vpop.f32.mrb[22].mxu0  ;;  %v14622_v45 = vpack.c.bf16 %v7905_v32, %v7897_v7 }
 0xaac   : > { %v14624_v55 = vpack.c.bf16 %v7907_v30, %v7899_v22  ;;  %v7656_v44 = vmul.f32 0.01, %v7223_v51  ;;  %v7227_v47 = vadd.f32 %v7226_v40, %v14338_v34  ;;  %v7420_v36 = vadd.f32 %v7419_v27, %v14342_v18  ;;  %v7228_v60 = vpop.f32.mrb[215].mxu1  ;;  %v7421_v29 = vpop.f32.mrb[23].mxu0 }
 0xaad   : > { %v7658_v50 = vmul.f32 0.01, %v7416_v63  ;;  %v7657_v54 = vmul.f32 0.01, %v7225_v17  ;;  %v7659_v0 = vmul.f32 0.01, %v7418_v2  ;;  %v7229_v4 = vadd.f32 %v7228_v60, %v14348_v5 }
 0xaae   : > { %v7422_v46 = vadd.f32 %v7421_v29, %v14352_v49  ;;  %v7664_v14 = vmul.f32 0.01, %v7227_v47  ;;  %v7666_v39 = vmul.f32 0.01, %v7420_v36  ;;  %9022 = vmatmul.mubr.bf16.gmra.mrb[64].mxu1 %v14534_v11  ;;  %9183 = vmatmul.mubr.bf16.gmra.mrb[128].mxu0 %v14536_v26  ;;  %v7912_v21 = vmax.f32 %v7223_v51, %v7656_v44 }
 0xaaf   : > { %v7665_v61 = vmul.f32 0.01, %v7229_v4  ;;  %9029 = vmatprep.mubr.bf16.mxu1 %v14562_v12  ;;  %9190 = vmatprep.mubr.bf16.mxu0 %v14564_v37  ;;  %v7914_v3 = vmax.f32 %v7416_v63, %v7658_v50  ;;  %v7913_v6 = vmax.f32 %v7225_v17, %v7657_v54  ;;  %v7915_v52 = vmax.f32 %v7418_v2, %v7659_v0 }
 0xab0   : > { %v7667_v13 = vmul.f32 0.01, %v7422_v46  ;;  %v7920_v53 = vmax.f32 %v7227_v47, %v7664_v14  ;;  %v7922_v20 = vmax.f32 %v7420_v36, %v7666_v39 }
 0xab1   : > { %v7921_v42 = vmax.f32 %v7229_v4, %v7665_v61  ;;  %v7232_v1 = vpop.f32.mrb[216].mxu1  ;;  %v7425_v24 = vpop.f32.mrb[24].mxu0 }
 0xab2   : > { %v7923_v19 = vmax.f32 %v7422_v46, %v7667_v13  ;;  %v14634_v33 = vpack.c.bf16 %v7920_v53, %v7912_v21  ;;  %v14636_v11 = vpack.c.bf16 %v7922_v20, %v7914_v3  ;;  %v7233_v26 = vadd.f32 %v7232_v1, %v14338_v34  ;;  %v7234_v41 = vpop.f32.mrb[217].mxu1  ;;  %v7427_v37 = vpop.f32.mrb[25].mxu0 }
 0xab3   : > { %v7426_v12 = vadd.f32 %v7425_v24, %v14342_v18  ;;  %v7235_v58 = vadd.f32 %v7234_v41, %v14348_v5  ;;  %v7428_v23 = vadd.f32 %v7427_v37, %v14352_v49  ;;  %v7236_v7 = vpop.f32.mrb[218].mxu1  ;;  %v7429_v22 = vpop.f32.mrb[26].mxu0  ;;  %v14642_v32 = vpack.c.bf16 %v7921_v42, %v7913_v6 }
 0xab4   : > { %v14644_v30 = vpack.c.bf16 %v7923_v19, %v7915_v52  ;;  %v7672_v62 = vmul.f32 0.01, %v7233_v26  ;;  %v7237_v51 = vadd.f32 %v7236_v7, %v14338_v34  ;;  %v7430_v63 = vadd.f32 %v7429_v22, %v14342_v18  ;;  %v7238_v25 = vpop.f32.mrb[219].mxu1  ;;  %v7431_v31 = vpop.f32.mrb[27].mxu0 }
 0xab5   : > { %v7674_v15 = vmul.f32 0.01, %v7426_v12  ;;  %v7673_v17 = vmul.f32 0.01, %v7235_v58  ;;  %v7675_v2 = vmul.f32 0.01, %v7428_v23  ;;  %v7239_v40 = vadd.f32 %v7238_v25, %v14348_v5 }
 0xab6   : > { %v7432_v27 = vadd.f32 %v7431_v31, %v14352_v49  ;;  %v7680_v44 = vmul.f32 0.01, %v7237_v51  ;;  %v7682_v50 = vmul.f32 0.01, %v7430_v63  ;;  %9030 = vmatmul.mubr.bf16.gmra.mrb[68].mxu1 %v14554_v59  ;;  %9191 = vmatmul.mubr.bf16.gmra.mrb[132].mxu0 %v14556_v38  ;;  %v7928_v60 = vmax.f32 %v7233_v26, %v7672_v62 }
 0xab7   : > { %v7681_v47 = vmul.f32 0.01, %v7239_v40  ;;  %9037 = vmatprep.mubr.bf16.mxu1 %v14582_v16  ;;  %9198 = vmatprep.mubr.bf16.mxu0 %v14584_v8  ;;  %v7930_v29 = vmax.f32 %v7426_v12, %v7674_v15  ;;  %v7929_v4 = vmax.f32 %v7235_v58, %v7673_v17  ;;  %v7931_v46 = vmax.f32 %v7428_v23, %v7675_v2 }
 0xab8   : > { %v7683_v36 = vmul.f32 0.01, %v7432_v27  ;;  %v7936_v54 = vmax.f32 %v7237_v51, %v7680_v44  ;;  %v7938_v0 = vmax.f32 %v7430_v63, %v7682_v50 }
 0xab9   : > { %v7937_v14 = vmax.f32 %v7239_v40, %v7681_v47  ;;  %v7242_v61 = vpop.f32.mrb[220].mxu1  ;;  %v7435_v13 = vpop.f32.mrb[28].mxu0 }
 0xaba   : > { %v7939_v39 = vmax.f32 %v7432_v27, %v7683_v36  ;;  %v14654_v21 = vpack.c.bf16 %v7936_v54, %v7928_v60  ;;  %v14656_v59 = vpack.c.bf16 %v7938_v0, %v7930_v29  ;;  %v7243_v38 = vadd.f32 %v7242_v61, %v14338_v34  ;;  %v7244_v3 = vpop.f32.mrb[221].mxu1  ;;  %v7437_v8 = vpop.f32.mrb[29].mxu0 }
 0xabb   : > { %v7436_v16 = vadd.f32 %v7435_v13, %v14342_v18  ;;  %v7245_v53 = vadd.f32 %v7244_v3, %v14348_v5  ;;  %v7438_v20 = vadd.f32 %v7437_v8, %v14352_v49  ;;  %v7246_v6 = vpop.f32.mrb[222].mxu1  ;;  %v7439_v52 = vpop.f32.mrb[30].mxu0  ;;  %v14662_v42 = vpack.c.bf16 %v7937_v14, %v7929_v4 }
 0xabc   : > { %v14664_v19 = vpack.c.bf16 %v7939_v39, %v7931_v46  ;;  %v7688_v1 = vmul.f32 0.01, %v7243_v38  ;;  %v7247_v26 = vadd.f32 %v7246_v6, %v14338_v34  ;;  %v7440_v12 = vadd.f32 %v7439_v52, %v14342_v18  ;;  %v7248_v41 = vpop.f32.mrb[223].mxu1  ;;  %v7441_v37 = vpop.f32.mrb[31].mxu0 }
 0xabd   : > { %v7690_v24 = vmul.f32 0.01, %v7436_v16  ;;  %v7689_v58 = vmul.f32 0.01, %v7245_v53  ;;  %v7691_v23 = vmul.f32 0.01, %v7438_v20  ;;  %v7249_v7 = vadd.f32 %v7248_v41, %v14348_v5 }
 0xabe   : > { %v7442_v22 = vadd.f32 %v7441_v37, %v14352_v49  ;;  %v7696_v62 = vmul.f32 0.01, %v7247_v26  ;;  %v7698_v15 = vmul.f32 0.01, %v7440_v12  ;;  %9038 = vmatmul.mubr.bf16.gmra.mrb[72].mxu1 %v14574_v10  ;;  %9199 = vmatmul.mubr.bf16.gmra.mrb[136].mxu0 %v14576_v35  ;;  %v7944_v34 = vmax.f32 %v7243_v38, %v7688_v1  ;;  %v14678_v35 = vld [vmem:[#allocation28] ss:$0 sm:$0xff] }
 0xabf   : > { %v7697_v51 = vmul.f32 0.01, %v7249_v7  ;;  %9045 = vmatprep.mubr.bf16.mxu1 %v14602_v57  ;;  %9206 = vmatprep.mubr.bf16.mxu0 %v14604_v43  ;;  %v7946_v18 = vmax.f32 %v7436_v16, %v7690_v24  ;;  %v7945_v17 = vmax.f32 %v7245_v53, %v7689_v58  ;;  %v7947_v5 = vmax.f32 %v7438_v20, %v7691_v23 }
 0xac0   : > { %v7699_v63 = vmul.f32 0.01, %v7442_v22  ;;  %v7952_v25 = vmax.f32 %v7247_v26, %v7696_v62  ;;  %v7954_v31 = vmax.f32 %v7440_v12, %v7698_v15 }
 0xac1   : > { %v7953_v2 = vmax.f32 %v7249_v7, %v7697_v51  ;;  %v10194_v40 = vpop.f32.mrb[224].mxu1  ;;  %v10306_v27 = vpop.f32.mrb[32].mxu0 }
 0xac2   : > { %v7955_v49 = vmax.f32 %v7442_v22, %v7699_v63  ;;  %v14674_v44 = vpack.c.bf16 %v7952_v25, %v7944_v34  ;;  %v14676_v10 = vpack.c.bf16 %v7954_v31, %v7946_v18  ;;  %v10195_v50 = vpop.f32.mrb[225].mxu1  ;;  %v10307_v57 = vpop.f32.mrb[33].mxu0 }
 0xac3   : > { %v10196_v47 = vadd.f32 %v10195_v50, %v10194_v40  ;;  %v10308_v43 = vadd.f32 %v10307_v57, %v10306_v27  ;;  %v10197_v36 = vpop.f32.mrb[226].mxu1  ;;  %v10309_v60 = vpop.f32.mrb[34].mxu0  ;;  %v14680_v29 = vpack.c.bf16 %v7953_v2, %v7945_v17 }
 0xac4   : > { %v14682_v54 = vpack.c.bf16 %v7955_v49, %v7947_v5  ;;  %v10198_v0 = vpop.f32.mrb[227].mxu1  ;;  %v10310_v4 = vpop.f32.mrb[35].mxu0 }
 0xac5   : > { %v8638_v46 = vadd.f32 %v10196_v47, %v14678_v35  ;;  %v10199_v14 = vadd.f32 %v10198_v0, %v10197_v36  ;;  %v10311_v39 = vadd.f32 %v10310_v4, %v10309_v60 }
 0xac6   : > { %9046 = vmatmul.mubr.bf16.gmra.mrb[76].mxu1 %v14594_v48  ;;  %9207 = vmatmul.mubr.bf16.gmra.mrb[140].mxu0 %v14596_v56 }
 0xac7   : > { %v14687_v61 = vadd.f32 %v10308_v43, %v8638_v46  ;;  %v8641_v13 = vadd.f32 %v10199_v14, %v14678_v35  ;;  %9053 = vmatprep.mubr.bf16.mxu1 %v14622_v45  ;;  %9214 = vmatprep.mubr.bf16.mxu0 %v14624_v55 }
 0xac9   : > { %v14692_v38 = vadd.f32 %v10311_v39, %v8641_v13  ;;  %v10200_v16 = vpop.f32.mrb[228].mxu1  ;;  %v10312_v3 = vpop.f32.mrb[36].mxu0 }
 0xaca   : > { %v10201_v8 = vpop.f32.mrb[229].mxu1  ;;  %v10313_v53 = vpop.f32.mrb[37].mxu0 }
 0xacb   : > { %v10202_v20 = vadd.f32 %v10201_v8, %v10200_v16  ;;  %v10314_v6 = vadd.f32 %v10313_v53, %v10312_v3  ;;  %v10203_v52 = vpop.f32.mrb[230].mxu1  ;;  %v10315_v48 = vpop.f32.mrb[38].mxu0 }
 0xacc   : > { %v10204_v1 = vpop.f32.mrb[231].mxu1  ;;  %v10316_v56 = vpop.f32.mrb[39].mxu0 }
 0xacd   : > { %v8646_v24 = vadd.f32 %v10202_v20, %v14678_v35  ;;  %v10205_v26 = vadd.f32 %v10204_v1, %v10203_v52  ;;  %v10317_v12 = vadd.f32 %v10316_v56, %v10315_v48 }
 0xace   : > { %9054 = vmatmul.mubr.bf16.gmra.mrb[80].mxu1 %v14614_v28  ;;  %9215 = vmatmul.mubr.bf16.gmra.mrb[144].mxu0 %v14616_v9 }
 0xacf   : > { %v14697_v45 = vadd.f32 %v10314_v6, %v8646_v24  ;;  %v8649_v55 = vadd.f32 %v10205_v26, %v14678_v35  ;;  %9061 = vmatprep.mubr.bf16.mxu1 %v14642_v32  ;;  %9222 = vmatprep.mubr.bf16.mxu0 %v14644_v30 }
 0xad1   : > { %v14702_v41 = vadd.f32 %v10317_v12, %v8649_v55  ;;  %v10206_v37 = vpop.f32.mrb[232].mxu1  ;;  %v10318_v58 = vpop.f32.mrb[40].mxu0 }
 0xad2   : > { %v10207_v23 = vpop.f32.mrb[233].mxu1  ;;  %v10319_v7 = vpop.f32.mrb[41].mxu0 }
 0xad3   : > { %v10208_v22 = vadd.f32 %v10207_v23, %v10206_v37  ;;  %v10320_v62 = vadd.f32 %v10319_v7, %v10318_v58  ;;  %v10209_v15 = vpop.f32.mrb[234].mxu1  ;;  %v10321_v28 = vpop.f32.mrb[42].mxu0 }
 0xad4   : > { %v10210_v51 = vpop.f32.mrb[235].mxu1  ;;  %v10322_v9 = vpop.f32.mrb[43].mxu0 }
 0xad5   : > { %v8654_v63 = vadd.f32 %v10208_v22, %v14678_v35  ;;  %v10211_v34 = vadd.f32 %v10210_v51, %v10209_v15  ;;  %v10323_v18 = vadd.f32 %v10322_v9, %v10321_v28 }
 0xad6   : > { %9062 = vmatmul.mubr.bf16.gmra.mrb[84].mxu1 %v14634_v33  ;;  %9223 = vmatmul.mubr.bf16.gmra.mrb[148].mxu0 %v14636_v11 }
 0xad7   : > { %v14707_v32 = vadd.f32 %v10320_v62, %v8654_v63  ;;  %v8657_v30 = vadd.f32 %v10211_v34, %v14678_v35  ;;  %9069 = vmatprep.mubr.bf16.mxu1 %v14662_v42  ;;  %9230 = vmatprep.mubr.bf16.mxu0 %v14664_v19 }
 0xad9   : > { %v14712_v25 = vadd.f32 %v10323_v18, %v8657_v30  ;;  %v10212_v31 = vpop.f32.mrb[236].mxu1  ;;  %v10324_v17 = vpop.f32.mrb[44].mxu0 }
 0xada   : > { %v10213_v5 = vpop.f32.mrb[237].mxu1  ;;  %v10325_v2 = vpop.f32.mrb[45].mxu0 }
 0xadb   : > { %v10214_v49 = vadd.f32 %v10213_v5, %v10212_v31  ;;  %v10326_v40 = vadd.f32 %v10325_v2, %v10324_v17  ;;  %v10215_v27 = vpop.f32.mrb[238].mxu1  ;;  %v10327_v33 = vpop.f32.mrb[46].mxu0 }
 0xadc   : > { %v10216_v50 = vpop.f32.mrb[239].mxu1  ;;  %v10328_v11 = vpop.f32.mrb[47].mxu0 }
 0xadd   : > { %v8662_v57 = vadd.f32 %v10214_v49, %v14678_v35  ;;  %v10217_v47 = vadd.f32 %v10216_v50, %v10215_v27  ;;  %v10329_v43 = vadd.f32 %v10328_v11, %v10327_v33 }
 0xade   : > { %9070 = vmatmul.mubr.bf16.gmra.mrb[88].mxu1 %v14654_v21  ;;  %9231 = vmatmul.mubr.bf16.gmra.mrb[152].mxu0 %v14656_v59 }
 0xadf   : > { %v14717_v42 = vadd.f32 %v10326_v40, %v8662_v57  ;;  %v8665_v19 = vadd.f32 %v10217_v47, %v14678_v35  ;;  %9077 = vmatprep.mubr.bf16.mxu1 %v14680_v29  ;;  %9238 = vmatprep.mubr.bf16.mxu0 %v14682_v54 }
 0xae1   : > { %v14722_v36 = vadd.f32 %v10329_v43, %v8665_v19  ;;  %v10218_v60 = vpop.f32.mrb[240].mxu1  ;;  %v10330_v0 = vpop.f32.mrb[48].mxu0 }
 0xae2   : > { %v10219_v4 = vpop.f32.mrb[241].mxu1  ;;  %v10331_v46 = vpop.f32.mrb[49].mxu0 }
 0xae3   : > { %v10220_v14 = vadd.f32 %v10219_v4, %v10218_v60  ;;  %v10332_v39 = vadd.f32 %v10331_v46, %v10330_v0  ;;  %v10221_v13 = vpop.f32.mrb[242].mxu1  ;;  %v10333_v21 = vpop.f32.mrb[50].mxu0 }
 0xae4   : > { %v10222_v16 = vpop.f32.mrb[243].mxu1  ;;  %v10334_v59 = vpop.f32.mrb[51].mxu0 }
 0xae5   : > { %v8670_v3 = vadd.f32 %v10220_v14, %v14678_v35  ;;  %v10223_v8 = vadd.f32 %v10222_v16, %v10221_v13  ;;  %v10335_v53 = vadd.f32 %v10334_v59, %v10333_v21 }
 0xae6   : > { %9078 = vmatmul.mubr.bf16.gmra.mrb[92].mxu1 %v14674_v44  ;;  %9239 = vmatmul.mubr.bf16.gmra.mrb[156].mxu0 %v14676_v10 }
 0xae7   : > { %v14727_v29 = vadd.f32 %v10332_v39, %v8670_v3  ;;  %v8673_v54 = vadd.f32 %v10223_v8, %v14678_v35 }
 0xae9   : > { %v14730_v20 = vadd.f32 %v10335_v53, %v8673_v54  ;;  %v10224_v6 = vpop.f32.mrb[244].mxu1  ;;  %v10336_v52 = vpop.f32.mrb[52].mxu0 }
 0xaea   : > { %v10225_v48 = vpop.f32.mrb[245].mxu1  ;;  %v10337_v1 = vpop.f32.mrb[53].mxu0 }
 0xaeb   : > { %v10226_v56 = vadd.f32 %v10225_v48, %v10224_v6  ;;  %v10338_v24 = vadd.f32 %v10337_v1, %v10336_v52  ;;  %v10227_v26 = vpop.f32.mrb[246].mxu1  ;;  %v10339_v12 = vpop.f32.mrb[54].mxu0 }
 0xaec   : > { %v10228_v55 = vpop.f32.mrb[247].mxu1  ;;  %v10340_v37 = vpop.f32.mrb[55].mxu0 }
 0xaed   : > { %v8678_v44 = vadd.f32 %v10226_v56, %v14678_v35  ;;  %v10229_v58 = vadd.f32 %v10228_v55, %v10227_v26  ;;  %v10341_v10 = vadd.f32 %v10340_v37, %v10339_v12 }
 0xaef   : > { %v14733_v23 = vadd.f32 %v10338_v24, %v8678_v44  ;;  %v8681_v7 = vadd.f32 %v10229_v58, %v14678_v35 }
 0xaf1   : > { %v14736_v22 = vadd.f32 %v10341_v10, %v8681_v7  ;;  %v10230_v62 = vpop.f32.mrb[248].mxu1  ;;  %v10342_v15 = vpop.f32.mrb[56].mxu0 }
 0xaf2   : > { %v10231_v28 = vpop.f32.mrb[249].mxu1  ;;  %v10343_v51 = vpop.f32.mrb[57].mxu0 }
 0xaf3   : > { %v10232_v9 = vadd.f32 %v10231_v28, %v10230_v62  ;;  %v10344_v63 = vadd.f32 %v10343_v51, %v10342_v15  ;;  %v10233_v34 = vpop.f32.mrb[250].mxu1  ;;  %v10345_v18 = vpop.f32.mrb[58].mxu0 }
 0xaf4   : > { %v10234_v30 = vpop.f32.mrb[251].mxu1  ;;  %v10346_v31 = vpop.f32.mrb[59].mxu0 }
 0xaf5   : > { %v8686_v17 = vadd.f32 %v10232_v9, %v14678_v35  ;;  %v10235_v5 = vadd.f32 %v10234_v30, %v10233_v34  ;;  %v10347_v2 = vadd.f32 %v10346_v31, %v10345_v18 }
 0xaf7   : > { %v14739_v49 = vadd.f32 %v10344_v63, %v8686_v17  ;;  %v8689_v40 = vadd.f32 %v10235_v5, %v14678_v35 }
 0xaf9   : > { %v14742_v27 = vadd.f32 %v10347_v2, %v8689_v40  ;;  %v10236_v33 = vpop.f32.mrb[252].mxu1  ;;  %v10348_v50 = vpop.f32.mrb[60].mxu0 }
 0xafa   : > { %v10237_v11 = vpop.f32.mrb[253].mxu1  ;;  %v10349_v57 = vpop.f32.mrb[61].mxu0 }
 0xafb   : > { %v10238_v47 = vadd.f32 %v10237_v11, %v10236_v33  ;;  %v10350_v43 = vadd.f32 %v10349_v57, %v10348_v50  ;;  %v10239_v19 = vpop.f32.mrb[254].mxu1  ;;  %v10351_v60 = vpop.f32.mrb[62].mxu0 }
 0xafc   : > { %v10240_v0 = vpop.f32.mrb[255].mxu1  ;;  %v10352_v4 = vpop.f32.mrb[63].mxu0 }
 0xafd   : > { %v8694_v46 = vadd.f32 %v10238_v47, %v14678_v35  ;;  %v10241_v14 = vadd.f32 %v10240_v0, %v10239_v19  ;;  %v10353_v39 = vadd.f32 %v10352_v4, %v10351_v60 }
 0xaff   : > { %v14745_v13 = vadd.f32 %v10350_v43, %v8694_v46  ;;  %v8697_v21 = vadd.f32 %v10241_v14, %v14678_v35 }
 0xb01   : > { %v14748_v16 = vadd.f32 %v10353_v39, %v8697_v21  ;;  %v10242_v59 = vpop.f32.mrb[0].mxu1  ;;  %v10354_v3 = vpop.f32.mrb[64].mxu0 }
 0xb02   : > { %v10243_v8 = vpop.f32.mrb[1].mxu1  ;;  %v10355_v53 = vpop.f32.mrb[65].mxu0 }
 0xb03   : > { %v10244_v54 = vadd.f32 %v10243_v8, %v10242_v59  ;;  %v10356_v6 = vadd.f32 %v10355_v53, %v10354_v3  ;;  %v10245_v52 = vpop.f32.mrb[2].mxu1  ;;  %v10357_v48 = vpop.f32.mrb[66].mxu0 }
 0xb04   : > { %v10246_v1 = vpop.f32.mrb[3].mxu1  ;;  %v10358_v56 = vpop.f32.mrb[67].mxu0 }
 0xb05   : > { %v8702_v24 = vadd.f32 %v10244_v54, %v14678_v35  ;;  %v10247_v26 = vadd.f32 %v10246_v1, %v10245_v52  ;;  %v10359_v12 = vadd.f32 %v10358_v56, %v10357_v48 }
 0xb07   : > { %v14751_v55 = vadd.f32 %v10356_v6, %v8702_v24  ;;  %v8705_v37 = vadd.f32 %v10247_v26, %v14678_v35 }
 0xb09   : > { %v14754_v44 = vadd.f32 %v10359_v12, %v8705_v37  ;;  %v10248_v58 = vpop.f32.mrb[4].mxu1  ;;  %v10360_v10 = vpop.f32.mrb[68].mxu0 }
 0xb0a   : > { %v10249_v7 = vpop.f32.mrb[5].mxu1  ;;  %v10361_v62 = vpop.f32.mrb[69].mxu0 }
 0xb0b   : > { %v10250_v15 = vadd.f32 %v10249_v7, %v10248_v58  ;;  %v10362_v28 = vadd.f32 %v10361_v62, %v10360_v10  ;;  %v10251_v51 = vpop.f32.mrb[6].mxu1  ;;  %v10363_v9 = vpop.f32.mrb[70].mxu0 }
 0xb0c   : > { %v10252_v63 = vpop.f32.mrb[7].mxu1  ;;  %v10364_v34 = vpop.f32.mrb[71].mxu0 }
 0xb0d   : > { %v8710_v18 = vadd.f32 %v10250_v15, %v14678_v35  ;;  %v10253_v30 = vadd.f32 %v10252_v63, %v10251_v51  ;;  %v10365_v31 = vadd.f32 %v10364_v34, %v10363_v9 }
 0xb0f   : > { %v14757_v17 = vadd.f32 %v10362_v28, %v8710_v18  ;;  %v8713_v5 = vadd.f32 %v10253_v30, %v14678_v35 }
 0xb11   : > { %v14760_v2 = vadd.f32 %v10365_v31, %v8713_v5  ;;  %v10254_v40 = vpop.f32.mrb[8].mxu1  ;;  %v10366_v33 = vpop.f32.mrb[72].mxu0 }
 0xb12   : > { %v10255_v50 = vpop.f32.mrb[9].mxu1  ;;  %v10367_v11 = vpop.f32.mrb[73].mxu0 }
 0xb13   : > { %v10256_v57 = vadd.f32 %v10255_v50, %v10254_v40  ;;  %v10368_v47 = vadd.f32 %v10367_v11, %v10366_v33  ;;  %v10257_v43 = vpop.f32.mrb[10].mxu1  ;;  %v10369_v19 = vpop.f32.mrb[74].mxu0 }
 0xb14   : > { %v10258_v60 = vpop.f32.mrb[11].mxu1  ;;  %v10370_v0 = vpop.f32.mrb[75].mxu0 }
 0xb15   : > { %v8718_v4 = vadd.f32 %v10256_v57, %v14678_v35  ;;  %v10259_v46 = vadd.f32 %v10258_v60, %v10257_v43  ;;  %v10371_v14 = vadd.f32 %v10370_v0, %v10369_v19 }
 0xb17   : > { %v14763_v39 = vadd.f32 %v10368_v47, %v8718_v4  ;;  %v8721_v21 = vadd.f32 %v10259_v46, %v14678_v35 }
 0xb19   : > { %v14766_v59 = vadd.f32 %v10371_v14, %v8721_v21  ;;  %v10260_v3 = vpop.f32.mrb[12].mxu1  ;;  %v10372_v8 = vpop.f32.mrb[76].mxu0 }
 0xb1a   : > { %v10261_v53 = vpop.f32.mrb[13].mxu1  ;;  %v10373_v54 = vpop.f32.mrb[77].mxu0 }
 0xb1b   : > { %v10262_v6 = vadd.f32 %v10261_v53, %v10260_v3  ;;  %v10374_v52 = vadd.f32 %v10373_v54, %v10372_v8  ;;  %v10263_v48 = vpop.f32.mrb[14].mxu1  ;;  %v10375_v1 = vpop.f32.mrb[78].mxu0 }
 0xb1c   : > { %v10264_v56 = vpop.f32.mrb[15].mxu1  ;;  %v10376_v24 = vpop.f32.mrb[79].mxu0 }
 0xb1d   : > { %v8726_v26 = vadd.f32 %v10262_v6, %v14678_v35  ;;  %v10265_v12 = vadd.f32 %v10264_v56, %v10263_v48  ;;  %v10377_v37 = vadd.f32 %v10376_v24, %v10375_v1 }
 0xb1f   : > { %v14769_v58 = vadd.f32 %v10374_v52, %v8726_v26  ;;  %v8729_v10 = vadd.f32 %v10265_v12, %v14678_v35 }
 0xb21   : > { %v14772_v7 = vadd.f32 %v10377_v37, %v8729_v10  ;;  %v10266_v62 = vpop.f32.mrb[16].mxu1  ;;  %v10378_v15 = vpop.f32.mrb[80].mxu0 }
 0xb22   : > { %v10267_v28 = vpop.f32.mrb[17].mxu1  ;;  %v10379_v51 = vpop.f32.mrb[81].mxu0 }
 0xb23   : > { %v10268_v9 = vadd.f32 %v10267_v28, %v10266_v62  ;;  %v10380_v63 = vadd.f32 %v10379_v51, %v10378_v15  ;;  %v10269_v34 = vpop.f32.mrb[18].mxu1  ;;  %v10381_v18 = vpop.f32.mrb[82].mxu0 }
 0xb24   : > { %v10270_v30 = vpop.f32.mrb[19].mxu1  ;;  %v10382_v31 = vpop.f32.mrb[83].mxu0 }
 0xb25   : > { %v8734_v5 = vadd.f32 %v10268_v9, %v14678_v35  ;;  %v10271_v40 = vadd.f32 %v10270_v30, %v10269_v34  ;;  %v10383_v33 = vadd.f32 %v10382_v31, %v10381_v18 }
 0xb27   : > { %v14775_v50 = vadd.f32 %v10380_v63, %v8734_v5  ;;  %v8737_v11 = vadd.f32 %v10271_v40, %v14678_v35 }
 0xb29   : > { %v14778_v57 = vadd.f32 %v10383_v33, %v8737_v11  ;;  %v10272_v47 = vpop.f32.mrb[20].mxu1  ;;  %v10384_v43 = vpop.f32.mrb[84].mxu0 }
 0xb2a   : > { %v10273_v19 = vpop.f32.mrb[21].mxu1  ;;  %v10385_v60 = vpop.f32.mrb[85].mxu0 }
 0xb2b   : > { %v10274_v0 = vadd.f32 %v10273_v19, %v10272_v47  ;;  %v10386_v4 = vadd.f32 %v10385_v60, %v10384_v43  ;;  %v10275_v46 = vpop.f32.mrb[22].mxu1  ;;  %v10387_v14 = vpop.f32.mrb[86].mxu0 }
 0xb2c   : > { %v10276_v21 = vpop.f32.mrb[23].mxu1  ;;  %v10388_v3 = vpop.f32.mrb[87].mxu0 }
 0xb2d   : > { %v8742_v8 = vadd.f32 %v10274_v0, %v14678_v35  ;;  %v10277_v53 = vadd.f32 %v10276_v21, %v10275_v46  ;;  %v10389_v54 = vadd.f32 %v10388_v3, %v10387_v14 }
 0xb2f   : > { %v14781_v6 = vadd.f32 %v10386_v4, %v8742_v8  ;;  %v8745_v52 = vadd.f32 %v10277_v53, %v14678_v35 }
 0xb31   : > { %v14784_v48 = vadd.f32 %v10389_v54, %v8745_v52  ;;  %v10278_v1 = vpop.f32.mrb[24].mxu1  ;;  %v10390_v56 = vpop.f32.mrb[88].mxu0 }
 0xb32   : > { %v10279_v24 = vpop.f32.mrb[25].mxu1  ;;  %v10391_v26 = vpop.f32.mrb[89].mxu0 }
 0xb33   : > { %v10280_v12 = vadd.f32 %v10279_v24, %v10278_v1  ;;  %v10392_v37 = vadd.f32 %v10391_v26, %v10390_v56  ;;  %v10281_v10 = vpop.f32.mrb[26].mxu1  ;;  %v10393_v62 = vpop.f32.mrb[90].mxu0 }
 0xb34   : > { %v10282_v15 = vpop.f32.mrb[27].mxu1  ;;  %v10394_v28 = vpop.f32.mrb[91].mxu0 }
 0xb35   : > { %v8750_v51 = vadd.f32 %v10280_v12, %v14678_v35  ;;  %v10283_v9 = vadd.f32 %v10282_v15, %v10281_v10  ;;  %v10395_v63 = vadd.f32 %v10394_v28, %v10393_v62 }
 0xb37   : > { %v14787_v34 = vadd.f32 %v10392_v37, %v8750_v51  ;;  %v8753_v18 = vadd.f32 %v10283_v9, %v14678_v35 }
 0xb39   : > { %v14790_v30 = vadd.f32 %v10395_v63, %v8753_v18  ;;  %v10284_v31 = vpop.f32.mrb[28].mxu1  ;;  %v10396_v5 = vpop.f32.mrb[92].mxu0 }
 0xb3a   : > { %v10285_v40 = vpop.f32.mrb[29].mxu1  ;;  %v10397_v33 = vpop.f32.mrb[93].mxu0 }
 0xb3b   : > { %v10286_v11 = vadd.f32 %v10285_v40, %v10284_v31  ;;  %v10398_v47 = vadd.f32 %v10397_v33, %v10396_v5  ;;  %v10287_v43 = vpop.f32.mrb[30].mxu1  ;;  %v10399_v19 = vpop.f32.mrb[94].mxu0 }
 0xb3c   : > { %v10288_v60 = vpop.f32.mrb[31].mxu1  ;;  %v10400_v0 = vpop.f32.mrb[95].mxu0 }
 0xb3d   : > { %v8758_v4 = vadd.f32 %v10286_v11, %v14678_v35  ;;  %v10289_v46 = vadd.f32 %v10288_v60, %v10287_v43  ;;  %v10401_v14 = vadd.f32 %v10400_v0, %v10399_v19 }
 0xb3f   : > { %v14793_v21 = vadd.f32 %v10398_v47, %v8758_v4  ;;  %v8761_v3 = vadd.f32 %v10289_v46, %v14678_v35 }
 0xb41   : > { %v14796_v8 = vadd.f32 %v10401_v14, %v8761_v3  ;;  %v10418_v53 = vpop.f32.mrb[32].mxu1  ;;  %v10530_v54 = vpop.f32.mrb[96].mxu0 }
 0xb42   : > { %v10419_v52 = vpop.f32.mrb[33].mxu1  ;;  %v10531_v1 = vpop.f32.mrb[97].mxu0 }
 0xb43   : > { %v10420_v56 = vadd.f32 %v10419_v52, %v10418_v53  ;;  %v10532_v24 = vadd.f32 %v10531_v1, %v10530_v54  ;;  %v10421_v26 = vpop.f32.mrb[34].mxu1  ;;  %v10533_v12 = vpop.f32.mrb[98].mxu0 }
 0xb44   : > { %v10422_v37 = vpop.f32.mrb[35].mxu1  ;;  %v10534_v10 = vpop.f32.mrb[99].mxu0 }
 0xb45   : > { %v8960_v62 = vadd.f32 %v10420_v56, %v14687_v61  ;;  %v10423_v15 = vadd.f32 %v10422_v37, %v10421_v26  ;;  %v10535_v28 = vadd.f32 %v10534_v10, %v10533_v12 }
 0xb47   : > { %v9121_v51 = vadd.f32 %v10532_v24, %v8960_v62  ;;  %v8963_v35 = vadd.f32 %v10423_v15, %v14692_v38 }
 0xb49   : > { %9247 = vst [vmem:[%s14802_s23] sm:$0xff] %v9121_v51  ;;  %v9124_v9 = vadd.f32 %v10535_v28, %v8963_v35  ;;  %v10424_v63 = vpop.f32.mrb[36].mxu1  ;;  %v10536_v18 = vpop.f32.mrb[100].mxu0 }
 0xb4a   : > { %v10425_v31 = vpop.f32.mrb[37].mxu1  ;;  %v10537_v5 = vpop.f32.mrb[101].mxu0 }
 0xb4b   : > { %9248 = vst [vmem:[%s14802_s23 + $0x8] sm:$0xff] %v9124_v9  ;;  %v10426_v40 = vadd.f32 %v10425_v31, %v10424_v63  ;;  %v10538_v61 = vadd.f32 %v10537_v5, %v10536_v18  ;;  %v10427_v33 = vpop.f32.mrb[38].mxu1  ;;  %v10539_v11 = vpop.f32.mrb[102].mxu0 }
 0xb4c   : > { %v10428_v47 = vpop.f32.mrb[39].mxu1  ;;  %v10540_v38 = vpop.f32.mrb[103].mxu0 }
 0xb4d   : > { %v8968_v43 = vadd.f32 %v10426_v40, %v14697_v45  ;;  %v10429_v19 = vadd.f32 %v10428_v47, %v10427_v33  ;;  %v10541_v60 = vadd.f32 %v10540_v38, %v10539_v11 }
 0xb4f   : > { %v9129_v0 = vadd.f32 %v10538_v61, %v8968_v43  ;;  %v8971_v4 = vadd.f32 %v10429_v19, %v14702_v41 }
 0xb51   : > { %9249 = vst [vmem:[%s14802_s23 + $0x10] sm:$0xff] %v9129_v0  ;;  %v9132_v46 = vadd.f32 %v10541_v60, %v8971_v4  ;;  %v10430_v14 = vpop.f32.mrb[40].mxu1  ;;  %v10542_v3 = vpop.f32.mrb[104].mxu0 }
 0xb52   : > { %v10431_v53 = vpop.f32.mrb[41].mxu1  ;;  %v10543_v54 = vpop.f32.mrb[105].mxu0 }
 0xb53   : > { %9250 = vst [vmem:[%s14802_s23 + $0x18] sm:$0xff] %v9132_v46  ;;  %v10432_v52 = vadd.f32 %v10431_v53, %v10430_v14  ;;  %v10544_v1 = vadd.f32 %v10543_v54, %v10542_v3  ;;  %v10433_v56 = vpop.f32.mrb[42].mxu1  ;;  %v10545_v24 = vpop.f32.mrb[106].mxu0 }
 0xb54   : > { %v10434_v26 = vpop.f32.mrb[43].mxu1  ;;  %v10546_v45 = vpop.f32.mrb[107].mxu0 }
 0xb55   : > { %v8976_v12 = vadd.f32 %v10432_v52, %v14707_v32  ;;  %v10435_v37 = vadd.f32 %v10434_v26, %v10433_v56  ;;  %v10547_v10 = vadd.f32 %v10546_v45, %v10545_v24 }
 0xb57   : > { %v9137_v41 = vadd.f32 %v10544_v1, %v8976_v12  ;;  %v8979_v62 = vadd.f32 %v10435_v37, %v14712_v25 }
 0xb59   : > { %9251 = vst [vmem:[%s14802_s23 + $0x20] sm:$0xff] %v9137_v41  ;;  %v9140_v15 = vadd.f32 %v10547_v10, %v8979_v62  ;;  %v10436_v28 = vpop.f32.mrb[44].mxu1  ;;  %v10548_v51 = vpop.f32.mrb[108].mxu0 }
 0xb5a   : > { %v10437_v35 = vpop.f32.mrb[45].mxu1  ;;  %v10549_v9 = vpop.f32.mrb[109].mxu0 }
 0xb5b   : > { %9252 = vst [vmem:[%s14802_s23 + $0x28] sm:$0xff] %v9140_v15  ;;  %v10438_v63 = vadd.f32 %v10437_v35, %v10436_v28  ;;  %v10550_v18 = vadd.f32 %v10549_v9, %v10548_v51  ;;  %v10439_v31 = vpop.f32.mrb[46].mxu1  ;;  %v10551_v5 = vpop.f32.mrb[110].mxu0 }
 0xb5c   : > { %v10440_v40 = vpop.f32.mrb[47].mxu1  ;;  %v10552_v32 = vpop.f32.mrb[111].mxu0 }
 0xb5d   : > { %v8984_v61 = vadd.f32 %v10438_v63, %v14717_v42  ;;  %v10441_v33 = vadd.f32 %v10440_v40, %v10439_v31  ;;  %v10553_v11 = vadd.f32 %v10552_v32, %v10551_v5 }
 0xb5f   : > { %v9145_v25 = vadd.f32 %v10550_v18, %v8984_v61  ;;  %v8987_v47 = vadd.f32 %v10441_v33, %v14722_v36 }
 0xb61   : > { %9253 = vst [vmem:[%s14802_s23 + $0x30] sm:$0xff] %v9145_v25  ;;  %v9148_v38 = vadd.f32 %v10553_v11, %v8987_v47  ;;  %v10442_v43 = vpop.f32.mrb[48].mxu1  ;;  %v10554_v19 = vpop.f32.mrb[112].mxu0 }
 0xb62   : > { %v10443_v60 = vpop.f32.mrb[49].mxu1  ;;  %v10555_v0 = vpop.f32.mrb[113].mxu0 }
 0xb63   : > { %9254 = vst [vmem:[%s14802_s23 + $0x38] sm:$0xff] %v9148_v38  ;;  %v10444_v4 = vadd.f32 %v10443_v60, %v10442_v43  ;;  %v10556_v46 = vadd.f32 %v10555_v0, %v10554_v19  ;;  %v10445_v14 = vpop.f32.mrb[50].mxu1  ;;  %v10557_v3 = vpop.f32.mrb[114].mxu0 }
 0xb64   : > { %v10446_v53 = vpop.f32.mrb[51].mxu1  ;;  %v10558_v42 = vpop.f32.mrb[115].mxu0 }
 0xb65   : > { %v8992_v54 = vadd.f32 %v10444_v4, %v14727_v29  ;;  %v10447_v52 = vadd.f32 %v10446_v53, %v10445_v14  ;;  %v10559_v1 = vadd.f32 %v10558_v42, %v10557_v3 }
 0xb67   : > { %v9153_v36 = vadd.f32 %v10556_v46, %v8992_v54  ;;  %v8995_v56 = vadd.f32 %v10447_v52, %v14730_v20 }
 0xb69   : > { %9255 = vst [vmem:[%s14802_s23 + $0x40] sm:$0xff] %v9153_v36  ;;  %v9156_v24 = vadd.f32 %v10559_v1, %v8995_v56  ;;  %v10448_v26 = vpop.f32.mrb[52].mxu1  ;;  %v10560_v45 = vpop.f32.mrb[116].mxu0 }
 0xb6a   : > { %v10449_v12 = vpop.f32.mrb[53].mxu1  ;;  %v10561_v37 = vpop.f32.mrb[117].mxu0 }
 0xb6b   : > { %9256 = vst [vmem:[%s14802_s23 + $0x48] sm:$0xff] %v9156_v24  ;;  %v10450_v10 = vadd.f32 %v10449_v12, %v10448_v26  ;;  %v10562_v41 = vadd.f32 %v10561_v37, %v10560_v45  ;;  %v10451_v62 = vpop.f32.mrb[54].mxu1  ;;  %v10563_v15 = vpop.f32.mrb[118].mxu0 }
 0xb6c   : > { %v10452_v28 = vpop.f32.mrb[55].mxu1  ;;  %v10564_v29 = vpop.f32.mrb[119].mxu0 }
 0xb6d   : > { %v9000_v51 = vadd.f32 %v10450_v10, %v14733_v23  ;;  %v10453_v35 = vadd.f32 %v10452_v28, %v10451_v62  ;;  %v10565_v9 = vadd.f32 %v10564_v29, %v10563_v15 }
 0xb6f   : > { %v9161_v20 = vadd.f32 %v10562_v41, %v9000_v51  ;;  %v9003_v63 = vadd.f32 %v10453_v35, %v14736_v22 }
 0xb71   : > { %9257 = vst [vmem:[%s14802_s23 + $0x50] sm:$0xff] %v9161_v20  ;;  %v9164_v18 = vadd.f32 %v10565_v9, %v9003_v63  ;;  %v10454_v31 = vpop.f32.mrb[56].mxu1  ;;  %v10566_v5 = vpop.f32.mrb[120].mxu0 }
 0xb72   : > { %v10455_v40 = vpop.f32.mrb[57].mxu1  ;;  %v10567_v32 = vpop.f32.mrb[121].mxu0 }
 0xb73   : > { %9258 = vst [vmem:[%s14802_s23 + $0x58] sm:$0xff] %v9164_v18  ;;  %v10456_v61 = vadd.f32 %v10455_v40, %v10454_v31  ;;  %v10568_v33 = vadd.f32 %v10567_v32, %v10566_v5  ;;  %v10457_v11 = vpop.f32.mrb[58].mxu1  ;;  %v10569_v25 = vpop.f32.mrb[122].mxu0 }
 0xb74   : > { %v10458_v47 = vpop.f32.mrb[59].mxu1  ;;  %v10570_v23 = vpop.f32.mrb[123].mxu0 }
 0xb75   : > { %v9008_v38 = vadd.f32 %v10456_v61, %v14739_v49  ;;  %v10459_v43 = vadd.f32 %v10458_v47, %v10457_v11  ;;  %v10571_v19 = vadd.f32 %v10570_v23, %v10569_v25 }
 0xb77   : > { %v9169_v22 = vadd.f32 %v10568_v33, %v9008_v38  ;;  %v9011_v60 = vadd.f32 %v10459_v43, %v14742_v27 }
 0xb79   : > { %9259 = vst [vmem:[%s14802_s23 + $0x60] sm:$0xff] %v9169_v22  ;;  %v9172_v0 = vadd.f32 %v10571_v19, %v9011_v60  ;;  %v10460_v4 = vpop.f32.mrb[60].mxu1  ;;  %v10572_v46 = vpop.f32.mrb[124].mxu0 }
 0xb7a   : > { %v10461_v14 = vpop.f32.mrb[61].mxu1  ;;  %v10573_v3 = vpop.f32.mrb[125].mxu0 }
 0xb7b   : > { %9260 = vst [vmem:[%s14802_s23 + $0x68] sm:$0xff] %v9172_v0  ;;  %v10462_v53 = vadd.f32 %v10461_v14, %v10460_v4  ;;  %v10574_v42 = vadd.f32 %v10573_v3, %v10572_v46  ;;  %v10463_v54 = vpop.f32.mrb[62].mxu1  ;;  %v10575_v52 = vpop.f32.mrb[126].mxu0 }
 0xb7c   : > { %v10464_v1 = vpop.f32.mrb[63].mxu1  ;;  %v10576_v49 = vpop.f32.mrb[127].mxu0 }
 0xb7d   : > { %v9016_v36 = vadd.f32 %v10462_v53, %v14745_v13  ;;  %v10465_v56 = vadd.f32 %v10464_v1, %v10463_v54  ;;  %v10577_v24 = vadd.f32 %v10576_v49, %v10575_v52 }
 0xb7f   : > { %v9177_v27 = vadd.f32 %v10574_v42, %v9016_v36  ;;  %v9019_v26 = vadd.f32 %v10465_v56, %v14748_v16 }
 0xb81   : > { %9261 = vst [vmem:[%s14802_s23 + $0x70] sm:$0xff] %v9177_v27  ;;  %v9180_v45 = vadd.f32 %v10577_v24, %v9019_v26  ;;  %v10466_v12 = vpop.f32.mrb[64].mxu1  ;;  %v10578_v37 = vpop.f32.mrb[128].mxu0 }
 0xb82   : > { %v10467_v10 = vpop.f32.mrb[65].mxu1  ;;  %v10579_v41 = vpop.f32.mrb[129].mxu0 }
 0xb83   : > { %9262 = vst [vmem:[%s14802_s23 + $0x78] sm:$0xff] %v9180_v45  ;;  %v10468_v62 = vadd.f32 %v10467_v10, %v10466_v12  ;;  %v10580_v15 = vadd.f32 %v10579_v41, %v10578_v37  ;;  %v10469_v28 = vpop.f32.mrb[66].mxu1  ;;  %v10581_v29 = vpop.f32.mrb[130].mxu0 }
 0xb84   : > { %v10470_v51 = vpop.f32.mrb[67].mxu1  ;;  %v10582_v13 = vpop.f32.mrb[131].mxu0 }
 0xb85   : > { %v9024_v35 = vadd.f32 %v10468_v62, %v14751_v55  ;;  %v10471_v9 = vadd.f32 %v10470_v51, %v10469_v28  ;;  %v10583_v20 = vadd.f32 %v10582_v13, %v10581_v29 }
 0xb87   : > { %v9185_v16 = vadd.f32 %v10580_v15, %v9024_v35  ;;  %v9027_v63 = vadd.f32 %v10471_v9, %v14754_v44 }
 0xb89   : > { %9263 = vst [vmem:[%s14802_s23 + $0x80] sm:$0xff] %v9185_v16  ;;  %v9188_v18 = vadd.f32 %v10583_v20, %v9027_v63  ;;  %v10472_v31 = vpop.f32.mrb[68].mxu1  ;;  %v10584_v5 = vpop.f32.mrb[132].mxu0 }
 0xb8a   : > { %v10473_v40 = vpop.f32.mrb[69].mxu1  ;;  %v10585_v32 = vpop.f32.mrb[133].mxu0 }
 0xb8b   : > { %9264 = vst [vmem:[%s14802_s23 + $0x88] sm:$0xff] %v9188_v18  ;;  %v10474_v61 = vadd.f32 %v10473_v40, %v10472_v31  ;;  %v10586_v33 = vadd.f32 %v10585_v32, %v10584_v5  ;;  %v10475_v11 = vpop.f32.mrb[70].mxu1  ;;  %v10587_v25 = vpop.f32.mrb[134].mxu0 }
 0xb8c   : > { %v10476_v47 = vpop.f32.mrb[71].mxu1  ;;  %v10588_v55 = vpop.f32.mrb[135].mxu0 }
 0xb8d   : > { %v9032_v23 = vadd.f32 %v10474_v61, %v14757_v17  ;;  %v10477_v38 = vadd.f32 %v10476_v47, %v10475_v11  ;;  %v10589_v43 = vadd.f32 %v10588_v55, %v10587_v25 }
 0xb8f   : > { %v9193_v44 = vadd.f32 %v10586_v33, %v9032_v23  ;;  %v9035_v19 = vadd.f32 %v10477_v38, %v14760_v2 }
 0xb91   : > { %9265 = vst [vmem:[%s14802_s23 + $0x90] sm:$0xff] %v9193_v44  ;;  %v9196_v22 = vadd.f32 %v10589_v43, %v9035_v19  ;;  %v10478_v60 = vpop.f32.mrb[72].mxu1  ;;  %v10590_v0 = vpop.f32.mrb[136].mxu0 }
 0xb92   : > { %v10479_v4 = vpop.f32.mrb[73].mxu1  ;;  %v10591_v46 = vpop.f32.mrb[137].mxu0 }
 0xb93   : > { %9266 = vst [vmem:[%s14802_s23 + $0x98] sm:$0xff] %v9196_v22  ;;  %v10480_v14 = vadd.f32 %v10479_v4, %v10478_v60  ;;  %v10592_v3 = vadd.f32 %v10591_v46, %v10590_v0  ;;  %v10481_v53 = vpop.f32.mrb[74].mxu1  ;;  %v10593_v42 = vpop.f32.mrb[138].mxu0 }
 0xb94   : > { %v10482_v54 = vpop.f32.mrb[75].mxu1  ;;  %v10594_v17 = vpop.f32.mrb[139].mxu0 }
 0xb95   : > { %v9040_v52 = vadd.f32 %v10480_v14, %v14763_v39  ;;  %v10483_v1 = vadd.f32 %v10482_v54, %v10481_v53  ;;  %v10595_v49 = vadd.f32 %v10594_v17, %v10593_v42 }
 0xb97   : > { %v9201_v2 = vadd.f32 %v10592_v3, %v9040_v52  ;;  %v9043_v36 = vadd.f32 %v10483_v1, %v14766_v59 }
 0xb99   : > { %9267 = vst [vmem:[%s14802_s23 + $0xa0] sm:$0xff] %v9201_v2  ;;  %v9204_v56 = vadd.f32 %v10595_v49, %v9043_v36  ;;  %v10484_v24 = vpop.f32.mrb[76].mxu1  ;;  %v10596_v27 = vpop.f32.mrb[140].mxu0 }
 0xb9a   : > { %v10485_v26 = vpop.f32.mrb[77].mxu1  ;;  %v10597_v45 = vpop.f32.mrb[141].mxu0 }
 0xb9b   : > { %9268 = vst [vmem:[%s14802_s23 + $0xa8] sm:$0xff] %v9204_v56  ;;  %v10486_v12 = vadd.f32 %v10485_v26, %v10484_v24  ;;  %v10598_v37 = vadd.f32 %v10597_v45, %v10596_v27  ;;  %v10487_v10 = vpop.f32.mrb[78].mxu1  ;;  %v10599_v41 = vpop.f32.mrb[142].mxu0 }
 0xb9c   : > { %v10488_v62 = vpop.f32.mrb[79].mxu1  ;;  %v10600_v39 = vpop.f32.mrb[143].mxu0 }
 0xb9d   : > { %v9048_v15 = vadd.f32 %v10486_v12, %v14769_v58  ;;  %v10489_v28 = vadd.f32 %v10488_v62, %v10487_v10  ;;  %v10601_v29 = vadd.f32 %v10600_v39, %v10599_v41 }
 0xb9f   : > { %v9209_v59 = vadd.f32 %v10598_v37, %v9048_v15  ;;  %v9051_v51 = vadd.f32 %v10489_v28, %v14772_v7 }
 0xba1   : > { %9269 = vst [vmem:[%s14802_s23 + $0xb0] sm:$0xff] %v9209_v59  ;;  %v9212_v13 = vadd.f32 %v10601_v29, %v9051_v51  ;;  %v10490_v35 = vpop.f32.mrb[80].mxu1  ;;  %v10602_v9 = vpop.f32.mrb[144].mxu0 }
 0xba2   : > { %v10491_v20 = vpop.f32.mrb[81].mxu1  ;;  %v10603_v16 = vpop.f32.mrb[145].mxu0 }
 0xba3   : > { %9270 = vst [vmem:[%s14802_s23 + $0xb8] sm:$0xff] %v9212_v13  ;;  %v10492_v63 = vadd.f32 %v10491_v20, %v10490_v35  ;;  %v10604_v18 = vadd.f32 %v10603_v16, %v10602_v9  ;;  %v10493_v31 = vpop.f32.mrb[82].mxu1  ;;  %v10605_v5 = vpop.f32.mrb[146].mxu0 }
 0xba4   : > { %v10494_v40 = vpop.f32.mrb[83].mxu1  ;;  %v10606_v58 = vpop.f32.mrb[147].mxu0 }
 0xba5   : > { %v9056_v32 = vadd.f32 %v10492_v63, %v14775_v50  ;;  %v10495_v61 = vadd.f32 %v10494_v40, %v10493_v31  ;;  %v10607_v33 = vadd.f32 %v10606_v58, %v10605_v5 }
 0xba7   : > { %v9217_v7 = vadd.f32 %v10604_v18, %v9056_v32  ;;  %v9059_v11 = vadd.f32 %v10495_v61, %v14778_v57 }
 0xba9   : > { %9271 = vst [vmem:[%s14802_s23 + $0xc0] sm:$0xff] %v9217_v7  ;;  %v9220_v25 = vadd.f32 %v10607_v33, %v9059_v11  ;;  %v10496_v47 = vpop.f32.mrb[84].mxu1  ;;  %v10608_v55 = vpop.f32.mrb[148].mxu0 }
 0xbaa   : > { %v10497_v23 = vpop.f32.mrb[85].mxu1  ;;  %v10609_v38 = vpop.f32.mrb[149].mxu0 }
 0xbab   : > { %9272 = vst [vmem:[%s14802_s23 + $0xc8] sm:$0xff] %v9220_v25  ;;  %v10498_v43 = vadd.f32 %v10497_v23, %v10496_v47  ;;  %v10610_v44 = vadd.f32 %v10609_v38, %v10608_v55  ;;  %v10499_v19 = vpop.f32.mrb[86].mxu1  ;;  %v10611_v22 = vpop.f32.mrb[150].mxu0 }
 0xbac   : > { %v10500_v60 = vpop.f32.mrb[87].mxu1  ;;  %v10612_v50 = vpop.f32.mrb[151].mxu0 }
 0xbad   : > { %v9064_v0 = vadd.f32 %v10498_v43, %v14781_v6  ;;  %v10501_v4 = vadd.f32 %v10500_v60, %v10499_v19  ;;  %v10613_v46 = vadd.f32 %v10612_v50, %v10611_v22 }
 0xbaf   : > { %v9225_v57 = vadd.f32 %v10610_v44, %v9064_v0  ;;  %v9067_v14 = vadd.f32 %v10501_v4, %v14784_v48 }
 0xbb1   : > { %9273 = vst [vmem:[%s14802_s23 + $0xd0] sm:$0xff] %v9225_v57  ;;  %v9228_v3 = vadd.f32 %v10613_v46, %v9067_v14  ;;  %v10502_v53 = vpop.f32.mrb[88].mxu1  ;;  %v10614_v42 = vpop.f32.mrb[152].mxu0 }
 0xbb2   : > { %v10503_v54 = vpop.f32.mrb[89].mxu1  ;;  %v10615_v17 = vpop.f32.mrb[153].mxu0 }
 0xbb3   : > { %9274 = vst [vmem:[%s14802_s23 + $0xd8] sm:$0xff] %v9228_v3  ;;  %v10504_v52 = vadd.f32 %v10503_v54, %v10502_v53  ;;  %v10616_v1 = vadd.f32 %v10615_v17, %v10614_v42  ;;  %v10505_v49 = vpop.f32.mrb[90].mxu1  ;;  %v10617_v2 = vpop.f32.mrb[154].mxu0 }
 0xbb4   : > { %v10506_v36 = vpop.f32.mrb[91].mxu1  ;;  %v10618_v6 = vpop.f32.mrb[155].mxu0 }
 0xbb5   : > { %v9072_v56 = vadd.f32 %v10504_v52, %v14787_v34  ;;  %v10507_v24 = vadd.f32 %v10506_v36, %v10505_v49  ;;  %v10619_v27 = vadd.f32 %v10618_v6, %v10617_v2 }
 0xbb7   : > { %v9233_v48 = vadd.f32 %v10616_v1, %v9072_v56  ;;  %v9075_v26 = vadd.f32 %v10507_v24, %v14790_v30 }
 0xbb9   : > { %9275 = vst [vmem:[%s14802_s23 + $0xe0] sm:$0xff] %v9233_v48  ;;  %v9236_v45 = vadd.f32 %v10619_v27, %v9075_v26  ;;  %v10508_v12 = vpop.f32.mrb[92].mxu1  ;;  %v10620_v37 = vpop.f32.mrb[156].mxu0 }
 0xbba   : > { %v10509_v10 = vpop.f32.mrb[93].mxu1  ;;  %v10621_v41 = vpop.f32.mrb[157].mxu0 }
 0xbbb   : > { %9276 = vst [vmem:[%s14802_s23 + $0xe8] sm:$0xff] %v9236_v45  ;;  %v10510_v62 = vadd.f32 %v10509_v10, %v10508_v12  ;;  %v10622_v39 = vadd.f32 %v10621_v41, %v10620_v37  ;;  %v10511_v15 = vpop.f32.mrb[94].mxu1  ;;  %v10623_v34 = vpop.f32.mrb[158].mxu0 }
 0xbbc   : > { %v10512_v28 = vpop.f32.mrb[95].mxu1  ;;  %v10624_v29 = vpop.f32.mrb[159].mxu0 }
 0xbbd   : > { %v9080_v30 = vadd.f32 %v10510_v62, %v14793_v21  ;;  %v10513_v59 = vadd.f32 %v10512_v28, %v10511_v15  ;;  %v10625_v51 = vadd.f32 %v10624_v29, %v10623_v34 }
 0xbbf   : > { %v9241_v13 = vadd.f32 %v10622_v39, %v9080_v30  ;;  %v9083_v35 = vadd.f32 %v10513_v59, %v14796_v8 }
 0xbc1   : > { %9277 = vst [vmem:[%s14802_s23 + $0xf0] sm:$0xff] %v9241_v13  ;;  %v9244_v9 = vadd.f32 %v10625_v51, %v9083_v35 }
 0xbc3   : > { %9278 = vst [vmem:[%s14802_s23 + $0xf8] sm:$0xff] %v9244_v9 }
 0xbc4   : > { %11991 = shalt.err (!%p11988_p1)
}
 0xbc5   : > { %s11992_s2 = scalar_lea.hbm %s14869_s24, 4096  ;;  %s11996_s20 = scalar_lea.hbm %s15065_s28, 8192 }
 0xbc6   : > { %p11993_p11 = scmp.ne.s32.totalorder %s14869_s24, %s11992_s2  ;;  %p11997_p8 = scmp.lt.u32.totalorder %s14869_s24, %s15065_s28 }
 0xbc7   : > { %p11998_p7 = scmp.lt.u32.totalorder %s11996_s20, %s11992_s2  ;;  %p12000_p4 = scmp.lt.u32.totalorder %s11992_s2, %s14869_s24 }
 0xbc8   : > { %p11994_p12 = pnand %p11993_p11, %p15066_p3 }
 0xbc9   : > { %p11999_p9 = por %p11998_p7, %p11997_p8 }
 0xbca   : > { %p11995_p13 = pneg %p11994_p12 }
 0xbcb   : > { %p12001_p0 = por %p12000_p4, %p11999_p9 }
 0xbcd   : > { %p12002_p2 = pnand %p12001_p0, %p11995_p13 }
 0xbcf   : > { %12005 = shalt.err (!%p12002_p2)
}
 0xbd0   : > { %s12103_s5 = smov 128   ;;  %s12104_s29 = smov 8  }
 0xbd1   : > { %11052 = dma.vmem_to_hbm [thread:$0]  (%p15066_p3), %s14871_s17, 4096, %s14869_s24, %s9280_s18, %s12103_s5, %s12103_s5, %s12104_s29  }
 0xbd2 PF: > { %s15067_s27 = sld [smem:[#allocation40_spill]]  ;;  %s15068_s23 = sld [smem:[#allocation43_spill]] }
 0xbd3   : > { %p15069_p6 = scmp.ne.s32.totalorder %s15006_s25, 0 }
 0xbd8   : > { %s9308_s26 = sand.u32 1, %s15067_s27   ;;  %p15070_p5 = scmp.ge.s32.totalorder %s15068_s23, 2 }
 0xbd9   : > { %s9309_s2 = scalar_lea.sflag [#allocation4], %s9308_s26 }
 0xbda   : > { %p11108_p10 = pnand %p15070_p5, %p15069_p6 }
 0xbdc   : > { %12059 = dma.done.wait (!%p11108_p10), %s9309_s2, 4096  }
 0xbdd   : > { %12061 = vsyncadd (!%p11108_p10), %s9309_s2, 4294963200  ;;  %s15071_s24 = sld [smem:[#allocation41_spill]]  ;;  %s15072_s25 = sld [smem:[#allocation42_spill]] }
 0xbde   : > { %p38_p1 = scmp.ge.s32.totalorder %s12571_s1, 4   ;;  %s15073_s26 = smov %s12582_s19 }
 0xbdf   : > { %s15074_s27 = smov %s12571_s1 }
 0xbe0   :  { %40 = sbr.rel (!%p38_p1) target bundleno = 21 (0x15), region = 197 }
 0xbe7   :  { %9314 = vsyncpa [#allocation3], 1 }
 0xbe8   :  { %9316 = vsyncpa [#allocation3 + $0x1], 1 }
 0xbe9   :  { %9317 = vsyncpa [#allocation6], 1 }
 0xbea   :  { %9318 = vsyncpa [#allocation9], 1 }
 0xbeb   :  { %9319 = vsyncpa [#allocation12], 1 }
 0xbec   :  { %9320 = vsyncpa [#allocation15], 1 }
 0xbed   :  { %9321 = vsyncpa [#allocation18], 1 }
 0xbee   :  { %9322 = vsyncpa [#allocation21], 1 }
 0xbef   :  { %9323 = vsyncpa [#allocation24], 1 }
 0xbf0   :  { %9324 = vsyncpa [#allocation27], 1 }
 0xbf1   :  { %9325 = vsyncpa [#allocation4], 1 }
 0xbf2   :  { %9327 = vsyncpa [#allocation4 + $0x1], 1 }

</bundles_post_ra>
